<compile_context>
chip_gen: v7x
topology: tpu7x:2x2x1
jax: 0.10.0
libtpu: 0.0.40
codegen_flags: <defaults>
</compile_context>

<pallas_src>
import jax
import jax.numpy as jnp
from jax.experimental import pallas as pl
from jax.experimental.pallas import tpu as pltpu

# ----------------------------------------------------------------------------
# Config (PriorPredictor defaults, small dmtet grid for the demo run)
# ----------------------------------------------------------------------------
GRID_RES = 12           # dmtet_grid (default 64; small here for a quick demo)
GRID_SCALE = 5.0        # grid_scale
NUM_LAYERS = 5          # num_layers_shape -> 5 linear layers total
HIDDEN = 64             # hidden_size
NFREQ = 8               # embedder_freq_shape
EMBED_CONCAT_PTS = True
OMEGA0 = 2.0 * 3.141592653589793 / GRID_SCALE * 0.9   # embedder scaler
D_IN = 3 * 2 * NFREQ + (3 if EMBED_CONCAT_PTS else 0)  # 51
D_OUT = 4               # [sdf, deform_x, deform_y, deform_z]
DEFORM_SCALE = 1.0 / GRID_RES

# Tile over vertices. 1024-4096 is the sweet spot (per-step overhead amortized,
# VMEM stays tiny). At real scale (64^3 = 262144 verts) this gives 64-256 grid
# steps, still plenty of parallel steps for v7x's 2 TensorCores.
TILE_M = 1024


# ----------------------------------------------------------------------------
# Pallas kernel: embedding + 5-layer MLP + tanh-deform epilogue, channel-first
# ----------------------------------------------------------------------------
def sdf_mlp_kernel(pts_ref, scales_ref,
                   w0p_ref, w0s_ref, w0c_ref, b0_ref,
                   wh_ref, bh_ref, w4_ref, b4_ref,
                   vdef_ref, sdf_ref):
    pts = pts_ref[...]                                   # (3, T) f32

    # Harmonic embedding, lane-dense: one multiply, one sin, one cos on (24, T).
    pts_rep = jnp.tile(pts, (NFREQ, 1))                  # (24, T) rows: f0(x,y,z), f1(x,y,z), ...
    scaled = pts_rep * scales_ref[...]                   # (24, T) * (24, 1)
    sin_f = jnp.sin(scaled)                              # (24, T)
    cos_f = jnp.cos(scaled)                              # (24, T)

    # Layer 0: split-W0 sum instead of a 17-way lane concatenate.
    h = (jnp.dot(w0p_ref[...], pts, preferred_element_type=jnp.float32)
         + jnp.dot(w0s_ref[...], sin_f, preferred_element_type=jnp.float32)
         + jnp.dot(w0c_ref[...], cos_f, preferred_element_type=jnp.float32)
         + b0_ref[...])                                  # (64, T)
    h = jnp.maximum(h, 0.0)

    # Hidden layers 1..3 (stacked weights, static unrolled loop).
    for l in range(NUM_LAYERS - 2):
        h = jnp.maximum(
            jnp.dot(wh_ref[l], h, preferred_element_type=jnp.float32) + bh_ref[l],
            0.0)                                         # (64, T)

    # Output layer + fused epilogue.
    raw = jnp.dot(w4_ref[...], h, preferred_element_type=jnp.float32) + b4_ref[...]  # (4, T)
    sdf_ref[...] = raw[0:1, :]
    vdef_ref[...] = pts + jnp.tanh(raw[1:4, :]) * DEFORM_SCALE


def prior_sdf_pallas(verts, kparams, *, tile_m=TILE_M):
    """Evaluate the prior SDF MLP + deform epilogue over all grid vertices.

    verts:   (N, 3) float32 (any N; padded internally to a multiple of tile_m)
    kparams: (scales, w0p, w0s, w0c, b0, wh, bh, w4t, b4) in channel-first form
    returns  v_deformed (N, 3) float32, sdf (N, 1) float32
    """
    scales, w0p, w0s, w0c, b0, wh, bh, w4t, b4 = kparams
    n = verts.shape[0]
    n_blocks = pl.cdiv(n, tile_m)
    n_pad = n_blocks * tile_m

    pts_cf = verts.T.astype(jnp.float32)                 # (3, N) channel-first
    if n_pad != n:
        pts_cf = jnp.pad(pts_cf, ((0, 0), (0, n_pad - n)))

    full2 = lambda shape: pl.BlockSpec(shape, lambda i: (0, 0))
    full3 = lambda shape: pl.BlockSpec(shape, lambda i: (0, 0, 0))

    grid_spec = pltpu.PrefetchScalarGridSpec(
        num_scalar_prefetch=0,
        grid=(n_blocks,),
        in_specs=[
            pl.BlockSpec((3, tile_m), lambda i: (0, i)),   # vertex tile
            full2((3 * NFREQ, 1)),                          # freq scales
            full2((HIDDEN, 3)),                             # W0_pts^T
            full2((HIDDEN, 3 * NFREQ)),                     # W0_sin^T
            full2((HIDDEN, 3 * NFREQ)),                     # W0_cos^T
            full2((HIDDEN, 1)),                             # b0
            full3((NUM_LAYERS - 2, HIDDEN, HIDDEN)),        # stacked hidden W^T
            full3((NUM_LAYERS - 2, HIDDEN, 1)),             # stacked hidden b
            full2((D_OUT, HIDDEN)),                         # W4^T
            full2((D_OUT, 1)),                              # b4
        ],
        out_specs=(
            pl.BlockSpec((3, tile_m), lambda i: (0, i)),    # v_deformed (lane-dense)
            pl.BlockSpec((1, tile_m), lambda i: (0, i)),    # sdf (lane-dense)
        ),
    )

    vdef_cf, sdf_cf = pl.pallas_call(
        sdf_mlp_kernel,
        out_shape=(jax.ShapeDtypeStruct((3, n_pad), jnp.float32),
                   jax.ShapeDtypeStruct((1, n_pad), jnp.float32)),
        grid_spec=grid_spec,
        compiler_params=pltpu.CompilerParams(
            dimension_semantics=("parallel",),
            vmem_limit_bytes=32 * 1024 * 1024),  # safe on v5e/v6e/v7x; usage is tiny
    )(pts_cf, scales, w0p, w0s, w0c, b0, wh, bh, w4t, b4)

    v_deformed = vdef_cf[:, :n].T                         # (N, 3)
    sdf = sdf_cf[:, :n].T                                 # (N, 1)
    return v_deformed, sdf


# ----------------------------------------------------------------------------
# Pure-JAX reference (channels-last, mirrors the PyTorch math) for validation
# ----------------------------------------------------------------------------
def prior_forward_ref(verts, Ws, bs):
    W0, W1, W2, W3, W4 = Ws
    b0, b1, b2, b3, b4 = bs
    feats = [verts]
    for k in range(NFREQ):
        feats.append(jnp.sin(verts * (OMEGA0 * (2.0 ** k))))
    for k in range(NFREQ):
        feats.append(jnp.cos(verts * (OMEGA0 * (2.0 ** k))))
    h = jnp.concatenate(feats, axis=-1)                   # (N, 51)
    h = jax.nn.relu(h @ W0 + b0)
    h = jax.nn.relu(h @ W1 + b1)
    h = jax.nn.relu(h @ W2 + b2)
    h = jax.nn.relu(h @ W3 + b3)
    raw = h @ W4 + b4                                     # (N, 4)
    sdf = raw[:, 0:1]
    v_deformed = verts + jnp.tanh(raw[:, 1:4]) * DEFORM_SCALE
    return v_deformed, sdf


# ----------------------------------------------------------------------------
# Parameter init (math form) + repack into the kernel's channel-first layout
# ----------------------------------------------------------------------------
def init_params(key):
    dims = [D_IN] + [HIDDEN] * (NUM_LAYERS - 1) + [D_OUT]
    Ws, bs = [], []
    for li in range(NUM_LAYERS):
        key, kw = jax.random.split(key)
        w = jax.random.normal(kw, (dims[li], dims[li + 1]), jnp.float32)
        w = w * (2.0 / dims[li]) ** 0.5
        Ws.append(w)
        bs.append(jnp.zeros((dims[li + 1],), jnp.float32))
    return Ws, bs


def pack_kernel_params(Ws, bs):
    W0, W1, W2, W3, W4 = Ws
    b0, b1, b2, b3, b4 = bs
    # Embedding channel order in the reference: [pts(3) | sin f0..f7 (24) | cos f0..f7 (24)]
    w0p = W0[0:3, :].T                                    # (64, 3)
    w0s = W0[3:3 + 3 * NFREQ, :].T                        # (64, 24)
    w0c = W0[3 + 3 * NFREQ:, :].T                         # (64, 24)
    b0c = b0[:, None]                                     # (64, 1)
    wh = jnp.stack([W1.T, W2.T, W3.T], axis=0)            # (3, 64, 64)
    bh = jnp.stack([b1[:, None], b2[:, None], b3[:, None]], axis=0)  # (3, 64, 1)
    w4t = W4.T                                            # (4, 64)
    b4c = b4[:, None]                                     # (4, 1)
    # Per-row frequency scales matching jnp.tile(pts, (NFREQ, 1)) row order.
    scales = jnp.asarray(
        [OMEGA0 * (2.0 ** k) for k in range(NFREQ) for _ in range(3)],
        jnp.float32).reshape(3 * NFREQ, 1)                # (24, 1)
    return (scales, w0p, w0s, w0c, b0c, wh, bh, w4t, b4c)


def make_grid_verts(res, scale):
    # Regular grid stand-in for the precomputed tet-grid vertices.
    lin = jnp.linspace(-0.5 * scale, 0.5 * scale, res, dtype=jnp.float32)
    gx, gy, gz = jnp.meshgrid(lin, lin, lin, indexing="ij")
    return jnp.stack([gx.ravel(), gy.ravel(), gz.ravel()], axis=-1)  # (res^3, 3)


def prior_predictor_forward(verts, kparams):
    """Mirrors PriorPredictor.forward(perturb_sdf=False, ...): evaluates the
    prior SDF MLP + deformation over grid vertices (Pallas hot path),
    returns (prior_shape_proxy, netDINO)."""
    v_deformed, sdf = prior_sdf_pallas(verts, kparams)
    # TODO(synk): marching-tetrahedra surface extraction (data-dependent
    # topology) has no clean Pallas equivalent; returning (v_deformed, sdf).
    prior_shape = (v_deformed, sdf)
    net_dino = None  # render_dino_mode=None in default cfg -> no DINO net
    return prior_shape, net_dino


if __name__ == "__main__":
    key = jax.random.PRNGKey(0)

    Ws, bs = init_params(key)
    kparams = pack_kernel_params(Ws, bs)
    verts = make_grid_verts(GRID_RES, GRID_SCALE)         # (1728, 3) -> padded to 2048 inside

    (v_def, sdf), net_dino = prior_predictor_forward(verts, kparams)
    jax.block_until_ready((v_def, sdf))

    # Validate the fused Pallas kernel against the pure-JAX reference.
    v_ref, s_ref = prior_forward_ref(verts, Ws, bs)
    jax.block_until_ready((v_ref, s_ref))
    if not (jnp.allclose(v_def, v_ref, atol=1e-4, rtol=1e-4)
            and jnp.allclose(sdf, s_ref, atol=1e-4, rtol=1e-4)):
        raise AssertionError("Pallas kernel does not match JAX reference")

    print("KERNEL_OK")
</pallas_src>

<mosaic_0001>
module attributes {stable_mosaic.version = 11 : i64} {
  func.func @sdf_mlp_kernel(%arg0: i32, %arg1: memref<3x1024xf32, #tpu.memory_space<vmem>>, %arg2: memref<24x1xf32, #tpu.memory_space<vmem>>, %arg3: memref<64x3xf32, #tpu.memory_space<vmem>>, %arg4: memref<64x24xf32, #tpu.memory_space<vmem>>, %arg5: memref<64x24xf32, #tpu.memory_space<vmem>>, %arg6: memref<64x1xf32, #tpu.memory_space<vmem>>, %arg7: memref<3x64x64xf32, #tpu.memory_space<vmem>>, %arg8: memref<3x64x1xf32, #tpu.memory_space<vmem>>, %arg9: memref<4x64xf32, #tpu.memory_space<vmem>>, %arg10: memref<4x1xf32, #tpu.memory_space<vmem>>, %arg11: memref<3x1024xf32, #tpu.memory_space<vmem>>, %arg12: memref<1x1024xf32, #tpu.memory_space<vmem>>) attributes {dimension_semantics = [#tpu.dimension_semantics<parallel>], iteration_bounds = array<i64: 2>, scalar_prefetch = 0 : i64, scratch_operands = 0 : i64, tpu.core_type = #tpu.core_type<tc>, window_params = [{transform_indices = @transform_0, window_bounds = array<i64: 3, 1024>}, {pipeline_mode = #tpu.pipeline_mode<synchronous>, transform_indices = @transform_1, window_bounds = array<i64: 24, 1>}, {pipeline_mode = #tpu.pipeline_mode<synchronous>, transform_indices = @transform_2, window_bounds = array<i64: 64, 3>}, {pipeline_mode = #tpu.pipeline_mode<synchronous>, transform_indices = @transform_3, window_bounds = array<i64: 64, 24>}, {pipeline_mode = #tpu.pipeline_mode<synchronous>, transform_indices = @transform_4, window_bounds = array<i64: 64, 24>}, {pipeline_mode = #tpu.pipeline_mode<synchronous>, transform_indices = @transform_5, window_bounds = array<i64: 64, 1>}, {pipeline_mode = #tpu.pipeline_mode<synchronous>, transform_indices = @transform_6, window_bounds = array<i64: 3, 64, 64>}, {pipeline_mode = #tpu.pipeline_mode<synchronous>, transform_indices = @transform_7, window_bounds = array<i64: 3, 64, 1>}, {pipeline_mode = #tpu.pipeline_mode<synchronous>, transform_indices = @transform_8, window_bounds = array<i64: 4, 64>}, {pipeline_mode = #tpu.pipeline_mode<synchronous>, transform_indices = @transform_9, window_bounds = array<i64: 4, 1>}, {transform_indices = @transform_10, window_bounds = array<i64: 3, 1024>}, {transform_indices = @transform_11, window_bounds = array<i64: 1, 1024>}]} {
    %c0 = arith.constant 0 : index
    %c0_0 = arith.constant 0 : index
    %0 = vector.load %arg1[%c0, %c0_0] : memref<3x1024xf32, #tpu.memory_space<vmem>>, vector<3x1024xf32>
    %1 = tpu.concatenate %0, %0, %0, %0, %0, %0, %0, %0 in 0 : vector<3x1024xf32>, vector<3x1024xf32>, vector<3x1024xf32>, vector<3x1024xf32>, vector<3x1024xf32>, vector<3x1024xf32>, vector<3x1024xf32>, vector<3x1024xf32> -> vector<24x1024xf32>
    %c0_1 = arith.constant 0 : index
    %c0_2 = arith.constant 0 : index
    %2 = vector.load %arg2[%c0_1, %c0_2] : memref<24x1xf32, #tpu.memory_space<vmem>>, vector<24x1xf32>
    %3 = vector.broadcast %2 : vector<24x1xf32> to vector<24x1024xf32>
    %4 = arith.mulf %1, %3 : vector<24x1024xf32>
    %5 = math.sin %4 : vector<24x1024xf32>
    %6 = math.cos %4 : vector<24x1024xf32>
    %c0_3 = arith.constant 0 : index
    %c0_4 = arith.constant 0 : index
    %7 = vector.load %arg3[%c0_3, %c0_4] : memref<64x3xf32, #tpu.memory_space<vmem>>, vector<64x3xf32>
    %cst = arith.constant dense<0.000000e+00> : vector<64x1024xf32>
    %8 = tpu.matmul %7, %0, %cst {dimension_numbers = #tpu.dot_dimension_numbers<[1], [0], [0], [1], [0, 0, 1, 1], [], []>} : vector<64x3xf32>, vector<3x1024xf32>, vector<64x1024xf32> -> vector<64x1024xf32>
    %c0_5 = arith.constant 0 : index
    %c0_6 = arith.constant 0 : index
    %9 = vector.load %arg4[%c0_5, %c0_6] : memref<64x24xf32, #tpu.memory_space<vmem>>, vector<64x24xf32>
    %cst_7 = arith.constant dense<0.000000e+00> : vector<64x1024xf32>
    %10 = tpu.matmul %9, %5, %cst_7 {dimension_numbers = #tpu.dot_dimension_numbers<[1], [0], [0], [1], [0, 0, 1, 1], [], []>} : vector<64x24xf32>, vector<24x1024xf32>, vector<64x1024xf32> -> vector<64x1024xf32>
    %11 = arith.addf %8, %10 : vector<64x1024xf32>
    %c0_8 = arith.constant 0 : index
    %c0_9 = arith.constant 0 : index
    %12 = vector.load %arg5[%c0_8, %c0_9] : memref<64x24xf32, #tpu.memory_space<vmem>>, vector<64x24xf32>
    %cst_10 = arith.constant dense<0.000000e+00> : vector<64x1024xf32>
    %13 = tpu.matmul %12, %6, %cst_10 {dimension_numbers = #tpu.dot_dimension_numbers<[1], [0], [0], [1], [0, 0, 1, 1], [], []>} : vector<64x24xf32>, vector<24x1024xf32>, vector<64x1024xf32> -> vector<64x1024xf32>
    %14 = arith.addf %11, %13 : vector<64x1024xf32>
    %c0_11 = arith.constant 0 : index
    %c0_12 = arith.constant 0 : index
    %15 = vector.load %arg6[%c0_11, %c0_12] : memref<64x1xf32, #tpu.memory_space<vmem>>, vector<64x1xf32>
    %16 = vector.broadcast %15 : vector<64x1xf32> to vector<64x1024xf32>
    %17 = arith.addf %14, %16 : vector<64x1024xf32>
    %cst_13 = arith.constant 0.000000e+00 : f32
    %18 = vector.broadcast %cst_13 : f32 to vector<64x1024xf32>
    %19 = arith.maximumf %17, %18 : vector<64x1024xf32>
    %c0_14 = arith.constant 0 : index
    %c0_15 = arith.constant 0 : index
    %c0_16 = arith.constant 0 : index
    %20 = vector.load %arg7[%c0_14, %c0_15, %c0_16] : memref<3x64x64xf32, #tpu.memory_space<vmem>>, vector<1x64x64xf32>
    %21 = vector.shape_cast %20 : vector<1x64x64xf32> to vector<64x64xf32>
    %cst_17 = arith.constant dense<0.000000e+00> : vector<64x1024xf32>
    %22 = tpu.matmul %21, %19, %cst_17 {dimension_numbers = #tpu.dot_dimension_numbers<[1], [0], [0], [1], [0, 0, 1, 1], [], []>} : vector<64x64xf32>, vector<64x1024xf32>, vector<64x1024xf32> -> vector<64x1024xf32>
    %c0_18 = arith.constant 0 : index
    %c0_19 = arith.constant 0 : index
    %c0_20 = arith.constant 0 : index
    %23 = vector.load %arg8[%c0_18, %c0_19, %c0_20] : memref<3x64x1xf32, #tpu.memory_space<vmem>>, vector<1x64x1xf32>
    %24 = vector.shape_cast %23 : vector<1x64x1xf32> to vector<64x1xf32>
    %25 = vector.broadcast %24 : vector<64x1xf32> to vector<64x1024xf32>
    %26 = arith.addf %22, %25 : vector<64x1024xf32>
    %cst_21 = arith.constant 0.000000e+00 : f32
    %27 = vector.broadcast %cst_21 : f32 to vector<64x1024xf32>
    %28 = arith.maximumf %26, %27 : vector<64x1024xf32>
    %c1 = arith.constant 1 : index
    %c0_22 = arith.constant 0 : index
    %c0_23 = arith.constant 0 : index
    %29 = vector.load %arg7[%c1, %c0_22, %c0_23] : memref<3x64x64xf32, #tpu.memory_space<vmem>>, vector<1x64x64xf32>
    %30 = vector.shape_cast %29 : vector<1x64x64xf32> to vector<64x64xf32>
    %cst_24 = arith.constant dense<0.000000e+00> : vector<64x1024xf32>
    %31 = tpu.matmul %30, %28, %cst_24 {dimension_numbers = #tpu.dot_dimension_numbers<[1], [0], [0], [1], [0, 0, 1, 1], [], []>} : vector<64x64xf32>, vector<64x1024xf32>, vector<64x1024xf32> -> vector<64x1024xf32>
    %c1_25 = arith.constant 1 : index
    %c0_26 = arith.constant 0 : index
    %c0_27 = arith.constant 0 : index
    %32 = vector.load %arg8[%c1_25, %c0_26, %c0_27] : memref<3x64x1xf32, #tpu.memory_space<vmem>>, vector<1x64x1xf32>
    %33 = vector.shape_cast %32 : vector<1x64x1xf32> to vector<64x1xf32>
    %34 = vector.broadcast %33 : vector<64x1xf32> to vector<64x1024xf32>
    %35 = arith.addf %31, %34 : vector<64x1024xf32>
    %cst_28 = arith.constant 0.000000e+00 : f32
    %36 = vector.broadcast %cst_28 : f32 to vector<64x1024xf32>
    %37 = arith.maximumf %35, %36 : vector<64x1024xf32>
    %c2 = arith.constant 2 : index
    %c0_29 = arith.constant 0 : index
    %c0_30 = arith.constant 0 : index
    %38 = vector.load %arg7[%c2, %c0_29, %c0_30] : memref<3x64x64xf32, #tpu.memory_space<vmem>>, vector<1x64x64xf32>
    %39 = vector.shape_cast %38 : vector<1x64x64xf32> to vector<64x64xf32>
    %cst_31 = arith.constant dense<0.000000e+00> : vector<64x1024xf32>
    %40 = tpu.matmul %39, %37, %cst_31 {dimension_numbers = #tpu.dot_dimension_numbers<[1], [0], [0], [1], [0, 0, 1, 1], [], []>} : vector<64x64xf32>, vector<64x1024xf32>, vector<64x1024xf32> -> vector<64x1024xf32>
    %c2_32 = arith.constant 2 : index
    %c0_33 = arith.constant 0 : index
    %c0_34 = arith.constant 0 : index
    %41 = vector.load %arg8[%c2_32, %c0_33, %c0_34] : memref<3x64x1xf32, #tpu.memory_space<vmem>>, vector<1x64x1xf32>
    %42 = vector.shape_cast %41 : vector<1x64x1xf32> to vector<64x1xf32>
    %43 = vector.broadcast %42 : vector<64x1xf32> to vector<64x1024xf32>
    %44 = arith.addf %40, %43 : vector<64x1024xf32>
    %cst_35 = arith.constant 0.000000e+00 : f32
    %45 = vector.broadcast %cst_35 : f32 to vector<64x1024xf32>
    %46 = arith.maximumf %44, %45 : vector<64x1024xf32>
    %c0_36 = arith.constant 0 : index
    %c0_37 = arith.constant 0 : index
    %47 = vector.load %arg9[%c0_36, %c0_37] : memref<4x64xf32, #tpu.memory_space<vmem>>, vector<4x64xf32>
    %cst_38 = arith.constant dense<0.000000e+00> : vector<4x1024xf32>
    %48 = tpu.matmul %47, %46, %cst_38 {dimension_numbers = #tpu.dot_dimension_numbers<[1], [0], [0], [1], [0, 0, 1, 1], [], []>} : vector<4x64xf32>, vector<64x1024xf32>, vector<4x1024xf32> -> vector<4x1024xf32>
    %c0_39 = arith.constant 0 : index
    %c0_40 = arith.constant 0 : index
    %49 = vector.load %arg10[%c0_39, %c0_40] : memref<4x1xf32, #tpu.memory_space<vmem>>, vector<4x1xf32>
    %50 = vector.broadcast %49 : vector<4x1xf32> to vector<4x1024xf32>
    %51 = arith.addf %48, %50 : vector<4x1024xf32>
    %52 = vector.extract_strided_slice %51 {offsets = [0, 0], sizes = [1, 1024], strides = [1, 1]} : vector<4x1024xf32> to vector<1x1024xf32>
    %c0_41 = arith.constant 0 : index
    %c0_42 = arith.constant 0 : index
    %53 = vector.load %arg12[%c0_41, %c0_42] : memref<1x1024xf32, #tpu.memory_space<vmem>>, vector<1x1024xf32>
    tpu.vector_store %arg12[%c0_41, %c0_42], %52 {strides = array<i32>} : memref<1x1024xf32, #tpu.memory_space<vmem>>, vector<1x1024xf32>,
    %54 = vector.extract_strided_slice %51 {offsets = [1, 0], sizes = [3, 1024], strides = [1, 1]} : vector<4x1024xf32> to vector<3x1024xf32>
    %55 = math.tanh %54 : vector<3x1024xf32>
    %cst_43 = arith.constant 0.0833333358 : f32
    %56 = vector.broadcast %cst_43 : f32 to vector<3x1024xf32>
    %57 = arith.mulf %55, %56 : vector<3x1024xf32>
    %58 = arith.addf %0, %57 : vector<3x1024xf32>
    %c0_44 = arith.constant 0 : index
    %c0_45 = arith.constant 0 : index
    %59 = vector.load %arg11[%c0_44, %c0_45] : memref<3x1024xf32, #tpu.memory_space<vmem>>, vector<3x1024xf32>
    tpu.vector_store %arg11[%c0_44, %c0_45], %58 {strides = array<i32>} : memref<3x1024xf32, #tpu.memory_space<vmem>>, vector<3x1024xf32>,
    return
  }
  func.func @transform_0(%arg0: i32) -> (i32, i32) {
    %c0_i32 = arith.constant 0 : i32
    %c0_i32_0 = arith.constant 0 : i32
    return %c0_i32, %arg0 : i32, i32
  }
  func.func @transform_1(%arg0: i32) -> (i32, i32) {
    %c0_i32 = arith.constant 0 : i32
    %c0_i32_0 = arith.constant 0 : i32
    %c0_i32_1 = arith.constant 0 : i32
    return %c0_i32, %c0_i32_0 : i32, i32
  }
  func.func @transform_2(%arg0: i32) -> (i32, i32) {
    %c0_i32 = arith.constant 0 : i32
    %c0_i32_0 = arith.constant 0 : i32
    %c0_i32_1 = arith.constant 0 : i32
    return %c0_i32, %c0_i32_0 : i32, i32
  }
  func.func @transform_3(%arg0: i32) -> (i32, i32) {
    %c0_i32 = arith.constant 0 : i32
    %c0_i32_0 = arith.constant 0 : i32
    %c0_i32_1 = arith.constant 0 : i32
    return %c0_i32, %c0_i32_0 : i32, i32
  }
  func.func @transform_4(%arg0: i32) -> (i32, i32) {
    %c0_i32 = arith.constant 0 : i32
    %c0_i32_0 = arith.constant 0 : i32
    %c0_i32_1 = arith.constant 0 : i32
    return %c0_i32, %c0_i32_0 : i32, i32
  }
  func.func @transform_5(%arg0: i32) -> (i32, i32) {
    %c0_i32 = arith.constant 0 : i32
    %c0_i32_0 = arith.constant 0 : i32
    %c0_i32_1 = arith.constant 0 : i32
    return %c0_i32, %c0_i32_0 : i32, i32
  }
  func.func @transform_6(%arg0: i32) -> (i32, i32, i32) {
    %c0_i32 = arith.constant 0 : i32
    %c0_i32_0 = arith.constant 0 : i32
    %c0_i32_1 = arith.constant 0 : i32
    %c0_i32_2 = arith.constant 0 : i32
    return %c0_i32, %c0_i32_0, %c0_i32_1 : i32, i32, i32
  }
  func.func @transform_7(%arg0: i32) -> (i32, i32, i32) {
    %c0_i32 = arith.constant 0 : i32
    %c0_i32_0 = arith.constant 0 : i32
    %c0_i32_1 = arith.constant 0 : i32
    %c0_i32_2 = arith.constant 0 : i32
    return %c0_i32, %c0_i32_0, %c0_i32_1 : i32, i32, i32
  }
  func.func @transform_8(%arg0: i32) -> (i32, i32) {
    %c0_i32 = arith.constant 0 : i32
    %c0_i32_0 = arith.constant 0 : i32
    %c0_i32_1 = arith.constant 0 : i32
    return %c0_i32, %c0_i32_0 : i32, i32
  }
  func.func @transform_9(%arg0: i32) -> (i32, i32) {
    %c0_i32 = arith.constant 0 : i32
    %c0_i32_0 = arith.constant 0 : i32
    %c0_i32_1 = arith.constant 0 : i32
    return %c0_i32, %c0_i32_0 : i32, i32
  }
  func.func @transform_10(%arg0: i32) -> (i32, i32) {
    %c0_i32 = arith.constant 0 : i32
    %c0_i32_0 = arith.constant 0 : i32
    return %c0_i32, %arg0 : i32, i32
  }
  func.func @transform_11(%arg0: i32) -> (i32, i32) {
    %c0_i32 = arith.constant 0 : i32
    %c0_i32_0 = arith.constant 0 : i32
    return %c0_i32, %arg0 : i32, i32
  }
}

</mosaic_0001>

<bundles_post_ra>
// kernel: tpu_custom_call.1
= control target key start
LH: loop header
LB: loop body
LE: loop exit
PB: predicated region body
PF: predicated region fallthrough
CT: control target
= control target key end

     0   :  { %s15298_s0 = inlined_call_operand.vmem [shape: f32[3,2048], index: 0, kind: input, shape index: {}]   ;;  %s15299_s1 = inlined_call_operand.vmem [shape: f32[24,1], index: 1, kind: input, shape index: {}]   ;;  %s15300_s2 = inlined_call_operand.vmem [shape: f32[64,3], index: 2, kind: input, shape index: {}]   ;;  %s15301_s3 = inlined_call_operand.vmem [shape: f32[64,24], index: 3, kind: input, shape index: {}]   ;;  %s15302_s4 = inlined_call_operand.vmem [shape: f32[64,24], index: 4, kind: input, shape index: {}]   ;;  %s15303_s5 = inlined_call_operand.vmem [shape: f32[64,1], index: 5, kind: input, shape index: {}]   ;;  %s15304_s6 = inlined_call_operand.vmem [shape: f32[3,64,64], index: 6, kind: input, shape index: {}]   ;;  %s15305_s7 = inlined_call_operand.vmem [shape: f32[3,64,1], index: 7, kind: input, shape index: {}]   ;;  %s15306_s8 = inlined_call_operand.vmem [shape: f32[4,64], index: 8, kind: input, shape index: {}]   ;;  %s15307_s9 = inlined_call_operand.vmem [shape: f32[4,1], index: 9, kind: input, shape index: {}]   ;;  %s15308_s10 = inlined_call_operand.hbm [shape: f32[3,2048], index: 10, kind: output, shape index: {0}]   ;;  %s15309_s11 = inlined_call_operand.hbm [shape: f32[1,2048], index: 11, kind: output, shape index: {1}]  }
   0x1   :  { %15444 = sst [smem:[#allocation56_spill]] %s15298_s0 }
   0x2   :  { %15445 = sst [smem:[#allocation57_spill]] %s15299_s1 }
   0x3   :  { %15446 = sst [smem:[#allocation58_spill]] %s15300_s2 }
   0x4   :  { %15447 = sst [smem:[#allocation59_spill]] %s15301_s3 }
   0x5   :  { %17 = vsyncpa [#allocation3], 0 }
   0x6   :  { %19 = vsyncpa [#allocation3 + $0x1], 0 }
   0x7   :  { %20 = vsyncpa [#allocation5], 0 }
   0x8   :  { %22 = vsyncpa [#allocation5 + $0x1], 0  ;;  %s10942_s17 = smov 0   ;;  %s10944_s18 = smov 0  }
   0x9   :  { %s10946_s19 = smov 0   ;;  %s10948_s20 = smov 0  }
   0xa LB: > { %s10963_s21 = sadd.s32 4294967295, %s10869_s20   ;;  %s9622_s22 = sadd.s32 4294967294, %s10869_s20   ;;  %s10869_s20 = sphi %s10948_s20, %s15701_s20   ;;  %s10865_s19 = sphi %s10946_s19, %s15700_s19   ;;  %s10861_s18 = sphi %s10944_s18, %s15699_s18   ;;  %s10857_s17 = sphi %s10942_s17, %s15698_s17  }
   0xb   : > { %s10967_s23 = sadd.s32 1, %s10869_s20   ;;  %s250_s24 = sadd.s32 1, %s10865_s19 }
   0xc   : > { %s247_s25 = ssub.s32 %s10869_s20, %s10967_s23  ;;  %p260_p0 = scmp.ne.s32.totalorder %s10865_s19, %s10861_s18 }
   0xd   : > { %p248_p1 = scmp.eq.s32.totalorder %s247_s25, 0  ;;  %p261_p2 = scmp.eq.s32.totalorder %s10963_s21, 1 }
   0xe   : > { %p266_p3 = scmp.ne.s32.totalorder %s10861_s18, %s10857_s17  ;;  %p267_p4 = scmp.eq.s32.totalorder %s9622_s22, 1 }
   0xf   : > { %s10978_s26 = scalar_select %p248_p1, %s10865_s19, %s250_s24  }
  0x10   : > { %p10980_p5 = por %p261_p2, %p260_p0  ;;  %p10984_p6 = por %p267_p4, %p266_p3 }
  0x11   : > { %p9625_p7 = scmp.ge.s32.totalorder %s10869_s20, 1  ;;  %p347_p8 = scmp.lt.s32.totalorder %s10869_s20, 3 }
  0x13   : > { %p348_p9 = pnand %p9625_p7, %p347_p8 }
  0x15   : > { %351 = sbr.rel (%p348_p9) target bundleno = 2249 (0x8c9), region = 60 }
  0x1c   : > { %s15450_s1 = sld [smem:[#allocation57_spill]]  ;;  %v10871_v2 = vmov 0   ;;  %v7127_v3 = vld [vmem:[%s15303_s5] sm:$0xff]  ;;  %v7129_v5 = vld [vmem:[%s15303_s5 + $0x10] sm:$0xff]  ;;  %v7128_v6 = vld [vmem:[%s15303_s5 + $0x8] sm:$0xff]  ;;  %s9628_s12 = sshll.u32 %s10963_s21, 3 }
  0x1d   : > { %10638 = vset.pattern.permute.xlu1 %v10871_v2  ;;  %10637 = vset.pattern.permute.xlu0 %v10871_v2  ;;  %v7131_v7 = vld [vmem:[%s15303_s5 + $0x20] sm:$0xff]  ;;  %v7130_v8 = vld [vmem:[%s15303_s5 + $0x18] sm:$0xff]  ;;  %v7133_v9 = vld [vmem:[%s15303_s5 + $0x30] sm:$0xff]  ;;  %p393_p10 = scmp.lt.s32.totalorder %s9628_s12, 15  ;;  %s15451_s0 = sld [smem:[#allocation56_spill]]  ;;  %vm15311_vm0 = vcmask 1042432  }
  0x1e   : > { %v7132_v10 = vld [vmem:[%s15303_s5 + $0x28] sm:$0xff]  ;;  %v7311_v11 = vld [vmem:[%s15305_s7] sm:$0xff]  ;;  %v7134_v12 = vld [vmem:[%s15303_s5 + $0x38] sm:$0xff]  ;;  %vm15325_vm1 = vcmask 1040384   ;;  %vm15324_vm2 = vcmask 1045504   ;;  %vm547_vm3 = vcmask 1043456  }
  0x1f   : > { %v7313_v13 = vld [vmem:[%s15305_s7 + $0x10] sm:$0xff]  ;;  %v7312_v14 = vld [vmem:[%s15305_s7 + $0x8] sm:$0xff]  ;;  %v7315_v15 = vld [vmem:[%s15305_s7 + $0x20] sm:$0xff]  ;;  %s15703_s12 = smov (!%p393_p10, %s9628_s12), 15  ;;  %vm15312_vm4 = vcmask 1046528   ;;  %s15526_s3 = sld [smem:[#allocation59_spill]] }
  0x20   : > { %v7314_v16 = vld [vmem:[%s15305_s7 + $0x18] sm:$0xff]  ;;  %v7317_v17 = vld [vmem:[%s15305_s7 + $0x30] sm:$0xff]  ;;  %v7316_v18 = vld [vmem:[%s15305_s7 + $0x28] sm:$0xff]  ;;  %s9629_s13 = sshll.u32 %s15703_s12, 2  ;;  %s15612_s2 = sld [smem:[#allocation58_spill]] }
  0x21   : > { %v9966_v19 = vld [vmem:[%s15305_s7 + $0x40] sm:$0xff]  ;;  %v7318_v20 = vld [vmem:[%s15305_s7 + $0x38] sm:$0xff]  ;;  %v9968_v21 = vld [vmem:[%s15305_s7 + $0x50] sm:$0xff]  ;;  %s15200_s29 = sand.u32 1, %s10861_s18   ;;  %s10071_s14 = sshll.u32 %s10963_s21, 7 }
  0x22   : > { %v585_v0 = vld [vmem:[%s15450_s1 + $0x10] sm:$0xff]  ;;  %v583_v1 = vld [vmem:[%s15450_s1] sm:$0xff]  ;;  %v584_v4 = vld [vmem:[%s15450_s1 + $0x8] sm:$0xff]  ;;  %s9626_s30 = sshll.u32 %s15200_s29, 5  ;;  %s10880_s1 = smov [#allocation4]  }
  0x23   : > { %598 = vperm.xlu1 %10638, %v585_v0   ;;  %588 = vperm.xlu0 %10637, %v583_v1   ;;  %v9967_v22 = vld [vmem:[%s15305_s7 + $0x48] sm:$0xff]  ;;  %v9970_v23 = vld [vmem:[%s15305_s7 + $0x60] sm:$0xff]  ;;  %v9969_v24 = vld [vmem:[%s15305_s7 + $0x58] sm:$0xff]  ;;  %s11102_s16 = scalar_lea.vmem %s15451_s0, %s9629_s13  ;;  %s15205_s12 = scalar_lea.vmem [#allocation2], %s9626_s30 }
  0x24   : > { %v9972_v25 = vld [vmem:[%s15305_s7 + $0x70] sm:$0xff]  ;;  %v9971_v26 = vld [vmem:[%s15305_s7 + $0x68] sm:$0xff]  ;;  %v10014_v27 = vld [vmem:[%s15305_s7 + $0x80] sm:$0xff]  ;;  %s9627_s13 = sshll.u32 %s15200_s29, 3  ;;  %s15222_s30 = scalar_lea.hbm %s15309_s11, %s10071_s14 }
  0x25   : > { %v9973_v28 = vld [vmem:[%s15305_s7 + $0x78] sm:$0xff]  ;;  %v10016_v29 = vld [vmem:[%s15305_s7 + $0x90] sm:$0xff]  ;;  %v10015_v30 = vld [vmem:[%s15305_s7 + $0x88] sm:$0xff]  ;;  %s391_s15 = scalar_lea.vmem [#allocation4], %s9627_s13  ;;  %s9503_s13 = scalar_lea.sflag [#allocation5], %s15200_s29 }
  0x26   : > { %v10018_v31 = vld [vmem:[%s15305_s7 + $0xa0] sm:$0xff]  ;;  %v10017_v32 = vld [vmem:[%s15305_s7 + $0x98] sm:$0xff]  ;;  %v10020_v33 = vld [vmem:[%s15305_s7 + $0xb0] sm:$0xff]  ;;  %s9531_s22 = sshll.u32 %s391_s15, 4  ;;  %s10779_s24 = sshll.u32 %s10880_s1, 4  ;;  %s15224_s22 = int_to_ptr.vmem [resolvable:$true] %s9531_s22  ;;  %s10780_s24 = int_to_ptr.vmem [resolvable:$false] %s10779_s24 }
  0x27   : > { %7137 = vperm.xlu1 %10638, %v7127_v3   ;;  %593 = vperm.xlu0 %10637, %v584_v4   ;;  %v10019_v34 = vld [vmem:[%s15305_s7 + $0xa8] sm:$0xff]  ;;  %v9097_v35 = vld [vmem:[%s15307_s9] sm:$0xf]  ;;  %v10021_v36 = vld [vmem:[%s15305_s7 + $0xb8] sm:$0xff]  ;;  %s10775_s0 = scalar_lea.vmem %s15224_s22, 128  ;;  %s10781_s14 = scalar_lea.vmem %s10780_s24, 256 }
  0x28   : > { %v11105_v37 = vld [vmem:[%s11102_s16] sm:$0x77]  ;;  %v11130_v50 = vld [vmem:[%s11102_s16 + $0x8] sm:$0x77]  ;;  %p10776_p11 = scmp.ne.s32.totalorder %s15224_s22, %s10775_s0  ;;  %p10782_p0 = scmp.lt.s32.totalorder %s15224_s22, %s10780_s24 }
  0x29   : > { %v11109_v38 = vcombine.high %v11105_v37, %v11105_v37  ;;  %v11141_v56 = vcombine.high %v11130_v50, %v11130_v50  ;;  %p10783_p1 = scmp.lt.s32.totalorder %s10781_s14, %s10775_s0 }
  0x2a   : > { %p10777_p12 = pnand %p10776_p11, %p10980_p5 }
  0x2b   : > { %7147 = vperm.xlu1 %10638, %v7129_v5   ;;  %7142 = vperm.xlu0 %10637, %v7128_v6   ;;  %v417_v39 = vrot.slane %v11109_v38, 5  ;;  %v449_v40 = vrot.slane %v11109_v38, 7  ;;  %v433_v41 = vrot.slane %v11109_v38, 2  ;;  %v473_v47 = vrot.slane %v11109_v38, 1  ;;  %p10784_p2 = por %p10783_p1, %p10782_p0 }
  0x2c   : > { %v419_v61 = vrot.slane %v11141_v56, 5  ;;  %v435_v63 = vrot.slane %v11141_v56, 2  ;;  %p10778_p13 = pneg %p10777_p12 }
  0x2d   : > { %v522_v42 = vsel %vm15311_vm0, %v11109_v38, %v417_v39  ;;  %v540_v43 = vsel %vm15325_vm1, %v433_v41, %v449_v40 }
  0x2e   : > { %v531_v44 = vsel %vm15324_vm2, %v522_v42, %v433_v41  ;;  %v549_v46 = vsel %vm547_vm3, %v540_v43, %v11105_v37  ;;  %v524_v3 = vsel %vm15311_vm0, %v11141_v56, %v419_v61  ;;  %p10785_p3 = pnand %p10784_p2, %p10778_p13 }
  0x2f   : > { %7157 = vperm.xlu1 %10638, %v7131_v7   ;;  %7152 = vperm.xlu0 %10637, %v7130_v8   ;;  %v558_v49 = vsel %vm15312_vm4, %v549_v46, %v473_v47  ;;  %v451_v7 = vrot.slane %v11141_v56, 7  ;;  %v533_v8 = vsel %vm15324_vm2, %v524_v3, %v435_v63 }
  0x33   : > { %7167 = vperm.xlu1 %10638, %v7133_v9   ;;  %7162 = vperm.xlu0 %10637, %v7132_v10   ;;  %v15335_v10 = vmov 683565275  }
  0x37   : > { %7321 = vperm.xlu1 %10638, %v7311_v11   ;;  %7172 = vperm.xlu0 %10637, %v7134_v12  }
  0x3b   : > { %7331 = vperm.xlu1 %10638, %v7313_v13   ;;  %7326 = vperm.xlu0 %10637, %v7312_v14  }
  0x3f   : > { %7341 = vperm.xlu1 %10638, %v7315_v15   ;;  %7336 = vperm.xlu0 %10637, %v7314_v16   ;;  %v15329_v15 = vmov 2475754826  }
  0x43   : > { %7351 = vperm.xlu1 %10638, %v7317_v17   ;;  %7346 = vperm.xlu0 %10637, %v7316_v18   ;;  %v15322_v18 = vmov 2131351028  }
  0x47   : > { %7920 = vperm.xlu1 %10638, %v9966_v19   ;;  %7356 = vperm.xlu0 %10637, %v7318_v20  }
  0x4b   : > { %7930 = vperm.xlu1 %10638, %v9968_v21   ;;  %7925 = vperm.xlu0 %10637, %v9967_v22   ;;  %v15315_v21 = vmov 2102212464  }
  0x4f   : > { %7940 = vperm.xlu1 %10638, %v9970_v23   ;;  %7935 = vperm.xlu0 %10637, %v9969_v24   ;;  %v15318_v24 = vmov 920167782  }
  0x53   : > { %7950 = vperm.xlu1 %10638, %v9972_v25   ;;  %7945 = vperm.xlu0 %10637, %v9971_v26  }
  0x57   : > { %8518 = vperm.xlu1 %10638, %v10014_v27   ;;  %7955 = vperm.xlu0 %10637, %v9973_v28  }
  0x5b   : > { %8528 = vperm.xlu1 %10638, %v10016_v29   ;;  %8523 = vperm.xlu0 %10637, %v10015_v30   ;;  %v15320_v29 = vmov 1326507024  }
  0x5f   : > { %8538 = vperm.xlu1 %10638, %v10018_v31   ;;  %8533 = vperm.xlu0 %10637, %v10017_v32  }
  0x63   : > { %8548 = vperm.xlu1 %10638, %v10020_v33   ;;  %8543 = vperm.xlu0 %10637, %v10019_v34  }
  0x67   : > { %9100 = vperm.xlu1 %10638, %v9097_v35   ;;  %8553 = vperm.xlu0 %10637, %v10021_v36  }
  0xa2   : > { %v11118_v45 = vpop.permute.xlu0 %588 }
  0xa3   : > { %v11124_v48 = vmul.f32 %v11118_v45, %v531_v44 }
  0xa5   : > { %v732_v52 = vand.u32 2139095040, %v11124_v48  ;;  %v729_v53 = vand.u32 2147483647, %v11124_v48 }
  0xa6   : > { %v11132_v51 = vpop.permute.xlu0 %593 }
  0xa7   : > { %v11137_v54 = vmul.f32 %v11132_v51, %v558_v49  ;;  %v733_v55 = vshrl.u32 %v732_v52, 23  ;;  %v736_v58 = vand.u32 8388607, %v729_v53 }
  0xa9   : > { %v9634_v57 = vadd.s32 4294967169, %v733_v55  ;;  %v1564_v60 = vand.u32 2139095040, %v11137_v54  ;;  %v737_v62 = vor.u32 8388608, %v736_v58  ;;  %v1561_v1 = vand.u32 2147483647, %v11137_v54 }
  0xab   : > { %v739_v59 = vadd.s32 1, %v9634_v57  ;;  %v1565_v2 = vshrl.u32 %v1564_v60, 23  ;;  %v11151_v6 = vshll.u32 %v737_v62, 8  ;;  %v1568_v13 = vand.u32 8388607, %v1561_v1 }
  0xad   : > { %vm740_vm5 = vcmp.gt.s32.totalorder %v739_v59, 0  ;;  %v9666_v12 = vadd.s32 4294967169, %v1565_v2  ;;  %v1569_v52 = vor.u32 8388608, %v1568_v13 }
  0xae   : > { %v741_v0 = vsel %vm740_vm5, %v739_v59, 0 }
  0xaf   : > { %v743_v4 = vand.u32 31, %v741_v0  ;;  %v742_v9 = vshrl.u32 %v741_v0, 5  ;;  %v1571_v33 = vadd.s32 1, %v9666_v12  ;;  %v11180_v0 = vmul.f32 %v11118_v45, %v533_v8 }
  0xb1   : > { %v744_v5 = vsub.s32 32, %v743_v4  ;;  %v746_v11 = vshll.u32 %v15335_v10, %v743_v4  ;;  %v749_v17 = vshll.u32 %v15329_v15, %v743_v4  ;;  %v752_v20 = vshll.u32 %v15322_v18, %v743_v4 }
  0xb2   : > { %v755_v23 = vshll.u32 %v15315_v21, %v743_v4  ;;  %v758_v28 = vshll.u32 %v15318_v24, %v743_v4  ;;  %vm761_vm6 = vcmp.lt.s32.totalorder %v742_v9, 1  ;;  %vm763_vm7 = vcmp.lt.s32.totalorder %v742_v9, 3 }
  0xb3   : > { %v745_v14 = vshrl.u32 %v15335_v10, %v744_v5  ;;  %v747_v16 = vshrl.u32 %v15329_v15, %v744_v5  ;;  %v750_v19 = vshrl.u32 %v15322_v18, %v744_v5  ;;  %v753_v22 = vshrl.u32 %v15315_v21, %v744_v5 }
  0xb4   : > { %v756_v25 = vshrl.u32 %v15318_v24, %v744_v5  ;;  %v759_v30 = vshrl.u32 %v15320_v29, %v744_v5  ;;  %vm764_vm8 = vcmp.lt.s32.totalorder %v742_v9, 4  ;;  %vm762_vm9 = vcmp.lt.s32.totalorder %v742_v9, 2 }
  0xb5   : > { %v748_v26 = vor.u32 %v747_v16, %v746_v11  ;;  %v751_v27 = vor.u32 %v750_v19, %v749_v17  ;;  %v754_v31 = vor.u32 %v753_v22, %v752_v20  ;;  %vm1572_vm10 = vcmp.gt.s32.totalorder %v1571_v33, 0 }
  0xb6   : > { %v757_v32 = vor.u32 %v756_v25, %v755_v23  ;;  %v760_v34 = vor.u32 %v759_v30, %v758_v28  ;;  %v1573_v62 = vsel %vm1572_vm10, %v1571_v33, 0  ;;  %v542_v4 = vsel %vm15325_vm1, %v435_v63, %v451_v7 }
  0xb7   : > { %v765_v35 = vsel %vm761_vm6, %v745_v14, %v748_v26  ;;  %v766_v36 = vsel %vm764_vm8, %v754_v31, 2102212464  ;;  %v769_v39 = vsel %vm761_vm6, %v748_v26, %v751_v27  ;;  %v773_v41 = vsel %vm761_vm6, %v751_v27, %v754_v31 }
  0xb8   : > { %v770_v40 = vsel %vm764_vm8, %v757_v32, 920167782  ;;  %v767_v42 = vsel %vm763_vm7, %v751_v27, %v766_v36  ;;  %v774_v44 = vsel %vm764_vm8, %v760_v34, 1326507024  ;;  %v1575_v2 = vand.u32 31, %v1573_v62 }
  0xb9   : > { %v771_v43 = vsel %vm763_vm7, %v754_v31, %v770_v40  ;;  %v775_v49 = vsel %vm763_vm7, %v757_v32, %v774_v44  ;;  %v768_v55 = vsel %vm762_vm9, %v765_v35, %v767_v42  ;;  %v416_v5 = vrot.slane %v11105_v37, 5 }
  0xba   : > { %v772_v46 = vsel %vm762_vm9, %v769_v39, %v771_v43  ;;  %v776_v57 = vsel %vm762_vm9, %v773_v41, %v775_v49  ;;  %v784_v3 = vmul.u32 %v11151_v6, %v768_v55  ;;  %v448_v9 = vrot.slane %v11105_v37, 7 }
  0xbb   : > { %v11171_v58 = vmul.u32.u64.low %v11151_v6, %v772_v46  ;;  %v11172_v59 = vmul.u32.u64.high %v11151_v6, %v772_v46, %v11171_v58  ;;  %v11176_v60 = vmul.u32.u64.low %v11151_v6, %v776_v57  ;;  %v11177_v61 = vmul.u32.u64.high %v11151_v6, %v776_v57, %v11176_v60 }
  0xbc   : > { %v1574_v12 = vshrl.u32 %v1573_v62, 5  ;;  %v1576_v13 = vsub.s32 32, %v1575_v2  ;;  %v11189_v14 = vshll.u32 %v1569_v52, 8  ;;  %v1578_v8 = vshll.u32 %v15335_v10, %v1575_v2 }
  0xbd   : > { %v787_v11 = vadd.s32 1, %v11172_v59  ;;  %vm786_vm11 = vc.u32 %v11177_v61, %v11171_v58  ;;  %v1581_v6 = vshll.u32 %v15329_v15, %v1575_v2  ;;  %v940_v16 = vand.u32 2139095040, %v11180_v0 }
  0xbe   : > { %v1579_v7 = vshrl.u32 %v15329_v15, %v1576_v13  ;;  %v1582_v17 = vshrl.u32 %v15322_v18, %v1576_v13  ;;  %v1584_v19 = vshll.u32 %v15322_v18, %v1575_v2  ;;  %v1585_v22 = vshrl.u32 %v15315_v21, %v1576_v13 }
  0xbf   : > { %v788_v63 = vsel %vm786_vm11, %v787_v11, %v11172_v59  ;;  %v1587_v23 = vshll.u32 %v15315_v21, %v1575_v2  ;;  %v1588_v25 = vshrl.u32 %v15318_v24, %v1576_v13  ;;  %v1590_v28 = vshll.u32 %v15318_v24, %v1575_v2 }
  0xc0   : > { %v789_v20 = vadd.s32 %v788_v63, %v784_v3  ;;  %v1580_v26 = vor.u32 %v1579_v7, %v1578_v8  ;;  %v1583_v27 = vor.u32 %v1582_v17, %v1581_v6  ;;  %v1591_v30 = vshrl.u32 %v15320_v29, %v1576_v13  ;;  %v11219_v8 = vld [vmem:[%s11102_s16 + $0x10] sm:$0x77] }
  0xc1   : > { %v1577_v32 = vshrl.u32 %v15335_v10, %v1576_v13  ;;  %v1586_v33 = vor.u32 %v1585_v22, %v1584_v19  ;;  %v1589_v34 = vor.u32 %v1588_v25, %v1587_v23  ;;  %vm1593_vm12 = vcmp.lt.s32.totalorder %v1574_v12, 1  ;;  %v11231_v23 = vld [vmem:[%s11102_s16 + $0x18] sm:$0x77] }
  0xc2   : > { %v790_v31 = vadd.s32 536870912, %v789_v20  ;;  %v1592_v35 = vor.u32 %v1591_v30, %v1590_v28  ;;  %vm1594_vm13 = vcmp.lt.s32.totalorder %v1574_v12, 2  ;;  %vm1596_vm14 = vcmp.lt.s32.totalorder %v1574_v12, 4 }
  0xc3   : > { %vm1595_vm15 = vcmp.lt.s32.totalorder %v1574_v12, 3  ;;  %v1601_v39 = vsel %vm1593_vm12, %v1580_v26, %v1583_v27  ;;  %v1602_v40 = vsel %vm1596_vm14, %v1589_v34, 920167782  ;;  %v1598_v41 = vsel %vm1596_vm14, %v1586_v33, 2102212464 }
  0xc4   : > { %v791_v36 = vshrl.u32 %v790_v31, 30  ;;  %v1603_v42 = vsel %vm1595_vm15, %v1586_v33, %v1602_v40  ;;  %v1605_v43 = vsel %vm1593_vm12, %v1583_v27, %v1586_v33  ;;  %v1606_v44 = vsel %vm1596_vm14, %v1592_v35, 1326507024 }
  0xc5   : > { %v1604_v49 = vsel %vm1594_vm13, %v1601_v39, %v1603_v42  ;;  %v432_v52 = vrot.slane %v11105_v37, 2  ;;  %v464_v55 = vcombine.low %v11105_v37, %v11105_v37  ;;  %v1597_v57 = vsel %vm1593_vm12, %v1577_v32, %v1580_v26 }
  0xc6   : > { %v792_v46 = vshll.u32 %v791_v36, 30  ;;  %v1607_v59 = vsel %vm1595_vm15, %v1589_v34, %v1606_v44  ;;  %v11211_v60 = vmul.u32.u64.low %v11189_v14, %v1604_v49  ;;  %v11212_v62 = vmul.u32.u64.high %v11189_v14, %v1604_v49, %v11211_v60 }
  0xc7   : > { %v1599_v3 = vsel %vm1595_vm15, %v1583_v27, %v1598_v41  ;;  %v1608_v11 = vsel %vm1594_vm13, %v1605_v43, %v1607_v59  ;;  %v941_v13 = vshrl.u32 %v940_v16, 23  ;;  %v539_v7 = vsel %vm15325_vm1, %v432_v52, %v448_v9 }
  0xc8   : > { %v11215_v2 = vsub.s32 %v789_v20, %v792_v46  ;;  %v11222_v6 = vmul.u32.u64.low %v11189_v14, %v1608_v11  ;;  %v11223_v63 = vmul.u32.u64.high %v11189_v14, %v1608_v11, %v11222_v6  ;;  %v420_v17 = vrot.slane %v11219_v8, 5 }
  0xc9   : > { %v551_v20 = vsel %vm547_vm3, %v542_v4, %v11130_v50  ;;  %v9642_v22 = vadd.s32 4294967169, %v941_v13  ;;  %v1600_v16 = vsel %vm1594_vm13, %v1597_v57, %v1599_v3  ;;  %v1619_v25 = vadd.s32 1, %v11212_v62 }
  0xca   : > { %v795_v19 = vsub.s32 0, %v11215_v2  ;;  %v937_v26 = vand.u32 2147483647, %v11180_v0  ;;  %v521_v9 = vsel %vm15311_vm0, %v11105_v37, %v416_v5  ;;  %v15314_v4 = vrot.slane %v11141_v56, 1 }
  0xcb   : > { %v548_v30 = vsel %vm547_vm3, %v539_v7, %v464_v55  ;;  %v815_v31 = vsub.s32 4, %v791_v36  ;;  %vm1618_vm5 = vc.u32 %v11223_v63, %v11211_v60  ;;  %v947_v12 = vadd.s32 1, %v9642_v22 }
  0xcc   : > { %v9635_v28 = vmin.u32 %v795_v19, %v11215_v2  ;;  %v15310_v32 = vrot.slane %v11105_v37, 1  ;;  %v1616_v34 = vmul.u32 %v11189_v14, %v1600_v16  ;;  %v560_v5 = vsel %vm15312_vm4, %v551_v20, %v15314_v4 }
  0xcd   : > { %v11252_v35 = vsel %vm15324_vm2, %v521_v9, %v432_v52  ;;  %v1620_v39 = vsel %vm1618_vm5, %v1619_v25, %v11212_v62  ;;  %v944_v40 = vand.u32 8388607, %v937_v26  ;;  %vm948_vm6 = vcmp.gt.s32.totalorder %v947_v12, 0 }
  0xce   : > { %v797_v33 = vclz %v9635_v28  ;;  %v11260_v41 = vsel %vm15312_vm4, %v548_v30, %v15310_v32  ;;  %vm731_vm7 = vcmp.lt.s32.totalorder %v11124_v48, 0  ;;  %v1621_v42 = vadd.s32 %v1620_v39, %v1616_v34 }
  0xcf   : > { %v949_v43 = vsel %vm948_vm6, %v947_v12, 0  ;;  %v816_v44 = vsel %vm731_vm7, %v815_v31, %v791_v36  ;;  %v11266_v46 = vmul.f32 %v11132_v51, %v560_v5  ;;  %v418_v52 = vrot.slane %v11130_v50, 5 }
  0xd0   : > { %v9636_v14 = vadd.s32 4294967294, %v797_v33  ;;  %v951_v49 = vand.u32 31, %v949_v43  ;;  %vm11271_vm8 = vcmp.le.f32.partialorder %v729_v53, 0.7853982  ;;  %v1622_v57 = vadd.s32 536870912, %v1621_v42 }
  0xd1   : > { %v15313_v59 = vrot.slane %v11130_v50, 1  ;;  %v785_v62 = vadd.s32 %v11171_v58, %v11177_v61  ;;  %v945_v3 = vor.u32 8388608, %v944_v40  ;;  %v11280_v7 = vsel %vm11271_vm8, 0, %v816_v44 }
  0xd2   : > { %vm9637_vm9 = vcmp.lt.s32.totalorder %v9636_v14, 0  ;;  %v952_v11 = vsub.s32 32, %v951_v49  ;;  %v11282_v53 = vshrl.u32 %v1622_v57, 30  ;;  %v1769_v20 = vand.u32 2147483647, %v11266_v46 }
  0xd3   : > { %v800_v36 = vsel %vm9637_vm9, 0, %v9636_v14  ;;  %v1772_v22 = vand.u32 2139095040, %v11266_v46  ;;  %v434_v16 = vrot.slane %v11130_v50, 2  ;;  %v11291_v28 = vadd.s32 3, %v11280_v7 }
  0xd4   : > { %v801_v13 = vsub.s32 32, %v800_v36  ;;  %v805_v6 = vsub.s32 4294967266, %v800_v36  ;;  %v802_v19 = vshll.u32 %v11215_v2, %v800_v36  ;;  %v1624_v25 = vshll.u32 %v11282_v53, 30 }
  0xd5   : > { %v955_v9 = vshrl.u32 %v15329_v15, %v952_v11  ;;  %v954_v30 = vshll.u32 %v15335_v10, %v951_v49  ;;  %v958_v31 = vshrl.u32 %v15322_v18, %v952_v11  ;;  %v11295_v2 = vshll.u32 %v945_v3, 8 }
  0xd6   : > { %v803_v58 = vshrl.u32 %v785_v62, %v801_v13  ;;  %v806_v61 = vadd.s32 127, %v805_v6  ;;  %v11297_v34 = vsub.s32 %v1621_v42, %v1624_v25  ;;  %v961_v5 = vshrl.u32 %v15315_v21, %v952_v11 }
  0xd7   : > { %v950_v39 = vshrl.u32 %v949_v43, 5  ;;  %v957_v40 = vshll.u32 %v15329_v15, %v951_v49  ;;  %v964_v14 = vshrl.u32 %v15318_v24, %v952_v11  ;;  %v1773_v44 = vshrl.u32 %v1772_v22, 23 }
  0xd8   : > { %v804_v12 = vor.u32 %v803_v58, %v802_v19  ;;  %v807_v33 = vshll.u32 %v806_v61, 23  ;;  %v1627_v62 = vsub.s32 0, %v11297_v34  ;;  %v956_v36 = vor.u32 %v955_v9, %v954_v30 }
  0xd9   : > { %v960_v13 = vshll.u32 %v15322_v18, %v951_v49  ;;  %v959_v3 = vor.u32 %v958_v31, %v957_v40  ;;  %v963_v6 = vshll.u32 %v15315_v21, %v951_v49  ;;  %v966_v42 = vshll.u32 %v15318_v24, %v951_v49 }
  0xda   : > { %v808_v57 = vor.u32 4788187, %v807_v33  ;;  %v967_v19 = vshrl.u32 %v15320_v29, %v952_v11  ;;  %v811_v43 = vcvt.s32.f32 %v804_v12  ;;  %v9667_v61 = vmin.u32 %v1627_v62, %v11297_v34 }
  0xdb   : > { %v962_v25 = vor.u32 %v961_v5, %v960_v13  ;;  %v1617_v22 = vadd.s32 %v11211_v60, %v11223_v63  ;;  %v965_v33 = vor.u32 %v964_v14, %v963_v6  ;;  %v9674_v9 = vadd.s32 4294967169, %v1773_v44 }
  0xdc   : > { %v809_v58 = vand.u32 2147483647, %v808_v57  ;;  %v968_v32 = vor.u32 %v967_v19, %v966_v42  ;;  %vm1563_vm10 = vcmp.lt.s32.totalorder %v11137_v54, 0  ;;  %v1629_v31 = vclz %v9667_v61 }
  0xdd   : > { %v1647_v40 = vsub.s32 4, %v11282_v53  ;;  %v953_v49 = vshrl.u32 %v15335_v10, %v952_v11  ;;  %vm969_vm11 = vcmp.lt.s32.totalorder %v950_v39, 1  ;;  %vm970_vm12 = vcmp.lt.s32.totalorder %v950_v39, 2 }
  0xde   : > { %v812_v30 = vmul.f32 %v811_v43, %v809_v58  ;;  %vm971_vm13 = vcmp.lt.s32.totalorder %v950_v39, 3  ;;  %vm972_vm14 = vcmp.lt.s32.totalorder %v950_v39, 4  ;;  %v9668_v5 = vadd.s32 4294967294, %v1629_v31 }
  0xdf   : > { %v974_v57 = vsel %vm972_vm14, %v962_v25, 2102212464  ;;  %v977_v62 = vsel %vm969_vm11, %v956_v36, %v959_v3  ;;  %v973_v60 = vsel %vm969_vm11, %v953_v49, %v956_v36  ;;  %v978_v14 = vsel %vm972_vm14, %v965_v33, 920167782 }
  0xe0   : > { %v813_v12 = vxor.u32 2147483648, %v812_v30  ;;  %v975_v63 = vsel %vm971_vm13, %v959_v3, %v974_v57  ;;  %v982_v44 = vsel %vm972_vm14, %v968_v32, 1326507024  ;;  %vm9669_vm15 = vcmp.lt.s32.totalorder %v9668_v5, 0 }
  0xe1   : > { %v979_v6 = vsel %vm971_vm13, %v962_v25, %v978_v14  ;;  %v981_v11 = vsel %vm969_vm11, %v959_v3, %v962_v25  ;;  %v1632_v19 = vsel %vm9669_vm15, 0, %v9668_v5  ;;  %v983_v36 = vsel %vm971_vm13, %v965_v33, %v982_v44 }
  0xe2   : > { %v814_v13 = vsel %vm731_vm7, %v813_v12, %v812_v30  ;;  %v980_v58 = vsel %vm970_vm12, %v977_v62, %v979_v6  ;;  %v1633_v43 = vsub.s32 32, %v1632_v19  ;;  %v1634_v32 = vshll.u32 %v11297_v34, %v1632_v19 }
  0xe3   : > { %v817_v42 = vsel %vm11271_vm8, %v11124_v48, %v814_v13  ;;  %v1637_v61 = vsub.s32 4294967266, %v1632_v19  ;;  %v984_v30 = vsel %vm970_vm12, %v981_v11, %v983_v36  ;;  %v1648_v33 = vsel %vm1563_vm10, %v1647_v40, %v11282_v53 }
  0xe4   : > { %10647 = vcosq.f32 %v817_v42  ;;  %v11325_v31 = vmul.u32.u64.low %v11295_v2, %v980_v58  ;;  %v11326_v3 = vmul.u32.u64.high %v11295_v2, %v980_v58, %v11325_v31  ;;  %v1635_v55 = vshrl.u32 %v1617_v22, %v1633_v43 }
  0xe5   : > { %10649 = vsinq.f32 %v817_v42  ;;  %v1638_v25 = vadd.s32 127, %v1637_v61  ;;  %v11330_v49 = vmul.u32.u64.low %v11295_v2, %v984_v30  ;;  %v11331_v12 = vmul.u32.u64.high %v11295_v2, %v984_v30, %v11330_v49 }
  0xe6   : > { %v3317_v34 = vand.u32 3, %v11280_v7  ;;  %v976_v5 = vsel %vm970_vm12, %v973_v60, %v975_v63  ;;  %v1779_v57 = vadd.s32 1, %v9674_v9  ;;  %v1636_v62 = vor.u32 %v1635_v55, %v1634_v32 }
  0xe7   : > { %v1639_v14 = vshll.u32 %v1638_v25, 23  ;;  %v11340_v44 = vmul.f32 %v11118_v45, %v11252_v35  ;;  %v11346_v22 = vsel %vm15311_vm0, %v11130_v50, %v418_v52  ;;  %v11349_v13 = vand.u32 3, %v11291_v28 }
  0xe8   : > { %vm11353_vm5 = vcmp.le.f32.partialorder %v1561_v1, 0.7853982  ;;  %v995_v53 = vadd.s32 1, %v11326_v3  ;;  %vm1780_vm6 = vcmp.gt.s32.totalorder %v1779_v57, 0  ;;  %v992_v9 = vmul.u32 %v11295_v2, %v976_v5 }
  0xe9   : > { %v1640_v35 = vor.u32 4788187, %v1639_v14  ;;  %v1650_v39 = vsel %vm11353_vm5, 0, %v1648_v33  ;;  %vm994_vm7 = vc.u32 %v11331_v12, %v11325_v31  ;;  %vm821_vm8 = vweird.f32 %v11124_v48 }
  0xea   : > { %vm3318_vm9 = vcmp.lt.s32.totalorder %v3317_v34, 2  ;;  %v996_v1 = vsel %vm994_vm7, %v995_v53, %v11326_v3  ;;  %v11367_v52 = vand.u32 8388607, %v1769_v20  ;;  %v1781_v28 = vsel %vm1780_vm6, %v1779_v57, 0 }
  0xeb   : > { %v1641_v40 = vand.u32 2147483647, %v1640_v35  ;;  %v1643_v60 = vcvt.s32.f32 %v1636_v62  ;;  %v997_v63 = vadd.s32 %v996_v1, %v992_v9  ;;  %v1783_v6 = vand.u32 31, %v1781_v28 }
  0xec   : > { %v1654_v11 = vadd.s32 3, %v1650_v39  ;;  %vm3319_vm11 = vcmp.eq.s32.totalorder %v3317_v34, 0  ;;  %vm3322_vm12 = vcmp.eq.s32.totalorder %v3317_v34, 2  ;;  %v628_v2 = vand.u32 2139095040, %v11340_v44 }
  0xed   : > { %vm825_vm13 = vcmp.eq.s32.totalorder %v11349_v13, 0  ;;  %vm828_vm14 = vcmp.eq.s32.totalorder %v11349_v13, 2  ;;  %v1644_v19 = vmul.f32 %v1643_v60, %v1641_v40  ;;  %v998_v58 = vadd.s32 536870912, %v997_v63 }
  0xee   : > { %v10648_v42 = vpop.eup %10647  ;;  %vm824_vm15 = vcmp.lt.s32.totalorder %v11349_v13, 2  ;;  %v1777_v32 = vor.u32 8388608, %v11367_v52  ;;  %v1784_v61 = vsub.s32 32, %v1783_v6  ;;  %v625_v30 = vand.u32 2147483647, %v11340_v44 }
  0xef   : > { %v10650_v36 = vpop.eup %10649  ;;  %v829_v43 = vxor.u32 2147483648, %v10648_v42  ;;  %v1645_v55 = vxor.u32 2147483648, %v1644_v19  ;;  %v11375_v25 = vand.u32 3, %v1650_v39  ;;  %v11377_v49 = vshrl.u32 %v998_v58, 30 }
  0xf0   : > { %v826_v3 = vxor.u32 2147483648, %v10650_v36  ;;  %v11379_v33 = vand.u32 3, %v1654_v11  ;;  %v11382_v57 = vshrl.u32 %v1781_v28, 5  ;;  %v629_v62 = vshrl.u32 %v628_v2, 23 }
  0xf1   : > { %v3324_v5 = vsel %vm3322_vm12, %v829_v43, %v10650_v36  ;;  %v1646_v14 = vsel %vm1563_vm10, %v1645_v55, %v1644_v19  ;;  %v1000_v35 = vshll.u32 %v11377_v49, 30  ;;  %v1786_v9 = vshll.u32 %v15335_v10, %v1783_v6 }
  0xf2   : > { %v3321_v53 = vsel %vm3319_vm11, %v10648_v42, %v826_v3  ;;  %v1649_v39 = vsel %vm11353_vm5, %v11137_v54, %v1646_v14  ;;  %v1787_v52 = vshrl.u32 %v15329_v15, %v1784_v61  ;;  %v1790_v28 = vshrl.u32 %v15322_v18, %v1784_v61 }
  0xf3   : > { %v3325_v1 = vsel %vm3318_vm9, %v3321_v53, %v3324_v5  ;;  %10651 = vcosq.f32 %v1649_v39  ;;  %v11399_v60 = vsub.s32 %v997_v63, %v1000_v35  ;;  %v1789_v11 = vshll.u32 %v15329_v15, %v1783_v6 }
  0xf4   : > { %v11397_v40 = vsel %vm821_vm8, nan, %v3325_v1  ;;  %v827_v2 = vsel %vm825_vm13, %v10648_v42, %v826_v3  ;;  %v830_v34 = vsel %vm828_vm14, %v829_v43, %v10650_v36  ;;  %10653 = vsinq.f32 %v1649_v39 }
  0xf5   : > { %v1792_v7 = vshll.u32 %v15322_v18, %v1783_v6  ;;  %v1003_v19 = vsub.s32 0, %v11399_v60  ;;  %v1793_v58 = vshrl.u32 %v15315_v21, %v1784_v61  ;;  %v1795_v55 = vshll.u32 %v15315_v21, %v1783_v6 }
  0xf6   : > { %v1796_v63 = vshrl.u32 %v15318_v24, %v1784_v61  ;;  %v1788_v5 = vor.u32 %v1787_v52, %v1786_v9  ;;  %v1791_v14 = vor.u32 %v1790_v28, %v1789_v11  ;;  %v1798_v53 = vshll.u32 %v15318_v24, %v1783_v6 }
  0xf7   : > { %v1799_v42 = vshrl.u32 %v15320_v29, %v1784_v61  ;;  %v831_v36 = vsel %vm824_vm15, %v827_v2, %v830_v34  ;;  %vm4146_vm10 = vcmp.eq.s32.totalorder %v11375_v25, 2  ;;  %v9643_v43 = vmin.u32 %v1003_v19, %v11399_v60 }
  0xf8   : > { %v1794_v3 = vor.u32 %v1793_v58, %v1792_v7  ;;  %v1797_v35 = vor.u32 %v1796_v63, %v1795_v55  ;;  %vm1657_vm5 = vcmp.eq.s32.totalorder %v11379_v33, 0  ;;  %vm1660_vm6 = vcmp.eq.s32.totalorder %v11379_v33, 2 }
  0xf9   : > { %vm4143_vm7 = vcmp.eq.s32.totalorder %v11375_v25, 0  ;;  %v993_v6 = vadd.s32 %v11325_v31, %v11331_v12  ;;  %v1800_v9 = vor.u32 %v1799_v42, %v1798_v53  ;;  %v11422_v39 = vshll.u32 %v1777_v32, 8 }
  0xfa   : > { %vm1656_vm9 = vcmp.lt.s32.totalorder %v11379_v33, 2  ;;  %vm4142_vm11 = vcmp.lt.s32.totalorder %v11375_v25, 2  ;;  %v1005_v13 = vclz %v9643_v43  ;;  %vm1801_vm12 = vcmp.lt.s32.totalorder %v11382_v57, 1 }
  0xfb   : > { %vm1804_vm13 = vcmp.lt.s32.totalorder %v11382_v57, 4  ;;  %v9630_v1 = vadd.s32 4294967169, %v629_v62  ;;  %v832_v52 = vsel %vm821_vm8, nan, %v831_v36  ;;  %vm1653_vm14 = vweird.f32 %v11137_v54 }
  0xfc   : > { %v1785_v31 = vshrl.u32 %v15335_v10, %v1784_v61  ;;  %v1806_v12 = vsel %vm1804_vm13, %v1794_v3, 2102212464  ;;  %v1809_v32 = vsel %vm1801_vm12, %v1788_v5, %v1791_v14  ;;  %v9644_v28 = vadd.s32 4294967294, %v1005_v13 }
  0xfd   : > { %vm1803_vm15 = vcmp.lt.s32.totalorder %v11382_v57, 3  ;;  %v1810_v11 = vsel %vm1804_vm13, %v1797_v35, 920167782  ;;  %v1813_v2 = vsel %vm1801_vm12, %v1791_v14, %v1794_v3  ;;  %vm1802_vm0 = vcmp.lt.s32.totalorder %v11382_v57, 2  ;;  %v10652_v62 = vpop.eup %10651 }
  0xfe   : > { %v1805_v34 = vsel %vm1801_vm12, %v1785_v31, %v1788_v5  ;;  %v1811_v7 = vsel %vm1803_vm15, %v1794_v3, %v1810_v11  ;;  %v1814_v19 = vsel %vm1804_vm13, %v1800_v9, 1326507024  ;;  %vm9645_vm4 = vcmp.lt.s32.totalorder %v9644_v28, 0  ;;  %v10654_v61 = vpop.eup %10653 }
  0xff   : > { %v1807_v48 = vsel %vm1803_vm15, %v1791_v14, %v1806_v12  ;;  %v1812_v58 = vsel %vm1802_vm0, %v1809_v32, %v1811_v7  ;;  %v1815_v55 = vsel %vm1803_vm15, %v1797_v35, %v1814_v19  ;;  %v1661_v63 = vxor.u32 2147483648, %v10652_v62 }
 0x100   : > { %v1008_v53 = vsel %vm9645_vm4, 0, %v9644_v28  ;;  %v1816_v42 = vsel %vm1802_vm0, %v1813_v2, %v1815_v55  ;;  %v635_v36 = vadd.s32 1, %v9630_v1  ;;  %v1658_v43 = vxor.u32 2147483648, %v10654_v61 }
 0x101   : > { %v1009_v13 = vsub.s32 32, %v1008_v53  ;;  %v1010_v5 = vshll.u32 %v11399_v60, %v1008_v53  ;;  %v1013_v3 = vsub.s32 4294967266, %v1008_v53  ;;  %v1662_v9 = vsel %vm1660_vm6, %v1661_v63, %v10654_v61 }
 0x102   : > { %v4148_v14 = vsel %vm4146_vm10, %v1661_v63, %v10654_v61  ;;  %v11444_v35 = vmul.u32.u64.low %v11422_v39, %v1816_v42  ;;  %v11445_v31 = vmul.u32.u64.high %v11422_v39, %v1816_v42, %v11444_v35  ;;  %v1659_v12 = vsel %vm1657_vm5, %v10652_v62, %v1658_v43 }
 0x103   : > { %v4145_v1 = vsel %vm4143_vm7, %v10652_v62, %v1658_v43  ;;  %v1011_v32 = vshrl.u32 %v993_v6, %v1009_v13  ;;  %v1014_v28 = vadd.s32 127, %v1013_v3  ;;  %v1663_v60 = vsel %vm1656_vm9, %v1659_v12, %v1662_v9 }
 0x104   : > { %v4149_v11 = vsel %vm4142_vm11, %v4145_v1, %v4148_v14  ;;  %v11456_v2 = vmul.u32.u64.low %v11422_v39, %v1812_v58  ;;  %v11457_v7 = vmul.u32.u64.high %v11422_v39, %v1812_v58, %v11456_v2  ;;  %v1664_v19 = vsel %vm1653_vm14, nan, %v1663_v60 }
 0x105   : > { %v11464_v55 = vsel %vm1653_vm14, nan, %v4149_v11  ;;  %v1012_v6 = vor.u32 %v1011_v32, %v1010_v5  ;;  %v1015_v62 = vshll.u32 %v1014_v28, 23  ;;  %v10072_v61 = vpack.c.bf16 %v1664_v19, %v832_v52 }
 0x106   : > { %v1808_v33 = vsel %vm1802_vm0, %v1805_v34, %v1807_v48  ;;  %v450_v25 = vrot.slane %v11130_v50, 7  ;;  %v11473_v58 = vsel %vm15324_vm2, %v11346_v22, %v434_v16  ;;  %vm1826_vm4 = vc.u32 %v11445_v31, %v11456_v2 }
 0x107   : > { %v1016_v63 = vor.u32 4788187, %v1015_v62  ;;  %v11479_v54 = vmul.f32 %v11132_v51, %v11260_v41  ;;  %vm636_vm8 = vcmp.gt.s32.totalorder %v635_v36, 0  ;;  %10073 = vmatprep.subr.bf16.mxu0 %v10072_v61  ;;  %v1023_v57 = vsub.s32 4, %v11377_v49 }
 0x108   : > { %v1827_v52 = vadd.s32 1, %v11457_v7  ;;  %v632_v34 = vand.u32 8388607, %v625_v30  ;;  %v637_v48 = vsel %vm636_vm8, %v635_v36, 0  ;;  %v1019_v53 = vcvt.s32.f32 %v1012_v6 }
 0x109   : > { %v1017_v22 = vand.u32 2147483647, %v1016_v63  ;;  %v1824_v42 = vmul.u32 %v11422_v39, %v1808_v33  ;;  %v639_v43 = vand.u32 31, %v637_v48  ;;  %vm939_vm0 = vcmp.lt.s32.totalorder %v11180_v0, 0 }
 0x10a   : > { %v1828_v41 = vsel %vm1826_vm4, %v1827_v52, %v11457_v7  ;;  %v465_v13 = vcombine.low %v11130_v50, %v11130_v50  ;;  %v541_v5 = vsel %vm15325_vm1, %v434_v16, %v450_v25  ;;  %vm11495_vm10 = vcmp.le.f32.partialorder %v937_v26, 0.7853982 }
 0x10b   : > { %v1020_v3 = vmul.f32 %v1019_v53, %v1017_v22  ;;  %v1829_v39 = vadd.s32 %v1828_v41, %v1824_v42  ;;  %v640_v9 = vsub.s32 32, %v639_v43  ;;  %v1024_v14 = vsel %vm939_vm0, %v1023_v57, %v11377_v49 }
 0x10c   : > { %v633_v35 = vor.u32 8388608, %v632_v34  ;;  %v11502_v12 = vshrl.u32 %v637_v48, 5  ;;  %v1460_v1 = vand.u32 2139095040, %v11479_v54  ;;  %v651_v26 = vshll.u32 %v15315_v21, %v639_v43 }
 0x10d   : > { %v1021_v32 = vxor.u32 2147483648, %v1020_v3  ;;  %v1830_v16 = vadd.s32 536870912, %v1829_v39  ;;  %v643_v28 = vshrl.u32 %v15329_v15, %v640_v9  ;;  %v646_v60 = vshrl.u32 %v15322_v18, %v640_v9 }
 0x10e   : > { %v649_v11 = vshrl.u32 %v15315_v21, %v640_v9  ;;  %v652_v7 = vshrl.u32 %v15318_v24, %v640_v9  ;;  %v655_v19 = vshrl.u32 %v15320_v29, %v640_v9  ;;  %v642_v62 = vshll.u32 %v15335_v10, %v639_v43 }
 0x10f   : > { %v1022_v49 = vsel %vm939_vm0, %v1021_v32, %v1020_v3  ;;  %v1831_v6 = vshrl.u32 %v1830_v16, 30  ;;  %v645_v61 = vshll.u32 %v15329_v15, %v639_v43  ;;  %v648_v25 = vshll.u32 %v15322_v18, %v639_v43 }
 0x110   : > { %v1025_v33 = vsel %vm11495_vm10, %v11180_v0, %v1022_v49  ;;  %v653_v63 = vor.u32 %v652_v7, %v651_v26  ;;  %v654_v57 = vshll.u32 %v15318_v24, %v639_v43  ;;  %v644_v34 = vor.u32 %v643_v28, %v642_v62 }
 0x111   : > { %10655 = vcosq.f32 %v1025_v33  ;;  %v1832_v52 = vshll.u32 %v1831_v6, 30  ;;  %v647_v48 = vor.u32 %v646_v60, %v645_v61  ;;  %v1026_v22 = vsel %vm11495_vm10, 0, %v1024_v14 }
 0x112   : > { %10657 = vsinq.f32 %v1025_v33  ;;  %v650_v53 = vor.u32 %v649_v11, %v648_v25  ;;  %v656_v42 = vor.u32 %v655_v19, %v654_v57  ;;  %vm1771_vm5 = vcmp.lt.s32.totalorder %v11266_v46, 0 }
 0x113   : > { %v11523_v41 = vsub.s32 %v1829_v39, %v1832_v52  ;;  %vm660_vm6 = vcmp.lt.s32.totalorder %v11502_v12, 4  ;;  %v11527_v3 = vsel %vm547_vm3, %v541_v5, %v465_v13  ;;  %vm657_vm7 = vcmp.lt.s32.totalorder %v11502_v12, 1 }
 0x114   : > { %v666_v43 = vsel %vm660_vm6, %v653_v63, 920167782  ;;  %v11532_v32 = vshll.u32 %v633_v35, 8  ;;  %v1461_v36 = vshrl.u32 %v1460_v1, 23  ;;  %v1030_v14 = vadd.s32 3, %v1026_v22 }
 0x115   : > { %v1835_v16 = vsub.s32 0, %v11523_v41  ;;  %vm659_vm9 = vcmp.lt.s32.totalorder %v11502_v12, 3  ;;  %v665_v39 = vsel %vm657_vm7, %v644_v34, %v647_v48  ;;  %vm11540_vm11 = vcmp.le.f32.partialorder %v1769_v20, 0.7853982 }
 0x116   : > { %v3523_v5 = vand.u32 3, %v1026_v22  ;;  %v641_v28 = vshrl.u32 %v15335_v10, %v640_v9  ;;  %v667_v35 = vsel %vm659_vm9, %v650_v53, %v666_v43  ;;  %v670_v1 = vsel %vm660_vm6, %v656_v42, 1326507024 }
 0x117   : > { %v9675_v26 = vmin.u32 %v1835_v16, %v11523_v41  ;;  %vm658_vm12 = vcmp.lt.s32.totalorder %v11502_v12, 2  ;;  %v662_v60 = vsel %vm660_vm6, %v650_v53, 2102212464  ;;  %v669_v20 = vsel %vm657_vm7, %v647_v48, %v650_v53 }
 0x118   : > { %v1855_v11 = vsub.s32 4, %v1831_v6  ;;  %v668_v9 = vsel %vm658_vm12, %v665_v39, %v667_v35  ;;  %v671_v7 = vsel %vm659_vm9, %v653_v63, %v670_v1  ;;  %v9662_v19 = vadd.s32 4294967169, %v1461_v36 }
 0x119   : > { %vm1029_vm13 = vweird.f32 %v11180_v0  ;;  %v11560_v49 = vand.u32 3, %v1030_v14  ;;  %v1837_v62 = vclz %v9675_v26  ;;  %v661_v61 = vsel %vm657_vm7, %v641_v28, %v644_v34 }
 0x11a   : > { %v1457_v33 = vand.u32 2147483647, %v11479_v54  ;;  %v663_v25 = vsel %vm659_vm9, %v647_v48, %v662_v60  ;;  %v672_v57 = vsel %vm658_vm12, %v669_v20, %v671_v7  ;;  %v1467_v34 = vadd.s32 1, %v9662_v19 }
 0x11b   : > { %v11570_v52 = vmul.u32.u64.low %v11532_v32, %v668_v9  ;;  %v11571_v63 = vmul.u32.u64.high %v11532_v32, %v668_v9, %v11570_v52  ;;  %v11574_v22 = vpop.eup %10655  ;;  %v9676_v53 = vadd.s32 4294967294, %v1837_v62  ;;  %v1825_v14 = vadd.s32 %v11456_v2, %v11445_v31 }
 0x11c   : > { %v11577_v42 = vmul.u32.u64.low %v11532_v32, %v672_v57  ;;  %v11578_v43 = vmul.u32.u64.high %v11532_v32, %v672_v57, %v11577_v42  ;;  %v11580_v36 = vpop.eup %10657  ;;  %v1037_v48 = vxor.u32 2147483648, %v11574_v22  ;;  %v1856_v16 = vsel %vm1771_vm5, %v1855_v11, %v1831_v6 }
 0x11d   : > { %vm3524_vm14 = vcmp.lt.s32.totalorder %v3523_v5, 2  ;;  %v1034_v39 = vxor.u32 2147483648, %v11580_v36  ;;  %vm9677_vm15 = vcmp.lt.s32.totalorder %v9676_v53, 0  ;;  %vm3528_vm4 = vcmp.eq.s32.totalorder %v3523_v5, 2 }
 0x11e   : > { %v664_v28 = vsel %vm658_vm12, %v661_v61, %v663_v25  ;;  %v1840_v35 = vsel %vm9677_vm15, 0, %v9676_v53  ;;  %vm3525_vm8 = vcmp.eq.s32.totalorder %v3523_v5, 0  ;;  %v3530_v1 = vsel %vm3528_vm4, %v1037_v48, %v11580_v36 }
 0x11f   : > { %v683_v26 = vadd.s32 1, %v11571_v63  ;;  %v1841_v31 = vsub.s32 32, %v1840_v35  ;;  %v1845_v2 = vsub.s32 4294967266, %v1840_v35  ;;  %v1858_v6 = vsel %vm11540_vm11, 0, %v1856_v16 }
 0x120   : > { %vm1468_vm0 = vcmp.gt.s32.totalorder %v1467_v34, 0  ;;  %v3527_v60 = vsel %vm3525_vm8, %v11574_v22, %v1034_v39  ;;  %v680_v12 = vmul.u32 %v11532_v32, %v664_v28  ;;  %vm682_vm10 = vc.u32 %v11578_v43, %v11570_v52 }
 0x121   : > { %v1464_v20 = vand.u32 8388607, %v1457_v33  ;;  %v1842_v11 = vshll.u32 %v11523_v41, %v1840_v35  ;;  %v1843_v9 = vshrl.u32 %v1825_v14, %v1841_v31  ;;  %v1846_v7 = vadd.s32 127, %v1845_v2 }
 0x122   : > { %v3531_v19 = vsel %vm3524_vm14, %v3527_v60, %v3530_v1  ;;  %v1862_v62 = vadd.s32 3, %v1858_v6  ;;  %v684_v25 = vsel %vm682_vm10, %v683_v26, %v11571_v63  ;;  %v1469_v32 = vsel %vm1468_vm0, %v1467_v34, 0 }
 0x123   : > { %v11608_v61 = vsel %vm1029_vm13, nan, %v3531_v19  ;;  %v1844_v57 = vor.u32 %v1843_v9, %v1842_v11  ;;  %v1847_v53 = vshll.u32 %v1846_v7, 23  ;;  %v685_v42 = vadd.s32 %v684_v25, %v680_v12 }
 0x124   : > { %v11613_v16 = vmul.f32 %v11118_v45, %v11473_v58  ;;  %v1471_v14 = vand.u32 31, %v1469_v32  ;;  %vm15460_vm6 = vcmask 1046528   ;;  %vm1033_vm7 = vcmp.eq.s32.totalorder %v11560_v49, 0 }
 0x125   : > { %v11621_v28 = vsel %vm15460_vm6, %v11527_v3, %v15313_v59  ;;  %vm1036_vm9 = vcmp.eq.s32.totalorder %v11560_v49, 2  ;;  %v1848_v63 = vor.u32 4788187, %v1847_v53  ;;  %v686_v34 = vadd.s32 536870912, %v685_v42 }
 0x126   : > { %v11625_v35 = vand.u32 3, %v1862_v62  ;;  %v11627_v58 = vand.u32 3, %v1858_v6  ;;  %v1465_v1 = vor.u32 8388608, %v1464_v20  ;;  %v1472_v26 = vsub.s32 32, %v1471_v14 }
 0x127   : > { %v1849_v31 = vand.u32 2147483647, %v1848_v63  ;;  %v1851_v2 = vcvt.s32.f32 %v1844_v57  ;;  %v11629_v60 = vshrl.u32 %v686_v34, 30  ;;  %v836_v12 = vand.u32 2139095040, %v11613_v16 }
 0x128   : > { %v1470_v3 = vshrl.u32 %v1469_v32, 5  ;;  %v1475_v11 = vshrl.u32 %v15329_v15, %v1472_v26  ;;  %v1478_v9 = vshrl.u32 %v15322_v18, %v1472_v26  ;;  %v1481_v7 = vshrl.u32 %v15315_v21, %v1472_v26 }
 0x129   : > { %v1852_v19 = vmul.f32 %v1851_v2, %v1849_v31  ;;  %v688_v62 = vshll.u32 %v11629_v60, 30  ;;  %v1480_v6 = vshll.u32 %v15322_v18, %v1471_v14  ;;  %v1484_v20 = vshrl.u32 %v15318_v24, %v1472_v26 }
 0x12a   : > { %v1474_v25 = vshll.u32 %v15335_v10, %v1471_v14  ;;  %v1477_v57 = vshll.u32 %v15329_v15, %v1471_v14  ;;  %v1483_v53 = vshll.u32 %v15315_v21, %v1471_v14  ;;  %v1487_v32 = vshrl.u32 %v15320_v29, %v1472_v26 }
 0x12b   : > { %vm1032_vm12 = vcmp.lt.s32.totalorder %v11560_v49, 2  ;;  %v1853_v63 = vxor.u32 2147483648, %v1852_v19  ;;  %v11643_v34 = vsub.s32 %v685_v42, %v688_v62  ;;  %v1482_v31 = vor.u32 %v1481_v7, %v1480_v6 }
 0x12c   : > { %v11645_v2 = vshll.u32 %v1465_v1, 8  ;;  %v1476_v59 = vor.u32 %v1475_v11, %v1474_v25  ;;  %v1479_v5 = vor.u32 %v1478_v9, %v1477_v57  ;;  %v1485_v41 = vor.u32 %v1484_v20, %v1483_v53 }
 0x12d   : > { %v1486_v4 = vshll.u32 %v15318_v24, %v1471_v14  ;;  %v1035_v27 = vsel %vm1033_vm7, %v11574_v22, %v1034_v39  ;;  %v1038_v42 = vsel %vm1036_vm9, %v1037_v48, %v11580_v36  ;;  %v1854_v1 = vsel %vm1771_vm5, %v1853_v63, %v1852_v19 }
 0x12e   : > { %v691_v11 = vsub.s32 0, %v11643_v34  ;;  %v1857_v14 = vsel %vm11540_vm11, %v11266_v46, %v1854_v1  ;;  %vm1492_vm14 = vcmp.lt.s32.totalorder %v1470_v3, 4  ;;  %v837_v7 = vshrl.u32 %v836_v12, 23 }
 0x12f   : > { %v1488_v9 = vor.u32 %v1487_v32, %v1486_v4  ;;  %10659 = vcosq.f32 %v1857_v14  ;;  %vm1489_vm15 = vcmp.lt.s32.totalorder %v1470_v3, 1  ;;  %v1494_v22 = vsel %vm1492_vm14, %v1482_v31, 2102212464 }
 0x130   : > { %v9631_v39 = vmin.u32 %v691_v11, %v11643_v34  ;;  %10661 = vsinq.f32 %v1857_v14  ;;  %v1473_v36 = vshrl.u32 %v15335_v10, %v1472_v26  ;;  %v1497_v48 = vsel %vm1489_vm15, %v1476_v59, %v1479_v5 }
 0x131   : > { %v1498_v19 = vsel %vm1492_vm14, %v1485_v41, 920167782  ;;  %vm627_vm5 = vcmp.lt.s32.totalorder %v11340_v44, 0  ;;  %vm1490_vm4 = vcmp.lt.s32.totalorder %v1470_v3, 2  ;;  %vm1491_vm11 = vcmp.lt.s32.totalorder %v1470_v3, 3 }
 0x132   : > { %v693_v62 = vclz %v9631_v39  ;;  %v1501_v4 = vsel %vm1489_vm15, %v1479_v5, %v1482_v31  ;;  %v1493_v13 = vsel %vm1489_vm15, %v1473_v36, %v1476_v59  ;;  %v1495_v12 = vsel %vm1491_vm11, %v1479_v5, %v1494_v22 }
 0x133   : > { %v1499_v6 = vsel %vm1491_vm11, %v1482_v31, %v1498_v19  ;;  %v1502_v20 = vsel %vm1492_vm14, %v1488_v9, 1326507024  ;;  %vm4352_vm8 = vcmp.eq.s32.totalorder %v11627_v58, 2  ;;  %v9638_v53 = vadd.s32 4294967169, %v837_v7 }
 0x134   : > { %v9632_v25 = vadd.s32 4294967294, %v693_v62  ;;  %v1500_v57 = vsel %vm1490_vm4, %v1497_v48, %v1499_v6  ;;  %v1503_v26 = vsel %vm1491_vm11, %v1485_v41, %v1502_v20  ;;  %v1039_v32 = vsel %vm1032_vm12, %v1035_v27, %v1038_v42 }
 0x135   : > { %vm1865_vm0 = vcmp.eq.s32.totalorder %v11625_v35, 0  ;;  %vm4349_vm10 = vcmp.eq.s32.totalorder %v11627_v58, 0  ;;  %vm11678_vm6 = vcmp.le.f32.partialorder %v625_v30, 0.7853982  ;;  %v1504_v5 = vsel %vm1490_vm4, %v1501_v4, %v1503_v26 }
 0x136   : > { %v11684_v63 = vmul.u32.u64.low %v11645_v2, %v1500_v57  ;;  %v11685_v31 = vmul.u32.u64.high %v11645_v2, %v1500_v57, %v11684_v63  ;;  %vm1864_vm7 = vcmp.lt.s32.totalorder %v11625_v35, 2  ;;  %vm4348_vm9 = vcmp.lt.s32.totalorder %v11627_v58, 2 }
 0x137   : > { %vm9633_vm12 = vcmp.lt.s32.totalorder %v9632_v25, 0  ;;  %v1496_v27 = vsel %vm1490_vm4, %v1493_v13, %v1495_v12  ;;  %v11692_v49 = vmul.u32.u64.low %v11645_v2, %v1504_v5  ;;  %v11693_v30 = vmul.u32.u64.high %v11645_v2, %v1504_v5, %v11692_v49 }
 0x138   : > { %vm1861_vm14 = vweird.f32 %v11266_v46  ;;  %vm1868_vm15 = vcmp.eq.s32.totalorder %v11625_v35, 2  ;;  %v696_v41 = vsel %vm9633_vm12, 0, %v9632_v25  ;;  %v711_v42 = vsub.s32 4, %v11629_v60 }
 0x139   : > { %v843_v1 = vadd.s32 1, %v9638_v53  ;;  %v681_v11 = vadd.s32 %v11570_v52, %v11578_v43  ;;  %v697_v14 = vsub.s32 32, %v696_v41  ;;  %v701_v9 = vsub.s32 4294967266, %v696_v41  ;;  %v10660_v36 = vpop.eup %10659 }
 0x13a   : > { %v833_v3 = vand.u32 2147483647, %v11613_v16  ;;  %v1040_v7 = vsel %vm1029_vm13, nan, %v1039_v32  ;;  %v1512_v39 = vmul.u32 %v11645_v2, %v1496_v27  ;;  %v1515_v22 = vadd.s32 1, %v11685_v31  ;;  %v10662_v52 = vpop.eup %10661 }
 0x13b   : > { %vm844_vm4 = vcmp.gt.s32.totalorder %v843_v1, 0  ;;  %v698_v48 = vshll.u32 %v11643_v34, %v696_v41  ;;  %v699_v19 = vshrl.u32 %v681_v11, %v697_v14  ;;  %v702_v62 = vadd.s32 127, %v701_v9 }
 0x13c   : > { %vm1514_vm11 = vc.u32 %v11693_v30, %v11684_v63  ;;  %v1869_v43 = vxor.u32 2147483648, %v10660_v36  ;;  %v712_v0 = vsel %vm627_vm5, %v711_v42, %v11629_v60  ;;  %v845_v2 = vsel %vm844_vm4, %v843_v1, 0 }
 0x13d   : > { %v1516_v4 = vsel %vm1514_vm11, %v1515_v22, %v11685_v31  ;;  %v1866_v13 = vxor.u32 2147483648, %v10662_v52  ;;  %v700_v12 = vor.u32 %v699_v19, %v698_v48  ;;  %v703_v6 = vshll.u32 %v702_v62, 23 }
 0x13e   : > { %v1517_v20 = vadd.s32 %v1516_v4, %v1512_v39  ;;  %v1870_v34 = vsel %vm1868_vm15, %v1869_v43, %v10662_v52  ;;  %v4354_v25 = vsel %vm4352_vm8, %v1869_v43, %v10662_v52  ;;  %v840_v57 = vand.u32 8388607, %v833_v3 }
 0x13f   : > { %v847_v26 = vand.u32 31, %v845_v2  ;;  %v1867_v60 = vsel %vm1865_vm0, %v10660_v36, %v1866_v13  ;;  %v4351_v53 = vsel %vm4349_vm10, %v10660_v36, %v1866_v13  ;;  %v704_v32 = vor.u32 4788187, %v703_v6 }
 0x140   : > { %v714_v5 = vsel %vm11678_vm6, 0, %v712_v0  ;;  %v1871_v31 = vsel %vm1864_vm7, %v1867_v60, %v1870_v34  ;;  %v4355_v27 = vsel %vm4348_vm9, %v4351_v53, %v4354_v25  ;;  %v1518_v49 = vadd.s32 536870912, %v1517_v20 }
 0x141   : > { %v848_v41 = vsub.s32 32, %v847_v26  ;;  %v1872_v42 = vsel %vm1861_vm14, nan, %v1871_v31  ;;  %v11732_v1 = vsel %vm1861_vm14, nan, %v4355_v27  ;;  %v705_v11 = vand.u32 2147483647, %v704_v32 }
 0x142   : > { %v707_v14 = vcvt.s32.f32 %v700_v12  ;;  %v452_v9 = vrot.slane %v11219_v8, 7  ;;  %v454_v39 = vrot.slane %v11231_v23, 7  ;;  %v10076_v35 = vpack.c.bf16 %v1872_v42, %v1040_v7 }
 0x143   : > { %v1519_v22 = vshrl.u32 %v1518_v49, 30  ;;  %v466_v58 = vcombine.low %v11219_v8, %v11219_v8  ;;  %v718_v48 = vadd.s32 3, %v714_v5  ;;  %v11740_v19 = vmul.f32 %v11132_v51, %v11621_v28 }
 0x144   : > { %v708_v36 = vmul.f32 %v707_v14, %v705_v11  ;;  %10077 = vmatprep.subr.bf16.mxu1 %v10076_v35  ;;  %vm1459_vm13 = vcmp.lt.s32.totalorder %v11479_v54, 0  ;;  %v11743_v62 = vand.u32 3, %v714_v5  ;;  %v841_v52 = vor.u32 8388608, %v840_v57 }
 0x145   : > { %v1520_v46 = vshll.u32 %v1519_v22, 30  ;;  %v851_v43 = vshrl.u32 %v15329_v15, %v848_v41  ;;  %v11746_v0 = vshrl.u32 %v845_v2, 5  ;;  %v854_v4 = vshrl.u32 %v15322_v18, %v848_v41 }
 0x146   : > { %v709_v7 = vxor.u32 2147483648, %v708_v36  ;;  %v860_v13 = vshrl.u32 %v15318_v24, %v848_v41  ;;  %v850_v28 = vshll.u32 %v15335_v10, %v847_v26  ;;  %v853_v6 = vshll.u32 %v15329_v15, %v847_v26 }
 0x147   : > { %v11750_v12 = vsub.s32 %v1517_v20, %v1520_v46  ;;  %v857_v34 = vshrl.u32 %v15315_v21, %v848_v41  ;;  %v856_v57 = vshll.u32 %v15322_v18, %v847_v26  ;;  %v859_v2 = vshll.u32 %v15315_v21, %v847_v26 }
 0x148   : > { %v710_v25 = vsel %vm627_vm5, %v709_v7, %v708_v36  ;;  %v863_v60 = vshrl.u32 %v15320_v29, %v848_v41  ;;  %v1543_v32 = vsub.s32 4, %v1519_v22  ;;  %v852_v5 = vor.u32 %v851_v43, %v850_v28 }
 0x149   : > { %v713_v20 = vsel %vm11678_vm6, %v11340_v44, %v710_v25  ;;  %v1523_v53 = vsub.s32 0, %v11750_v12  ;;  %v855_v31 = vor.u32 %v854_v4, %v853_v6  ;;  %v861_v27 = vor.u32 %v860_v13, %v859_v2 }
 0x14a   : > { %10663 = vcosq.f32 %v713_v20  ;;  %v862_v49 = vshll.u32 %v15318_v24, %v847_v26  ;;  %vm11767_vm5 = vcmp.le.f32.partialorder %v1457_v33, 0.7853982  ;;  %v858_v59 = vor.u32 %v857_v34, %v856_v57 }
 0x14b   : > { %10665 = vsinq.f32 %v713_v20  ;;  %v9663_v11 = vmin.u32 %v1523_v53, %v11750_v12  ;;  %v11772_v14 = vand.u32 3, %v718_v48  ;;  %v11774_v36 = vshll.u32 %v841_v52, 8 }
 0x14c   : > { %v864_v35 = vor.u32 %v863_v60, %v862_v49  ;;  %v1665_v46 = vand.u32 2147483647, %v11740_v19  ;;  %v849_v26 = vshrl.u32 %v15335_v10, %v848_v41  ;;  %vm865_vm8 = vcmp.lt.s32.totalorder %v11746_v0, 1 }
 0x14d   : > { %v1525_v43 = vclz %v9663_v11  ;;  %vm868_vm0 = vcmp.lt.s32.totalorder %v11746_v0, 4  ;;  %v1544_v33 = vsel %vm1459_vm13, %v1543_v32, %v1519_v22  ;;  %vm3219_vm10 = vcmp.eq.s32.totalorder %v11743_v62, 2 }
 0x14e   : > { %vm867_vm6 = vcmp.lt.s32.totalorder %v11746_v0, 3  ;;  %v873_v48 = vsel %vm865_vm8, %v852_v5, %v855_v31  ;;  %v874_v52 = vsel %vm868_vm0, %v861_v27, 920167782  ;;  %vm866_vm7 = vcmp.lt.s32.totalorder %v11746_v0, 2 }
 0x14f   : > { %v9664_v7 = vadd.s32 4294967294, %v1525_v43  ;;  %v875_v41 = vsel %vm867_vm6, %v858_v59, %v874_v52  ;;  %v877_v4 = vsel %vm865_vm8, %v855_v31, %v858_v59  ;;  %v870_v13 = vsel %vm868_vm0, %v858_v59, 2102212464 }
 0x150   : > { %v876_v22 = vsel %vm866_vm7, %v873_v48, %v875_v41  ;;  %v878_v28 = vsel %vm868_vm0, %v864_v35, 1326507024  ;;  %v1668_v6 = vand.u32 2139095040, %v11740_v19  ;;  %vm717_vm9 = vweird.f32 %v11340_v44 }
 0x151   : > { %vm9665_vm12 = vcmp.lt.s32.totalorder %v9664_v7, 0  ;;  %v879_v34 = vsel %vm867_vm6, %v861_v27, %v878_v28  ;;  %v11798_v25 = vmul.u32.u64.low %v11774_v36, %v876_v22  ;;  %v11799_v57 = vmul.u32.u64.high %v11774_v36, %v876_v22, %v11798_v25 }
 0x152   : > { %v1513_v2 = vadd.s32 %v11684_v63, %v11693_v30  ;;  %v1528_v60 = vsel %vm9665_vm12, 0, %v9664_v7  ;;  %v880_v20 = vsel %vm866_vm7, %v877_v4, %v879_v34  ;;  %v1669_v53 = vshrl.u32 %v1668_v6, 23 }
 0x153   : > { %v1529_v32 = vsub.s32 32, %v1528_v60  ;;  %v1533_v49 = vsub.s32 4294967266, %v1528_v60  ;;  %v869_v11 = vsel %vm865_vm8, %v849_v26, %v852_v5  ;;  %v871_v27 = vsel %vm867_vm6, %v855_v31, %v870_v13 }
 0x154   : > { %v10664_v59 = vpop.eup %10663  ;;  %v1546_v35 = vsel %vm11767_vm5, 0, %v1544_v33  ;;  %v11813_v43 = vmul.u32.u64.low %v11774_v36, %v880_v20  ;;  %v11814_v63 = vmul.u32.u64.high %v11774_v36, %v880_v20, %v11813_v43  ;;  %v9670_v30 = vadd.s32 4294967169, %v1669_v53 }
 0x155   : > { %v10666_v48 = vpop.eup %10665  ;;  %v725_v52 = vxor.u32 2147483648, %v10664_v59  ;;  %v1530_v7 = vshll.u32 %v11750_v12, %v1528_v60  ;;  %v1531_v41 = vshrl.u32 %v1513_v2, %v1529_v32  ;;  %v1534_v4 = vadd.s32 127, %v1533_v49 }
 0x156   : > { %v722_v22 = vxor.u32 2147483648, %v10666_v48  ;;  %v872_v5 = vsel %vm866_vm7, %v869_v11, %v871_v27  ;;  %v891_v31 = vadd.s32 1, %v11799_v57  ;;  %v1675_v26 = vadd.s32 1, %v9670_v30 }
 0x157   : > { %v1532_v13 = vor.u32 %v1531_v41, %v1530_v7  ;;  %v1535_v33 = vshll.u32 %v1534_v4, 23  ;;  %vm3216_vm14 = vcmp.eq.s32.totalorder %v11743_v62, 0  ;;  %v3221_v28 = vsel %vm3219_vm10, %v725_v52, %v10666_v48 }
 0x158   : > { %v1550_v6 = vadd.s32 3, %v1546_v35  ;;  %vm3215_vm15 = vcmp.lt.s32.totalorder %v11743_v62, 2  ;;  %v3218_v12 = vsel %vm3216_vm14, %v10664_v59, %v722_v22  ;;  %vm890_vm4 = vc.u32 %v11814_v63, %v11798_v25 }
 0x159   : > { %vm720_vm11 = vcmp.lt.s32.totalorder %v11772_v14, 2  ;;  %v1536_v0 = vor.u32 4788187, %v1535_v33  ;;  %v3222_v34 = vsel %vm3215_vm15, %v3218_v12, %v3221_v28  ;;  %v888_v2 = vmul.u32 %v11774_v36, %v872_v5 }
 0x15a   : > { %v1672_v60 = vand.u32 8388607, %v1665_v46  ;;  %vm721_vm8 = vcmp.eq.s32.totalorder %v11772_v14, 0  ;;  %v11833_v20 = vsel %vm717_vm9, nan, %v3222_v34  ;;  %v892_v62 = vsel %vm890_vm4, %v891_v31, %v11799_v57 }
 0x15b   : > { %15465 = vst [vmem:[#allocation8_spill] sm:$0xff] %v11833_v20  ;;  %vm1676_vm0 = vcmp.gt.s32.totalorder %v1675_v26, 0  ;;  %v1537_v53 = vand.u32 2147483647, %v1536_v0  ;;  %v1539_v32 = vcvt.s32.f32 %v1532_v13  ;;  %v893_v49 = vadd.s32 %v892_v62, %v888_v2 }
 0x15c   : > { %v1677_v11 = vsel %vm1676_vm0, %v1675_v26, 0  ;;  %vm724_vm10 = vcmp.eq.s32.totalorder %v11772_v14, 2  ;;  %v11837_v27 = vand.u32 3, %v1550_v6  ;;  %v11839_v36 = vand.u32 3, %v1546_v35 }
 0x15d   : > { %v1679_v43 = vand.u32 31, %v1677_v11  ;;  %v1540_v30 = vmul.f32 %v1539_v32, %v1537_v53  ;;  %v894_v7 = vadd.s32 536870912, %v893_v49  ;;  %v1673_v41 = vor.u32 8388608, %v1672_v60 }
 0x15e   : > { %v489_v4 = vrot.slane %v11109_v38, 6  ;;  %v723_v57 = vsel %vm721_vm8, %v10664_v59, %v722_v22  ;;  %v726_v5 = vsel %vm724_vm10, %v725_v52, %v10666_v48  ;;  %v1678_v31 = vshrl.u32 %v1677_v11, 5 }
 0x15f   : > { %v1680_v13 = vsub.s32 32, %v1679_v43  ;;  %v1541_v33 = vxor.u32 2147483648, %v1540_v30  ;;  %v11844_v26 = vshrl.u32 %v894_v7, 30  ;;  %v1682_v28 = vshll.u32 %v15335_v10, %v1679_v43 }
 0x160   : > { %v1685_v35 = vshll.u32 %v15329_v15, %v1679_v43  ;;  %v1688_v0 = vshll.u32 %v15322_v18, %v1679_v43  ;;  %v1691_v52 = vshll.u32 %v15315_v21, %v1679_v43  ;;  %v727_v2 = vsel %vm720_vm11, %v723_v57, %v726_v5 }
 0x161   : > { %v1683_v6 = vshrl.u32 %v15329_v15, %v1680_v13  ;;  %v1686_v12 = vshrl.u32 %v15322_v18, %v1680_v13  ;;  %v1689_v34 = vshrl.u32 %v15315_v21, %v1680_v13  ;;  %v1542_v59 = vsel %vm1459_vm13, %v1541_v33, %v1540_v30 }
 0x162   : > { %v896_v48 = vshll.u32 %v11844_v26, 30  ;;  %v1692_v22 = vshrl.u32 %v15318_v24, %v1680_v13  ;;  %v1545_v60 = vsel %vm11767_vm5, %v11479_v54, %v1542_v59  ;;  %v1681_v7 = vshrl.u32 %v15335_v10, %v1680_v13 }
 0x163   : > { %v1684_v62 = vor.u32 %v1683_v6, %v1682_v28  ;;  %v1687_v53 = vor.u32 %v1686_v12, %v1685_v35  ;;  %10667 = vcosq.f32 %v1545_v60  ;;  %v1690_v11 = vor.u32 %v1689_v34, %v1688_v0 }
 0x164   : > { %v11862_v32 = vsub.s32 %v893_v49, %v896_v48  ;;  %v1693_v30 = vor.u32 %v1692_v22, %v1691_v52  ;;  %10669 = vsinq.f32 %v1545_v60  ;;  %v1694_v33 = vshll.u32 %v15318_v24, %v1679_v43 }
 0x165   : > { %v1695_v21 = vshrl.u32 %v15320_v29, %v1680_v13  ;;  %vm1697_vm13 = vcmp.lt.s32.totalorder %v1678_v31, 1  ;;  %v11868_v57 = vshll.u32 %v1673_v41, 8  ;;  %vm565_vm5 = vcmask 1041408  }
 0x166   : > { %v899_v14 = vsub.s32 0, %v11862_v32  ;;  %vm1699_vm6 = vcmp.lt.s32.totalorder %v1678_v31, 3  ;;  %vm1700_vm7 = vcmp.lt.s32.totalorder %v1678_v31, 4  ;;  %v1701_v49 = vsel %vm1697_vm13, %v1681_v7, %v1684_v62 }
 0x167   : > { %v1696_v42 = vor.u32 %v1695_v21, %v1694_v33  ;;  %vm4043_vm12 = vcmp.eq.s32.totalorder %v11839_v36, 2  ;;  %v1702_v28 = vsel %vm1700_vm7, %v1690_v11, 2102212464  ;;  %v1705_v35 = vsel %vm1697_vm13, %v1684_v62, %v1687_v53 }
 0x168   : > { %v9639_v5 = vmin.u32 %v899_v14, %v11862_v32  ;;  %v1706_v6 = vsel %vm1700_vm7, %v1693_v30, 920167782  ;;  %vm4040_vm14 = vcmp.eq.s32.totalorder %v11839_v36, 0  ;;  %v1703_v43 = vsel %vm1699_vm6, %v1687_v53, %v1702_v28 }
 0x169   : > { %v1707_v13 = vsel %vm1699_vm6, %v1690_v11, %v1706_v6  ;;  %v1709_v41 = vsel %vm1697_vm13, %v1687_v53, %v1690_v11  ;;  %v1710_v12 = vsel %vm1700_vm7, %v1696_v42, 1326507024  ;;  %vm4039_vm15 = vcmp.lt.s32.totalorder %v11839_v36, 2  ;;  %v11887_v11 = vpop.permute.xlu1 %598 }
 0x16a   : > { %v901_v21 = vclz %v9639_v5  ;;  %vm1698_vm4 = vcmp.lt.s32.totalorder %v1678_v31, 2  ;;  %v505_v0 = vrot.slane %v11109_v38, 3  ;;  %v567_v34 = vsel %vm565_vm5, %v473_v47, %v489_v4 }
 0x16b   : > { %vm1549_vm11 = vweird.f32 %v11479_v54  ;;  %v1704_v59 = vsel %vm1698_vm4, %v1701_v49, %v1703_v43  ;;  %v1708_v48 = vsel %vm1698_vm4, %v1705_v35, %v1707_v13  ;;  %v1711_v52 = vsel %vm1699_vm6, %v1693_v30, %v1710_v12 }
 0x16c   : > { %vm574_vm8 = vcmask 1044480   ;;  %v9640_v22 = vadd.s32 4294967294, %v901_v21  ;;  %v1712_v60 = vsel %vm1698_vm4, %v1709_v41, %v1711_v52  ;;  %vm1552_vm0 = vcmp.lt.s32.totalorder %v11837_v27, 2 }
 0x16d   : > { %v11883_v62 = vmul.u32.u64.low %v11868_v57, %v1708_v48  ;;  %v11884_v53 = vmul.u32.u64.high %v11868_v57, %v1708_v48, %v11883_v62  ;;  %vm1553_vm10 = vcmp.eq.s32.totalorder %v11837_v27, 0  ;;  %v10668_v31 = vpop.eup %10667  ;;  %vm1556_vm13 = vcmp.eq.s32.totalorder %v11837_v27, 2 }
 0x16e   : > { %v11892_v47 = vmul.u32.u64.low %v11868_v57, %v1712_v60  ;;  %v11893_v4 = vmul.u32.u64.high %v11868_v57, %v1712_v60, %v11892_v47  ;;  %v889_v30 = vadd.s32 %v11798_v25, %v11814_v63  ;;  %vm9641_vm6 = vcmp.lt.s32.totalorder %v9640_v22, 0  ;;  %v10670_v33 = vpop.eup %10669 }
 0x16f   : > { %v576_v7 = vsel %vm574_vm8, %v567_v34, %v505_v0  ;;  %v728_v14 = vsel %vm717_vm9, nan, %v727_v2  ;;  %v1557_v42 = vxor.u32 2147483648, %v10668_v31  ;;  %v904_v49 = vsel %vm9641_vm6, 0, %v9640_v22  ;;  %v11934_v47 = vld [vmem:[%s11102_s16 + $0x10] sm:$0x77] }
 0x170   : > { %v1720_v5 = vmul.u32 %v11868_v57, %v1704_v59  ;;  %v1554_v28 = vxor.u32 2147483648, %v10670_v33  ;;  %v905_v35 = vsub.s32 32, %v904_v49  ;;  %v909_v6 = vsub.s32 4294967266, %v904_v49 }
 0x171   : > { %v11903_v43 = vmul.f32 %v11887_v11, %v576_v7  ;;  %v1558_v13 = vsel %vm1556_vm13, %v1557_v42, %v10670_v33  ;;  %v4045_v25 = vsel %vm4043_vm12, %v1557_v42, %v10670_v33  ;;  %v906_v63 = vshll.u32 %v11862_v32, %v904_v49 }
 0x172   : > { %vm1722_vm7 = vc.u32 %v11893_v4, %v11883_v62  ;;  %v1555_v44 = vsel %vm1553_vm10, %v10668_v31, %v1554_v28  ;;  %v4042_v2 = vsel %vm4040_vm14, %v10668_v31, %v1554_v28  ;;  %v907_v57 = vshrl.u32 %v889_v30, %v905_v35  ;;  %v11941_v31 = vld [vmem:[%s11102_s16 + $0x18] sm:$0x77] }
 0x173   : > { %15466 = vst [vmem:[#allocation9_spill] sm:$0xff] %v11903_v43  ;;  %v910_v41 = vadd.s32 127, %v909_v6  ;;  %v1559_v12 = vsel %vm1552_vm0, %v1555_v44, %v1558_v13  ;;  %v4046_v21 = vsel %vm4039_vm15, %v4042_v2, %v4045_v25  ;;  %v1723_v32 = vadd.s32 1, %v11884_v53 }
 0x174   : > { %v491_v0 = vrot.slane %v11141_v56, 6  ;;  %v1560_v34 = vsel %vm1549_vm11, nan, %v1559_v12  ;;  %v11924_v59 = vsel %vm1549_vm11, nan, %v4046_v21  ;;  %v908_v48 = vor.u32 %v907_v57, %v906_v63 }
 0x175   : > { %15467 = vst [vmem:[#allocation10_spill] sm:$0xff] %v11924_v59  ;;  %v911_v52 = vshll.u32 %v910_v41, 23  ;;  %v10074_v22 = vpack.c.bf16 %v1560_v34, %v728_v14  ;;  %v919_v36 = vsub.s32 4, %v11844_v26  ;;  %v1724_v60 = vsel %vm1722_vm7, %v1723_v32, %v11884_v53 }
 0x176   : > { %vm15468_vm9 = vcmask 1042432   ;;  %v15469_v30 = vrot.slane %v11231_v23, 5  ;;  %v1725_v14 = vadd.s32 %v1724_v60, %v1720_v5  ;;  %vm835_vm14 = vcmp.lt.s32.totalorder %v11613_v16, 0 }
 0x177   : > { %v525_v54 = vsel %vm15468_vm9, %v11934_v47, %v420_v17  ;;  %vm15470_vm12 = vmmov %vm15468_vm9  ;;  %v912_v33 = vor.u32 4788187, %v911_v52  ;;  %10075 = vmatpush1.bf16.msra.mxu0 %v10074_v22  ;;  %v15317_v53 = vand.u32 2147483647, %v11903_v43  ;;  %v2396_v42 = vand.u32 2139095040, %v11903_v43 }
 0x178   : > { %v527_v7 = vsel %vm15470_vm12, %v11941_v31, %v15469_v30  ;;  %v507_v49 = vrot.slane %v11141_v56, 3  ;;  %v915_v17 = vcvt.s32.f32 %v908_v48  ;;  %v1726_v35 = vadd.s32 536870912, %v1725_v14 }
 0x179   : > { %v913_v28 = vand.u32 2147483647, %v912_v33  ;;  %v15471_v6 = vrot.slane %v11141_v56, 1  ;;  %v920_v63 = vsel %vm835_vm14, %v919_v36, %v11844_v26  ;;  %v2397_v44 = vshrl.u32 %v2396_v42, 23  ;;  %v10761_v33 = vld [vmem:[%s11102_s16] sm:$0x77] }
 0x17a   : > { %v1727_v41 = vshrl.u32 %v1726_v35, 30  ;;  %v15472_v21 = vrot.slane %v11219_v8, 2  ;;  %vm834_vm15 = vcmp.le.f32.partialorder %v833_v3, 0.7853982  ;;  %v2400_v36 = vand.u32 8388607, %v15317_v53 }
 0x17b   : > { %v569_v13 = vsel %vm565_vm5, %v15471_v6, %v491_v0  ;;  %v916_v57 = vmul.f32 %v915_v17, %v913_v28  ;;  %v15473_v0 = vrot.slane %v11231_v23, 2  ;;  %v9698_v26 = vadd.s32 4294967169, %v2397_v44 }
 0x17c   : > { %v578_v12 = vsel %vm574_vm8, %v569_v13, %v507_v49  ;;  %v11965_v32 = vsel %vm15324_vm2, %v525_v54, %v15472_v21  ;;  %v922_v52 = vsel %vm834_vm15, 0, %v920_v63  ;;  %v1728_v22 = vshll.u32 %v1727_v41, 30 }
 0x17d   : > { %v11970_v34 = vsel %vm15324_vm2, %v527_v7, %v15473_v0  ;;  %v917_v48 = vxor.u32 2147483648, %v916_v57  ;;  %v15474_v60 = vmov %v15472_v21  ;;  %v2403_v30 = vadd.s32 1, %v9698_v26 }
 0x17e   : > { %v543_v54 = vsel %vm15325_vm1, %v15474_v60, %v452_v9  ;;  %v11982_v7 = vmul.f32 %v11887_v11, %v578_v12  ;;  %v488_v42 = vrot.slane %v10761_v33, 6  ;;  %vm1667_vm4 = vcmp.lt.s32.totalorder %v11740_v19, 0 }
 0x17f   : > { %v918_v3 = vsel %vm835_vm14, %v917_v48, %v916_v57  ;;  %v11988_v49 = vsub.s32 %v1725_v14, %v1728_v22  ;;  %v1751_v28 = vsub.s32 4, %v1727_v41  ;;  %v926_v35 = vadd.s32 3, %v922_v52 }
 0x180   : > { %15475 = vst [vmem:[#allocation11_spill] sm:$0xff] %v11982_v7  ;;  %v921_v17 = vsel %vm834_vm15, %v11613_v16, %v918_v3  ;;  %v11991_v6 = vand.u32 3, %v922_v52  ;;  %vm2404_vm11 = vcmp.gt.s32.totalorder %v2403_v30, 0  ;;  %v2401_v13 = vor.u32 8388608, %v2400_v36 }
 0x181   : > { %10671 = vcosq.f32 %v921_v17  ;;  %v1731_v9 = vsub.s32 0, %v11988_v49  ;;  %v504_v63 = vrot.slane %v10761_v33, 3  ;;  %v2405_v44 = vsel %vm2404_vm11, %v2403_v30, 0 }
 0x182   : > { %10673 = vsinq.f32 %v921_v17  ;;  %v2604_v57 = vand.u32 2139095040, %v11982_v7  ;;  %v15476_v12 = vrot.slane %v11105_v37, 1  ;;  %v15477_v21 = vmov %v15473_v0 }
 0x183   : > { %v12003_v0 = vsel %vm15325_vm1, %v15477_v21, %v454_v39  ;;  %v12009_v26 = vsel %vm547_vm3, %v543_v54, %v466_v58  ;;  %v9671_v48 = vmin.u32 %v1731_v9, %v11988_v49  ;;  %v1752_v37 = vsel %vm1667_vm4, %v1751_v28, %v1727_v41 }
 0x184   : > { %v566_v14 = vsel %vm565_vm5, %v15476_v12, %v488_v42  ;;  %v12014_v52 = vand.u32 3, %v926_v35  ;;  %vm12018_vm0 = vcmp.le.f32.partialorder %v1665_v46, 0.7853982  ;;  %v1721_v39 = vadd.s32 %v11883_v62, %v11893_v4 }
 0x185   : > { %v2407_v8 = vand.u32 31, %v2405_v44  ;;  %v1733_v22 = vclz %v9671_v48  ;;  %vm3425_vm10 = vcmp.eq.s32.totalorder %v11991_v6, 2  ;;  %v12025_v58 = vshll.u32 %v2401_v13, 8 }
 0x186   : > { %v2601_v36 = vand.u32 2147483647, %v11982_v7  ;;  %v12029_v41 = vsel %vm574_vm8, %v566_v14, %v504_v63  ;;  %v12033_v46 = vsel %vm12018_vm0, 0, %v1752_v37  ;;  %vm3422_vm13 = vcmp.eq.s32.totalorder %v11991_v6, 0 }
 0x187   : > { %v12036_v60 = vshrl.u32 %v2405_v44, 5  ;;  %v2408_v62 = vsub.s32 32, %v2407_v8  ;;  %v2605_v4 = vshrl.u32 %v2604_v57, 23  ;;  %v9672_v54 = vadd.s32 4294967294, %v1733_v22 }
 0x188   : > { %vm3421_vm6 = vcmp.lt.s32.totalorder %v11991_v6, 2  ;;  %v2410_v30 = vshll.u32 %v15335_v10, %v2407_v8  ;;  %v2413_v33 = vshll.u32 %v15329_v15, %v2407_v8  ;;  %v2416_v42 = vshll.u32 %v15322_v18, %v2407_v8 }
 0x189   : > { %vm925_vm7 = vweird.f32 %v11613_v16  ;;  %v2411_v3 = vshrl.u32 %v15329_v15, %v2408_v62  ;;  %v2414_v28 = vshrl.u32 %v15322_v18, %v2408_v62  ;;  %v15480_v17 = vmov 2102212464  }
 0x18a   : > { %v2417_v35 = vshrl.u32 %v15480_v17, %v2408_v62  ;;  %v2419_v9 = vshll.u32 %v15480_v17, %v2407_v8  ;;  %vm9673_vm9 = vcmp.lt.s32.totalorder %v9672_v54, 0  ;;  %v1758_v13 = vadd.s32 3, %v12033_v46 }
 0x18b   : > { %v2420_v63 = vshrl.u32 %v15318_v24, %v2408_v62  ;;  %v2422_v44 = vshll.u32 %v15318_v24, %v2407_v8  ;;  %v1736_v57 = vsel %vm9673_vm9, 0, %v9672_v54  ;;  %v2409_v12 = vshrl.u32 %v15335_v10, %v2408_v62  ;;  %v12053_v21 = vpop.eup %10671 }
 0x18c   : > { %v2423_v14 = vshrl.u32 %v15320_v29, %v2408_v62  ;;  %vm2425_vm12 = vcmp.lt.s32.totalorder %v12036_v60, 1  ;;  %v1737_v48 = vsub.s32 32, %v1736_v57  ;;  %v1741_v37 = vsub.s32 4294967266, %v1736_v57  ;;  %v10674_v2 = vpop.eup %10673 }
 0x18d   : > { %v2412_v22 = vor.u32 %v2411_v3, %v2410_v30  ;;  %v2418_v27 = vor.u32 %v2417_v35, %v2416_v42  ;;  %v933_v5 = vxor.u32 2147483648, %v12053_v21  ;;  %v2415_v25 = vor.u32 %v2414_v28, %v2413_v33 }
 0x18e   : > { %v2421_v53 = vor.u32 %v2420_v63, %v2419_v9  ;;  %vm2428_vm14 = vcmp.lt.s32.totalorder %v12036_v60, 4  ;;  %v930_v8 = vxor.u32 2147483648, %v10674_v2  ;;  %v1738_v54 = vshll.u32 %v11988_v49, %v1736_v57 }
 0x18f   : > { %v1739_v24 = vshrl.u32 %v1721_v39, %v1737_v48  ;;  %v1742_v62 = vadd.s32 127, %v1741_v37  ;;  %v3427_v29 = vsel %vm3425_vm10, %v933_v5, %v10674_v2  ;;  %v2424_v18 = vor.u32 %v2423_v14, %v2422_v44 }
 0x190   : > { %vm2427_vm15 = vcmp.lt.s32.totalorder %v12036_v60, 3  ;;  %v9706_v30 = vadd.s32 4294967169, %v2605_v4  ;;  %vm929_vm11 = vcmp.eq.s32.totalorder %v12014_v52, 0  ;;  %vm932_vm9 = vcmp.eq.s32.totalorder %v12014_v52, 2 }
 0x191   : > { %v1740_v33 = vor.u32 %v1739_v24, %v1738_v54  ;;  %v1743_v42 = vshll.u32 %v1742_v62, 23  ;;  %v3424_v3 = vsel %vm3422_vm13, %v12053_v21, %v930_v8  ;;  %v2430_v49 = vsel %vm2428_vm14, %v2418_v27, 2102212464 }
 0x192   : > { %v3428_v39 = vsel %vm3421_vm6, %v3424_v3, %v3427_v29  ;;  %vm2426_vm10 = vcmp.lt.s32.totalorder %v12036_v60, 2  ;;  %v2433_v4 = vsel %vm2425_vm12, %v2412_v22, %v2415_v25  ;;  %v2434_v28 = vsel %vm2428_vm14, %v2421_v53, 920167782 }
 0x193   : > { %v1744_v24 = vor.u32 4788187, %v1743_v42  ;;  %v12077_v35 = vsel %vm925_vm7, nan, %v3428_v39  ;;  %v2429_v9 = vsel %vm2425_vm12, %v2409_v12, %v2412_v22  ;;  %v12083_v29 = vand.u32 8388607, %v2601_v36 }
 0x194   : > { %15481 = vst [vmem:[#allocation12_spill] sm:$0xff] %v12077_v35  ;;  %v2431_v6 = vsel %vm2427_vm15, %v2415_v25, %v2430_v49  ;;  %v2435_v63 = vsel %vm2427_vm15, %v2418_v27, %v2434_v28  ;;  %v2437_v44 = vsel %vm2425_vm12, %v2415_v25, %v2418_v27  ;;  %v2438_v57 = vsel %vm2428_vm14, %v2424_v18, 1326507024 }
 0x195   : > { %vm928_vm13 = vcmp.lt.s32.totalorder %v12014_v52, 2  ;;  %v1745_v12 = vand.u32 2147483647, %v1744_v24  ;;  %v1747_v14 = vcvt.s32.f32 %v1740_v33  ;;  %v2436_v48 = vsel %vm2426_vm10, %v2433_v4, %v2435_v63  ;;  %v12110_v33 = vld [vmem:[%s11102_s16 + $0x8] sm:$0x77] }
 0x196   : > { %v2439_v37 = vsel %vm2427_vm15, %v2421_v53, %v2438_v57  ;;  %v12101_v54 = vmul.u32.u64.low %v12025_v58, %v2436_v48  ;;  %v12102_v62 = vmul.u32.u64.high %v12025_v58, %v2436_v48, %v12101_v54  ;;  %v2611_v27 = vadd.s32 1, %v9706_v30 }
 0x197   : > { %v2440_v22 = vsel %vm2426_vm10, %v2437_v44, %v2439_v37  ;;  %v1748_v18 = vmul.f32 %v1747_v14, %v1745_v12  ;;  %v490_v3 = vrot.slane %v12110_v33, 6  ;;  %v12114_v53 = vand.u32 3, %v12033_v46 }
 0x198   : > { %v12106_v25 = vmul.u32.u64.low %v12025_v58, %v2440_v22  ;;  %v12107_v42 = vmul.u32.u64.high %v12025_v58, %v2440_v22, %v12106_v25  ;;  %v2432_v49 = vsel %vm2426_vm10, %v2429_v9, %v2431_v6  ;;  %vm2612_vm6 = vcmp.gt.s32.totalorder %v2611_v27, 0 }
 0x199   : > { %v1749_v39 = vxor.u32 2147483648, %v1748_v18  ;;  %v12118_v4 = vand.u32 3, %v1758_v13  ;;  %v2609_v30 = vor.u32 8388608, %v12083_v29  ;;  %v2613_v28 = vsel %vm2612_vm6, %v2611_v27, 0 }
 0x19a   : > { %v15326_v24 = vmov 0.0   ;;  %v931_v46 = vsel %vm929_vm11, %v12053_v21, %v930_v8  ;;  %v934_v60 = vsel %vm932_vm9, %v933_v5, %v10674_v2  ;;  %v2451_v9 = vadd.s32 1, %v12102_v62 }
 0x19b   : > { %5698 = vmatprep.mubr.f32.mxu0 %v15326_v24  ;;  %5811 = vmatprep.mubr.f32.mxu1 %v15326_v24  ;;  %v2615_v6 = vand.u32 31, %v2613_v28  ;;  %v1750_v13 = vsel %vm1667_vm4, %v1749_v39, %v1748_v18  ;;  %v2448_v29 = vmul.u32 %v12025_v58, %v2432_v49  ;;  %vm2450_vm12 = vc.u32 %v12107_v42, %v12101_v54 }
 0x19c   : > { %v12134_v63 = vshrl.u32 %v2613_v28, 5  ;;  %v1753_v21 = vsel %vm12018_vm0, %v11740_v19, %v1750_v13  ;;  %v2452_v8 = vsel %vm2450_vm12, %v2451_v9, %v12102_v62  ;;  %v15482_v12 = vmov 2131351028  }
 0x19d   : > { %v2616_v5 = vsub.s32 32, %v2615_v6  ;;  %v2618_v2 = vshll.u32 %v15335_v10, %v2615_v6  ;;  %10675 = vcosq.f32 %v1753_v21  ;;  %v2453_v44 = vadd.s32 %v2452_v8, %v2448_v29 }
 0x19e   : > { %v2621_v57 = vshll.u32 %v15329_v15, %v2615_v6  ;;  %v2624_v58 = vshll.u32 %v15482_v12, %v2615_v6  ;;  %v935_v14 = vsel %vm928_vm13, %v931_v46, %v934_v60  ;;  %10677 = vsinq.f32 %v1753_v21 }
 0x19f   : > { %v2619_v48 = vshrl.u32 %v15329_v15, %v2616_v5  ;;  %v2622_v23 = vshrl.u32 %v15482_v12, %v2616_v5  ;;  %v2454_v37 = vadd.s32 536870912, %v2453_v44  ;;  %v2625_v22 = vshrl.u32 %v15480_v17, %v2616_v5 }
 0x1a0   : > { %v2627_v62 = vshll.u32 %v15480_v17, %v2615_v6  ;;  %v15483_v27 = vmov 920167782   ;;  %v15484_v28 = vmov 1326507024   ;;  %vm4249_vm4 = vcmp.eq.s32.totalorder %v12114_v53, 2 }
 0x1a1   : > { %v2628_v18 = vshrl.u32 %v15483_v27, %v2616_v5  ;;  %v2620_v25 = vor.u32 %v2619_v48, %v2618_v2  ;;  %v2623_v49 = vor.u32 %v2622_v23, %v2621_v57  ;;  %v2630_v39 = vshll.u32 %v15483_v27, %v2615_v6 }
 0x1a2   : > { %v2631_v9 = vshrl.u32 %v15484_v28, %v2616_v5  ;;  %v2455_v52 = vshrl.u32 %v2454_v37, 30  ;;  %v2626_v46 = vor.u32 %v2625_v22, %v2624_v58  ;;  %vm2633_vm0 = vcmp.lt.s32.totalorder %v12134_v63, 1 }
 0x1a3   : > { %v2629_v60 = vor.u32 %v2628_v18, %v2627_v62  ;;  %vm1761_vm14 = vcmp.eq.s32.totalorder %v12118_v4, 0  ;;  %vm4246_vm15 = vcmp.eq.s32.totalorder %v12114_v53, 0  ;;  %v2617_v13 = vshrl.u32 %v15335_v10, %v2616_v5 }
 0x1a4   : > { %v2632_v29 = vor.u32 %v2631_v9, %v2630_v39  ;;  %vm2635_vm11 = vcmp.lt.s32.totalorder %v12134_v63, 3  ;;  %vm2636_vm9 = vcmp.lt.s32.totalorder %v12134_v63, 4  ;;  %vm1760_vm10 = vcmp.lt.s32.totalorder %v12118_v4, 2 }
 0x1a5   : > { %vm1764_vm13 = vcmp.eq.s32.totalorder %v12118_v4, 2  ;;  %vm4245_vm6 = vcmp.lt.s32.totalorder %v12114_v53, 2  ;;  %vm2395_vm12 = vcmp.lt.s32.totalorder %v11903_v43, 0  ;;  %v2456_v6 = vshll.u32 %v2455_v52, 30 }
 0x1a6   : > { %vm2634_vm2 = vcmp.lt.s32.totalorder %v12134_v63, 2  ;;  %v2638_v21 = vsel %vm2636_vm9, %v2626_v46, 2102212464  ;;  %v936_v8 = vsel %vm925_vm7, nan, %v935_v14  ;;  %vm1757_vm1 = vweird.f32 %v11740_v19 }
 0x1a7   : > { %v2641_v5 = vsel %vm2633_vm0, %v2620_v25, %v2623_v49  ;;  %v2642_v2 = vsel %vm2636_vm9, %v2629_v60, 920167782  ;;  %v2649_v57 = vshll.u32 %v2609_v30, 8  ;;  %v12173_v58 = vsub.s32 %v2453_v44, %v2456_v6 }
 0x1a8   : > { %v2643_v48 = vsel %vm2635_vm11, %v2626_v46, %v2642_v2  ;;  %v2645_v23 = vsel %vm2633_vm0, %v2623_v49, %v2626_v46  ;;  %v12181_v16 = vmul.f32 %v11887_v11, %v12029_v41  ;;  %v15486_v14 = vand.u32 2147483647, %v11903_v43  ;;  %v10676_v41 = vpop.eup %10675 }
 0x1a9   : > { %v2637_v30 = vsel %vm2633_vm0, %v2617_v13, %v2620_v25  ;;  %v2639_v44 = vsel %vm2635_vm11, %v2623_v49, %v2638_v21  ;;  %v2644_v22 = vsel %vm2634_vm2, %v2641_v5, %v2643_v48  ;;  %v2646_v62 = vsel %vm2636_vm9, %v2632_v29, 1326507024  ;;  %v10678_v6 = vpop.eup %10677 }
 0x1aa   : > { %15485 = vst [vmem:[#allocation13_spill] sm:$0xff] %v12181_v16  ;;  %vm12185_vm7 = vcmp.le.f32.partialorder %v15486_v14, 0.7853982  ;;  %v2459_v18 = vsub.s32 0, %v12173_v58  ;;  %v2479_v39 = vsub.s32 4, %v2455_v52  ;;  %v2647_v9 = vsel %vm2635_vm11, %v2629_v60, %v2646_v62 }
 0x1ab   : > { %v506_v46 = vrot.slane %v12110_v33, 3  ;;  %v1765_v25 = vxor.u32 2147483648, %v10676_v41  ;;  %v2648_v49 = vsel %vm2634_vm2, %v2645_v23, %v2647_v9  ;;  %v1762_v5 = vxor.u32 2147483648, %v10678_v6 }
 0x1ac   : > { %v12203_v13 = vmul.u32.u64.low %v2649_v57, %v2644_v22  ;;  %v12204_v21 = vmul.u32.u64.high %v2649_v57, %v2644_v22, %v12203_v13  ;;  %v9699_v29 = vmin.u32 %v2459_v18, %v12173_v58  ;;  %v2640_v2 = vsel %vm2634_vm2, %v2637_v30, %v2639_v44 }
 0x1ad   : > { %v15489_v60 = vrot.slane %v11130_v50, 1  ;;  %v1766_v14 = vsel %vm1764_vm13, %v1765_v25, %v10678_v6  ;;  %v4251_v23 = vsel %vm4249_vm4, %v1765_v25, %v10678_v6  ;;  %v1763_v18 = vsel %vm1761_vm14, %v10676_v41, %v1762_v5 }
 0x1ae   : > { %v12219_v22 = vmul.u32.u64.low %v2649_v57, %v2648_v49  ;;  %v12220_v62 = vmul.u32.u64.high %v2649_v57, %v2648_v49, %v12219_v22  ;;  %v4248_v63 = vsel %vm4246_vm15, %v10676_v41, %v1762_v5  ;;  %v2461_v33 = vclz %v9699_v29 }
 0x1af   : > { %v568_v48 = vsel %vm565_vm5, %v15489_v60, %v490_v3  ;;  %v2292_v50 = vand.u32 2139095040, %v12181_v16  ;;  %v1767_v3 = vsel %vm1760_vm10, %v1763_v18, %v1766_v14  ;;  %v4252_v30 = vsel %vm4245_vm6, %v4248_v63, %v4251_v23 }
 0x1b0   : > { %v2480_v44 = vsel %vm2395_vm12, %v2479_v39, %v2455_v52  ;;  %v15328_v9 = vand.u32 2147483647, %v12181_v16  ;;  %v1768_v6 = vsel %vm1757_vm1, nan, %v1767_v3  ;;  %v12238_v41 = vsel %vm1757_vm1, nan, %v4252_v30 }
 0x1b1   : > { %15490 = vst [vmem:[#allocation14_spill] sm:$0xff] %v12238_v41  ;;  %v9700_v25 = vadd.s32 4294967294, %v2461_v33  ;;  %v2659_v49 = vadd.s32 1, %v12204_v21  ;;  %v10078_v4 = vpack.c.bf16 %v1768_v6, %v936_v8  ;;  %v2656_v5 = vmul.u32 %v2649_v57, %v2640_v2 }
 0x1b2   : > { %vm2658_vm2 = vc.u32 %v12220_v62, %v12203_v13  ;;  %v12247_v52 = vsel %vm12185_vm7, 0, %v2480_v44  ;;  %v2293_v39 = vshrl.u32 %v2292_v50, 23  ;;  %v2449_v29 = vadd.s32 %v12101_v54, %v12107_v42 }
 0x1b3   : > { %vm9701_vm4 = vcmp.lt.s32.totalorder %v9700_v25, 0  ;;  %v2660_v19 = vsel %vm2658_vm2, %v2659_v49, %v12204_v21  ;;  %10079 = vmatpush1.bf16.msra.mxu1 %v10078_v4  ;;  %v2296_v57 = vand.u32 8388607, %v15328_v9  ;;  %v577_v22 = vsel %vm574_vm8, %v568_v48, %v506_v46 }
 0x1b4   : > { %v2464_v8 = vsel %vm9701_vm4, 0, %v9700_v25  ;;  %v2661_v60 = vadd.s32 %v2660_v19, %v2656_v5  ;;  %v9694_v23 = vadd.s32 4294967169, %v2293_v39  ;;  %v12257_v18 = vmul.f32 %v11118_v45, %v11965_v32 }
 0x1b5   : > { %v2465_v2 = vsub.s32 32, %v2464_v8  ;;  %v2469_v14 = vsub.s32 4294967266, %v2464_v8  ;;  %v12261_v21 = vmul.f32 %v11118_v45, %v11970_v34  ;;  %v2486_v54 = vadd.s32 3, %v12247_v52 }
 0x1b6   : > { %15491 = vst [vmem:[#allocation15_spill] sm:$0xff] %v12257_v18  ;;  %v2662_v42 = vadd.s32 536870912, %v2661_v60  ;;  %v2466_v63 = vshll.u32 %v12173_v58, %v2464_v8  ;;  %v2299_v3 = vadd.s32 1, %v9694_v23  ;;  %v15493_v30 = vcombine.low %v11941_v31, %v11941_v31 }
 0x1b7   : > { %15492 = vst [vmem:[#allocation16_spill] sm:$0xff] %v12261_v21  ;;  %v2467_v33 = vshrl.u32 %v2449_v29, %v2465_v2  ;;  %v2470_v50 = vadd.s32 127, %v2469_v14  ;;  %v2297_v48 = vor.u32 8388608, %v2296_v57  ;;  %v12273_v34 = vmul.f32 %v11887_v11, %v577_v22 }
 0x1b8   : > { %v12270_v46 = vsel %vm547_vm3, %v12003_v0, %v15493_v30  ;;  %v2663_v32 = vshrl.u32 %v2662_v42, 30  ;;  %v15495_v44 = vrot.slane %v11934_v47, 1  ;;  %vm15496_vm1 = vcmask 1046528  }
 0x1b9   : > { %15494 = vst [vmem:[#allocation17_spill] sm:$0xff] %v12273_v34  ;;  %v2468_v6 = vor.u32 %v2467_v33, %v2466_v63  ;;  %v2471_v25 = vshll.u32 %v2470_v50, 23  ;;  %vm2300_vm0 = vcmp.gt.s32.totalorder %v2299_v3, 0  ;;  %v12283_v39 = vand.u32 3, %v2486_v54 }
 0x1ba   : > { %v12279_v58 = vsel %vm15496_vm1, %v12009_v26, %v15495_v44  ;;  %v2664_v0 = vshll.u32 %v2663_v32, 30  ;;  %v2301_v5 = vsel %vm2300_vm0, %v2299_v3, 0  ;;  %vm2603_vm14 = vcmp.lt.s32.totalorder %v11982_v7, 0 }
 0x1bb   : > { %v2472_v19 = vor.u32 4788187, %v2471_v25  ;;  %v2303_v29 = vand.u32 31, %v2301_v5  ;;  %vm12288_vm15 = vcmp.le.f32.partialorder %v2601_v36, 0.7853982  ;;  %v2657_v8 = vadd.s32 %v12203_v13, %v12220_v62 }
 0x1bc   : > { %v12294_v57 = vsub.s32 %v2661_v60, %v2664_v0  ;;  %v12296_v2 = vshll.u32 %v2297_v48, 8  ;;  %v2500_v14 = vand.u32 2139095040, %v12273_v34  ;;  %v2475_v22 = vcvt.s32.f32 %v2468_v6 }
 0x1bd   : > { %v2473_v23 = vand.u32 2147483647, %v2472_v19  ;;  %v2687_v54 = vsub.s32 4, %v2663_v32  ;;  %v2304_v42 = vsub.s32 32, %v2303_v29  ;;  %v2306_v36 = vshll.u32 %v15335_v10, %v2303_v29 }
 0x1be   : > { %v2667_v63 = vsub.s32 0, %v12294_v57  ;;  %v2309_v33 = vshll.u32 %v15329_v15, %v2303_v29  ;;  %v15333_v50 = vand.u32 2147483647, %v12273_v34  ;;  %v2312_v60 = vshll.u32 %v15482_v12, %v2303_v29 }
 0x1bf   : > { %v2476_v3 = vmul.f32 %v2475_v22, %v2473_v23  ;;  %v2307_v13 = vshrl.u32 %v15329_v15, %v2304_v42  ;;  %v2310_v62 = vshrl.u32 %v15482_v12, %v2304_v42  ;;  %v2302_v48 = vshrl.u32 %v2301_v5, 5 }
 0x1c0   : > { %v9707_v30 = vmin.u32 %v2667_v63, %v12294_v57  ;;  %v2313_v44 = vshrl.u32 %v15480_v17, %v2304_v42  ;;  %v2315_v6 = vshll.u32 %v15480_v17, %v2303_v29  ;;  %v2688_v0 = vsel %vm2603_vm14, %v2687_v54, %v2663_v32 }
 0x1c1   : > { %v2477_v25 = vxor.u32 2147483648, %v2476_v3  ;;  %v2316_v19 = vshrl.u32 %v15483_v27, %v2304_v42  ;;  %v2501_v23 = vshrl.u32 %v2500_v14, 23  ;;  %v2305_v53 = vshrl.u32 %v15335_v10, %v2304_v42 }
 0x1c2   : > { %v2669_v22 = vclz %v9707_v30  ;;  %v2308_v24 = vor.u32 %v2307_v13, %v2306_v36  ;;  %v2311_v4 = vor.u32 %v2310_v62, %v2309_v33  ;;  %v2314_v5 = vor.u32 %v2313_v44, %v2312_v60 }
 0x1c3   : > { %v2478_v63 = vsel %vm2395_vm12, %v2477_v25, %v2476_v3  ;;  %v2317_v9 = vor.u32 %v2316_v19, %v2315_v6  ;;  %v2318_v49 = vshll.u32 %v15483_v27, %v2303_v29  ;;  %v2319_v54 = vshrl.u32 %v15484_v28, %v2304_v42 }
 0x1c4   : > { %v2481_v15 = vsel %vm12185_vm7, %v11903_v43, %v2478_v63  ;;  %v9708_v32 = vadd.s32 4294967294, %v2669_v22  ;;  %vm2321_vm11 = vcmp.lt.s32.totalorder %v2302_v48, 1  ;;  %v12322_v14 = vsel %vm12288_vm15, 0, %v2688_v0 }
 0x1c5   : > { %10679 = vcosq.f32 %v2481_v15  ;;  %15499 = vst [vmem:[#allocation18_spill] sm:$0xff] %v12322_v14  ;;  %vm2323_vm9 = vcmp.lt.s32.totalorder %v2302_v48, 3  ;;  %vm2324_vm10 = vcmp.lt.s32.totalorder %v2302_v48, 4  ;;  %v2320_v36 = vor.u32 %v2319_v54, %v2318_v49 }
 0x1c6   : > { %10681 = vsinq.f32 %v2481_v15  ;;  %vm9709_vm13 = vcmp.lt.s32.totalorder %v9708_v32, 0  ;;  %vm2322_vm6 = vcmp.lt.s32.totalorder %v2302_v48, 2  ;;  %v2326_v33 = vsel %vm2324_vm10, %v2314_v5, 2102212464 }
 0x1c7   : > { %v2672_v29 = vsel %vm9709_vm13, 0, %v9708_v32  ;;  %v2329_v37 = vsel %vm2321_vm11, %v2308_v24, %v2311_v4  ;;  %v2330_v3 = vsel %vm2324_vm10, %v2317_v9, 920167782  ;;  %v2325_v62 = vsel %vm2321_vm11, %v2305_v53, %v2308_v24 }
 0x1c8   : > { %v2673_v42 = vsub.s32 32, %v2672_v29  ;;  %v2677_v13 = vsub.s32 4294967266, %v2672_v29  ;;  %v2327_v60 = vsel %vm2323_vm9, %v2311_v4, %v2326_v33  ;;  %v2674_v30 = vshll.u32 %v12294_v57, %v2672_v29 }
 0x1c9   : > { %v2331_v15 = vsel %vm2323_vm9, %v2314_v5, %v2330_v3  ;;  %v2333_v49 = vsel %vm2321_vm11, %v2311_v4, %v2314_v5  ;;  %v2334_v44 = vsel %vm2324_vm10, %v2320_v36, 1326507024  ;;  %v2328_v22 = vsel %vm2322_vm6, %v2325_v62, %v2327_v60 }
 0x1ca   : > { %v2675_v6 = vshrl.u32 %v2657_v8, %v2673_v42  ;;  %v2678_v25 = vadd.s32 127, %v2677_v13  ;;  %v2332_v0 = vsel %vm2322_vm6, %v2329_v37, %v2331_v15  ;;  %v2335_v19 = vsel %vm2323_vm9, %v2317_v9, %v2334_v44 }
 0x1cb   : > { %v2336_v24 = vsel %vm2322_vm6, %v2333_v49, %v2335_v19  ;;  %v12338_v53 = vmul.u32.u64.low %v12296_v2, %v2332_v0  ;;  %v12339_v63 = vmul.u32.u64.high %v12296_v2, %v2332_v0, %v12338_v53  ;;  %vm2485_vm12 = vweird.f32 %v11903_v43 }
 0x1cc   : > { %v2676_v57 = vor.u32 %v2675_v6, %v2674_v30  ;;  %v2679_v32 = vshll.u32 %v2678_v25, 23  ;;  %v12343_v4 = vmul.u32.u64.low %v12296_v2, %v2336_v24  ;;  %v12344_v5 = vmul.u32.u64.high %v12296_v2, %v2336_v24, %v12343_v4 }
 0x1cd   : > { %vm2488_vm7 = vcmp.lt.s32.totalorder %v12283_v39, 2  ;;  %v9702_v9 = vadd.s32 4294967169, %v2501_v23  ;;  %v12350_v8 = vcombine.high %v11934_v47, %v11934_v47  ;;  %vm2489_vm2 = vcmp.eq.s32.totalorder %v12283_v39, 0 }
 0x1ce   : > { %vm2492_vm4 = vcmp.eq.s32.totalorder %v12283_v39, 2  ;;  %v2680_v48 = vor.u32 4788187, %v2679_v32  ;;  %v12356_v54 = vand.u32 8388607, %v15333_v50  ;;  %v2694_v29 = vadd.s32 3, %v12322_v14 }
 0x1cf   : > { %v12358_v36 = vpop.eup %10679  ;;  %v2344_v33 = vmul.u32 %v12296_v2, %v2328_v22  ;;  %v2347_v23 = vadd.s32 1, %v12339_v63  ;;  %v2507_v37 = vadd.s32 1, %v9702_v9  ;;  %v2683_v62 = vcvt.s32.f32 %v2676_v57 }
 0x1d0   : > { %15500 = vst [vmem:[#allocation19_spill] sm:$0xff] %v12358_v36  ;;  %v12363_v3 = vpop.eup %10681  ;;  %v15331_v42 = vxor.u32 2147483648, %v12358_v36  ;;  %v2681_v13 = vand.u32 2147483647, %v2680_v48  ;;  %vm2346_vm1 = vc.u32 %v12344_v5, %v12338_v53  ;;  %v421_v15 = vrot.slane %v12350_v8, 5 }
 0x1d1   : > { %15501 = vst [vmem:[#allocation20_spill] sm:$0xff] %v12363_v3  ;;  %v15332_v60 = vxor.u32 2147483648, %v12363_v3  ;;  %v2348_v30 = vsel %vm2346_vm1, %v2347_v23, %v12339_v63  ;;  %vm2508_vm0 = vcmp.gt.s32.totalorder %v2507_v37, 0  ;;  %v12381_v0 = vand.u32 3, %v2694_v29 }
 0x1d2   : > { %v2494_v2 = vsel %vm2492_vm4, %v15331_v42, %v12363_v3  ;;  %v2684_v49 = vmul.f32 %v2683_v62, %v2681_v13  ;;  %v2349_v44 = vadd.s32 %v2348_v30, %v2344_v33  ;;  %v2509_v6 = vsel %vm2508_vm0, %v2507_v37, 0 }
 0x1d3   : > { %v2491_v25 = vsel %vm2489_vm2, %v12358_v36, %v15332_v60  ;;  %v2505_v19 = vor.u32 8388608, %v12356_v54  ;;  %v2511_v22 = vand.u32 31, %v2509_v6  ;;  %v437_v32 = vrot.slane %v12350_v8, 2 }
 0x1d4   : > { %v2495_v24 = vsel %vm2488_vm7, %v2491_v25, %v2494_v2  ;;  %v2685_v63 = vxor.u32 2147483648, %v2684_v49  ;;  %v2350_v57 = vadd.s32 536870912, %v2349_v44  ;;  %v2510_v9 = vshrl.u32 %v2509_v6, 5 }
 0x1d5   : > { %v2496_v4 = vsel %vm2485_vm12, nan, %v2495_v24  ;;  %v2512_v48 = vsub.s32 32, %v2511_v22  ;;  %v2514_v33 = vshll.u32 %v15335_v10, %v2511_v22  ;;  %v15502_v23 = vmov 2475754826  }
 0x1d6   : > { %5638 = vmatprep.subr.mxu0 %v2496_v4  ;;  %v2686_v29 = vsel %vm2603_vm14, %v2685_v63, %v2684_v49  ;;  %v12392_v54 = vshrl.u32 %v2350_v57, 30  ;;  %v2517_v39 = vshll.u32 %v15502_v23, %v2511_v22  ;;  %v2520_v37 = vshll.u32 %v15482_v12, %v2511_v22 }
 0x1d7   : > { %v2689_v13 = vsel %vm12288_vm15, %v11982_v7, %v2686_v29  ;;  %v2515_v62 = vshrl.u32 %v15502_v23, %v2512_v48  ;;  %v2518_v30 = vshrl.u32 %v15482_v12, %v2512_v48  ;;  %v2523_v2 = vshll.u32 %v15480_v17, %v2511_v22 }
 0x1d8   : > { %10683 = vcosq.f32 %v2689_v13  ;;  %v2352_v6 = vshll.u32 %v12392_v54, 30  ;;  %v2521_v49 = vshrl.u32 %v15480_v17, %v2512_v48  ;;  %v453_v25 = vrot.slane %v12350_v8, 7 }
 0x1d9   : > { %10685 = vsinq.f32 %v2689_v13  ;;  %v2513_v24 = vshrl.u32 %v15335_v10, %v2512_v48  ;;  %v2516_v63 = vor.u32 %v2515_v62, %v2514_v33  ;;  %v2524_v26 = vshrl.u32 %v15483_v27, %v2512_v48 }
 0x1da   : > { %v12407_v57 = vsub.s32 %v2349_v44, %v2352_v6  ;;  %v2519_v4 = vor.u32 %v2518_v30, %v2517_v39  ;;  %v2522_v29 = vor.u32 %v2521_v49, %v2520_v37  ;;  %v2526_v42 = vshll.u32 %v15483_v27, %v2511_v22 }
 0x1db   : > { %v2525_v60 = vor.u32 %v2524_v26, %v2523_v2  ;;  %v2527_v50 = vshrl.u32 %v15484_v28, %v2512_v48  ;;  %vm2529_vm14 = vcmp.lt.s32.totalorder %v2510_v9, 1  ;;  %v15339_v35 = vrot.slane %v12350_v8, 1 }
 0x1dc   : > { %vm2700_vm15 = vcmp.eq.s32.totalorder %v12381_v0, 2  ;;  %vm2291_vm11 = vcmp.lt.s32.totalorder %v12181_v16, 0  ;;  %v2355_v33 = vsub.s32 0, %v12407_v57  ;;  %vm2531_vm9 = vcmp.lt.s32.totalorder %v2510_v9, 3 }
 0x1dd   : > { %vm15503_vm10 = vcmask 1042432   ;;  %vm15504_vm13 = vcmask 1040384   ;;  %vm2697_vm6 = vcmp.eq.s32.totalorder %v12381_v0, 0  ;;  %v2528_v22 = vor.u32 %v2527_v50, %v2526_v42 }
 0x1de   : > { %v526_v44 = vsel %vm15503_vm10, %v12350_v8, %v421_v15  ;;  %v544_v39 = vsel %vm15504_vm13, %v437_v32, %v453_v25  ;;  %vm2530_vm7 = vcmp.lt.s32.totalorder %v2510_v9, 2  ;;  %vm2532_vm2 = vcmp.lt.s32.totalorder %v2510_v9, 4 }
 0x1df   : > { %v2533_v48 = vsel %vm2529_vm14, %v2513_v24, %v2516_v63  ;;  %vm2696_vm4 = vcmp.lt.s32.totalorder %v12381_v0, 2  ;;  %v9695_v37 = vmin.u32 %v2355_v33, %v12407_v57  ;;  %v2534_v13 = vsel %vm2532_vm2, %v2522_v29, 2102212464 }
 0x1e0   : > { %v2537_v62 = vsel %vm2529_vm14, %v2516_v63, %v2519_v4  ;;  %v2538_v30 = vsel %vm2532_vm2, %v2525_v60, 920167782  ;;  %vm15346_vm1 = vweird.f32 %v11982_v7  ;;  %v2535_v15 = vsel %vm2531_vm9, %v2519_v4, %v2534_v13 }
 0x1e1   : > { %v2539_v2 = vsel %vm2531_vm9, %v2522_v29, %v2538_v30  ;;  %v2541_v50 = vsel %vm2529_vm14, %v2519_v4, %v2522_v29  ;;  %v2542_v42 = vsel %vm2532_vm2, %v2528_v22, 1326507024  ;;  %v2357_v6 = vclz %v9695_v37 }
 0x1e2   : > { %v2545_v49 = vshll.u32 %v2505_v19, 8  ;;  %vm15505_vm0 = vcmask 1045504   ;;  %v553_v24 = vsel %vm547_vm3, %v544_v39, %v11934_v47  ;;  %v2375_v26 = vsub.s32 4, %v12392_v54  ;;  %v12434_v10 = vpop.eup %10683 }
 0x1e3   : > { %v535_v25 = vsel %vm15505_vm0, %v526_v44, %v437_v32  ;;  %v2536_v63 = vsel %vm2530_vm7, %v2533_v48, %v2535_v15  ;;  %v2540_v33 = vsel %vm2530_vm7, %v2537_v62, %v2539_v2  ;;  %v2543_v13 = vsel %vm2531_vm9, %v2525_v60, %v2542_v42  ;;  %15506 = vst [vmem:[#allocation21_spill] sm:$0xff] %v12434_v10  ;;  %v12441_v32 = vpop.eup %10685 }
 0x1e4   : > { %v9696_v30 = vadd.s32 4294967294, %v2357_v6  ;;  %v2544_v4 = vsel %vm2530_vm7, %v2541_v50, %v2543_v13  ;;  %v12437_v29 = vmul.u32.u64.low %v2545_v49, %v2540_v33  ;;  %v12438_v19 = vmul.u32.u64.high %v2545_v49, %v2540_v33, %v12437_v29  ;;  %15507 = vst [vmem:[#allocation22_spill] sm:$0xff] %v12441_v32 }
 0x1e5   : > { %v15337_v44 = vxor.u32 2147483648, %v12434_v10  ;;  %v12444_v39 = vmul.u32.u64.low %v2545_v49, %v2544_v4  ;;  %v12445_v22 = vmul.u32.u64.high %v2545_v49, %v2544_v4, %v12444_v39  ;;  %vm15508_vm14 = vcmask 1046528  }
 0x1e6   : > { %v562_v60 = vsel %vm15508_vm14, %v553_v24, %v15339_v35  ;;  %v15338_v48 = vxor.u32 2147483648, %v12441_v32  ;;  %v2345_v9 = vadd.s32 %v12338_v53, %v12344_v5  ;;  %vm9697_vm9 = vcmp.lt.s32.totalorder %v9696_v30, 0  ;;  %vm15512_vm10 = vmmov %vm15508_vm14 }
 0x1e7   : > { %v12454_v37 = vmul.f32 %v11118_v45, %v535_v25  ;;  %v2702_v62 = vsel %vm2700_vm15, %v15337_v44, %v12441_v32  ;;  %v2360_v15 = vsel %vm9697_vm9, 0, %v9696_v30  ;;  %v2376_v2 = vsel %vm2291_vm11, %v2375_v26, %v12392_v54 }
 0x1e8   : > { %v2552_v50 = vmul.u32 %v2545_v49, %v2536_v63  ;;  %v2699_v53 = vsel %vm2697_vm6, %v12434_v10, %v15338_v48  ;;  %v2361_v5 = vsub.s32 32, %v2360_v15  ;;  %v2365_v42 = vsub.s32 4294967266, %v2360_v15 }
 0x1e9   : > { %15509 = vst [vmem:[#allocation23_spill] sm:$0xff] %v12454_v37  ;;  %v12470_v6 = vmul.f32 %v11132_v51, %v562_v60  ;;  %v2703_v25 = vsel %vm2696_vm4, %v2699_v53, %v2702_v62  ;;  %v2362_v24 = vshll.u32 %v12407_v57, %v2360_v15  ;;  %vm2554_vm15 = vc.u32 %v12445_v22, %v12437_v29 }
 0x1ea   : > { %v2555_v54 = vadd.s32 1, %v12438_v19  ;;  %v2704_v49 = vsel %vm15346_vm1, nan, %v2703_v25  ;;  %v2363_v26 = vshrl.u32 %v2345_v9, %v2361_v5  ;;  %v2366_v63 = vadd.s32 127, %v2365_v42 }
 0x1eb   : > { %v15341_v33 = vand.u32 2147483647, %v12454_v37  ;;  %v15510_v13 = vand.u32 2139095040, %v12257_v18  ;;  %v15511_v0 = vrot.slane %v11941_v31, 1  ;;  %5751 = vmatprep.subr.mxu1 %v2704_v49  ;;  %v1148_v39 = vand.u32 2139095040, %v12454_v37 }
 0x1ec   : > { %v2556_v4 = vsel %vm2554_vm15, %v2555_v54, %v12438_v19  ;;  %v15513_v60 = vand.u32 2147483647, %v12181_v16  ;;  %v2364_v62 = vor.u32 %v2363_v26, %v2362_v24  ;;  %v2367_v15 = vshll.u32 %v2366_v63, 23 }
 0x1ed   : > { %v1045_v30 = vshrl.u32 %v15510_v13, 23  ;;  %v563_v57 = vsel %vm15512_vm10, %v12270_v46, %v15511_v0  ;;  %v2557_v53 = vadd.s32 %v2556_v4, %v2552_v50  ;;  %v1149_v42 = vshrl.u32 %v1148_v39, 23 }
 0x1ee   : > { %vm12491_vm13 = vcmp.le.f32.partialorder %v15513_v60, 0.7853982  ;;  %v1152_v46 = vand.u32 8388607, %v15341_v33  ;;  %v15340_v19 = vand.u32 2147483647, %v12470_v6  ;;  %v12507_v50 = vmul.f32 %v11132_v51, %v12279_v58 }
 0x1ef   : > { %v12497_v5 = vsel %vm12491_vm13, 0, %v2376_v2  ;;  %v15517_v25 = vand.u32 2139095040, %v12261_v21  ;;  %v2368_v49 = vor.u32 4788187, %v2367_v15  ;;  %v2558_v13 = vadd.s32 536870912, %v2557_v53 }
 0x1f0   : > { %15516 = vst [vmem:[#allocation24_spill] sm:$0xff] %v12497_v5  ;;  %v1980_v0 = vand.u32 2139095040, %v12470_v6  ;;  %15518 = vst [vmem:[#allocation25_spill] sm:$0xff] %v12507_v50  ;;  %v12510_v2 = vmul.f32 %v11132_v51, %v563_v57  ;;  %v9650_v24 = vadd.s32 4294967169, %v1149_v42  ;;  %v1984_v26 = vand.u32 8388607, %v15340_v19 }
 0x1f1   : > { %v1253_v54 = vshrl.u32 %v15517_v25, 23  ;;  %v2369_v63 = vand.u32 2147483647, %v2368_v49  ;;  %v2371_v4 = vcvt.s32.f32 %v2364_v62  ;;  %v2382_v39 = vadd.s32 3, %v12497_v5 }
 0x1f2   : > { %15519 = vst [vmem:[#allocation26_spill] sm:$0xff] %v12510_v2  ;;  %v2559_v60 = vshrl.u32 %v2558_v13, 30  ;;  %v12515_v15 = vadd.s32 4294967169, %v1045_v30  ;;  %v1153_v25 = vor.u32 8388608, %v1152_v46  ;;  %v1155_v44 = vadd.s32 1, %v9650_v24 }
 0x1f3   : > { %v12519_v58 = vcombine.high %v11941_v31, %v11941_v31  ;;  %v12521_v48 = vadd.s32 4294967169, %v1253_v54  ;;  %v2372_v57 = vmul.f32 %v2371_v4, %v2369_v63  ;;  %v1981_v35 = vshrl.u32 %v1980_v0, 23 }
 0x1f4   : > { %v2560_v42 = vshll.u32 %v2559_v60, 30  ;;  %vm2499_vm6 = vcmp.lt.s32.totalorder %v12273_v34, 0  ;;  %vm1156_vm7 = vcmp.gt.s32.totalorder %v1155_v44, 0  ;;  %v1985_v62 = vor.u32 8388608, %v1984_v26 }
 0x1f5   : > { %v2373_v49 = vxor.u32 2147483648, %v2372_v57  ;;  %v12525_v30 = vand.u32 3, %v2382_v39  ;;  %v1157_v13 = vsel %vm1156_vm7, %v1155_v44, 0  ;;  %v2553_v24 = vadd.s32 %v12437_v29, %v12445_v22 }
 0x1f6   : > { %v12527_v46 = vsub.s32 %v2557_v53, %v2560_v42  ;;  %v1159_v54 = vand.u32 31, %v1157_v13  ;;  %v12531_v33 = vshll.u32 %v1153_v25, 8  ;;  %v2583_v26 = vsub.s32 4, %v2559_v60 }
 0x1f7   : > { %v2374_v63 = vsel %vm2291_vm11, %v2373_v49, %v2372_v57  ;;  %v9682_v19 = vadd.s32 4294967169, %v1981_v35  ;;  %v12540_v39 = vshll.u32 %v1985_v62, 8  ;;  %v12544_v25 = vshrl.u32 %v1157_v13, 5 }
 0x1f8   : > { %v2563_v4 = vsub.s32 0, %v12527_v46  ;;  %v2377_v53 = vsel %vm12491_vm13, %v12181_v16, %v2374_v63  ;;  %v1160_v44 = vsub.s32 32, %v1159_v54  ;;  %v15520_v42 = vmov 683565275  }
 0x1f9   : > { %10687 = vcosq.f32 %v2377_v53  ;;  %v1162_v57 = vshll.u32 %v15520_v42, %v1159_v54  ;;  %v1165_v35 = vshll.u32 %v15502_v23, %v1159_v54  ;;  %v12552_v62 = vsel %vm2499_vm6, %v2583_v26, %v2559_v60 }
 0x1fa   : > { %v9703_v22 = vmin.u32 %v2563_v4, %v12527_v46  ;;  %10689 = vsinq.f32 %v2377_v53  ;;  %v1163_v49 = vshrl.u32 %v15502_v23, %v1160_v44  ;;  %v1166_v9 = vshrl.u32 %v15482_v12, %v1160_v44 }
 0x1fb   : > { %v1168_v29 = vshll.u32 %v15482_v12, %v1159_v54  ;;  %v1169_v41 = vshrl.u32 %v15480_v17, %v1160_v44  ;;  %v1171_v53 = vshll.u32 %v15480_v17, %v1159_v54  ;;  %vm2388_vm11 = vcmp.eq.s32.totalorder %v12525_v30, 2 }
 0x1fc   : > { %v2565_v63 = vclz %v9703_v22  ;;  %v1164_v13 = vor.u32 %v1163_v49, %v1162_v57  ;;  %v1167_v0 = vor.u32 %v1166_v9, %v1165_v35  ;;  %v1172_v10 = vshrl.u32 %v15483_v27, %v1160_v44 }
 0x1fd   : > { %v1174_v22 = vshll.u32 %v15483_v27, %v1159_v54  ;;  %v1175_v60 = vshrl.u32 %v15484_v28, %v1160_v44  ;;  %vm2385_vm2 = vcmp.eq.s32.totalorder %v12525_v30, 0  ;;  %v1161_v26 = vshrl.u32 %v15520_v42, %v1160_v44 }
 0x1fe   : > { %v9704_v7 = vadd.s32 4294967294, %v2565_v63  ;;  %v1170_v4 = vor.u32 %v1169_v41, %v1168_v29  ;;  %vm1177_vm4 = vcmp.lt.s32.totalorder %v12544_v25, 1  ;;  %v1987_v57 = vadd.s32 1, %v9682_v19 }
 0x1ff   : > { %vm2384_vm0 = vcmp.lt.s32.totalorder %v12525_v30, 2  ;;  %v1173_v49 = vor.u32 %v1172_v10, %v1171_v53  ;;  %v1176_v35 = vor.u32 %v1175_v60, %v1174_v22  ;;  %vm1178_vm9 = vcmp.lt.s32.totalorder %v12544_v25, 2 }
 0x200   : > { %vm9705_vm14 = vcmp.lt.s32.totalorder %v9704_v7, 0  ;;  %vm15383_vm15 = vweird.f32 %v12181_v16  ;;  %v15521_v54 = vand.u32 2147483647, %v12273_v34  ;;  %vm5609_vm13 = vcmask 195584  }
 0x201   : > { %v2568_v44 = vsel %vm9705_vm14, 0, %v9704_v7  ;;  %vm1179_vm7 = vcmp.lt.s32.totalorder %v12544_v25, 3  ;;  %vm1180_vm1 = vcmp.lt.s32.totalorder %v12544_v25, 4  ;;  %v1181_v10 = vsel %vm1177_vm4, %v1161_v26, %v1164_v13 }
 0x202   : > { %vm12570_vm10 = vcmp.le.f32.partialorder %v15521_v54, 0.7853982  ;;  %v2569_v41 = vsub.s32 32, %v2568_v44  ;;  %v2573_v19 = vsub.s32 4294967266, %v2568_v44  ;;  %v1182_v29 = vsel %vm1180_vm1, %v1170_v4, 2102212464 }
 0x203   : > { %v1185_v63 = vsel %vm1177_vm4, %v1164_v13, %v1167_v0  ;;  %v2570_v53 = vshll.u32 %v12527_v46, %v2568_v44  ;;  %v1186_v22 = vsel %vm1180_vm1, %v1173_v49, 920167782  ;;  %v1189_v7 = vsel %vm1177_vm4, %v1167_v0, %v1170_v4  ;;  %v12583_v54 = vpop.eup %10687 }
 0x204   : > { %v1190_v60 = vsel %vm1180_vm1, %v1176_v35, 1326507024  ;;  %15524 = vst [vmem:[#allocation27_spill] sm:$0xff] %v12583_v54  ;;  %v2571_v32 = vshrl.u32 %v2553_v24, %v2569_v41  ;;  %v2574_v14 = vadd.s32 127, %v2573_v19  ;;  %v1187_v26 = vsel %vm1179_vm7, %v1170_v4, %v1186_v22  ;;  %v12589_v20 = vpop.eup %10689  ;;  %v12622_v22 = vld [vmem:[%s15526_s3] sm:$0xff] }
 0x205   : > { %v1191_v43 = vsel %vm1179_vm7, %v1173_v49, %v1190_v60  ;;  %15525 = vst [vmem:[#allocation28_spill] sm:$0xff] %v12589_v20  ;;  %v15352_v13 = vxor.u32 2147483648, %v12583_v54  ;;  %v1183_v46 = vsel %vm1179_vm7, %v1167_v0, %v1182_v29  ;;  %v1188_v35 = vsel %vm1178_vm9, %v1185_v63, %v1187_v26 }
 0x206   : > { %v1192_v24 = vsel %vm1178_vm9, %v1189_v7, %v1191_v43  ;;  %v15353_v44 = vxor.u32 2147483648, %v12589_v20  ;;  %v2572_v41 = vor.u32 %v2571_v32, %v2570_v53  ;;  %v2575_v4 = vshll.u32 %v2574_v14, 23 }
 0x207   : > { %vm1988_vm1 = vcmp.gt.s32.totalorder %v1987_v57, 0  ;;  %v2390_v49 = vsel %vm2388_vm11, %v15352_v13, %v12589_v20  ;;  %v12605_v19 = vmul.u32.u64.low %v12531_v33, %v1192_v24  ;;  %v12606_v0 = vmul.u32.u64.high %v12531_v33, %v1192_v24, %v12605_v19 }
 0x208   : > { %v1989_v29 = vsel %vm1988_vm1, %v1987_v57, 0  ;;  %v2387_v43 = vsel %vm2385_vm2, %v12583_v54, %v15353_v44  ;;  %v2576_v32 = vor.u32 4788187, %v2575_v4  ;;  %v1184_v14 = vsel %vm1178_vm9, %v1181_v10, %v1183_v46 }
 0x209   : > { %v12615_v63 = vshrl.u32 %v1989_v29, 5  ;;  %v2391_v53 = vsel %vm2384_vm0, %v2387_v43, %v2390_v49  ;;  %v12625_v57 = vmul.u32.u64.low %v12531_v33, %v1188_v35  ;;  %v12626_v7 = vmul.u32.u64.high %v12531_v33, %v1188_v35, %v12625_v57 }
 0x20a   : > { %v1991_v60 = vand.u32 31, %v1989_v29  ;;  %v2392_v25 = vsel %vm15383_vm15, nan, %v2391_v53  ;;  %v2577_v10 = vand.u32 2147483647, %v2576_v32  ;;  %v2579_v26 = vcvt.s32.f32 %v2572_v41 }
 0x20b   : > { %v12634_v30 = vsel %vm12570_vm10, 0, %v12552_v62  ;;  %5639 = vmatpush1.msra.mxu0 %v2392_v25  ;;  %v1200_v46 = vmul.u32 %v12531_v33, %v1184_v14  ;;  %vm1202_vm11 = vc.u32 %v12606_v0, %v12625_v57  ;;  %vm2009_vm2 = vcmp.lt.s32.totalorder %v12615_v63, 1 }
 0x20c   : > { %15527 = vst [vmem:[#allocation29_spill] sm:$0xff] %v12634_v30  ;;  %v1992_v35 = vsub.s32 32, %v1991_v60  ;;  %v2580_v24 = vmul.f32 %v2579_v26, %v2577_v10  ;;  %9822 = vmatmul.mubr.msk.f32.vlgmr.msra.gmra.mrb[0].mxu0 %vm5609_vm13, %v12622_v22  ;;  %v1994_v41 = vshll.u32 %v15520_v42, %v1991_v60  ;;  %v1997_v4 = vshll.u32 %v15502_v23, %v1991_v60 }
 0x20d   : > { %v2000_v62 = vshll.u32 %v15482_v12, %v1991_v60  ;;  %v1203_v49 = vadd.s32 1, %v12626_v7  ;;  %v2003_v29 = vshll.u32 %v15480_v17, %v1991_v60  ;;  %v15528_v43 = vmov 0.0  }
 0x20e   : > { %v1995_v33 = vshrl.u32 %v15502_v23, %v1992_v35  ;;  %v1998_v19 = vshrl.u32 %v15482_v12, %v1992_v35  ;;  %5704 = vmatprep.mubr.f32.mxu0 %v15528_v43  ;;  %v2581_v32 = vxor.u32 2147483648, %v2580_v24  ;;  %v2001_v14 = vshrl.u32 %v15480_v17, %v1992_v35 }
 0x20f   : > { %v2004_v53 = vshrl.u32 %v15483_v27, %v1992_v35  ;;  %v2006_v25 = vshll.u32 %v15483_v27, %v1991_v60  ;;  %v1204_v10 = vsel %vm1202_vm11, %v1203_v49, %v12626_v7  ;;  %v2007_v44 = vshrl.u32 %v15484_v28, %v1992_v35 }
 0x210   : > { %v1996_v26 = vor.u32 %v1995_v33, %v1994_v41  ;;  %v1999_v13 = vor.u32 %v1998_v19, %v1997_v4  ;;  %v2582_v16 = vsel %vm2499_vm6, %v2581_v32, %v2580_v24  ;;  %v1205_v59 = vadd.s32 %v1204_v10, %v1200_v46 }
 0x211   : > { %v2002_v54 = vor.u32 %v2001_v14, %v2000_v62  ;;  %v2005_v20 = vor.u32 %v2004_v53, %v2003_v29  ;;  %v2585_v36 = vsel %vm12570_vm10, %v12273_v34, %v2582_v16  ;;  %v2008_v60 = vor.u32 %v2007_v44, %v2006_v25 }
 0x212   : > { %vm2010_vm4 = vcmp.lt.s32.totalorder %v12615_v63, 2  ;;  %vm2012_vm0 = vcmp.lt.s32.totalorder %v12615_v63, 4  ;;  %10691 = vcosq.f32 %v2585_v36  ;;  %v1206_v7 = vadd.s32 536870912, %v1205_v59 }
 0x213   : > { %v1993_v41 = vshrl.u32 %v15520_v42, %v1992_v35  ;;  %v2014_v4 = vsel %vm2012_vm0, %v2002_v54, 2102212464  ;;  %10693 = vsinq.f32 %v2585_v36  ;;  %vm2011_vm6 = vcmp.lt.s32.totalorder %v12615_v63, 3 }
 0x214   : > { %v2017_v46 = vsel %vm2009_vm2, %v1996_v26, %v1999_v13  ;;  %v2018_v24 = vsel %vm2012_vm0, %v2005_v20, 920167782  ;;  %v1207_v62 = vshrl.u32 %v1206_v7, 30  ;;  %v2021_v44 = vsel %vm2009_vm2, %v1999_v13, %v2002_v54 }
 0x215   : > { %v2013_v16 = vsel %vm2009_vm2, %v1993_v41, %v1996_v26  ;;  %v2019_v9 = vsel %vm2011_vm6, %v2002_v54, %v2018_v24  ;;  %v2015_v49 = vsel %vm2011_vm6, %v1999_v13, %v2014_v4  ;;  %v2022_v33 = vsel %vm2012_vm0, %v2008_v60, 1326507024 }
 0x216   : > { %v2020_v35 = vsel %vm2010_vm4, %v2017_v46, %v2019_v9  ;;  %v15529_v36 = vrot.slane %v12519_v58, 5  ;;  %vm15530_vm14 = vcmask 1042432   ;;  %v2590_v29 = vadd.s32 3, %v12634_v30 }
 0x217   : > { %v1208_v32 = vshll.u32 %v1207_v62, 30  ;;  %v2023_v14 = vsel %vm2011_vm6, %v2005_v20, %v2022_v33  ;;  %v15531_v53 = vrot.slane %v12519_v58, 2  ;;  %vm15532_vm9 = vcmask 1045504  }
 0x218   : > { %v528_v19 = vsel %vm15530_vm14, %v12519_v58, %v15529_v36  ;;  %v2084_v54 = vand.u32 2139095040, %v12510_v2  ;;  %v2024_v13 = vsel %vm2010_vm4, %v2021_v44, %v2023_v14  ;;  %v2016_v7 = vsel %vm2010_vm4, %v2013_v16, %v2015_v49 }
 0x219   : > { %v537_v25 = vsel %vm15532_vm9, %v528_v19, %v15531_v53  ;;  %v12687_v10 = vmul.u32.u64.low %v12540_v39, %v2020_v35  ;;  %v12688_v26 = vmul.u32.u64.high %v12540_v39, %v2020_v35, %v12687_v10  ;;  %v12691_v60 = vsub.s32 %v1205_v59, %v1208_v32  ;;  %v10763_v32 = vld [vmem:[%s11102_s16 + $0x18] sm:$0x77] }
 0x21a   : > { %v12696_v20 = vmul.u32.u64.low %v12540_v39, %v2024_v13  ;;  %v12697_v41 = vmul.u32.u64.high %v12540_v39, %v2024_v13, %v12696_v20  ;;  %v12700_v4 = vadd.s32 1, %v12515_v15  ;;  %v12703_v46 = vadd.s32 1, %v12521_v48 }
 0x21b   : > { %v15533_v24 = vrot.slane %v12519_v58, 7  ;;  %v15534_v9 = vmov %v15531_v53  ;;  %vm15535_vm10 = vcmask 1040384   ;;  %v12711_v63 = vmul.f32 %v11118_v45, %v537_v25 }
 0x21c   : > { %v15537_v16 = vand.u32 2139095040, %v12507_v50  ;;  %vm15382_vm7 = vweird.f32 %v12273_v34  ;;  %v2591_v15 = vand.u32 3, %v2590_v29  ;;  %v1211_v49 = vsub.s32 0, %v12691_v60  ;;  %v12723_v36 = vpop.eup %10691 }
 0x21d   : > { %v546_v59 = vsel %vm15535_vm10, %v15534_v9, %v15533_v24  ;;  %15536 = vst [vmem:[#allocation30_spill] sm:$0xff] %v12711_v63  ;;  %vm1147_vm1 = vcmp.lt.s32.totalorder %v12454_v37, 0  ;;  %v2032_v48 = vmul.u32 %v12540_v39, %v2016_v7  ;;  %v2035_v35 = vadd.s32 1, %v12688_v26  ;;  %15538 = vst [vmem:[#allocation31_spill] sm:$0xff] %v12723_v36  ;;  %v12730_v14 = vpop.eup %10693 }
 0x21e   : > { %v12715_v44 = vshrl.u32 %v15537_v16, 23  ;;  %v15364_v33 = vrot.slane %v12519_v58, 1  ;;  %v9651_v45 = vmin.u32 %v1211_v49, %v12691_v60  ;;  %v1231_v19 = vsub.s32 4, %v1207_v62  ;;  %15539 = vst [vmem:[#allocation32_spill] sm:$0xff] %v12730_v14 }
 0x21f   : > { %vm2034_vm11 = vc.u32 %v12697_v41, %v12687_v10  ;;  %v555_v29 = vsel %vm547_vm3, %v546_v59, %v10763_v32  ;;  %v15362_v53 = vxor.u32 2147483648, %v12723_v36  ;;  %v15365_v25 = vand.u32 2147483647, %v12711_v63 }
 0x220   : > { %v2036_v39 = vsel %vm2034_vm11, %v2035_v35, %v12688_v26  ;;  %v1356_v13 = vand.u32 2139095040, %v12711_v63  ;;  %vm2592_vm2 = vcmp.lt.s32.totalorder %v2591_v15, 2  ;;  %v15363_v7 = vxor.u32 2147483648, %v12730_v14 }
 0x221   : > { %vm2596_vm4 = vcmp.eq.s32.totalorder %v2591_v15, 2  ;;  %v1213_v20 = vclz %v9651_v45  ;;  %vm2593_vm0 = vcmp.eq.s32.totalorder %v2591_v15, 0  ;;  %v2037_v9 = vadd.s32 %v2036_v39, %v2032_v48 }
 0x222   : > { %v2598_v24 = vsel %vm2596_vm4, %v15362_v53, %v12730_v14  ;;  %v1357_v59 = vshrl.u32 %v1356_v13, 23  ;;  %v2595_v26 = vsel %vm2593_vm0, %v12723_v36, %v15363_v7  ;;  %v1232_v49 = vsel %vm1147_vm1, %v1231_v19, %v1207_v62 }
 0x223   : > { %v9652_v16 = vadd.s32 4294967294, %v1213_v20  ;;  %vm15540_vm3 = vcmask 1046528   ;;  %v2599_v45 = vsel %vm2592_vm2, %v2595_v26, %v2598_v24  ;;  %v2038_v15 = vadd.s32 536870912, %v2037_v9 }
 0x224   : > { %v564_v35 = vsel %vm15540_vm3, %v555_v29, %v15364_v33  ;;  %v9658_v32 = vadd.s32 4294967169, %v1357_v59  ;;  %v1360_v53 = vand.u32 8388607, %v15365_v25  ;;  %vm1052_vm6 = vcmp.gt.s32.totalorder %v12700_v4, 0 }
 0x225   : > { %v2600_v48 = vsel %vm15382_vm7, nan, %v2599_v45  ;;  %v15541_v39 = vand.u32 2147483647, %v12454_v37  ;;  %vm9653_vm9 = vcmp.lt.s32.totalorder %v9652_v16, 0  ;;  %v1201_v62 = vadd.s32 %v12625_v57, %v12606_v0 }
 0x226   : > { %5752 = vmatpush1.msra.mxu1 %v2600_v48  ;;  %v1216_v19 = vsel %vm9653_vm9, 0, %v9652_v16  ;;  %v2039_v29 = vshrl.u32 %v2038_v15, 30  ;;  %v1363_v20 = vadd.s32 1, %v9658_v32  ;;  %v12768_v45 = vmul.f32 %v11132_v51, %v564_v35 }
 0x227   : > { %vm12755_vm14 = vcmp.le.f32.partialorder %v15541_v39, 0.7853982  ;;  %9830 = vmatmul.mubr.msk.f32.vlgmr.msra.gmra.mrb[0].mxu1 %vm5609_vm13, %v12622_v22  ;;  %v1217_v24 = vsub.s32 32, %v1216_v19  ;;  %v1221_v59 = vsub.s32 4294967266, %v1216_v19  ;;  %v1218_v48 = vshll.u32 %v12691_v60, %v1216_v19 }
 0x228   : > { %v12765_v26 = vsel %vm12755_vm14, 0, %v1232_v49  ;;  %15545 = vst [vmem:[#allocation34_spill] sm:$0xff] %v12768_v45  ;;  %v2040_v39 = vshll.u32 %v2039_v29, 30  ;;  %v1361_v7 = vor.u32 8388608, %v1360_v53  ;;  %vm1364_vm10 = vcmp.gt.s32.totalorder %v1363_v20, 0  ;;  %5817 = vmatprep.mubr.f32.mxu1 %v15528_v43 }
 0x229   : > { %15544 = vst [vmem:[#allocation33_spill] sm:$0xff] %v12765_v26  ;;  %v1219_v0 = vshrl.u32 %v1201_v62, %v1217_v24  ;;  %v1222_v57 = vadd.s32 127, %v1221_v59  ;;  %v2063_v16 = vsub.s32 4, %v2039_v29  ;;  %v1365_v22 = vsel %vm1364_vm10, %v1363_v20, 0 }
 0x22a   : > { %v12775_v15 = vsel %vm1052_vm6, %v12700_v4, 0  ;;  %v12779_v51 = vshrl.u32 %v2084_v54, 23  ;;  %v12781_v49 = vsub.s32 %v2037_v9, %v2040_v39  ;;  %v1367_v60 = vand.u32 31, %v1365_v22 }
 0x22b   : > { %v1220_v53 = vor.u32 %v1219_v0, %v1218_v48  ;;  %v1223_v35 = vshll.u32 %v1222_v57, 23  ;;  %v12784_v32 = vadd.s32 3, %v12765_v26  ;;  %vm1979_vm11 = vcmp.lt.s32.totalorder %v12470_v6, 0 }
 0x22c   : > { %v2033_v62 = vadd.s32 %v12687_v10, %v12697_v41  ;;  %v2043_v4 = vsub.s32 0, %v12781_v49  ;;  %v1368_v19 = vsub.s32 32, %v1367_v60  ;;  %v2188_v20 = vand.u32 2139095040, %v12768_v45 }
 0x22d   : > { %v1224_v54 = vor.u32 4788187, %v1223_v35  ;;  %v2064_v9 = vsel %vm1979_vm11, %v2063_v16, %v2039_v29  ;;  %v12793_v24 = vshll.u32 %v1361_v7, 8  ;;  %v1227_v48 = vcvt.s32.f32 %v1220_v53 }
 0x22e   : > { %v9683_v39 = vmin.u32 %v2043_v4, %v12781_v49  ;;  %v1366_v0 = vshrl.u32 %v1365_v22, 5  ;;  %v1371_v57 = vshrl.u32 %v15502_v23, %v1368_v19  ;;  %v1374_v41 = vshrl.u32 %v15482_v12, %v1368_v19 }
 0x22f   : > { %v1225_v10 = vand.u32 2147483647, %v1224_v54  ;;  %v1376_v33 = vshll.u32 %v15482_v12, %v1367_v60  ;;  %v1377_v35 = vshrl.u32 %v15480_v17, %v1368_v19  ;;  %v1370_v29 = vshll.u32 %v15520_v42, %v1367_v60 }
 0x230   : > { %v2045_v25 = vclz %v9683_v39  ;;  %v1373_v7 = vshll.u32 %v15502_v23, %v1367_v60  ;;  %v2189_v16 = vshrl.u32 %v2188_v20, 23  ;;  %v1369_v53 = vshrl.u32 %v15520_v42, %v1368_v19 }
 0x231   : > { %v1228_v59 = vmul.f32 %v1227_v48, %v1225_v10  ;;  %v1378_v4 = vor.u32 %v1377_v35, %v1376_v33  ;;  %v1379_v22 = vshll.u32 %v15480_v17, %v1367_v60  ;;  %v1372_v54 = vor.u32 %v1371_v57, %v1370_v29 }
 0x232   : > { %v9684_v34 = vadd.s32 4294967294, %v2045_v25  ;;  %v1380_v36 = vshrl.u32 %v15483_v27, %v1368_v19  ;;  %v1383_v14 = vshrl.u32 %v15484_v28, %v1368_v19  ;;  %v15546_v39 = vand.u32 2147483647, %v12470_v6 }
 0x233   : > { %v1229_v30 = vxor.u32 2147483648, %v1228_v59  ;;  %v1375_v20 = vor.u32 %v1374_v41, %v1373_v7  ;;  %v1382_v48 = vshll.u32 %v15483_v27, %v1367_v60  ;;  %vm1385_vm4 = vcmp.lt.s32.totalorder %v1366_v0, 1 }
 0x234   : > { %vm12809_vm2 = vcmp.le.f32.partialorder %v15546_v39, 0.7853982  ;;  %vm9685_vm0 = vcmp.lt.s32.totalorder %v9684_v34, 0  ;;  %v1381_v33 = vor.u32 %v1380_v36, %v1379_v22  ;;  %vm1386_vm3 = vcmp.lt.s32.totalorder %v1366_v0, 2 }
 0x235   : > { %vm1388_vm6 = vcmp.lt.s32.totalorder %v1366_v0, 4  ;;  %v1230_v25 = vsel %vm1147_vm1, %v1229_v30, %v1228_v59  ;;  %v2048_v57 = vsel %vm9685_vm0, 0, %v9684_v34  ;;  %v1384_v19 = vor.u32 %v1383_v14, %v1382_v48 }
 0x236   : > { %v1390_v10 = vsel %vm1388_vm6, %v1378_v4, 2102212464  ;;  %v1233_v35 = vsel %vm12755_vm14, %v12454_v37, %v1230_v25  ;;  %v2049_v29 = vsub.s32 32, %v2048_v57  ;;  %v2053_v41 = vsub.s32 4294967266, %v2048_v57 }
 0x237   : > { %vm1387_vm9 = vcmp.lt.s32.totalorder %v1366_v0, 3  ;;  %v2050_v60 = vshll.u32 %v12781_v49, %v2048_v57  ;;  %v1389_v36 = vsel %vm1385_vm4, %v1369_v53, %v1372_v54  ;;  %v1393_v7 = vsel %vm1385_vm4, %v1372_v54, %v1375_v20 }
 0x238   : > { %v1394_v22 = vsel %vm1388_vm6, %v1381_v33, 920167782  ;;  %10695 = vcosq.f32 %v1233_v35  ;;  %v2051_v34 = vshrl.u32 %v2033_v62, %v2049_v29  ;;  %v2054_v30 = vadd.s32 127, %v2053_v41 }
 0x239   : > { %v1391_v14 = vsel %vm1387_vm9, %v1375_v20, %v1390_v10  ;;  %10697 = vsinq.f32 %v1233_v35  ;;  %v1395_v13 = vsel %vm1387_vm9, %v1378_v4, %v1394_v22  ;;  %v1397_v59 = vsel %vm1385_vm4, %v1375_v20, %v1378_v4 }
 0x23a   : > { %v1398_v39 = vsel %vm1388_vm6, %v1384_v19, 1326507024  ;;  %v2052_v48 = vor.u32 %v2051_v34, %v2050_v60  ;;  %v2055_v49 = vshll.u32 %v2054_v30, 23  ;;  %v1396_v53 = vsel %vm1386_vm3, %v1393_v7, %v1395_v13 }
 0x23b   : > { %v1399_v54 = vsel %vm1387_vm9, %v1381_v33, %v1398_v39  ;;  %v12832_v62 = vmul.u32.u64.low %v12793_v24, %v1396_v53  ;;  %v12833_v57 = vmul.u32.u64.high %v12793_v24, %v1396_v53, %v12832_v62  ;;  %v9690_v10 = vadd.s32 4294967169, %v2189_v16 }
 0x23c   : > { %v1400_v25 = vsel %vm1386_vm3, %v1397_v59, %v1399_v54  ;;  %v2056_v35 = vor.u32 4788187, %v2055_v49  ;;  %v12838_v4 = vsel %vm12809_vm2, 0, %v2064_v9  ;;  %v12845_v29 = vand.u32 31, %v12775_v15 }
 0x23d   : > { %15549 = vst [vmem:[#allocation35_spill] sm:$0xff] %v12838_v4  ;;  %v12841_v20 = vmul.u32.u64.low %v12793_v24, %v1400_v25  ;;  %v12842_v19 = vmul.u32.u64.high %v12793_v24, %v1400_v25, %v12841_v20  ;;  %v9678_v33 = vadd.s32 4294967169, %v12715_v44  ;;  %v1392_v41 = vsel %vm1386_vm3, %v1389_v36, %v1391_v14 }
 0x23e   : > { %v2195_v60 = vadd.s32 1, %v9690_v10  ;;  %v12850_v7 = vand.u32 3, %v12784_v32  ;;  %v2057_v16 = vand.u32 2147483647, %v2056_v35  ;;  %v2059_v22 = vcvt.s32.f32 %v2052_v48 }
 0x23f   : > { %v15374_v9 = vand.u32 2147483647, %v12257_v18  ;;  %v2070_v34 = vadd.s32 3, %v12838_v4  ;;  %v1411_v30 = vadd.s32 1, %v12833_v57  ;;  %v15550_v13 = vand.u32 2147483647, %v12768_v45 }
 0x240   : > { %vm2196_vm1 = vcmp.gt.s32.totalorder %v2195_v60, 0  ;;  %v2060_v39 = vmul.f32 %v2059_v22, %v2057_v16  ;;  %v1408_v44 = vmul.u32 %v12793_v24, %v1392_v41  ;;  %vm1410_vm14 = vc.u32 %v12842_v19, %v12832_v62 }
 0x241   : > { %v2192_v59 = vand.u32 8388607, %v15550_v13  ;;  %v2197_v32 = vsel %vm2196_vm1, %v2195_v60, 0  ;;  %v12861_v0 = vshrl.u32 %v12775_v15, 5  ;;  %v12863_v36 = vadd.s32 1, %v9678_v33 }
 0x242   : > { %v1412_v14 = vsel %vm1410_vm14, %v1411_v30, %v12833_v57  ;;  %v2199_v48 = vand.u32 31, %v2197_v32  ;;  %v12866_v49 = vpop.eup %10695  ;;  %vm1241_vm10 = vcmp.eq.s32.totalorder %v12850_v7, 0  ;;  %vm1244_vm4 = vcmp.eq.s32.totalorder %v12850_v7, 2 }
 0x243   : > { %15551 = vst [vmem:[#allocation36_spill] sm:$0xff] %v12866_v49  ;;  %v2061_v53 = vxor.u32 2147483648, %v2060_v39  ;;  %v1413_v24 = vadd.s32 %v1412_v14, %v1408_v44  ;;  %v12870_v54 = vpop.eup %10697  ;;  %v12872_v25 = vand.u32 3, %v2070_v34  ;;  %v2193_v10 = vor.u32 8388608, %v2192_v59 }
 0x244   : > { %15552 = vst [vmem:[#allocation37_spill] sm:$0xff] %v12870_v54  ;;  %v2200_v15 = vsub.s32 32, %v2199_v48  ;;  %v12876_v35 = vand.u32 8388607, %v15374_v9  ;;  %v12880_v33 = vshrl.u32 %v2197_v32, 5  ;;  %v12883_v41 = vsub.s32 32, %v12845_v29 }
 0x245   : > { %v2062_v57 = vsel %vm1979_vm11, %v2061_v53, %v2060_v39  ;;  %v1414_v20 = vadd.s32 536870912, %v1413_v24  ;;  %v2202_v22 = vshll.u32 %v15520_v42, %v2199_v48  ;;  %v2205_v13 = vshll.u32 %v15502_v23, %v2199_v48 }
 0x246   : > { %v2065_v16 = vsel %vm12809_vm2, %v12470_v6, %v2062_v57  ;;  %v2203_v34 = vshrl.u32 %v15502_v23, %v2200_v15  ;;  %v2206_v59 = vshrl.u32 %v15482_v12, %v2200_v15  ;;  %vm1240_vm11 = vcmp.lt.s32.totalorder %v12850_v7, 2 }
 0x247   : > { %10699 = vcosq.f32 %v2065_v16  ;;  %v12891_v30 = vshrl.u32 %v1414_v20, 30  ;;  %v2208_v44 = vshll.u32 %v15482_v12, %v2199_v48  ;;  %v2209_v3 = vshrl.u32 %v15480_v17, %v2200_v15 }
 0x248   : > { %10701 = vsinq.f32 %v2065_v16  ;;  %v2204_v14 = vor.u32 %v2203_v34, %v2202_v22  ;;  %v2207_v53 = vor.u32 %v2206_v59, %v2205_v13  ;;  %v2211_v57 = vshll.u32 %v15480_v17, %v2199_v48 }
 0x249   : > { %v1416_v32 = vshll.u32 %v12891_v30, 30  ;;  %v2210_v20 = vor.u32 %v2209_v3, %v2208_v44  ;;  %v2212_v9 = vshrl.u32 %v15483_v27, %v2200_v15  ;;  %v2214_v60 = vshll.u32 %v15483_v27, %v2199_v48 }
 0x24a   : > { %v2215_v26 = vshrl.u32 %v15484_v28, %v2200_v15  ;;  %vm2076_vm2 = vcmp.eq.s32.totalorder %v12872_v25, 2  ;;  %v12907_v39 = vshll.u32 %v2193_v10, 8  ;;  %v1058_v5 = vshll.u32 %v15520_v42, %v12845_v29 }
 0x24b   : > { %v12905_v16 = vsub.s32 %v1413_v24, %v1416_v32  ;;  %v1061_v22 = vshll.u32 %v15502_v23, %v12845_v29  ;;  %vm1237_vm0 = vweird.f32 %v12454_v37  ;;  %v15553_v34 = vxor.u32 2147483648, %v12870_v54 }
 0x24c   : > { %v15554_v24 = vxor.u32 2147483648, %v12866_v49  ;;  %vm2073_vm3 = vcmp.eq.s32.totalorder %v12872_v25, 0  ;;  %v2213_v13 = vor.u32 %v2212_v9, %v2211_v57  ;;  %v2216_v59 = vor.u32 %v2215_v26, %v2214_v60 }
 0x24d   : > { %v1243_v48 = vsel %vm1241_vm10, %v12866_v49, %v15553_v34  ;;  %vm2072_vm6 = vcmp.lt.s32.totalorder %v12872_v25, 2  ;;  %v1419_v44 = vsub.s32 0, %v12905_v16  ;;  %v2201_v3 = vshrl.u32 %v15520_v42, %v2200_v15 }
 0x24e   : > { %v1246_v10 = vsel %vm1244_vm4, %v15554_v24, %v12870_v54  ;;  %vm2217_vm9 = vcmp.lt.s32.totalorder %v12880_v33, 1  ;;  %vm2220_vm1 = vcmp.lt.s32.totalorder %v12880_v33, 4  ;;  %vm2069_vm14 = vweird.f32 %v12470_v6  ;;  %v15641_v6 = vld [vmem:[#allocation18_spill] sm:$0xff] }
 0x24f   : > { %vm2219_vm10 = vcmp.lt.s32.totalorder %v12880_v33, 3  ;;  %v2222_v32 = vsel %vm2220_vm1, %v2210_v20, 2102212464  ;;  %v2225_v34 = vsel %vm2217_vm9, %v2204_v14, %v2207_v53  ;;  %v2226_v24 = vsel %vm2220_vm1, %v2213_v13, 920167782 }
 0x250   : > { %v9659_v9 = vmin.u32 %v1419_v44, %v12905_v16  ;;  %vm2218_vm4 = vcmp.lt.s32.totalorder %v12880_v33, 2  ;;  %v2221_v26 = vsel %vm2217_vm9, %v2201_v3, %v2204_v14  ;;  %v2227_v60 = vsel %vm2219_vm10, %v2210_v20, %v2226_v24 }
 0x251   : > { %v2223_v15 = vsel %vm2219_vm10, %v2207_v53, %v2222_v32  ;;  %v2228_v57 = vsel %vm2218_vm4, %v2225_v34, %v2227_v60  ;;  %v2229_v49 = vsel %vm2217_vm9, %v2207_v53, %v2210_v20  ;;  %v2230_v54 = vsel %vm2220_vm1, %v2216_v59, 1326507024  ;;  %v12940_v4 = vpop.eup %10699 }
 0x252   : > { %vm1260_vm7 = vcmp.gt.s32.totalorder %v12703_v46, 0  ;;  %vm1884_vm15 = vcmp.gt.s32.totalorder %v12863_v36, 0  ;;  %v1247_v14 = vsel %vm1240_vm11, %v1243_v48, %v1246_v10  ;;  %v1409_v44 = vadd.s32 %v12832_v62, %v12842_v19  ;;  %v12950_v24 = vpop.eup %10701 }
 0x253   : > { %v1421_v3 = vclz %v9659_v9  ;;  %v1059_v32 = vshrl.u32 %v15502_v23, %v12883_v41  ;;  %v15384_v53 = vxor.u32 2147483648, %v12940_v4  ;;  %v2231_v20 = vsel %vm2219_vm10, %v2213_v13, %v2230_v54 }
 0x254   : > { %v12956_v59 = vmul.u32.u64.low %v12907_v39, %v2228_v57  ;;  %v12957_v34 = vmul.u32.u64.high %v12907_v39, %v2228_v57, %v12956_v59  ;;  %v15385_v7 = vxor.u32 2147483648, %v12950_v24  ;;  %v2224_v62 = vsel %vm2218_vm4, %v2221_v26, %v2223_v15 }
 0x255   : > { %v9660_v48 = vadd.s32 4294967294, %v1421_v3  ;;  %v2232_v19 = vsel %vm2218_vm4, %v2229_v49, %v2231_v20  ;;  %v2078_v54 = vsel %vm2076_vm2, %v15384_v53, %v12950_v24  ;;  %v1062_v9 = vshrl.u32 %v15482_v12, %v12883_v41 }
 0x256   : > { %v12971_v10 = vmul.u32.u64.low %v12907_v39, %v2232_v19  ;;  %v12972_v13 = vmul.u32.u64.high %v12907_v39, %v2232_v19, %v12971_v10  ;;  %v1248_v60 = vsel %vm1237_vm0, nan, %v1247_v14  ;;  %v2075_v49 = vsel %vm2073_vm3, %v12940_v4, %v15385_v7 }
 0x257   : > { %vm9661_vm11 = vcmp.lt.s32.totalorder %v9660_v48, 0  ;;  %v1060_v33 = vor.u32 %v1059_v32, %v1058_v5  ;;  %v2079_v26 = vsel %vm2072_vm6, %v2075_v49, %v2078_v54  ;;  %v2240_v57 = vmul.u32 %v12907_v39, %v2224_v62 }
 0x258   : > { %v1424_v15 = vsel %vm9661_vm11, 0, %v9660_v48  ;;  %v2243_v3 = vadd.s32 1, %v12957_v34  ;;  %v2080_v20 = vsel %vm2069_vm14, nan, %v2079_v26  ;;  %v1065_v10 = vshrl.u32 %v15480_v17, %v12883_v41 }
 0x259   : > { %v1425_v14 = vsub.s32 32, %v1424_v15  ;;  %v1429_v19 = vsub.s32 4294967266, %v1424_v15  ;;  %v10080_v53 = vpack.c.bf16 %v2080_v20, %v1248_v60  ;;  %vm2242_vm2 = vc.u32 %v12972_v13, %v12956_v59 }
 0x25a   : > { %v1063_v5 = vor.u32 %v1062_v9, %v1061_v22  ;;  %v1064_v25 = vshll.u32 %v15482_v12, %v12845_v29  ;;  %v1426_v39 = vshll.u32 %v12905_v16, %v1424_v15  ;;  %v2244_v62 = vsel %vm2242_vm2, %v2243_v3, %v12957_v34 }
 0x25b   : > { %v1427_v32 = vshrl.u32 %v1409_v44, %v1425_v14  ;;  %v1430_v48 = vadd.s32 127, %v1429_v19  ;;  %10081 = vmatprep.subr.bf16.mxu0 %v10080_v53  ;;  %v2245_v54 = vadd.s32 %v2244_v62, %v2240_v57  ;;  %v1067_v49 = vshll.u32 %v15480_v17, %v12845_v29 }
 0x25c   : > { %v1068_v60 = vshrl.u32 %v15483_v27, %v12883_v41  ;;  %v1071_v22 = vshrl.u32 %v15484_v28, %v12883_v41  ;;  %v1066_v20 = vor.u32 %v1065_v10, %v1064_v25  ;;  %v1070_v16 = vshll.u32 %v15483_v27, %v12845_v29 }
 0x25d   : > { %v1428_v9 = vor.u32 %v1427_v32, %v1426_v39  ;;  %v1431_v26 = vshll.u32 %v1430_v48, 23  ;;  %v13008_v44 = vsel %vm1260_vm7, %v12703_v46, 0  ;;  %v1885_v53 = vsel %vm1884_vm15, %v12863_v36, 0 }
 0x25e   : > { %v2246_v34 = vadd.s32 536870912, %v2245_v54  ;;  %v1069_v15 = vor.u32 %v1068_v60, %v1067_v49  ;;  %v1049_v3 = vor.u32 8388608, %v12876_v35  ;;  %v1072_v14 = vor.u32 %v1071_v22, %v1070_v16 }
 0x25f   : > { %v1432_v57 = vor.u32 4788187, %v1431_v26  ;;  %vm1076_vm3 = vcmp.lt.s32.totalorder %v12861_v0, 4  ;;  %vm1073_vm6 = vcmp.lt.s32.totalorder %v12861_v0, 1  ;;  %vm1075_vm9 = vcmp.lt.s32.totalorder %v12861_v0, 3 }
 0x260   : > { %v2247_v19 = vshrl.u32 %v2246_v34, 30  ;;  %v1082_v46 = vsel %vm1076_vm3, %v1069_v15, 920167782  ;;  %v1435_v10 = vcvt.s32.f32 %v1428_v9  ;;  %v1081_v36 = vsel %vm1073_vm6, %v1060_v33, %v1063_v5 }
 0x261   : > { %v1433_v29 = vand.u32 2147483647, %v1432_v57  ;;  %v1083_v25 = vsel %vm1075_vm9, %v1066_v20, %v1082_v46  ;;  %v1439_v35 = vsub.s32 4, %v12891_v30  ;;  %v1057_v32 = vshrl.u32 %v15520_v42, %v12883_v41 }
 0x262   : > { %v2248_v39 = vshll.u32 %v2247_v19, 30  ;;  %v1085_v48 = vsel %vm1073_vm6, %v1063_v5, %v1066_v20  ;;  %vm1074_vm15 = vcmp.lt.s32.totalorder %v12861_v0, 2  ;;  %v1078_v49 = vsel %vm1076_vm3, %v1066_v20, 2102212464 }
 0x263   : > { %v1436_v62 = vmul.f32 %v1435_v10, %v1433_v29  ;;  %v1086_v60 = vsel %vm1076_vm3, %v1072_v14, 1326507024  ;;  %v1084_v9 = vsel %vm1074_vm15, %v1081_v36, %v1083_v25  ;;  %v1089_v26 = vshll.u32 %v1049_v3, 8 }
 0x264   : > { %v13033_v22 = vsub.s32 %v2245_v54, %v2248_v39  ;;  %v1087_v41 = vsel %vm1075_vm9, %v1069_v15, %v1086_v60  ;;  %vm1355_vm7 = vcmp.lt.s32.totalorder %v12711_v63, 0  ;;  %v1077_v34 = vsel %vm1073_vm6, %v1057_v32, %v1060_v33 }
 0x265   : > { %v1437_v16 = vxor.u32 2147483648, %v1436_v62  ;;  %v1088_v20 = vsel %vm1074_vm15, %v1085_v48, %v1087_v41  ;;  %v1079_v54 = vsel %vm1075_vm9, %v1063_v5, %v1078_v49  ;;  %v1887_v29 = vand.u32 31, %v1885_v53 }
 0x266   : > { %v2251_v57 = vsub.s32 0, %v13033_v22  ;;  %v13047_v14 = vmul.u32.u64.low %v1089_v26, %v1088_v20  ;;  %v13048_v46 = vmul.u32.u64.high %v1089_v26, %v1088_v20, %v13047_v14  ;;  %v1440_v15 = vsel %vm1355_vm7, %v1439_v35, %v12891_v30 }
 0x267   : > { %v13051_v3 = vmul.u32.u64.low %v1089_v26, %v1084_v9  ;;  %v13052_v10 = vmul.u32.u64.high %v1089_v26, %v1084_v9, %v13051_v3  ;;  %v9686_v33 = vadd.s32 4294967169, %v12779_v51  ;;  %v1438_v36 = vsel %vm1355_vm7, %v1437_v16, %v1436_v62 }
 0x268   : > { %v9691_v25 = vmin.u32 %v2251_v57, %v13033_v22  ;;  %v13058_v39 = vshrl.u32 %v13008_v44, 5  ;;  %v15555_v5 = vand.u32 2147483647, %v12711_v63  ;;  %v1080_v32 = vsel %vm1074_vm15, %v1077_v34, %v1079_v54 }
 0x269   : > { %v2271_v35 = vsub.s32 4, %v2247_v19  ;;  %v15386_v49 = vand.u32 2147483647, %v12507_v50  ;;  %vm1098_vm10 = vc.u32 %v13048_v46, %v13051_v3  ;;  %v1099_v62 = vadd.s32 1, %v13052_v10 }
 0x26a   : > { %vm1354_vm1 = vcmp.le.f32.partialorder %v15555_v5, 0.7853982  ;;  %v2253_v30 = vclz %v9691_v25  ;;  %v13071_v60 = vsub.s32 32, %v1887_v29  ;;  %v13073_v9 = vshrl.u32 %v1885_v53, 5 }
 0x26b   : > { %v13064_v48 = vsel %vm1354_vm1, 0, %v1440_v15  ;;  %v1441_v51 = vsel %vm1354_vm1, %v12711_v63, %v1438_v36  ;;  %v13075_v41 = vadd.s32 1, %v9686_v33  ;;  %v1096_v16 = vmul.u32 %v1089_v26, %v1080_v32 }
 0x26c   : > { %15556 = vst [vmem:[#allocation38_spill] sm:$0xff] %v13064_v48  ;;  %v9692_v0 = vadd.s32 4294967294, %v2253_v30  ;;  %v1446_v34 = vadd.s32 3, %v13064_v48  ;;  %vm2187_vm4 = vcmp.lt.s32.totalorder %v12768_v45, 0  ;;  %v2241_v20 = vadd.s32 %v12956_v59, %v12972_v13 }
 0x26d   : > { %v1100_v57 = vsel %vm1098_vm10, %v1099_v62, %v13052_v10  ;;  %10703 = vcosq.f32 %v1441_v51  ;;  %v2272_v54 = vsel %vm2187_vm4, %v2271_v35, %v2247_v19  ;;  %v1880_v15 = vand.u32 8388607, %v15386_v49 }
 0x26e   : > { %vm9693_vm11 = vcmp.lt.s32.totalorder %v9692_v0, 0  ;;  %v1101_v53 = vadd.s32 %v1100_v57, %v1096_v16  ;;  %v1890_v26 = vshll.u32 %v15520_v42, %v1887_v29  ;;  %v1891_v33 = vshrl.u32 %v15502_v23, %v13071_v60 }
 0x26f   : > { %v2256_v14 = vsel %vm9693_vm11, 0, %v9692_v0  ;;  %v1894_v13 = vshrl.u32 %v15482_v12, %v13071_v60  ;;  %10705 = vsinq.f32 %v1441_v51  ;;  %v1893_v10 = vshll.u32 %v15502_v23, %v1887_v29 }
 0x270   : > { %v2257_v36 = vsub.s32 32, %v2256_v14  ;;  %v2261_v25 = vsub.s32 4294967266, %v2256_v14  ;;  %v1102_v59 = vadd.s32 536870912, %v1101_v53  ;;  %v1897_v19 = vshrl.u32 %v15480_v17, %v13071_v60 }
 0x271   : > { %v1900_v5 = vshrl.u32 %v15483_v27, %v13071_v60  ;;  %v2258_v32 = vshll.u32 %v13033_v22, %v2256_v14  ;;  %v1892_v0 = vor.u32 %v1891_v33, %v1890_v26  ;;  %v1896_v16 = vshll.u32 %v15482_v12, %v1887_v29 }
 0x272   : > { %v2259_v30 = vshrl.u32 %v2241_v20, %v2257_v36  ;;  %v2262_v35 = vadd.s32 127, %v2261_v25  ;;  %v13097_v62 = vshrl.u32 %v1102_v59, 30  ;;  %v1899_v57 = vshll.u32 %v15480_v17, %v1887_v29 }
 0x273   : > { %v1903_v51 = vshrl.u32 %v15484_v28, %v13071_v60  ;;  %vm2092_vm2 = vcmp.gt.s32.totalorder %v13075_v41, 0  ;;  %v1895_v37 = vor.u32 %v1894_v13, %v1893_v10  ;;  %v15557_v22 = vand.u32 2147483647, %v12768_v45 }
 0x274   : > { %v2260_v7 = vor.u32 %v2259_v30, %v2258_v32  ;;  %v2263_v49 = vshll.u32 %v2262_v35, 23  ;;  %v1104_v48 = vshll.u32 %v13097_v62, 30  ;;  %v1898_v14 = vor.u32 %v1897_v19, %v1896_v16 }
 0x275   : > { %vm13107_vm3 = vcmp.le.f32.partialorder %v15557_v22, 0.7853982  ;;  %v1901_v26 = vor.u32 %v1900_v5, %v1899_v57  ;;  %v1902_v33 = vshll.u32 %v15483_v27, %v1887_v29  ;;  %v13112_v36 = vand.u32 3, %v1446_v34 }
 0x276   : > { %v2264_v25 = vor.u32 4788187, %v2263_v49  ;;  %v13116_v59 = vsel %vm13107_vm3, 0, %v2272_v54  ;;  %v13118_v32 = vsub.s32 %v1101_v53, %v1104_v48  ;;  %v1881_v13 = vor.u32 8388608, %v1880_v15 }
 0x277   : > { %15560 = vst [vmem:[#allocation39_spill] sm:$0xff] %v13116_v59  ;;  %v1904_v10 = vor.u32 %v1903_v51, %v1902_v33  ;;  %vm1905_vm6 = vcmp.lt.s32.totalorder %v13073_v9, 1  ;;  %vm1908_vm9 = vcmp.lt.s32.totalorder %v13073_v9, 4  ;;  %v13122_v30 = vpop.eup %10703  ;;  %v2267_v5 = vcvt.s32.f32 %v2260_v7 }
 0x278   : > { %15561 = vst [vmem:[#allocation40_spill] sm:$0xff] %v13122_v30  ;;  %v2265_v19 = vand.u32 2147483647, %v2264_v25  ;;  %v1107_v29 = vsub.s32 0, %v13118_v32  ;;  %v1913_v49 = vsel %vm1905_vm6, %v1892_v0, %v1895_v37  ;;  %vm1906_vm15 = vcmp.lt.s32.totalorder %v13073_v9, 2 }
 0x279   : > { %vm1907_vm7 = vcmp.lt.s32.totalorder %v13073_v9, 3  ;;  %v1910_v48 = vsel %vm1908_vm9, %v1898_v14, 2102212464  ;;  %v1914_v34 = vsel %vm1908_vm9, %v1901_v26, 920167782  ;;  %v1917_v15 = vsel %vm1905_vm6, %v1895_v37, %v1898_v14  ;;  %v13138_v35 = vpop.eup %10705 }
 0x27a   : > { %v2268_v54 = vmul.f32 %v2267_v5, %v2265_v19  ;;  %v9647_v53 = vmin.u32 %v1107_v29, %v13118_v32  ;;  %v1915_v7 = vsel %vm1907_vm7, %v1898_v14, %v1914_v34  ;;  %15562 = vst [vmem:[#allocation41_spill] sm:$0xff] %v13138_v35  ;;  %v2278_v16 = vadd.s32 3, %v13116_v59 }
 0x27b   : > { %v1889_v57 = vshrl.u32 %v15520_v42, %v13071_v60  ;;  %v1916_v51 = vsel %vm1906_vm15, %v1913_v49, %v1915_v7  ;;  %v1918_v22 = vsel %vm1908_vm9, %v1904_v10, 1326507024  ;;  %v1921_v5 = vshll.u32 %v1881_v13, 8 }
 0x27c   : > { %v2269_v33 = vxor.u32 2147483648, %v2268_v54  ;;  %v1109_v25 = vclz %v9647_v53  ;;  %v1919_v19 = vsel %vm1907_vm7, %v1901_v26, %v1918_v22  ;;  %v13150_v14 = vand.u32 31, %v13008_v44 }
 0x27d   : > { %v1909_v29 = vsel %vm1905_vm6, %v1889_v57, %v1892_v0  ;;  %v1911_v60 = vsel %vm1907_vm7, %v1895_v37, %v1910_v48  ;;  %v1920_v49 = vsel %vm1906_vm15, %v1917_v15, %v1919_v19  ;;  %v13166_v44 = vsel %vm2092_vm2, %v13075_v41, 0 }
 0x27e   : > { %v2270_v10 = vsel %vm2187_vm4, %v2269_v33, %v2268_v54  ;;  %v9648_v34 = vadd.s32 4294967294, %v1109_v25  ;;  %v13160_v53 = vmul.u32.u64.low %v1921_v5, %v1920_v49  ;;  %v13161_v7 = vmul.u32.u64.high %v1921_v5, %v1920_v49, %v13160_v53 }
 0x27f   : > { %v2273_v0 = vsel %vm13107_vm3, %v12768_v45, %v2270_v10  ;;  %v13171_v37 = vmul.u32.u64.low %v1921_v5, %v1916_v51  ;;  %v13172_v26 = vmul.u32.u64.high %v1921_v5, %v1916_v51, %v13171_v37  ;;  %vm1448_vm1 = vcmp.lt.s32.totalorder %v13112_v36, 2 }
 0x280   : > { %v15389_v13 = vxor.u32 2147483648, %v13122_v30  ;;  %10707 = vcosq.f32 %v2273_v0  ;;  %v13177_v48 = vand.u32 3, %v2278_v16  ;;  %vm9649_vm10 = vcmp.lt.s32.totalorder %v9648_v34, 0 }
 0x281   : > { %v15390_v54 = vxor.u32 2147483648, %v13138_v35  ;;  %10709 = vsinq.f32 %v2273_v0  ;;  %v1112_v41 = vsel %vm9649_vm10, 0, %v9648_v34  ;;  %v1912_v20 = vsel %vm1906_vm15, %v1909_v29, %v1911_v60 }
 0x282   : > { %vm1449_vm4 = vcmp.eq.s32.totalorder %v13112_v36, 0  ;;  %v1113_v15 = vsub.s32 32, %v1112_v41  ;;  %v1117_v57 = vsub.s32 4294967266, %v1112_v41  ;;  %v13184_v51 = vsub.s32 32, %v13150_v14 }
 0x283   : > { %v1097_v22 = vadd.s32 %v13051_v3, %v13048_v46  ;;  %vm1930_vm11 = vc.u32 %v13161_v7, %v13171_v37  ;;  %v1931_v16 = vadd.s32 1, %v13172_v26  ;;  %v15391_v33 = vand.u32 2147483647, %v12261_v21 }
 0x284   : > { %vm1452_vm2 = vcmp.eq.s32.totalorder %v13112_v36, 2  ;;  %vm2284_vm3 = vcmp.eq.s32.totalorder %v13177_v48, 2  ;;  %v1118_v9 = vadd.s32 127, %v1117_v57  ;;  %v1928_v25 = vmul.u32 %v1921_v5, %v1912_v20 }
 0x285   : > { %v1451_v19 = vsel %vm1449_vm4, %v13122_v30, %v15390_v54  ;;  %v1454_v46 = vsel %vm1452_vm2, %v15389_v13, %v13138_v35  ;;  %vm2281_vm6 = vcmp.eq.s32.totalorder %v13177_v48, 0  ;;  %v1115_v3 = vshrl.u32 %v1097_v22, %v1113_v15 }
 0x286   : > { %v1932_v29 = vsel %vm1930_vm11, %v1931_v16, %v13172_v26  ;;  %vm2280_vm9 = vcmp.lt.s32.totalorder %v13177_v48, 2  ;;  %v1119_v60 = vshll.u32 %v1118_v9, 23  ;;  %v1267_v5 = vshrl.u32 %v15502_v23, %v13184_v51 }
 0x287   : > { %v1933_v49 = vadd.s32 %v1932_v29, %v1928_v25  ;;  %v1270_v10 = vshrl.u32 %v15482_v12, %v13184_v51  ;;  %vm15398_vm15 = vweird.f32 %v12711_v63  ;;  %vm2277_vm7 = vweird.f32 %v12768_v45 }
 0x288   : > { %v1114_v34 = vshll.u32 %v13118_v32, %v1112_v41  ;;  %v1127_v53 = vsub.s32 4, %v13097_v62  ;;  %v1256_v0 = vand.u32 8388607, %v15391_v33  ;;  %v1266_v26 = vshll.u32 %v15520_v42, %v13150_v14 }
 0x289   : > { %v1120_v20 = vor.u32 4788187, %v1119_v60  ;;  %v1934_v15 = vadd.s32 536870912, %v1933_v49  ;;  %v1269_v57 = vshll.u32 %v15502_v23, %v13150_v14  ;;  %v1276_v22 = vshrl.u32 %v15483_v27, %v13184_v51 }
 0x28a   : > { %v1455_v16 = vsel %vm1448_vm1, %v1451_v19, %v1454_v46  ;;  %v1116_v32 = vor.u32 %v1115_v3, %v1114_v34  ;;  %v1273_v41 = vshrl.u32 %v15480_v17, %v13184_v51  ;;  %v1275_v9 = vshll.u32 %v15480_v17, %v13150_v14  ;;  %v13225_v25 = vpop.eup %10707 }
 0x28b   : > { %15563 = vst [vmem:[#allocation42_spill] sm:$0xff] %v13225_v25  ;;  %v13227_v29 = vshrl.u32 %v1934_v15, 30  ;;  %v1268_v60 = vor.u32 %v1267_v5, %v1266_v26  ;;  %v1271_v13 = vor.u32 %v1270_v10, %v1269_v57  ;;  %v1279_v54 = vshrl.u32 %v15484_v28, %v13184_v51  ;;  %v13231_v33 = vpop.eup %10709 }
 0x28c   : > { %15564 = vst [vmem:[#allocation43_spill] sm:$0xff] %v13231_v33  ;;  %v15394_v36 = vxor.u32 2147483648, %v13225_v25  ;;  %v1121_v19 = vand.u32 2147483647, %v1120_v20  ;;  %v1272_v46 = vshll.u32 %v15482_v12, %v13150_v14  ;;  %v1277_v3 = vor.u32 %v1276_v22, %v1275_v9 }
 0x28d   : > { %v15395_v34 = vxor.u32 2147483648, %v13231_v33  ;;  %v1936_v30 = vshll.u32 %v13227_v29, 30  ;;  %v1257_v15 = vor.u32 8388608, %v1256_v0  ;;  %v1278_v5 = vshll.u32 %v15483_v27, %v13150_v14 }
 0x28e   : > { %v2286_v10 = vsel %vm2284_vm3, %v15394_v36, %v13231_v33  ;;  %v1123_v26 = vcvt.s32.f32 %v1116_v32  ;;  %v1274_v20 = vor.u32 %v1273_v41, %v1272_v46  ;;  %vm1281_vm1 = vcmp.lt.s32.totalorder %v13058_v39, 1 }
 0x28f   : > { %v2283_v57 = vsel %vm2281_vm6, %v13225_v25, %v15395_v34  ;;  %v13251_v0 = vsub.s32 %v1933_v49, %v1936_v30  ;;  %v1280_v22 = vor.u32 %v1279_v54, %v1278_v5  ;;  %vm1284_vm10 = vcmp.lt.s32.totalorder %v13058_v39, 4 }
 0x290   : > { %v2287_v14 = vsel %vm2280_vm9, %v2283_v57, %v2286_v10  ;;  %v1124_v9 = vmul.f32 %v1123_v26, %v1121_v19  ;;  %v1289_v32 = vsel %vm1281_vm1, %v1268_v60, %v1271_v13  ;;  %v1290_v41 = vsel %vm1284_vm10, %v1277_v3, 920167782 }
 0x291   : > { %v1456_v46 = vsel %vm15398_vm15, nan, %v1455_v16  ;;  %v2288_v30 = vsel %vm2277_vm7, nan, %v2287_v14  ;;  %v1939_v54 = vsub.s32 0, %v13251_v0  ;;  %vm1283_vm4 = vcmp.lt.s32.totalorder %v13058_v39, 3 }
 0x292   : > { %v10084_v49 = vpack.c.bf16 %v2288_v30, %v1456_v46  ;;  %vm1043_vm11 = vcmp.lt.s32.totalorder %v12257_v18, 0  ;;  %vm1282_vm2 = vcmp.lt.s32.totalorder %v13058_v39, 2  ;;  %v1291_v48 = vsel %vm1283_vm4, %v1274_v20, %v1290_v41 }
 0x293   : > { %v9679_v19 = vmin.u32 %v1939_v54, %v13251_v0  ;;  %v1265_v16 = vshrl.u32 %v15520_v42, %v13184_v51  ;;  %v1286_v5 = vsel %vm1284_vm10, %v1274_v20, 2102212464  ;;  %v1292_v10 = vsel %vm1282_vm2, %v1289_v32, %v1291_v48 }
 0x294   : > { %10085 = vmatprep.subr.bf16.mxu1 %v10084_v49  ;;  %v1125_v26 = vxor.u32 2147483648, %v1124_v9  ;;  %v1293_v57 = vsel %vm1281_vm1, %v1271_v13, %v1274_v20  ;;  %v1294_v14 = vsel %vm1284_vm10, %v1280_v22, 1326507024  ;;  %v1297_v41 = vshll.u32 %v1257_v15, 8 }
 0x295   : > { %v1128_v46 = vsel %vm1043_vm11, %v1127_v53, %v13097_v62  ;;  %v1941_v51 = vclz %v9679_v19  ;;  %v1959_v30 = vsub.s32 4, %v13227_v29  ;;  %v1285_v54 = vsel %vm1281_vm1, %v1265_v16, %v1268_v60 }
 0x296   : > { %v1287_v32 = vsel %vm1283_vm4, %v1271_v13, %v1286_v5  ;;  %v1295_v20 = vsel %vm1283_vm4, %v1277_v3, %v1294_v14  ;;  %v13291_v49 = vmul.u32.u64.low %v1297_v41, %v1292_v10  ;;  %v13292_v48 = vmul.u32.u64.high %v1297_v41, %v1292_v10, %v13291_v49 }
 0x297   : > { %v13296_v15 = vshrl.u32 %v13166_v44, 5  ;;  %v2095_v62 = vand.u32 31, %v13166_v44  ;;  %v9680_v53 = vadd.s32 4294967294, %v1941_v51  ;;  %v1296_v22 = vsel %vm1282_vm2, %v1293_v57, %v1295_v20 }
 0x298   : > { %v15565_v60 = vand.u32 2147483647, %v12257_v18  ;;  %v1126_v13 = vsel %vm1043_vm11, %v1125_v26, %v1124_v9  ;;  %v13305_v3 = vmul.u32.u64.low %v1297_v41, %v1296_v22  ;;  %v13306_v19 = vmul.u32.u64.high %v1297_v41, %v1296_v22, %v13305_v3 }
 0x299   : > { %vm1875_vm6 = vcmp.lt.s32.totalorder %v12507_v50, 0  ;;  %vm9681_vm9 = vcmp.lt.s32.totalorder %v9680_v53, 0  ;;  %v1288_v44 = vsel %vm1282_vm2, %v1285_v54, %v1287_v32  ;;  %v1929_v5 = vadd.s32 %v13171_v37, %v13161_v7 }
 0x29a   : > { %vm1042_vm3 = vcmp.le.f32.partialorder %v15565_v60, 0.7853982  ;;  %v1944_v10 = vsel %vm9681_vm9, 0, %v9680_v53  ;;  %v1960_v57 = vsel %vm1875_vm6, %v1959_v30, %v13227_v29  ;;  %v1307_v9 = vadd.s32 1, %v13292_v48 }
 0x29b   : > { %v13308_v16 = vsel %vm1042_vm3, 0, %v1128_v46  ;;  %v1129_v26 = vsel %vm1042_vm3, %v12257_v18, %v1126_v13  ;;  %v1945_v14 = vsub.s32 32, %v1944_v10  ;;  %v1949_v46 = vsub.s32 4294967266, %v1944_v10 }
 0x29c   : > { %15566 = vst [vmem:[#allocation44_spill] sm:$0xff] %v13308_v16  ;;  %v15396_v51 = vand.u32 2147483647, %v12510_v2  ;;  %v15567_v20 = vand.u32 2147483647, %v12507_v50  ;;  %v1304_v7 = vmul.u32 %v1297_v41, %v1288_v44  ;;  %vm1306_vm10 = vc.u32 %v13306_v19, %v13291_v49 }
 0x29d   : > { %v2096_v37 = vsub.s32 32, %v2095_v62  ;;  %v1946_v29 = vshll.u32 %v13251_v0, %v1944_v10  ;;  %v1947_v30 = vshrl.u32 %v1929_v5, %v1945_v14  ;;  %v1950_v54 = vadd.s32 127, %v1949_v46 }
 0x29e   : > { %vm13323_vm1 = vcmp.le.f32.partialorder %v15567_v20, 0.7853982  ;;  %v1308_v32 = vsel %vm1306_vm10, %v1307_v9, %v13292_v48  ;;  %10711 = vcosq.f32 %v1129_v26  ;;  %v1134_v53 = vadd.s32 3, %v13308_v16 }
 0x29f   : > { %v13334_v22 = vsel %vm13323_vm1, 0, %v1960_v57  ;;  %v1309_v60 = vadd.s32 %v1308_v32, %v1304_v7  ;;  %10713 = vsinq.f32 %v1129_v26  ;;  %v1948_v41 = vor.u32 %v1947_v30, %v1946_v29 }
 0x2a0   : > { %15570 = vst [vmem:[#allocation45_spill] sm:$0xff] %v13334_v22  ;;  %v1951_v13 = vshll.u32 %v1950_v54, 23  ;;  %v2088_v3 = vand.u32 8388607, %v15396_v51  ;;  %v2099_v0 = vshrl.u32 %v15502_v23, %v2096_v37  ;;  %v2102_v5 = vshrl.u32 %v15482_v12, %v2096_v37 }
 0x2a1   : > { %v1310_v44 = vadd.s32 536870912, %v1309_v60  ;;  %v2105_v48 = vshrl.u32 %v15480_v17, %v2096_v37  ;;  %v2098_v9 = vshll.u32 %v15520_v42, %v2095_v62  ;;  %v2107_v57 = vshll.u32 %v15480_v17, %v2095_v62 }
 0x2a2   : > { %v1952_v10 = vor.u32 4788187, %v1951_v13  ;;  %v2108_v14 = vshrl.u32 %v15483_v27, %v2096_v37  ;;  %v2101_v46 = vshll.u32 %v15502_v23, %v2095_v62  ;;  %v2104_v20 = vshll.u32 %v15482_v12, %v2095_v62  ;;  %v5602_v13 = vld [vmem:[%s15526_s3 + $0x8] sm:$0xff] }
 0x2a3   : > { %v13344_v26 = vshrl.u32 %v1310_v44, 30  ;;  %v2111_v7 = vshrl.u32 %v15484_v28, %v2096_v37  ;;  %v1955_v30 = vcvt.s32.f32 %v1948_v41  ;;  %v2110_v32 = vshll.u32 %v15483_v27, %v2095_v62  ;;  %9823 = vmatmul.mubr.msk.f32.gmra.mrb[2].mxu0 %vm5609_vm13, %v5602_v13  ;;  %9831 = vmatmul.mubr.msk.f32.gmra.mrb[2].mxu1 %vm5609_vm13, %v5602_v13 }
 0x2a4   : > { %v1953_v29 = vand.u32 2147483647, %v1952_v10  ;;  %v2109_v54 = vor.u32 %v2108_v14, %v2107_v57  ;;  %v2100_v34 = vor.u32 %v2099_v0, %v2098_v9  ;;  %v2103_v44 = vor.u32 %v2102_v5, %v2101_v46  ;;  %5710 = vmatprep.mubr.f32.mxu0 %v15528_v43  ;;  %5823 = vmatprep.mubr.f32.mxu1 %v15528_v43 }
 0x2a5   : > { %v1312_v36 = vshll.u32 %v13344_v26, 30  ;;  %v2106_v51 = vor.u32 %v2105_v48, %v2104_v20  ;;  %v13356_v63 = vand.u32 3, %v1134_v53  ;;  %v2112_v41 = vor.u32 %v2111_v7, %v2110_v32 }
 0x2a6   : > { %v1956_v10 = vmul.f32 %v1955_v30, %v1953_v29  ;;  %v1966_v62 = vadd.s32 3, %v13334_v22  ;;  %v2089_v14 = vor.u32 8388608, %v2088_v3  ;;  %vm2116_vm4 = vcmp.lt.s32.totalorder %v13296_v15, 4 }
 0x2a7   : > { %v13361_v57 = vsub.s32 %v1309_v60, %v1312_v36  ;;  %vm2113_vm11 = vcmp.lt.s32.totalorder %v13296_v15, 1  ;;  %vm2115_vm2 = vcmp.lt.s32.totalorder %v13296_v15, 3  ;;  %v2122_v53 = vsel %vm2116_vm4, %v2109_v54, 920167782 }
 0x2a8   : > { %v1957_v0 = vxor.u32 2147483648, %v1956_v10  ;;  %v13368_v5 = vpop.eup %10711  ;;  %v2097_v9 = vshrl.u32 %v15520_v42, %v2096_v37  ;;  %v2121_v36 = vsel %vm2113_vm11, %v2100_v34, %v2103_v44  ;;  %v2123_v60 = vsel %vm2115_vm2, %v2106_v51, %v2122_v53 }
 0x2a9   : > { %15571 = vst [vmem:[#allocation46_spill] sm:$0xff] %v13368_v5  ;;  %v1315_v48 = vsub.s32 0, %v13361_v57  ;;  %v13376_v3 = vpop.eup %10713  ;;  %vm2114_vm3 = vcmp.lt.s32.totalorder %v13296_v15, 2  ;;  %v2125_v20 = vsel %vm2113_vm11, %v2103_v44, %v2106_v51  ;;  %v2126_v7 = vsel %vm2116_vm4, %v2112_v41, 1326507024 }
 0x2aa   : > { %15572 = vst [vmem:[#allocation47_spill] sm:$0xff] %v13376_v3  ;;  %v1958_v46 = vsel %vm1875_vm6, %v1957_v0, %v1956_v10  ;;  %v2118_v30 = vsel %vm2116_vm4, %v2106_v51, 2102212464  ;;  %v2127_v32 = vsel %vm2115_vm2, %v2109_v54, %v2126_v7  ;;  %v2124_v13 = vsel %vm2114_vm3, %v2121_v36, %v2123_v60 }
 0x2ab   : > { %v1961_v37 = vsel %vm13323_vm1, %v12507_v50, %v1958_v46  ;;  %v9655_v29 = vmin.u32 %v1315_v48, %v13361_v57  ;;  %v2128_v10 = vsel %vm2114_vm3, %v2125_v20, %v2127_v32  ;;  %v2129_v41 = vshll.u32 %v2089_v14, 8 }
 0x2ac   : > { %10715 = vcosq.f32 %v1961_v37  ;;  %vm1136_vm6 = vcmp.lt.s32.totalorder %v13356_v63, 2  ;;  %v15400_v39 = vxor.u32 2147483648, %v13376_v3  ;;  %v15399_v0 = vxor.u32 2147483648, %v13368_v5 }
 0x2ad   : > { %10717 = vsinq.f32 %v1961_v37  ;;  %v1317_v53 = vclz %v9655_v29  ;;  %v2117_v51 = vsel %vm2113_vm11, %v2097_v9, %v2100_v34  ;;  %v2119_v54 = vsel %vm2115_vm2, %v2103_v44, %v2118_v30 }
 0x2ae   : > { %v13404_v48 = vmul.u32.u64.low %v2129_v41, %v2128_v10  ;;  %v13405_v36 = vmul.u32.u64.high %v2129_v41, %v2128_v10, %v13404_v48  ;;  %v13407_v46 = vmul.u32.u64.low %v2129_v41, %v2124_v13  ;;  %v13408_v14 = vmul.u32.u64.high %v2129_v41, %v2124_v13, %v13407_v46 }
 0x2af   : > { %v9656_v60 = vadd.s32 4294967294, %v1317_v53  ;;  %v493_v20 = vrot.slane %v12350_v8, 6  ;;  %vm1137_vm9 = vcmp.eq.s32.totalorder %v13356_v63, 0  ;;  %vm1140_vm1 = vcmp.eq.s32.totalorder %v13356_v63, 2 }
 0x2b0   : > { %v1967_v7 = vand.u32 3, %v1966_v62  ;;  %v509_v34 = vrot.slane %v12350_v8, 3  ;;  %vm15411_vm10 = vweird.f32 %v12257_v18  ;;  %v1305_v44 = vadd.s32 %v13291_v49, %v13306_v19 }
 0x2b1   : > { %vm9657_vm4 = vcmp.lt.s32.totalorder %v9656_v60, 0  ;;  %v2120_v9 = vsel %vm2114_vm3, %v2117_v51, %v2119_v54  ;;  %v15573_v37 = vrot.slane %v12350_v8, 1  ;;  %v1142_v30 = vsel %vm1140_vm1, %v15399_v0, %v13376_v3 }
 0x2b2   : > { %v1320_v62 = vsel %vm9657_vm4, 0, %v9656_v60  ;;  %vm2138_vm11 = vc.u32 %v13405_v36, %v13407_v46  ;;  %v1139_v49 = vsel %vm1137_vm9, %v13368_v5, %v15400_v39  ;;  %vm15426_vm2 = vweird.f32 %v12507_v50 }
 0x2b3   : > { %v571_v29 = vsel %vm565_vm5, %v15573_v37, %v493_v20  ;;  %v1321_v15 = vsub.s32 32, %v1320_v62  ;;  %v1325_v19 = vsub.s32 4294967266, %v1320_v62  ;;  %v2139_v13 = vadd.s32 1, %v13408_v14 }
 0x2b4   : > { %v580_v32 = vsel %vm574_vm8, %v571_v29, %v509_v34  ;;  %vm1968_vm3 = vcmp.lt.s32.totalorder %v1967_v7, 2  ;;  %vm1251_vm15 = vcmp.lt.s32.totalorder %v12261_v21, 0  ;;  %v2136_v10 = vmul.u32 %v2129_v41, %v2120_v9 }
 0x2b5   : > { %v13436_v53 = vmul.f32 %v11887_v11, %v580_v32  ;;  %v15574_v51 = vand.u32 2147483647, %v12261_v21  ;;  %v1322_v48 = vshll.u32 %v13361_v57, %v1320_v62  ;;  %v1323_v60 = vshrl.u32 %v1305_v44, %v1321_v15 }
 0x2b6   : > { %v1326_v20 = vadd.s32 127, %v1325_v19  ;;  %v2140_v34 = vsel %vm2138_vm11, %v2139_v13, %v13408_v14  ;;  %v13446_v37 = vpop.eup %10715  ;;  %v1143_v41 = vsel %vm1136_vm6, %v1139_v49, %v1142_v30  ;;  %vm1969_vm9 = vcmp.eq.s32.totalorder %v1967_v7, 0 }
 0x2b7   : > { %vm13440_vm1 = vcmp.le.f32.partialorder %v15574_v51, 0.7853982  ;;  %15577 = vst [vmem:[#allocation48_spill] sm:$0xff] %v13446_v37  ;;  %v2141_v9 = vadd.s32 %v2140_v34, %v2136_v10  ;;  %v2812_v29 = vand.u32 2139095040, %v13436_v53  ;;  %v13451_v32 = vpop.eup %10717  ;;  %v15401_v51 = vxor.u32 2147483648, %v13446_v37 }
 0x2b8   : > { %15578 = vst [vmem:[#allocation49_spill] sm:$0xff] %v13451_v32  ;;  %v1324_v0 = vor.u32 %v1323_v60, %v1322_v48  ;;  %v1327_v39 = vshll.u32 %v1326_v20, 23  ;;  %v1335_v57 = vsub.s32 4, %v13344_v26  ;;  %v15402_v44 = vxor.u32 2147483648, %v13451_v32 }
 0x2b9   : > { %vm1972_vm4 = vcmp.eq.s32.totalorder %v1967_v7, 2  ;;  %v2142_v14 = vadd.s32 536870912, %v2141_v9  ;;  %v2813_v62 = vshrl.u32 %v2812_v29, 23  ;;  %v495_v15 = vrot.slane %v12519_v58, 6 }
 0x2ba   : > { %v1974_v63 = vsel %vm1972_vm4, %v15401_v51, %v13451_v32  ;;  %v1328_v30 = vor.u32 4788187, %v1327_v39  ;;  %v1144_v19 = vsel %vm15411_vm10, nan, %v1143_v41  ;;  %v1971_v13 = vsel %vm1969_vm9, %v13446_v37, %v15402_v44 }
 0x2bb   : > { %v13467_v10 = vshrl.u32 %v2142_v14, 30  ;;  %v9714_v48 = vadd.s32 4294967169, %v2813_v62  ;;  %v1975_v60 = vsel %vm1968_vm3, %v1971_v13, %v1974_v63  ;;  %v1331_v34 = vcvt.s32.f32 %v1324_v0 }
 0x2bc   : > { %v1329_v20 = vand.u32 2147483647, %v1328_v30  ;;  %v1336_v39 = vsel %vm1251_vm15, %v1335_v57, %v13344_v26  ;;  %v1976_v29 = vsel %vm15426_vm2, nan, %v1975_v60  ;;  %v511_v49 = vrot.slane %v12519_v58, 3 }
 0x2bd   : > { %v2144_v41 = vshll.u32 %v13467_v10, 30  ;;  %v2819_v51 = vadd.s32 1, %v9714_v48  ;;  %v10082_v44 = vpack.c.bf16 %v1976_v29, %v1144_v19  ;;  %v15579_v7 = vand.u32 2147483647, %v13436_v53  ;;  %v13494_v29 = vld [vmem:[%s11102_s16 + $0x10] sm:$0x77] }
 0x2be   : > { %v1332_v14 = vmul.f32 %v1331_v34, %v1329_v20  ;;  %v15580_v0 = vrot.slane %v12519_v58, 1  ;;  %v13484_v26 = vsel %vm13440_vm1, 0, %v1336_v39  ;;  %vm2083_vm11 = vcmp.lt.s32.totalorder %v12510_v2, 0 }
 0x2bf   : > { %v2816_v62 = vand.u32 8388607, %v15579_v7  ;;  %15581 = vst [vmem:[#allocation50_spill] sm:$0xff] %v13484_v26  ;;  %v13486_v57 = vsub.s32 %v2141_v9, %v2144_v41  ;;  %vm2820_vm6 = vcmp.gt.s32.totalorder %v2819_v51, 0  ;;  %10083 = vmatpush1.bf16.msra.mxu0 %v10082_v44  ;;  %v2167_v41 = vsub.s32 4, %v13467_v10 }
 0x2c0   : > { %v573_v63 = vsel %vm565_vm5, %v15580_v0, %v495_v15  ;;  %v1333_v30 = vxor.u32 2147483648, %v1332_v14  ;;  %v2821_v13 = vsel %vm2820_vm6, %v2819_v51, 0  ;;  %v1342_v15 = vadd.s32 3, %v13484_v26 }
 0x2c1   : > { %v2147_v19 = vsub.s32 0, %v13486_v57  ;;  %v2823_v48 = vand.u32 31, %v2821_v13  ;;  %v582_v60 = vsel %vm574_vm8, %v573_v63, %v511_v49  ;;  %v2817_v34 = vor.u32 8388608, %v2816_v62 }
 0x2c2   : > { %v1334_v20 = vsel %vm1251_vm15, %v1333_v30, %v1332_v14  ;;  %v2137_v51 = vadd.s32 %v13407_v46, %v13405_v36  ;;  %v13508_v62 = vmul.f32 %v11887_v11, %v582_v60  ;;  %v2822_v0 = vshrl.u32 %v2821_v13, 5 }
 0x2c3   : > { %v1337_v44 = vsel %vm13440_vm1, %v12261_v21, %v1334_v20  ;;  %v9687_v49 = vmin.u32 %v2147_v19, %v13486_v57  ;;  %v2824_v39 = vsub.s32 32, %v2823_v48  ;;  %v2826_v14 = vshll.u32 %v15520_v42, %v2823_v48 }
 0x2c4   : > { %v2829_v7 = vshll.u32 %v15502_v23, %v2823_v48  ;;  %10719 = vcosq.f32 %v1337_v44  ;;  %v2832_v63 = vshll.u32 %v15482_v12, %v2823_v48  ;;  %v13513_v30 = vshll.u32 %v2817_v34, 8 }
 0x2c5   : > { %v2149_v54 = vclz %v9687_v49  ;;  %10721 = vsinq.f32 %v1337_v44  ;;  %v2827_v36 = vshrl.u32 %v15502_v23, %v2824_v39  ;;  %v2830_v46 = vshrl.u32 %v15482_v12, %v2824_v39 }
 0x2c6   : > { %v2833_v20 = vshrl.u32 %v15480_v17, %v2824_v39  ;;  %v2835_v9 = vshll.u32 %v15480_v17, %v2823_v48  ;;  %v2836_v60 = vshrl.u32 %v15483_v27, %v2824_v39  ;;  %v2838_v13 = vshll.u32 %v15483_v27, %v2823_v48 }
 0x2c7   : > { %v9688_v19 = vadd.s32 4294967294, %v2149_v54  ;;  %v2828_v26 = vor.u32 %v2827_v36, %v2826_v14  ;;  %v2831_v18 = vor.u32 %v2830_v46, %v2829_v7  ;;  %v2839_v49 = vshrl.u32 %v15484_v28, %v2824_v39 }
 0x2c8   : > { %v2834_v44 = vor.u32 %v2833_v20, %v2832_v63  ;;  %v2837_v50 = vor.u32 %v2836_v60, %v2835_v9  ;;  %vm2841_vm3 = vcmp.lt.s32.totalorder %v2822_v0, 1  ;;  %v2825_v34 = vshrl.u32 %v15520_v42, %v2824_v39 }
 0x2c9   : > { %vm9689_vm15 = vcmp.lt.s32.totalorder %v9688_v19, 0  ;;  %v2840_v54 = vor.u32 %v2839_v49, %v2838_v13  ;;  %vm2843_vm1 = vcmp.lt.s32.totalorder %v2822_v0, 3  ;;  %vm2842_vm9 = vcmp.lt.s32.totalorder %v2822_v0, 2 }
 0x2ca   : > { %v2152_v5 = vsel %vm9689_vm15, 0, %v9688_v19  ;;  %vm2844_vm4 = vcmp.lt.s32.totalorder %v2822_v0, 4  ;;  %v2168_v48 = vsel %vm2083_vm11, %v2167_v41, %v13467_v10  ;;  %v2849_v7 = vsel %vm2841_vm3, %v2828_v26, %v2831_v18 }
 0x2cb   : > { %v2153_v3 = vsub.s32 32, %v2152_v5  ;;  %v2157_v45 = vsub.s32 4294967266, %v2152_v5  ;;  %v2154_v14 = vshll.u32 %v13486_v57, %v2152_v5  ;;  %v2850_v63 = vsel %vm2844_vm4, %v2837_v50, 920167782 }
 0x2cc   : > { %v2846_v46 = vsel %vm2844_vm4, %v2834_v44, 2102212464  ;;  %v2851_v39 = vsel %vm2843_vm1, %v2834_v44, %v2850_v63  ;;  %v2853_v20 = vsel %vm2841_vm3, %v2831_v18, %v2834_v44  ;;  %v2854_v60 = vsel %vm2844_vm4, %v2840_v54, 1326507024 }
 0x2cd   : > { %v2155_v9 = vshrl.u32 %v2137_v51, %v2153_v3  ;;  %v2158_v36 = vadd.s32 127, %v2157_v45  ;;  %v2852_v19 = vsel %vm2842_vm9, %v2849_v7, %v2851_v39  ;;  %v3020_v13 = vand.u32 2139095040, %v13508_v62 }
 0x2ce   : > { %v13530_v5 = vpop.eup %10719  ;;  %v2845_v10 = vsel %vm2841_vm3, %v2825_v34, %v2828_v26  ;;  %v2855_v41 = vsel %vm2843_vm1, %v2837_v50, %v2854_v60  ;;  %v2847_v45 = vsel %vm2843_vm1, %v2831_v18, %v2846_v46  ;;  %v1343_v54 = vand.u32 3, %v1342_v15 }
 0x2cf   : > { %15582 = vst [vmem:[#allocation51_spill] sm:$0xff] %v13530_v5  ;;  %v2156_v57 = vor.u32 %v2155_v9, %v2154_v14  ;;  %v2159_v49 = vshll.u32 %v2158_v36, 23  ;;  %v13534_v3 = vpop.eup %10721  ;;  %v2856_v51 = vsel %vm2842_vm9, %v2853_v20, %v2855_v41  ;;  %v15584_v63 = vand.u32 2147483647, %v12510_v2 }
 0x2d0   : > { %15583 = vst [vmem:[#allocation52_spill] sm:$0xff] %v13534_v3  ;;  %v13539_v7 = vmul.u32.u64.low %v13513_v30, %v2852_v19  ;;  %v13540_v44 = vmul.u32.u64.high %v13513_v30, %v2852_v19, %v13539_v7  ;;  %v508_v50 = vrot.slane %v13494_v29, 3  ;;  %v3021_v9 = vshrl.u32 %v3020_v13, 23 }
 0x2d1   : > { %vm13545_vm6 = vcmp.le.f32.partialorder %v15584_v63, 0.7853982  ;;  %v2160_v26 = vor.u32 4788187, %v2159_v49  ;;  %v13551_v34 = vmul.u32.u64.low %v13513_v30, %v2856_v51  ;;  %v13552_v18 = vmul.u32.u64.high %v13513_v30, %v2856_v51, %v13551_v34 }
 0x2d2   : > { %v15587_v36 = vrot.slane %v13494_v29, 6  ;;  %v15588_v46 = vrot.slane %v11934_v47, 1  ;;  %v2163_v19 = vcvt.s32.f32 %v2156_v57  ;;  %v13561_v20 = vsel %vm13545_vm6, 0, %v2168_v48  ;;  %v13570_v47 = vld [vmem:[%s15526_s3 + $0x10] sm:$0xff] }
 0x2d3   : > { %v2161_v39 = vand.u32 2147483647, %v2160_v26  ;;  %15589 = vst [vmem:[#allocation53_spill] sm:$0xff] %v13561_v20  ;;  %v2848_v60 = vsel %vm2842_vm9, %v2845_v10, %v2847_v45  ;;  %v15413_v49 = vxor.u32 2147483648, %v13534_v3  ;;  %v15412_v41 = vxor.u32 2147483648, %v13530_v5  ;;  %9824 = vmatmul.mubr.msk.f32.gmra.mrb[4].mxu0 %vm5609_vm13, %v13570_v47  ;;  %9832 = vmatmul.mubr.msk.f32.gmra.mrb[4].mxu1 %vm5609_vm13, %v13570_v47  ;;  %v13585_v10 = vld [vmem:[%s15526_s3 + $0x18] sm:$0xff] }
 0x2d4   : > { %v570_v15 = vsel %vm565_vm5, %v15588_v46, %v15587_v36  ;;  %v2867_v13 = vadd.s32 1, %v13540_v44  ;;  %v9722_v51 = vadd.s32 4294967169, %v3021_v9  ;;  %vm1344_vm15 = vcmp.lt.s32.totalorder %v1343_v54, 2  ;;  %5716 = vmatprep.mubr.f32.mxu0 %v15528_v43  ;;  %5829 = vmatprep.mubr.f32.mxu1 %v15528_v43  ;;  %v13602_v46 = vld [vmem:[%s11102_s16 + $0x18] sm:$0x77] }
 0x2d5   : > { %vm1345_vm3 = vcmp.eq.s32.totalorder %v1343_v54, 0  ;;  %vm1348_vm1 = vcmp.eq.s32.totalorder %v1343_v54, 2  ;;  %v2164_v29 = vmul.f32 %v2163_v19, %v2161_v39  ;;  %v2864_v0 = vmul.u32 %v13513_v30, %v2848_v60 }
 0x2d6   : > { %vm2866_vm9 = vc.u32 %v13552_v18, %v13539_v7  ;;  %v3027_v48 = vadd.s32 1, %v9722_v51  ;;  %v579_v57 = vsel %vm574_vm8, %v570_v15, %v508_v50  ;;  %v2174_v63 = vadd.s32 3, %v13561_v20 }
 0x2d7   : > { %v2165_v45 = vxor.u32 2147483648, %v2164_v29  ;;  %v2868_v30 = vsel %vm2866_vm9, %v2867_v13, %v13540_v44  ;;  %v15414_v26 = vand.u32 2147483647, %v13508_v62  ;;  %v1347_v50 = vsel %vm1345_vm3, %v13530_v5, %v15413_v49  ;;  %9825 = vmatmul.mubr.msk.f32.gmra.mrb[6].mxu0 %vm5609_vm13, %v13585_v10  ;;  %9833 = vmatmul.mubr.msk.f32.gmra.mrb[6].mxu1 %vm5609_vm13, %v13585_v10 }
 0x2d8   : > { %v1350_v34 = vsel %vm1348_vm1, %v15412_v41, %v13534_v3  ;;  %v2869_v9 = vadd.s32 %v2868_v30, %v2864_v0  ;;  %vm3028_vm4 = vcmp.gt.s32.totalorder %v3027_v48, 0  ;;  %vm15425_vm10 = vweird.f32 %v12261_v21  ;;  %5722 = vmatprep.mubr.f32.mxu0 %v15528_v43  ;;  %5835 = vmatprep.mubr.f32.mxu1 %v15528_v43 }
 0x2d9   : > { %v2166_v36 = vsel %vm2083_vm11, %v2165_v45, %v2164_v29  ;;  %v3029_v44 = vsel %vm3028_vm4, %v3027_v48, 0  ;;  %v13614_v51 = vmul.f32 %v11887_v11, %v579_v57  ;;  %v13621_v29 = vld [vmem:[%s15526_s3 + $0x20] sm:$0xff]  ;;  %v1351_v0 = vsel %vm1344_vm15, %v1347_v50, %v1350_v34 }
 0x2da   : > { %v2169_v19 = vsel %vm13545_vm6, %v12510_v2, %v2166_v36  ;;  %v2870_v60 = vadd.s32 536870912, %v2869_v9  ;;  %v3031_v13 = vand.u32 31, %v3029_v44  ;;  %v13624_v48 = vand.u32 3, %v2174_v63 }
 0x2db   : > { %10723 = vcosq.f32 %v2169_v19  ;;  %v13628_v14 = vand.u32 8388607, %v15414_v26  ;;  %v13633_v36 = vshrl.u32 %v3029_v44, 5  ;;  %9826 = vmatmul.mubr.msk.f32.gmra.mrb[8].mxu0 %vm5609_vm13, %v13621_v29  ;;  %9834 = vmatmul.mubr.msk.f32.gmra.mrb[8].mxu1 %vm5609_vm13, %v13621_v29  ;;  %v13650_v44 = vld [vmem:[%s15526_s3 + $0x28] sm:$0xff]  ;;  %v13668_v16 = vsel %vm15425_vm10, nan, %v1351_v0 }
 0x2dc   : > { %10725 = vsinq.f32 %v2169_v19  ;;  %v13630_v57 = vshrl.u32 %v2870_v60, 30  ;;  %v3032_v45 = vsub.s32 32, %v3031_v13  ;;  %v3034_v30 = vshll.u32 %v15520_v42, %v3031_v13  ;;  %5728 = vmatprep.mubr.f32.mxu0 %v15528_v43  ;;  %5841 = vmatprep.mubr.f32.mxu1 %v15528_v43 }
 0x2dd   : > { %v3037_v41 = vshll.u32 %v15502_v23, %v3031_v13  ;;  %v3040_v54 = vshll.u32 %v15482_v12, %v3031_v13  ;;  %v3043_v50 = vshll.u32 %v15480_v17, %v3031_v13  ;;  %v3046_v19 = vshll.u32 %v15483_v27, %v3031_v13 }
 0x2de   : > { %v2872_v63 = vshll.u32 %v13630_v57, 30  ;;  %v3035_v34 = vshrl.u32 %v15502_v23, %v3032_v45  ;;  %v2708_v60 = vand.u32 2139095040, %v13614_v51  ;;  %v3038_v49 = vshrl.u32 %v15482_v12, %v3032_v45 }
 0x2df   : > { %v3041_v26 = vshrl.u32 %v15480_v17, %v3032_v45  ;;  %v3044_v39 = vshrl.u32 %v15483_v27, %v3032_v45  ;;  %v3047_v13 = vshrl.u32 %v15484_v28, %v3032_v45  ;;  %vm2177_vm11 = vcmp.eq.s32.totalorder %v13624_v48, 0  ;;  %9827 = vmatmul.mubr.msk.f32.gmra.mrb[10].mxu0 %vm5609_vm13, %v13650_v44  ;;  %9835 = vmatmul.mubr.msk.f32.gmra.mrb[10].mxu1 %vm5609_vm13, %v13650_v44 }
 0x2e0   : > { %vm2180_vm6 = vcmp.eq.s32.totalorder %v13624_v48, 2  ;;  %v13659_v15 = vsub.s32 %v2869_v9, %v2872_v63  ;;  %v3033_v5 = vshrl.u32 %v15520_v42, %v3032_v45  ;;  %v3036_v3 = vor.u32 %v3035_v34, %v3034_v30  ;;  %5734 = vmatprep.mubr.f32.mxu0 %v15528_v43  ;;  %5847 = vmatprep.mubr.f32.mxu1 %v15528_v43 }
 0x2e1   : > { %vm2176_vm15 = vcmp.lt.s32.totalorder %v13624_v48, 2  ;;  %v3039_v20 = vor.u32 %v3038_v49, %v3037_v41  ;;  %v3042_v37 = vor.u32 %v3041_v26, %v3040_v54  ;;  %v3045_v32 = vor.u32 %v3044_v39, %v3043_v50  ;;  %v13679_v49 = vld [vmem:[%s15526_s3 + $0x30] sm:$0xff] }
 0x2e2   : > { %vm3049_vm3 = vcmp.lt.s32.totalorder %v13633_v36, 1  ;;  %vm2173_vm1 = vweird.f32 %v12510_v2  ;;  %v2875_v9 = vsub.s32 0, %v13659_v15  ;;  %v3025_v45 = vor.u32 8388608, %v13628_v14 }
 0x2e3   : > { %v3048_v30 = vor.u32 %v3047_v13, %v3046_v19  ;;  %vm3050_vm9 = vcmp.lt.s32.totalorder %v13633_v36, 2  ;;  %vm3051_vm4 = vcmp.lt.s32.totalorder %v13633_v36, 3  ;;  %vm3052_vm10 = vcmp.lt.s32.totalorder %v13633_v36, 4  ;;  %9828 = vmatmul.mubr.msk.f32.gmra.mrb[12].mxu0 %vm5609_vm13, %v13679_v49  ;;  %9836 = vmatmul.mubr.msk.f32.gmra.mrb[12].mxu1 %vm5609_vm13, %v13679_v49 }
 0x2e4   : > { %v2709_v41 = vshrl.u32 %v2708_v60, 23  ;;  %v9715_v26 = vmin.u32 %v2875_v9, %v13659_v15  ;;  %v3054_v39 = vsel %vm3052_vm10, %v3042_v37, 2102212464  ;;  %v3057_v0 = vsel %vm3049_vm3, %v3036_v3, %v3039_v20  ;;  %5740 = vmatprep.mubr.f32.mxu0 %v15528_v43  ;;  %5853 = vmatprep.mubr.f32.mxu1 %v15528_v43 }
 0x2e5   : > { %v3058_v14 = vsel %vm3052_vm10, %v3045_v32, 920167782  ;;  %v13688_v54 = vpop.eup %10723  ;;  %v3053_v50 = vsel %vm3049_vm3, %v3033_v5, %v3036_v3  ;;  %v3055_v63 = vsel %vm3051_vm4, %v3039_v20, %v3054_v39  ;;  %v3062_v19 = vsel %vm3052_vm10, %v3048_v30, 1326507024  ;;  %v13715_v30 = vld [vmem:[%s15526_s3 + $0x38] sm:$0xff] }
 0x2e6   : > { %15590 = vst [vmem:[#allocation54_spill] sm:$0xff] %v13688_v54  ;;  %v3059_v34 = vsel %vm3051_vm4, %v3042_v37, %v3058_v14  ;;  %v13698_v60 = vpop.eup %10725  ;;  %vm2811_vm2 = vcmp.lt.s32.totalorder %v13436_v53, 0  ;;  %v2877_v9 = vclz %v9715_v26  ;;  %v3061_v5 = vsel %vm3049_vm3, %v3039_v20, %v3042_v37 }
 0x2e7   : > { %15591 = vst [vmem:[#allocation55_spill] sm:$0xff] %v13698_v60  ;;  %v15592_v3 = vrot.slane %v13602_v46, 6  ;;  %v15593_v39 = vrot.slane %v11941_v31, 1  ;;  %v3060_v37 = vsel %vm3050_vm9, %v3057_v0, %v3059_v34  ;;  %v3065_v20 = vshll.u32 %v3025_v45, 8  ;;  %9829 = vmatmul.mubr.msk.f32.gmra.mrb[14].mxu0 %vm5609_vm13, %v13715_v30  ;;  %9837 = vmatmul.mubr.msk.f32.gmra.mrb[14].mxu1 %vm5609_vm13, %v13715_v30 }
 0x2e8   : > { %v9710_v13 = vadd.s32 4294967169, %v2709_v41  ;;  %v15594_v31 = vxor.u32 2147483648, %v13688_v54  ;;  %v3056_v21 = vsel %vm3050_vm9, %v3053_v50, %v3055_v63  ;;  %v3063_v26 = vsel %vm3051_vm4, %v3045_v32, %v3062_v19  ;;  %5924 = vmatprep.mubr.f32.mxu0 %v15528_v43  ;;  %6037 = vmatprep.mubr.f32.mxu1 %v15528_v43 }
 0x2e9   : > { %v572_v14 = vsel %vm565_vm5, %v15593_v39, %v15592_v3  ;;  %v9716_v39 = vadd.s32 4294967294, %v2877_v9  ;;  %v15595_v35 = vxor.u32 2147483648, %v13698_v60  ;;  %v3064_v41 = vsel %vm3050_vm9, %v3061_v5, %v3063_v26 }
 0x2ea   : > { %v2182_v3 = vsel %vm2180_vm6, %v15594_v31, %v13698_v60  ;;  %v13737_v0 = vmul.u32.u64.low %v3065_v20, %v3060_v37  ;;  %v13738_v34 = vmul.u32.u64.high %v3065_v20, %v3060_v37, %v13737_v0  ;;  %v2895_v19 = vsub.s32 4, %v13630_v57 }
 0x2eb   : > { %v2179_v45 = vsel %vm2177_vm11, %v13688_v54, %v15595_v35  ;;  %vm9717_vm5 = vcmp.lt.s32.totalorder %v9716_v39, 0  ;;  %v13745_v32 = vmul.u32.u64.low %v3065_v20, %v3064_v41  ;;  %v13746_v63 = vmul.u32.u64.high %v3065_v20, %v3064_v41, %v13745_v32 }
 0x2ec   : > { %v2183_v50 = vsel %vm2176_vm15, %v2179_v45, %v2182_v3  ;;  %v2880_v36 = vsel %vm9717_vm5, 0, %v9716_v39  ;;  %v2715_v9 = vadd.s32 1, %v9710_v13  ;;  %v2865_v5 = vadd.s32 %v13539_v7, %v13552_v18 }
 0x2ed   : > { %v2184_v35 = vsel %vm2173_vm1, nan, %v2183_v50  ;;  %v2881_v26 = vsub.s32 32, %v2880_v36  ;;  %v2885_v37 = vsub.s32 4294967266, %v2880_v36  ;;  %v3072_v31 = vmul.u32 %v3065_v20, %v3056_v21 }
 0x2ee   : > { %v10086_v48 = vpack.c.bf16 %v2184_v35, %v13668_v16  ;;  %v3075_v3 = vadd.s32 1, %v13738_v34  ;;  %v15430_v45 = vand.u32 2147483647, %v13614_v51  ;;  %vm2716_vm10 = vcmp.gt.s32.totalorder %v2715_v9, 0 }
 0x2ef   : > { %v2882_v39 = vshll.u32 %v13659_v15, %v2880_v36  ;;  %v2883_v41 = vshrl.u32 %v2865_v5, %v2881_v26  ;;  %v2886_v13 = vadd.s32 127, %v2885_v37  ;;  %vm3074_vm11 = vc.u32 %v13746_v63, %v13737_v0 }
 0x2f0   : > { %10087 = vmatpush1.bf16.msra.mxu1 %v10086_v48  ;;  %v2896_v16 = vsel %vm2811_vm2, %v2895_v19, %v13630_v57  ;;  %v3076_v7 = vsel %vm3074_vm11, %v3075_v3, %v13738_v34  ;;  %v2717_v21 = vsel %vm2716_vm10, %v2715_v9, 0  ;;  %v15596_v18 = vrot.slane %v13602_v46, 3 }
 0x2f1   : > { %v2884_v50 = vor.u32 %v2883_v41, %v2882_v39  ;;  %v2887_v32 = vshll.u32 %v2886_v13, 23  ;;  %v3077_v35 = vadd.s32 %v3076_v7, %v3072_v31  ;;  %v15597_v15 = vand.u32 2147483647, %v13436_v53 }
 0x2f2   : > { %v581_v20 = vsel %vm574_vm8, %v572_v14, %v15596_v18  ;;  %v2712_v48 = vand.u32 8388607, %v15430_v45  ;;  %v2719_v57 = vand.u32 31, %v2717_v21  ;;  %v2718_v26 = vshrl.u32 %v2717_v21, 5 }
 0x2f3   : > { %vm13772_vm6 = vcmp.le.f32.partialorder %v15597_v15, 0.7853982  ;;  %v2888_v19 = vor.u32 4788187, %v2887_v32  ;;  %v3078_v9 = vadd.s32 536870912, %v3077_v35  ;;  %v13783_v14 = vmul.f32 %v11887_v11, %v581_v20 }
 0x2f4   : > { %v13780_v34 = vsel %vm13772_vm6, 0, %v2896_v16  ;;  %v2891_v5 = vcvt.s32.f32 %v2884_v50  ;;  %v2720_v37 = vsub.s32 32, %v2719_v57  ;;  %v2722_v31 = vshll.u32 %v15520_v42, %v2719_v57 }
 0x2f5   : > { %v2889_v3 = vand.u32 2147483647, %v2888_v19  ;;  %v13786_v39 = vshrl.u32 %v3078_v9, 30  ;;  %v2725_v41 = vshll.u32 %v15502_v23, %v2719_v57  ;;  %v2728_v13 = vshll.u32 %v15482_v12, %v2719_v57 }
 0x2f6   : > { %v2723_v7 = vshrl.u32 %v15502_v23, %v2720_v37  ;;  %v2726_v16 = vshrl.u32 %v15482_v12, %v2720_v37  ;;  %v2729_v18 = vshrl.u32 %v15480_v17, %v2720_v37  ;;  %v2731_v11 = vshll.u32 %v15480_v17, %v2719_v57 }
 0x2f7   : > { %v2892_v20 = vmul.f32 %v2891_v5, %v2889_v3  ;;  %v3080_v21 = vshll.u32 %v13786_v39, 30  ;;  %v2732_v50 = vshrl.u32 %v15483_v27, %v2720_v37  ;;  %v2902_v32 = vadd.s32 3, %v13780_v34 }
 0x2f8   : > { %v2734_v15 = vshll.u32 %v15483_v27, %v2719_v57  ;;  %v2735_v19 = vshrl.u32 %v15484_v28, %v2720_v37  ;;  %v2916_v9 = vand.u32 2139095040, %v13783_v14  ;;  %v2713_v54 = vor.u32 8388608, %v2712_v48 }
 0x2f9   : > { %v2893_v45 = vxor.u32 2147483648, %v2892_v20  ;;  %v13800_v2 = vsub.s32 %v3077_v35, %v3080_v21  ;;  %v2730_v60 = vor.u32 %v2729_v18, %v2728_v13  ;;  %v2724_v22 = vor.u32 %v2723_v7, %v2722_v31 }
 0x2fa   : > { %v2727_v25 = vor.u32 %v2726_v16, %v2725_v41  ;;  %v2733_v5 = vor.u32 %v2732_v50, %v2731_v11  ;;  %vm2737_vm8 = vcmp.lt.s32.totalorder %v2718_v26, 1  ;;  %v2721_v57 = vshrl.u32 %v15520_v42, %v2720_v37 }
 0x2fb   : > { %v2894_v3 = vsel %vm2811_vm2, %v2893_v45, %v2892_v20  ;;  %v3083_v33 = vsub.s32 0, %v13800_v2  ;;  %vm2740_vm15 = vcmp.lt.s32.totalorder %v2718_v26, 4  ;;  %v13809_v35 = vand.u32 3, %v2902_v32 }
 0x2fc   : > { %v2897_v59 = vsel %vm13772_vm6, %v13436_v53, %v2894_v3  ;;  %v2736_v48 = vor.u32 %v2735_v19, %v2734_v15  ;;  %v2917_v13 = vshrl.u32 %v2916_v9, 23  ;;  %vm2739_vm3 = vcmp.lt.s32.totalorder %v2718_v26, 3 }
 0x2fd   : > { %10727 = vcosq.f32 %v2897_v59  ;;  %v9723_v31 = vmin.u32 %v3083_v33, %v13800_v2  ;;  %v2742_v41 = vsel %vm2740_vm15, %v2730_v60, 2102212464  ;;  %vm2738_vm2 = vcmp.lt.s32.totalorder %v2718_v26, 2 }
 0x2fe   : > { %10729 = vsinq.f32 %v2897_v59  ;;  %v2745_v45 = vsel %vm2737_vm8, %v2724_v22, %v2727_v25  ;;  %v2746_v37 = vsel %vm2740_vm15, %v2733_v5, 920167782  ;;  %v2741_v36 = vsel %vm2737_vm8, %v2721_v57, %v2724_v22 }
 0x2ff   : > { %v3085_v7 = vclz %v9723_v31  ;;  %v2749_v16 = vsel %vm2737_vm8, %v2727_v25, %v2730_v60  ;;  %v2753_v18 = vshll.u32 %v2713_v54, 8  ;;  %v2743_v11 = vsel %vm2739_vm3, %v2727_v25, %v2742_v41 }
 0x300   : > { %v2747_v20 = vsel %vm2739_vm3, %v2730_v60, %v2746_v37  ;;  %v2750_v33 = vsel %vm2740_vm15, %v2736_v48, 1326507024  ;;  %v9718_v21 = vadd.s32 4294967169, %v2917_v13  ;;  %v2913_v15 = vand.u32 2147483647, %v13783_v14 }
 0x301   : > { %v9724_v50 = vadd.s32 4294967294, %v3085_v7  ;;  %v2748_v59 = vsel %vm2738_vm2, %v2745_v45, %v2747_v20  ;;  %v2751_v32 = vsel %vm2739_vm3, %v2733_v5, %v2750_v33  ;;  %vm2905_vm9 = vcmp.eq.s32.totalorder %v13809_v35, 0 }
 0x302   : > { %v2752_v22 = vsel %vm2738_vm2, %v2749_v16, %v2751_v32  ;;  %v13825_v19 = vmul.u32.u64.low %v2753_v18, %v2748_v59  ;;  %v13826_v54 = vmul.u32.u64.high %v2753_v18, %v2748_v59, %v13825_v19  ;;  %v2923_v25 = vadd.s32 1, %v9718_v21 }
 0x303   : > { %vm2904_vm4 = vcmp.lt.s32.totalorder %v13809_v35, 2  ;;  %vm9725_vm5 = vcmp.lt.s32.totalorder %v9724_v50, 0  ;;  %v2744_v60 = vsel %vm2738_vm2, %v2741_v36, %v2743_v11  ;;  %vm2901_vm10 = vweird.f32 %v13436_v53 }
 0x304   : > { %v13831_v9 = vmul.u32.u64.low %v2753_v18, %v2752_v22  ;;  %v13832_v3 = vmul.u32.u64.high %v2753_v18, %v2752_v22, %v13831_v9  ;;  %v3088_v5 = vsel %vm9725_vm5, 0, %v9724_v50  ;;  %vm2924_vm11 = vcmp.gt.s32.totalorder %v2923_v25, 0 }
 0x305   : > { %v3073_v13 = vadd.s32 %v13737_v0, %v13746_v63  ;;  %v3089_v31 = vsub.s32 32, %v3088_v5  ;;  %v3093_v41 = vsub.s32 4294967266, %v3088_v5  ;;  %v2925_v26 = vsel %vm2924_vm11, %v2923_v25, 0 }
 0x306   : > { %vm2908_vm6 = vcmp.eq.s32.totalorder %v13809_v35, 2  ;;  %v2760_v45 = vmul.u32 %v2753_v18, %v2744_v60  ;;  %v2763_v37 = vadd.s32 1, %v13826_v54  ;;  %v2927_v7 = vand.u32 31, %v2925_v26 }
 0x307   : > { %v13843_v36 = vpop.eup %10727  ;;  %v3090_v16 = vshll.u32 %v13800_v2, %v3088_v5  ;;  %v3091_v11 = vshrl.u32 %v3073_v13, %v3089_v31  ;;  %v3094_v20 = vadd.s32 127, %v3093_v41  ;;  %vm2762_vm8 = vc.u32 %v13832_v3, %v13825_v19 }
 0x308   : > { %v13848_v33 = vpop.eup %10729  ;;  %v15442_v0 = vxor.u32 2147483648, %v13843_v36  ;;  %v2764_v63 = vsel %vm2762_vm8, %v2763_v37, %v13826_v54  ;;  %v2920_v18 = vand.u32 8388607, %v2913_v15  ;;  %v2928_v21 = vsub.s32 32, %v2927_v7 }
 0x309   : > { %v15443_v50 = vxor.u32 2147483648, %v13848_v33  ;;  %v3092_v59 = vor.u32 %v3091_v11, %v3090_v16  ;;  %v3095_v32 = vshll.u32 %v3094_v20, 23  ;;  %v2765_v2 = vadd.s32 %v2764_v63, %v2760_v45 }
 0x30a   : > { %v2910_v22 = vsel %vm2908_vm6, %v15442_v0, %v13848_v33  ;;  %v3103_v25 = vsub.s32 4, %v13786_v39  ;;  %v2930_v60 = vshll.u32 %v15520_v42, %v2927_v7  ;;  %v2931_v54 = vshrl.u32 %v15502_v23, %v2928_v21 }
 0x30b   : > { %v2907_v9 = vsel %vm2905_vm9, %v13843_v36, %v15443_v50  ;;  %v3096_v5 = vor.u32 4788187, %v3095_v32  ;;  %v2766_v13 = vadd.s32 536870912, %v2765_v2  ;;  %v2933_v31 = vshll.u32 %v15502_v23, %v2927_v7 }
 0x30c   : > { %v2911_v41 = vsel %vm2904_vm4, %v2907_v9, %v2910_v22  ;;  %v3099_v45 = vcvt.s32.f32 %v3092_v59  ;;  %v2934_v37 = vshrl.u32 %v15482_v12, %v2928_v21  ;;  %v2936_v16 = vshll.u32 %v15482_v12, %v2927_v7 }
 0x30d   : > { %v2912_v11 = vsel %vm2901_vm10, nan, %v2911_v41  ;;  %v3097_v20 = vand.u32 2147483647, %v3096_v5  ;;  %v13875_v63 = vshrl.u32 %v2766_v13, 30  ;;  %v2937_v48 = vshrl.u32 %v15480_v17, %v2928_v21 }
 0x30e   : > { %5864 = vmatprep.subr.mxu0 %v2912_v11  ;;  %v2926_v32 = vshrl.u32 %v2925_v26, 5  ;;  %v2939_v23 = vshll.u32 %v15480_v17, %v2927_v7  ;;  %v2940_v35 = vshrl.u32 %v15483_v27, %v2928_v21  ;;  %v2942_v59 = vshll.u32 %v15483_v27, %v2927_v7 }
 0x30f   : > { %v15600_v22 = vand.u32 2147483647, %v13508_v62  ;;  %vm3019_vm3 = vcmp.lt.s32.totalorder %v13508_v62, 0  ;;  %v3100_v9 = vmul.f32 %v3099_v45, %v3097_v20  ;;  %v2768_v5 = vshll.u32 %v13875_v63, 30 }
 0x310   : > { %v3104_v13 = vsel %vm3019_vm3, %v3103_v25, %v13786_v39  ;;  %v2932_v26 = vor.u32 %v2931_v54, %v2930_v60  ;;  %v2941_v41 = vor.u32 %v2940_v35, %v2939_v23  ;;  %v2943_v17 = vshrl.u32 %v15484_v28, %v2928_v21 }
 0x311   : > { %vm13883_vm15 = vcmp.le.f32.partialorder %v15600_v22, 0.7853982  ;;  %v3101_v11 = vxor.u32 2147483648, %v3100_v9  ;;  %v2769_v57 = vsub.s32 %v2765_v2, %v2768_v5  ;;  %v2935_v27 = vor.u32 %v2934_v37, %v2933_v31 }
 0x312   : > { %v2938_v7 = vor.u32 %v2937_v48, %v2936_v16  ;;  %v2921_v0 = vor.u32 8388608, %v2920_v18  ;;  %v2944_v22 = vor.u32 %v2943_v17, %v2942_v59  ;;  %vm2945_vm2 = vcmp.lt.s32.totalorder %v2926_v32, 1 }
 0x313   : > { %vm2948_vm9 = vcmp.lt.s32.totalorder %v2926_v32, 4  ;;  %v3102_v50 = vsel %vm3019_vm3, %v3101_v11, %v3100_v9  ;;  %v13893_v45 = vsel %vm13883_vm15, 0, %v3104_v13  ;;  %v2771_v20 = vsub.s32 0, %v2769_v57 }
 0x314   : > { %vm2947_vm4 = vcmp.lt.s32.totalorder %v2926_v32, 3  ;;  %v3105_v39 = vsel %vm13883_vm15, %v13508_v62, %v3102_v50  ;;  %v2929_v28 = vshrl.u32 %v15520_v42, %v2928_v21  ;;  %vm2946_vm5 = vcmp.lt.s32.totalorder %v2926_v32, 2 }
 0x315   : > { %v2954_v48 = vsel %vm2948_vm9, %v2941_v41, 920167782  ;;  %10731 = vcosq.f32 %v3105_v39  ;;  %v9711_v18 = vmin.u32 %v2771_v20, %v2769_v57  ;;  %v2950_v2 = vsel %vm2948_vm9, %v2938_v7, 2102212464 }
 0x316   : > { %v2953_v25 = vsel %vm2945_vm2, %v2932_v26, %v2935_v27  ;;  %10733 = vsinq.f32 %v3105_v39  ;;  %v2955_v60 = vsel %vm2947_vm4, %v2938_v7, %v2954_v48  ;;  %v2957_v54 = vsel %vm2945_vm2, %v2935_v27, %v2938_v7 }
 0x317   : > { %v2958_v31 = vsel %vm2948_vm9, %v2944_v22, 1326507024  ;;  %v3110_v50 = vadd.s32 3, %v13893_v45  ;;  %v2773_v37 = vclz %v9711_v18  ;;  %v2961_v42 = vshll.u32 %v2921_v0, 8 }
 0x318   : > { %v2949_v21 = vsel %vm2945_vm2, %v2929_v28, %v2932_v26  ;;  %v2951_v16 = vsel %vm2947_vm4, %v2935_v27, %v2950_v2  ;;  %v2956_v23 = vsel %vm2946_vm5, %v2953_v25, %v2955_v60  ;;  %v2959_v35 = vsel %vm2947_vm4, %v2941_v41, %v2958_v31 }
 0x319   : > { %v9712_v59 = vadd.s32 4294967294, %v2773_v37  ;;  %v2960_v12 = vsel %vm2946_vm5, %v2957_v54, %v2959_v35  ;;  %v13911_v9 = vmul.u32.u64.low %v2961_v42, %v2956_v23  ;;  %v13912_v5 = vmul.u32.u64.high %v2961_v42, %v2956_v23, %v13911_v9 }
 0x31a   : > { %v13914_v13 = vmul.u32.u64.low %v2961_v42, %v2960_v12  ;;  %v13915_v17 = vmul.u32.u64.high %v2961_v42, %v2960_v12, %v13914_v13  ;;  %v2952_v0 = vsel %vm2946_vm5, %v2949_v21, %v2951_v16  ;;  %v3111_v11 = vand.u32 3, %v3110_v50 }
 0x31b   : > { %vm9713_vm11 = vcmp.lt.s32.totalorder %v9712_v59, 0  ;;  %v2761_v27 = vadd.s32 %v13825_v19, %v13832_v3  ;;  %v2971_v41 = vadd.s32 1, %v13912_v5  ;;  %v2968_v20 = vmul.u32 %v2961_v42, %v2952_v0 }
 0x31c   : > { %v2776_v26 = vsel %vm9713_vm11, 0, %v9712_v59  ;;  %vm2970_vm6 = vc.u32 %v13915_v17, %v13911_v9  ;;  %vm3116_vm8 = vcmp.eq.s32.totalorder %v3111_v11, 2  ;;  %vm3113_vm15 = vcmp.eq.s32.totalorder %v3111_v11, 0 }
 0x31d   : > { %v2777_v7 = vsub.s32 32, %v2776_v26  ;;  %v2781_v22 = vsub.s32 4294967266, %v2776_v26  ;;  %v2778_v28 = vshll.u32 %v2769_v57, %v2776_v26  ;;  %v2972_v32 = vsel %vm2970_vm6, %v2971_v41, %v13912_v5 }
 0x31e   : > { %v2973_v60 = vadd.s32 %v2972_v32, %v2968_v20  ;;  %vm3112_vm3 = vcmp.lt.s32.totalorder %v3111_v11, 2  ;;  %vm3109_vm2 = vweird.f32 %v13508_v62  ;;  %v2791_v5 = vsub.s32 4, %v13875_v63 }
 0x31f   : > { %v13922_v39 = vpop.eup %10731  ;;  %v2779_v48 = vshrl.u32 %v2761_v27, %v2777_v7  ;;  %v2782_v18 = vadd.s32 127, %v2781_v22  ;;  %vm2707_vm9 = vcmp.lt.s32.totalorder %v13614_v51, 0  ;;  %v15603_v26 = vand.u32 2147483647, %v13614_v51 }
 0x320   : > { %v13925_v2 = vpop.eup %10733  ;;  %v3117_v25 = vxor.u32 2147483648, %v13922_v39  ;;  %v2974_v57 = vadd.s32 536870912, %v2973_v60  ;;  %v2792_v7 = vsel %vm2707_vm9, %v2791_v5, %v13875_v63 }
 0x321   : > { %v3114_v19 = vxor.u32 2147483648, %v13925_v2  ;;  %v2780_v3 = vor.u32 %v2779_v48, %v2778_v28  ;;  %v2783_v54 = vshll.u32 %v2782_v18, 23  ;;  %vm2706_vm4 = vcmp.le.f32.partialorder %v15603_v26, 0.7853982 }
 0x322   : > { %v3118_v31 = vsel %vm3116_vm8, %v3117_v25, %v13925_v2  ;;  %v13936_v21 = vshrl.u32 %v2974_v57, 30  ;;  %v13947_v20 = vsel %vm2706_vm4, 0, %v2792_v7  ;;  %v13966_v7 = vld [vmem:[%s15526_s3] sm:$0xff] }
 0x323   : > { %v3115_v50 = vsel %vm3113_vm15, %v13922_v39, %v3114_v19  ;;  %v2784_v37 = vor.u32 4788187, %v2783_v54  ;;  %v2787_v35 = vcvt.s32.f32 %v2780_v3  ;;  %v2798_v18 = vadd.s32 3, %v13947_v20 }
 0x324   : > { %v3119_v42 = vsel %vm3112_vm3, %v3115_v50, %v3118_v31  ;;  %v2976_v59 = vshll.u32 %v13936_v21, 30  ;;  %vm2797_vm15 = vweird.f32 %v13614_v51  ;;  %vm15604_vm3 = vcmask 1042432  }
 0x325   : > { %v3120_v16 = vsel %vm3109_vm2, nan, %v3119_v42  ;;  %v2785_v23 = vand.u32 2147483647, %v2784_v37  ;;  %v2799_v31 = vand.u32 3, %v2798_v18 }
 0x326   : > { %5977 = vmatprep.subr.mxu1 %v3120_v16  ;;  %v2977_v13 = vsub.s32 %v2973_v60, %v2976_v59  ;;  %v2969_v60 = vadd.s32 %v13911_v9, %v13915_v17 }
 0x327   : > { %v2788_v12 = vmul.f32 %v2787_v35, %v2785_v23  ;;  %vm2804_vm11 = vcmp.eq.s32.totalorder %v2799_v31, 2  ;;  %vm2801_vm6 = vcmp.eq.s32.totalorder %v2799_v31, 0  ;;  %vm2800_vm8 = vcmp.lt.s32.totalorder %v2799_v31, 2 }
 0x328   : > { %v2979_v11 = vsub.s32 0, %v2977_v13 }
 0x329   : > { %v2789_v0 = vxor.u32 2147483648, %v2788_v12 }
 0x32a   : > { %v9719_v41 = vmin.u32 %v2979_v11, %v2977_v13 }
 0x32b   : > { %v2790_v27 = vsel %vm2707_vm9, %v2789_v0, %v2788_v12  ;;  %vm15605_vm9 = vmmov %vm15604_vm3 }
 0x32c   : > { %v2793_v22 = vsel %vm2706_vm4, %v13614_v51, %v2790_v27  ;;  %v2981_v28 = vclz %v9719_v41  ;;  %v2999_v27 = vsub.s32 4, %v13936_v21  ;;  %vm2915_vm4 = vcmp.lt.s32.totalorder %v13783_v14, 0 }
 0x32d   : > { %10735 = vcosq.f32 %v2793_v22 }
 0x32e   : > { %10737 = vsinq.f32 %v2793_v22  ;;  %v9720_v48 = vadd.s32 4294967294, %v2981_v28  ;;  %v5377_v22 = vand.u32 3, %v13780_v34  ;;  %v10767_v28 = vld [vmem:[%s11102_s16] sm:$0x77]  ;;  %v3000_v18 = vsel %vm2915_vm4, %v2999_v27, %v13936_v21 }
 0x32f   : > { %v15608_v21 = vxor.u32 2147483648, %v13843_v36 }
 0x330   : > { %vm9721_vm5 = vcmp.lt.s32.totalorder %v9720_v48, 0 }
 0x331   : > { %v2984_v32 = vsel %vm9721_vm5, 0, %v9720_v48  ;;  %vm15606_vm5 = vmmov %vm15604_vm3 }
 0x332   : > { %v2985_v3 = vsub.s32 32, %v2984_v32  ;;  %v2989_v54 = vsub.s32 4294967266, %v2984_v32  ;;  %v2986_v57 = vshll.u32 %v2977_v13, %v2984_v32  ;;  %v13987_v32 = vld [vmem:[%s15526_s3 + $0x8] sm:$0xff] }
 0x334   : > { %v2987_v63 = vshrl.u32 %v2969_v60, %v2985_v3  ;;  %v2990_v50 = vadd.s32 127, %v2989_v54 }
 0x336   : > { %v2988_v23 = vor.u32 %v2987_v63, %v2986_v57  ;;  %v2991_v35 = vshll.u32 %v2990_v50, 23 }
 0x337   : > { %v13951_v37 = vpop.eup %10735 }
 0x338   : > { %v13953_v42 = vpop.eup %10737  ;;  %v2805_v16 = vxor.u32 2147483648, %v13951_v37  ;;  %v2992_v17 = vor.u32 4788187, %v2991_v35  ;;  %v2995_v0 = vcvt.s32.f32 %v2988_v23 }
 0x339   : > { %v2802_v59 = vxor.u32 2147483648, %v13953_v42 }
 0x33a   : > { %v2806_v9 = vsel %vm2804_vm11, %v2805_v16, %v13953_v42  ;;  %v2993_v13 = vand.u32 2147483647, %v2992_v17  ;;  %vm2914_vm11 = vcmp.le.f32.partialorder %v2913_v15, 0.7853982 }
 0x33b   : > { %v2803_v12 = vsel %vm2801_vm6, %v13951_v37, %v2802_v59  ;;  %vm5379_vm6 = vcmp.eq.s32.totalorder %v5377_v22, 0 }
 0x33c   : > { %v2807_v5 = vsel %vm2800_vm8, %v2803_v12, %v2806_v9  ;;  %v2996_v26 = vmul.f32 %v2995_v0, %v2993_v13  ;;  %vm5382_vm8 = vcmp.eq.s32.totalorder %v5377_v22, 2  ;;  %v14068_v13 = vld [vmem:[%s15612_s2 + $0x8] sm:$0xff]  ;;  %v14082_v0 = vld [vmem:[%s15612_s2 + $0x10] sm:$0xff] }
 0x33d   : > { %v2808_v11 = vsel %vm2797_vm15, nan, %v2807_v5  ;;  %v5384_v60 = vsel %vm5382_vm8, %v15608_v21, %v13848_v33 }
 0x33e   : > { %5865 = vmatpush1.msra.mxu0 %v2808_v11  ;;  %v2997_v41 = vxor.u32 2147483648, %v2996_v26 }
 0x33f   : > { %9838 = vmatmul.mubr.msk.f32.vlgmr.msra.gmra.mrb[16].mxu0 %vm5609_vm13, %v13966_v7  ;;  %9854 = vmatprep.subr.msk.mxu0 %vm15604_vm3, %v11109_v38  ;;  %v5583_v38 = vand.u32 3, %v13893_v45  ;;  %v3002_v45 = vsel %vm2914_vm11, 0, %v3000_v18  ;;  %vm5378_vm3 = vcmp.lt.s32.totalorder %v5377_v22, 2  ;;  %v15624_v18 = vxor.u32 2147483648, %v12950_v24 }
 0x340   : > { %5930 = vmatprep.mubr.f32.mxu0 %v15528_v43  ;;  %9855 = vmatpush1.msk.msra.mxu0 %vm15605_vm9, %v10767_v28  ;;  %v2998_v48 = vsel %vm2915_vm4, %v2997_v41, %v2996_v26  ;;  %v3006_v57 = vadd.s32 3, %v3002_v45  ;;  %v5480_v62 = vand.u32 3, %v3002_v45  ;;  %v15618_v26 = vld [vmem:[#allocation24_spill] sm:$0xff] }
 0x341   : > { %9874 = vmatprep.subr.msk.mxu0 %vm15606_vm5, %v12350_v8  ;;  %v3001_v34 = vsel %vm2914_vm11, %v13783_v14, %v2998_v48  ;;  %v15607_v8 = vxor.u32 2147483648, %v13848_v33  ;;  %vm5584_vm9 = vcmp.lt.s32.totalorder %v5583_v38, 2  ;;  %vm5585_vm4 = vcmp.eq.s32.totalorder %v5583_v38, 0  ;;  %v15628_v45 = vld [vmem:[#allocation36_spill] sm:$0xff] }
 0x342   : > { %10739 = vcosq.f32 %v3001_v34  ;;  %vm5588_vm5 = vcmp.eq.s32.totalorder %v5583_v38, 2  ;;  %v5587_v31 = vsel %vm5585_vm4, %v13922_v39, %v3114_v19  ;;  %v5274_v33 = vand.u32 3, %v13947_v20 }
 0x343   : > { %9839 = vmatmul.mubr.msk.f32.gmra.mrb[18].mxu0 %vm5609_vm13, %v13987_v32  ;;  %v5381_v15 = vsel %vm5379_vm6, %v13843_v36, %v15607_v8  ;;  %10741 = vsinq.f32 %v3001_v34  ;;  %v5590_v36 = vsel %vm5588_vm5, %v3117_v25, %v13925_v2  ;;  %v3007_v2 = vand.u32 3, %v3006_v57  ;;  %v15626_v8 = vld [vmem:[#allocation37_spill] sm:$0xff] }
 0x344   : > { %5936 = vmatprep.mubr.f32.mxu0 %v15528_v43  ;;  %v5385_v3 = vsel %vm5378_vm3, %v5381_v15, %v5384_v60  ;;  %v5591_v63 = vsel %vm5584_vm9, %v5587_v31, %v5590_v36  ;;  %vm5279_vm11 = vcmp.eq.s32.totalorder %v5274_v33, 2  ;;  %vm5275_vm6 = vcmp.lt.s32.totalorder %v5274_v33, 2  ;;  %v15632_v36 = vld [vmem:[#allocation27_spill] sm:$0xff] }
 0x345   : > { %v14002_v54 = vsel %vm2901_vm10, nan, %v5385_v3  ;;  %v14014_v50 = vsel %vm3109_vm2, nan, %v5591_v63  ;;  %vm5276_vm10 = vcmp.eq.s32.totalorder %v5274_v33, 0  ;;  %v5281_v19 = vsel %vm5279_vm11, %v2805_v16, %v13953_v42 }
 0x346   : > { %v5278_v53 = vsel %vm5276_vm10, %v13951_v37, %v2802_v59  ;;  %vm3012_vm2 = vcmp.eq.s32.totalorder %v3007_v2, 2  ;;  %vm5485_vm8 = vcmp.eq.s32.totalorder %v5480_v62, 2  ;;  %vm3009_vm3 = vcmp.eq.s32.totalorder %v3007_v2, 0 }
 0x347   : > { %9840 = vmatmul.mubr.msk.f32.gmra.mrb[20].mxu0 %vm5609_vm13, %v13570_v47  ;;  %v5282_v39 = vsel %vm5275_vm6, %v5278_v53, %v5281_v19  ;;  %vm5482_vm9 = vcmp.eq.s32.totalorder %v5480_v62, 0  ;;  %vm3008_vm4 = vcmp.lt.s32.totalorder %v3007_v2, 2  ;;  %vm3005_vm5 = vweird.f32 %v13783_v14  ;;  %v10769_v14 = vld [vmem:[%s11102_s16 + $0x8] sm:$0x77]  ;;  %v15635_v2 = vld [vmem:[#allocation8_spill] sm:$0xff] }
 0x348   : > { %5942 = vmatprep.mubr.f32.mxu0 %v15528_v43  ;;  %v14023_v25 = vsel %vm2797_vm15, nan, %v5282_v39  ;;  %vm5481_vm15 = vcmp.lt.s32.totalorder %v5480_v62, 2  ;;  %vm15609_vm10 = vcmask 1042432   ;;  %v4862_v27 = vand.u32 3, %v15618_v26  ;;  %v15634_v39 = vld [vmem:[#allocation10_spill] sm:$0xff]  ;;  %v15647_v26 = vld [vmem:[#allocation29_spill] sm:$0xff] }
 0x349   : > { %vm15610_vm11 = vmmov %vm15609_vm10  ;;  %v15625_v34 = vxor.u32 2147483648, %v12940_v4  ;;  %v15627_v15 = vxor.u32 2147483648, %v15626_v8  ;;  %v15629_v60 = vxor.u32 2147483648, %v15628_v45  ;;  %v15633_v57 = vxor.u32 2147483648, %v15632_v36 }
 0x34a   : > { %vm15611_vm6 = vmmov %vm15609_vm10  ;;  %v15636_v62 = vpack.c.bf16 %v15634_v39, %v15635_v2 }
 0x34b   : > { %9841 = vmatmul.mubr.msk.f32.gmra.mrb[22].mxu0 %vm5609_vm13, %v13585_v10 }
 0x34c   : > { %5948 = vmatprep.mubr.f32.mxu0 %v15528_v43  ;;  %v10740_v20 = vpop.eup %10739 }
 0x34d   : > { %v10742_v23 = vpop.eup %10741  ;;  %v3013_v35 = vxor.u32 2147483648, %v10740_v20 }
 0x34e   : > { %v3010_v37 = vxor.u32 2147483648, %v10742_v23 }
 0x34f   : > { %9842 = vmatmul.mubr.msk.f32.gmra.mrb[24].mxu0 %vm5609_vm13, %v13621_v29  ;;  %v3014_v42 = vsel %vm3012_vm2, %v3013_v35, %v10742_v23  ;;  %v5487_v16 = vsel %vm5485_vm8, %v3013_v35, %v10742_v23  ;;  %vm6086_vm2 = vcmask 23552   ;;  %vm15613_vm8 = vmmov %vm15611_vm6 }
 0x350   : > { %5954 = vmatprep.mubr.f32.mxu0 %v15528_v43  ;;  %v3011_v51 = vsel %vm3009_vm3, %v10740_v20, %v3010_v37  ;;  %v5484_v59 = vsel %vm5482_vm9, %v10740_v20, %v3010_v37  ;;  %vm15616_vm3 = vmmov %vm15611_vm6 }
 0x351   : > { %v3015_v9 = vsel %vm3008_vm4, %v3011_v51, %v3014_v42  ;;  %v5488_v17 = vsel %vm5481_vm15, %v5484_v59, %v5487_v16  ;;  %v15639_v51 = vld [vmem:[#allocation13_spill] sm:$0xff] }
 0x352   : > { %v3016_v12 = vsel %vm3005_vm5, nan, %v3015_v9  ;;  %v14032_v5 = vsel %vm3005_vm5, nan, %v5488_v17  ;;  %v5171_v17 = vand.u32 3, %v15641_v6 }
 0x353   : > { %9843 = vmatmul.mubr.msk.f32.gmra.mrb[26].mxu0 %vm5609_vm13, %v13650_v44  ;;  %5978 = vmatpush1.msra.mxu1 %v3016_v12  ;;  %v15642_v12 = vld [vmem:[#allocation39_spill] sm:$0xff] }
 0x354   : > { %5960 = vmatprep.mubr.f32.mxu0 %v15528_v43  ;;  %9846 = vmatmul.mubr.msk.f32.vlgmr.msra.gmra.mrb[16].mxu1 %vm5609_vm13, %v13966_v7  ;;  %v15619_v7 = vld [vmem:[#allocation33_spill] sm:$0xff] }
 0x355   : > { %9864 = vmatprep.subr.msk.mxu1 %vm15609_vm10, %v11141_v56  ;;  %6043 = vmatprep.mubr.f32.mxu1 %v15528_v43  ;;  %v14055_v56 = vld [vmem:[%s15612_s2] sm:$0xff]  ;;  %v3729_v22 = vand.u32 3, %v15619_v7 }
 0x356   : > { %9865 = vmatpush1.msk.msra.mxu1 %vm15610_vm11, %v10769_v14  ;;  %vm4864_vm11 = vcmp.eq.s32.totalorder %v4862_v27, 0  ;;  %v4759_v14 = vand.u32 3, %v15642_v12  ;;  %v15648_v7 = vld [vmem:[#allocation38_spill] sm:$0xff] }
 0x357   : > { %9844 = vmatmul.mubr.msk.f32.gmra.mrb[28].mxu0 %vm5609_vm13, %v13679_v49  ;;  %9884 = vmatprep.subr.msk.mxu1 %vm15611_vm6, %v12519_v58  ;;  %v10770_v58 = vld [vmem:[%s11102_s16 + $0x10] sm:$0x77]  ;;  %vm3731_vm6 = vcmp.eq.s32.totalorder %v3729_v22, 0 }
 0x358   : > { %5966 = vmatprep.mubr.f32.mxu0 %v15528_v43  ;;  %9847 = vmatmul.mubr.msk.f32.gmra.mrb[18].mxu1 %vm5609_vm13, %v13987_v32  ;;  %v3733_v21 = vsel %vm3731_vm6, %v15628_v45, %v15627_v15  ;;  %v15656_v15 = vld [vmem:[#allocation40_spill] sm:$0xff] }
 0x359   : > { %6049 = vmatprep.mubr.f32.mxu1 %v15528_v43 }
 0x35b   : > { %9845 = vmatmul.mubr.msk.f32.gmra.mrb[30].mxu0 %vm5609_vm13, %v13715_v30 }
 0x35c   : > { %6191 = vmatprep.mubr.f32.mxu0 %v15528_v43  ;;  %9848 = vmatmul.mubr.msk.f32.gmra.mrb[20].mxu1 %vm5609_vm13, %v13570_v47  ;;  %v15614_v47 = vpack.c.bf16 %v11464_v55, %v11397_v40  ;;  %v14093_v40 = vld [vmem:[%s15612_s2 + $0x18] sm:$0xff]  ;;  %v14104_v55 = vld [vmem:[%s15612_s2 + $0x20] sm:$0xff] }
 0x35d   : > { %6055 = vmatprep.mubr.f32.mxu1 %v15528_v43 }
 0x35f   : > { %9856 = vmatmul.mubr.msk.f32.vlgmr.msra.gmra.mrb[0].mxu0 %vm6086_vm2, %v14055_v56 }
 0x360   : > { %9875 = vmatpush1.msk.msra.mxu0 %vm15613_vm8, %v10770_v58  ;;  %6197 = vmatprep.mubr.f32.mxu0 %v15528_v43  ;;  %vm3734_vm8 = vcmp.eq.s32.totalorder %v3729_v22, 2  ;;  %v15643_v58 = vld [vmem:[#allocation22_spill] sm:$0xff] }
 0x361   : > { %9849 = vmatmul.mubr.msk.f32.gmra.mrb[22].mxu1 %vm5609_vm13, %v13585_v10  ;;  %10089 = vmatprep.subr.bf16.mxu0 %v15614_v47  ;;  %v14115_v10 = vld [vmem:[%s15612_s2 + $0x28] sm:$0xff]  ;;  %v3736_v3 = vsel %vm3734_vm8, %v15629_v60, %v15626_v8  ;;  %v15644_v47 = vxor.u32 2147483648, %v15643_v58 }
 0x362   : > { %6061 = vmatprep.mubr.f32.mxu1 %v15528_v43 }
 0x363   : > { %9857 = vmatmul.mubr.msk.f32.gmra.mrb[2].mxu0 %vm6086_vm2, %v14068_v13 }
 0x364   : > { %6203 = vmatprep.mubr.f32.mxu0 %v15528_v43 }
 0x365   : > { %9850 = vmatmul.mubr.msk.f32.gmra.mrb[24].mxu1 %vm5609_vm13, %v13621_v29  ;;  %v14126_v29 = vld [vmem:[%s15612_s2 + $0x30] sm:$0xff] }
 0x366   : > { %6067 = vmatprep.mubr.f32.mxu1 %v15528_v43 }
 0x367   : > { %9858 = vmatmul.mubr.msk.f32.gmra.mrb[4].mxu0 %vm6086_vm2, %v14082_v0 }
 0x368   : > { %6209 = vmatprep.mubr.f32.mxu0 %v15528_v43 }
 0x369   : > { %9851 = vmatmul.mubr.msk.f32.gmra.mrb[26].mxu1 %vm5609_vm13, %v13650_v44  ;;  %v4965_v44 = vand.u32 3, %v12247_v52  ;;  %v14146_v52 = vld [vmem:[%s15612_s2 + $0x38] sm:$0xff] }
 0x36a   : > { %6073 = vmatprep.mubr.f32.mxu1 %v15528_v43 }
 0x36b   : > { %9859 = vmatmul.mubr.msk.f32.gmra.mrb[6].mxu0 %vm6086_vm2, %v14093_v40  ;;  %vm4967_vm9 = vcmp.eq.s32.totalorder %v4965_v44, 0  ;;  %vm4970_vm4 = vcmp.eq.s32.totalorder %v4965_v44, 2  ;;  %vm4966_vm10 = vcmp.lt.s32.totalorder %v4965_v44, 2  ;;  %v15645_v44 = vld [vmem:[#allocation21_spill] sm:$0xff] }
 0x36c   : > { %6215 = vmatprep.mubr.f32.mxu0 %v15528_v43 }
 0x36d   : > { %9852 = vmatmul.mubr.msk.f32.gmra.mrb[28].mxu1 %vm5609_vm13, %v13679_v49  ;;  %v15615_v49 = vld [vmem:[#allocation35_spill] sm:$0xff] }
 0x36e   : > { %6079 = vmatprep.mubr.f32.mxu1 %v15528_v43  ;;  %v4553_v11 = vand.u32 3, %v15615_v49 }
 0x36f   : > { %9860 = vmatmul.mubr.msk.f32.gmra.mrb[8].mxu0 %vm6086_vm2, %v14104_v55 }
 0x370   : > { %6221 = vmatprep.mubr.f32.mxu0 %v15528_v43  ;;  %vm4555_vm15 = vcmp.eq.s32.totalorder %v4553_v11, 0  ;;  %vm4558_vm5 = vcmp.eq.s32.totalorder %v4553_v11, 2 }
 0x371   : > { %9853 = vmatmul.mubr.msk.f32.gmra.mrb[30].mxu1 %vm5609_vm13, %v13715_v30  ;;  %v15617_v30 = vpack.c.bf16 %v11732_v1, %v11608_v61  ;;  %v15620_v61 = vld [vmem:[#allocation20_spill] sm:$0xff]  ;;  %v4557_v38 = vsel %vm4555_vm15, %v12940_v4, %v15624_v18  ;;  %v4560_v32 = vsel %vm4558_vm5, %v15625_v34, %v12950_v24  ;;  %vm4863_vm15 = vcmp.lt.s32.totalorder %v4862_v27, 2 }
 0x372   : > { %6304 = vmatprep.mubr.f32.mxu1 %v15528_v43  ;;  %v15621_v1 = vxor.u32 2147483648, %v15620_v61  ;;  %v15630_v24 = vld [vmem:[#allocation28_spill] sm:$0xff]  ;;  %vm5172_vm5 = vcmp.lt.s32.totalorder %v5171_v17, 2 }
 0x373   : > { %9861 = vmatmul.mubr.msk.f32.gmra.mrb[10].mxu0 %vm6086_vm2, %v14115_v10  ;;  %v15631_v31 = vxor.u32 2147483648, %v15630_v24 }
 0x374   : > { %6227 = vmatprep.mubr.f32.mxu0 %v15528_v43 }
 0x375   : > { %9866 = vmatmul.mubr.msk.f32.vlgmr.msra.gmra.mrb[0].mxu1 %vm6086_vm2, %v14055_v56  ;;  %v4866_v33 = vsel %vm4864_vm11, %v15632_v36, %v15631_v31  ;;  %vm4764_vm11 = vcmp.eq.s32.totalorder %v4759_v14, 2  ;;  %v15661_v36 = vld [vmem:[#allocation31_spill] sm:$0xff] }
 0x376   : > { %9885 = vmatpush1.msk.msra.mxu1 %vm15616_vm3, %v13602_v46  ;;  %6310 = vmatprep.mubr.f32.mxu1 %v15528_v43  ;;  %v15622_v46 = vld [vmem:[#allocation19_spill] sm:$0xff]  ;;  %vm4867_vm3 = vcmp.eq.s32.totalorder %v4862_v27, 2  ;;  %v5068_v27 = vand.u32 3, %v15647_v26  ;;  %v15679_v26 = vld [vmem:[#allocation17_spill] sm:$0xff] }
 0x377   : > { %10093 = vmatprep.subr.bf16.mxu1 %v15617_v30  ;;  %9862 = vmatmul.mubr.msk.f32.gmra.mrb[12].mxu0 %vm6086_vm2, %v14126_v29  ;;  %v4969_v41 = vsel %vm4967_vm9, %v15622_v46, %v15621_v1  ;;  %v15623_v28 = vxor.u32 2147483648, %v15622_v46  ;;  %vm4554_vm9 = vcmp.lt.s32.totalorder %v4553_v11, 2  ;;  %v4869_v63 = vsel %vm4867_vm3, %v15633_v57, %v15630_v24  ;;  %v15649_v1 = vld [vmem:[#allocation43_spill] sm:$0xff]  ;;  %v15659_v24 = vld [vmem:[#allocation32_spill] sm:$0xff] }
 0x378   : > { %6233 = vmatprep.mubr.f32.mxu0 %v15528_v43  ;;  %v4561_v53 = vsel %vm4554_vm9, %v4557_v38, %v4560_v32  ;;  %v4870_v35 = vsel %vm4863_vm15, %v4866_v33, %v4869_v63  ;;  %v15646_v11 = vxor.u32 2147483648, %v15645_v44  ;;  %v15650_v46 = vxor.u32 2147483648, %v15649_v1  ;;  %v15653_v38 = vld [vmem:[#allocation45_spill] sm:$0xff] }
 0x379   : > { %9867 = vmatmul.mubr.msk.f32.gmra.mrb[2].mxu1 %vm6086_vm2, %v14068_v13  ;;  %v4972_v48 = vsel %vm4970_vm4, %v15623_v28, %v15620_v61  ;;  %vm3730_vm4 = vcmp.lt.s32.totalorder %v3729_v22, 2  ;;  %v4562_v37 = vsel %vm2069_vm14, nan, %v4561_v53  ;;  %vm5176_vm14 = vcmp.eq.s32.totalorder %v5171_v17, 2  ;;  %v15654_v32 = vld [vmem:[#allocation41_spill] sm:$0xff] }
 0x37a   : > { %6316 = vmatprep.mubr.f32.mxu1 %v15528_v43  ;;  %v4973_v4 = vsel %vm4966_vm10, %v4969_v41, %v4972_v48  ;;  %v3737_v19 = vsel %vm3730_vm4, %v3733_v21, %v3736_v3  ;;  %v5178_v30 = vsel %vm5176_vm14, %v15646_v11, %v15643_v58  ;;  %v3935_v22 = vand.u32 3, %v15648_v7  ;;  %v15651_v41 = vld [vmem:[#allocation42_spill] sm:$0xff]  ;;  %v15658_v3 = vld [vmem:[#allocation44_spill] sm:$0xff] }
 0x37b   : > { %9863 = vmatmul.mubr.msk.f32.gmra.mrb[14].mxu0 %vm6086_vm2, %v14146_v52  ;;  %v4974_v23 = vsel %vm2485_vm12, nan, %v4973_v4  ;;  %v3738_v16 = vsel %vm1237_vm0, nan, %v3737_v19  ;;  %vm15640_vm12 = vweird.f32 %v15639_v51  ;;  %vm5173_vm0 = vcmp.eq.s32.totalorder %v5171_v17, 0  ;;  %v15663_v19 = vld [vmem:[#allocation11_spill] sm:$0xff]  ;;  %v15670_v51 = vld [vmem:[#allocation12_spill] sm:$0xff] }
 0x37c   : > { %6417 = vmatprep.mubr.f32.mxu0 %v15528_v43  ;;  %v4871_v59 = vsel %vm15640_vm12, nan, %v4870_v35  ;;  %v10096_v9 = vpack.c.bf16 %v4562_v37, %v3738_v16  ;;  %v5175_v49 = vsel %vm5173_vm0, %v15645_v44, %v15644_v47  ;;  %vm4761_vm10 = vcmp.eq.s32.totalorder %v4759_v14, 0  ;;  %v15669_v16 = vld [vmem:[#allocation14_spill] sm:$0xff]  ;;  %v15673_v17 = vld [vmem:[#allocation47_spill] sm:$0xff] }
 0x37d   : > { %9868 = vmatmul.mubr.msk.f32.gmra.mrb[4].mxu1 %vm6086_vm2, %v14082_v0  ;;  %v5179_v61 = vsel %vm5172_vm5, %v5175_v49, %v5178_v30  ;;  %v4763_v28 = vsel %vm4761_vm10, %v15651_v41, %v15650_v46  ;;  %v15652_v48 = vxor.u32 2147483648, %v15651_v41  ;;  %v4450_v34 = vand.u32 3, %v15653_v38  ;;  %v15677_v49 = vld [vmem:[#allocation30_spill] sm:$0xff]  ;;  %v15683_v46 = vld [vmem:[#allocation15_spill] sm:$0xff] }
 0x37e   : > { %6322 = vmatprep.mubr.f32.mxu1 %v15528_v43  ;;  %vm5070_vm6 = vcmp.eq.s32.totalorder %v5068_v27, 0  ;;  %vm5073_vm8 = vcmp.eq.s32.totalorder %v5068_v27, 2  ;;  %vm3937_vm3 = vcmp.eq.s32.totalorder %v3935_v22, 0  ;;  %vm3940_vm9 = vcmp.eq.s32.totalorder %v3935_v22, 2 }
 0x37f   : > { %9876 = vmatmul.mubr.msk.f32.vlgmr.msra.gmra.mrb[16].mxu0 %vm6086_vm2, %v14055_v56  ;;  %v4766_v18 = vsel %vm4764_vm11, %v15652_v48, %v15649_v1  ;;  %v15655_v8 = vxor.u32 2147483648, %v15654_v32  ;;  %v15657_v21 = vxor.u32 2147483648, %v15656_v15  ;;  %vm4760_vm4 = vcmp.lt.s32.totalorder %v4759_v14, 2  ;;  %v15675_v14 = vld [vmem:[#allocation46_spill] sm:$0xff]  ;;  %v14308_v48 = vld [vmem:[%s15302_s4 + $0x8] sm:$0xff] }
 0x380   : > { %10091 = vmatpush1.bf16.msra.mxu0 %v15636_v62  ;;  %6423 = vmatprep.mubr.f32.mxu0 %v15528_v43  ;;  %v3626_v4 = vand.u32 3, %v15658_v3  ;;  %v15660_v31 = vxor.u32 2147483648, %v15659_v24  ;;  %v15662_v57 = vxor.u32 2147483648, %v15661_v36  ;;  %v4767_v53 = vsel %vm4760_vm4, %v4763_v28, %v4766_v18  ;;  %v15665_v62 = vld [vmem:[#allocation49_spill] sm:$0xff]  ;;  %v15686_v18 = vld [vmem:[#allocation50_spill] sm:$0xff]  ;;  %v15693_v3 = vld [vmem:[#allocation51_spill] sm:$0xff] }
 0x381   : > { %9869 = vmatmul.mubr.msk.f32.gmra.mrb[6].mxu1 %vm6086_vm2, %v14093_v40  ;;  %6615 = vmatprep.subr.mxu0 %v4974_v23  ;;  %v3939_v45 = vsel %vm3937_vm3, %v15656_v15, %v15655_v8  ;;  %v3942_v60 = vsel %vm3940_vm9, %v15657_v21, %v15654_v32  ;;  %vm15664_vm15 = vweird.f32 %v15663_v19  ;;  %vm3936_vm12 = vcmp.lt.s32.totalorder %v3935_v22, 2  ;;  %v15667_v23 = vld [vmem:[#allocation48_spill] sm:$0xff]  ;;  %v15689_v32 = vld [vmem:[#allocation54_spill] sm:$0xff] }
 0x382   : > { %6328 = vmatprep.mubr.f32.mxu1 %v15528_v43  ;;  %v5072_v33 = vsel %vm5070_vm6, %v15661_v36, %v15660_v31  ;;  %v5075_v63 = vsel %vm5073_vm8, %v15662_v57, %v15659_v24  ;;  %v5180_v39 = vsel %vm15664_vm15, nan, %v5179_v61  ;;  %vm4452_vm0 = vcmp.eq.s32.totalorder %v4450_v34, 0  ;;  %v15681_v61 = vld [vmem:[#allocation25_spill] sm:$0xff]  ;;  %v15691_v21 = vld [vmem:[#allocation52_spill] sm:$0xff] }
 0x383   : > { %9877 = vmatmul.mubr.msk.f32.gmra.mrb[18].mxu0 %vm6086_vm2, %v14068_v13  ;;  %vm4455_vm14 = vcmp.eq.s32.totalorder %v4450_v34, 2  ;;  %vm5069_vm5 = vcmp.lt.s32.totalorder %v5068_v27, 2  ;;  %v3943_v2 = vsel %vm3936_vm12, %v3939_v45, %v3942_v60  ;;  %v15666_v20 = vxor.u32 2147483648, %v15665_v62 }
 0x384   : > { %6616 = vmatpush1.msra.mxu0 %v4871_v59  ;;  %6429 = vmatprep.mubr.f32.mxu0 %v15528_v43  ;;  %v15668_v37 = vxor.u32 2147483648, %v15667_v23  ;;  %v15671_v59 = vpack.c.bf16 %v15669_v16, %v15670_v51  ;;  %vm3628_vm10 = vcmp.eq.s32.totalorder %v3626_v4, 0  ;;  %vm3631_vm11 = vcmp.eq.s32.totalorder %v3626_v4, 2 }
 0x385   : > { %9870 = vmatmul.mubr.msk.f32.gmra.mrb[8].mxu1 %vm6086_vm2, %v14104_v55  ;;  %10097 = vmatprep.subr.bf16.mxu0 %v10096_v9  ;;  %v4454_v35 = vsel %vm4452_vm0, %v15667_v23, %v15666_v20  ;;  %v5076_v9 = vsel %vm5069_vm5, %v5072_v33, %v5075_v63  ;;  %v15674_v12 = vxor.u32 2147483648, %v15673_v17  ;;  %v15676_v47 = vxor.u32 2147483648, %v15675_v14  ;;  %v14455_v23 = vpop.permute.xlu0 %7142 }
 0x386   : > { %6334 = vmatprep.mubr.f32.mxu1 %v15528_v43  ;;  %v4457_v42 = vsel %vm4455_vm14, %v15668_v37, %v15665_v62  ;;  %vm4451_vm6 = vcmp.lt.s32.totalorder %v4450_v34, 2  ;;  %vm15678_vm8 = vweird.f32 %v15677_v49  ;;  %vm3627_vm3 = vcmp.lt.s32.totalorder %v3626_v4, 2  ;;  %v14452_v62 = vpop.permute.xlu1 %7137 }
 0x387   : > { %9878 = vmatmul.mubr.msk.f32.gmra.mrb[20].mxu0 %vm6086_vm2, %v14082_v0  ;;  %v3630_v58 = vsel %vm3628_vm10, %v15675_v14, %v15674_v12  ;;  %v3633_v44 = vsel %vm3631_vm11, %v15676_v47, %v15673_v17  ;;  %v3944_v11 = vsel %vm15678_vm8, nan, %v3943_v2  ;;  %v4458_v30 = vsel %vm4451_vm6, %v4454_v35, %v4457_v42  ;;  %v6585_v2 = vld [vmem:[%s15302_s4 + $0x30] sm:$0xff] }
 0x388   : > { %6435 = vmatprep.mubr.f32.mxu0 %v15528_v43  ;;  %v3634_v22 = vsel %vm3627_vm3, %v3630_v58, %v3633_v44  ;;  %vm15682_vm9 = vweird.f32 %v15681_v61  ;;  %vm15684_vm4 = vweird.f32 %v15683_v46  ;;  %v3832_v38 = vand.u32 3, %v15686_v18 }
 0x389   : > { %9871 = vmatmul.mubr.msk.f32.gmra.mrb[10].mxu1 %vm6086_vm2, %v14115_v10  ;;  %v4459_v1 = vsel %vm15682_vm9, nan, %v4458_v30  ;;  %v3635_v41 = vsel %vm15684_vm4, nan, %v3634_v22  ;;  %v15690_v15 = vxor.u32 2147483648, %v15689_v32  ;;  %v15692_v60 = vxor.u32 2147483648, %v15691_v21  ;;  %v14463_v49 = vpop.permute.xlu0 %7152 }
 0x38a   : > { %6340 = vmatprep.mubr.f32.mxu1 %v15528_v43  ;;  %v10098_v28 = vpack.c.bf16 %v4459_v1, %v3635_v41  ;;  %vm3834_vm0 = vcmp.eq.s32.totalorder %v3832_v38, 0  ;;  %vm3837_vm14 = vcmp.eq.s32.totalorder %v3832_v38, 2  ;;  %v15694_v24 = vxor.u32 2147483648, %v15693_v3  ;;  %v14460_v58 = vpop.permute.xlu1 %7147 }
 0x38b   : > { %9879 = vmatmul.mubr.msk.f32.gmra.mrb[22].mxu0 %vm6086_vm2, %v14093_v40  ;;  %v3836_v4 = vsel %vm3834_vm0, %v15693_v3, %v15692_v60  ;;  %vm3833_vm10 = vcmp.lt.s32.totalorder %v3832_v38, 2 }
 0x38c   : > { %6441 = vmatprep.mubr.f32.mxu0 %v15528_v43  ;;  %v3839_v31 = vsel %vm3837_vm14, %v15694_v24, %v15691_v21 }
 0x38d   : > { %9872 = vmatmul.mubr.msk.f32.gmra.mrb[12].mxu1 %vm6086_vm2, %v14126_v29  ;;  %v3840_v33 = vsel %vm3833_vm10, %v3836_v4, %v3839_v31 }
 0x38e   : > { %6346 = vmatprep.mubr.f32.mxu1 %v15528_v43 }
 0x38f   : > { %9880 = vmatmul.mubr.msk.f32.gmra.mrb[24].mxu0 %vm6086_vm2, %v14104_v55 }
 0x390   : > { %6447 = vmatprep.mubr.f32.mxu0 %v15528_v43 }
 0x391   : > { %9873 = vmatmul.mubr.msk.f32.gmra.mrb[14].mxu1 %vm6086_vm2, %v14146_v52 }
 0x392   : > { %6530 = vmatprep.mubr.f32.mxu1 %v15528_v43 }
 0x393   : > { %9881 = vmatmul.mubr.msk.f32.gmra.mrb[26].mxu0 %vm6086_vm2, %v14115_v10 }
 0x394   : > { %6453 = vmatprep.mubr.f32.mxu0 %v15528_v43 }
 0x395   : > { %9886 = vmatmul.mubr.msk.f32.vlgmr.msra.gmra.mrb[16].mxu1 %vm6086_vm2, %v14055_v56  ;;  %v4768_v56 = vsel %vm2277_vm7, nan, %v4767_v53  ;;  %vm15680_vm7 = vweird.f32 %v15679_v26  ;;  %v15696_v53 = vld [vmem:[#allocation16_spill] sm:$0xff] }
 0x396   : > { %10095 = vmatpush1.bf16.msra.mxu1 %v15671_v59  ;;  %6536 = vmatprep.mubr.f32.mxu1 %v15528_v43  ;;  %v5077_v27 = vsel %vm15680_vm7, nan, %v5076_v9  ;;  %v10100_v7 = vpack.c.bf16 %v4768_v56, %v3944_v11  ;;  %vm15697_vm11 = vweird.f32 %v15696_v53 }
 0x397   : > { %6728 = vmatprep.subr.mxu1 %v5180_v39  ;;  %9882 = vmatmul.mubr.msk.f32.gmra.mrb[28].mxu0 %vm6086_vm2, %v14126_v29  ;;  %v3841_v19 = vsel %vm15697_vm11, nan, %v3840_v33 }
 0x398   : > { %6459 = vmatprep.mubr.f32.mxu0 %v15528_v43 }
 0x399   : > { %9887 = vmatmul.mubr.msk.f32.gmra.mrb[18].mxu1 %vm6086_vm2, %v14068_v13  ;;  %v14295_v13 = vld [vmem:[%s15302_s4] sm:$0xff] }
 0x39a   : > { %6729 = vmatpush1.msra.mxu1 %v5077_v27  ;;  %6542 = vmatprep.mubr.f32.mxu1 %v15528_v43 }
 0x39b   : > { %10101 = vmatprep.subr.bf16.mxu1 %v10100_v7  ;;  %9883 = vmatmul.mubr.msk.f32.gmra.mrb[30].mxu0 %vm6086_vm2, %v14146_v52 }
 0x39c   : > { %6675 = vmatprep.mubr.f32.mxu0 %v15528_v43 }
 0x39d   : > { %9888 = vmatmul.mubr.msk.f32.gmra.mrb[20].mxu1 %vm6086_vm2, %v14082_v0  ;;  %v14321_v0 = vld [vmem:[%s15302_s4 + $0x10] sm:$0xff] }
 0x39e   : > { %6548 = vmatprep.mubr.f32.mxu1 %v15528_v43 }
 0x39f   : > { %9894 = vmatmul.mubr.msk.f32.vlgmr.msra.gmra.mrb[0].mxu0 %vm5609_vm13, %v14295_v13 }
 0x3a0   : > { %10099 = vmatpush1.bf16.msra.mxu0 %v10098_v28  ;;  %6681 = vmatprep.mubr.f32.mxu0 %v15528_v43 }
 0x3a1   : > { %9889 = vmatmul.mubr.msk.f32.gmra.mrb[22].mxu1 %vm6086_vm2, %v14093_v40  ;;  %6841 = vmatprep.subr.mxu0 %v14002_v54  ;;  %v15685_v54 = vld [vmem:[#allocation53_spill] sm:$0xff] }
 0x3a2   : > { %6554 = vmatprep.mubr.f32.mxu1 %v15528_v43  ;;  %v4656_v40 = vand.u32 3, %v15685_v54 }
 0x3a3   : > { %9895 = vmatmul.mubr.msk.f32.gmra.mrb[2].mxu0 %vm5609_vm13, %v14308_v48 }
 0x3a4   : > { %6842 = vmatpush1.msra.mxu0 %v14023_v25  ;;  %6687 = vmatprep.mubr.f32.mxu0 %v15528_v43  ;;  %v14334_v25 = vld [vmem:[%s15302_s4 + $0x18] sm:$0xff]  ;;  %vm4658_vm15 = vcmp.eq.s32.totalorder %v4656_v40, 0  ;;  %vm4661_vm12 = vcmp.eq.s32.totalorder %v4656_v40, 2  ;;  %vm4657_vm5 = vcmp.lt.s32.totalorder %v4656_v40, 2  ;;  %v14471_v40 = vpop.permute.xlu0 %7162 }
 0x3a5   : > { %9890 = vmatmul.mubr.msk.f32.gmra.mrb[24].mxu1 %vm6086_vm2, %v14104_v55  ;;  %v15687_v55 = vld [vmem:[#allocation55_spill] sm:$0xff] }
 0x3a6   : > { %6560 = vmatprep.mubr.f32.mxu1 %v15528_v43  ;;  %v15688_v34 = vxor.u32 2147483648, %v15687_v55  ;;  %v4663_v45 = vsel %vm4661_vm12, %v15690_v15, %v15687_v55 }
 0x3a7   : > { %9896 = vmatmul.mubr.msk.f32.gmra.mrb[4].mxu0 %vm5609_vm13, %v14321_v0 }
 0x3a8   : > { %6693 = vmatprep.mubr.f32.mxu0 %v15528_v43  ;;  %v4660_v8 = vsel %vm4658_vm15, %v15689_v32, %v15688_v34 }
 0x3a9   : > { %9891 = vmatmul.mubr.msk.f32.gmra.mrb[26].mxu1 %vm6086_vm2, %v14115_v10  ;;  %v14351_v10 = vld [vmem:[%s15302_s4 + $0x20] sm:$0xff]  ;;  %v4664_v36 = vsel %vm4657_vm5, %v4660_v8, %v4663_v45 }
 0x3aa   : > { %6566 = vmatprep.mubr.f32.mxu1 %v15528_v43  ;;  %v4665_v63 = vsel %vm2173_vm1, nan, %v4664_v36 }
 0x3ab   : > { %9897 = vmatmul.mubr.msk.f32.gmra.mrb[6].mxu0 %vm5609_vm13, %v14334_v25  ;;  %v10102_v39 = vpack.c.bf16 %v4665_v63, %v3841_v19  ;;  %v14482_v19 = vpop.permute.xlu0 %7172 }
 0x3ac   : > { %6699 = vmatprep.mubr.f32.mxu0 %v15528_v43 }
 0x3ad   : > { %9892 = vmatmul.mubr.msk.f32.gmra.mrb[28].mxu1 %vm6086_vm2, %v14126_v29  ;;  %v6584_v29 = vld [vmem:[%s15302_s4 + $0x28] sm:$0xff] }
 0x3ae   : > { %6572 = vmatprep.mubr.f32.mxu1 %v15528_v43 }
 0x3af   : > { %9898 = vmatmul.mubr.msk.f32.gmra.mrb[8].mxu0 %vm5609_vm13, %v14351_v10 }
 0x3b0   : > { %6705 = vmatprep.mubr.f32.mxu0 %v15528_v43 }
 0x3b1   : > { %9893 = vmatmul.mubr.msk.f32.gmra.mrb[30].mxu1 %vm6086_vm2, %v14146_v52  ;;  %v6586_v52 = vld [vmem:[%s15302_s4 + $0x38] sm:$0xff] }
 0x3b2   : > { %6788 = vmatprep.mubr.f32.mxu1 %v15528_v43 }
 0x3b3   : > { %9899 = vmatmul.mubr.msk.f32.gmra.mrb[10].mxu0 %vm5609_vm13, %v6584_v29 }
 0x3b4   : > { %6711 = vmatprep.mubr.f32.mxu0 %v15528_v43 }
 0x3b5   : > { %9902 = vmatmul.mubr.msk.f32.vlgmr.msra.gmra.mrb[0].mxu1 %vm5609_vm13, %v14295_v13 }
 0x3b6   : > { %10103 = vmatpush1.bf16.msra.mxu1 %v10102_v39  ;;  %6794 = vmatprep.mubr.f32.mxu1 %v15528_v43 }
 0x3b7   : > { %6954 = vmatprep.subr.mxu1 %v14014_v50  ;;  %9900 = vmatmul.mubr.msk.f32.gmra.mrb[12].mxu0 %vm5609_vm13, %v6585_v2 }
 0x3b8   : > { %6717 = vmatprep.mubr.f32.mxu0 %v15528_v43 }
 0x3b9   : > { %9903 = vmatmul.mubr.msk.f32.gmra.mrb[2].mxu1 %vm5609_vm13, %v14308_v48 }
 0x3ba   : > { %6955 = vmatpush1.msra.mxu1 %v14032_v5  ;;  %6800 = vmatprep.mubr.f32.mxu1 %v15528_v43 }
 0x3bb   : > { %9901 = vmatmul.mubr.msk.f32.gmra.mrb[14].mxu0 %vm5609_vm13, %v6586_v52 }
 0x3bc   : > { %6901 = vmatprep.mubr.f32.mxu0 %v15528_v43 }
 0x3bd   : > { %9904 = vmatmul.mubr.msk.f32.gmra.mrb[4].mxu1 %vm5609_vm13, %v14321_v0 }
 0x3be   : > { %6806 = vmatprep.mubr.f32.mxu1 %v15528_v43 }
 0x3bf   : > { %9910 = vmatmul.mubr.msk.f32.vlgmr.msra.gmra.mrb[16].mxu0 %vm5609_vm13, %v14295_v13 }
 0x3c0   : > { %6907 = vmatprep.mubr.f32.mxu0 %v15528_v43 }
 0x3c1   : > { %9905 = vmatmul.mubr.msk.f32.gmra.mrb[6].mxu1 %vm5609_vm13, %v14334_v25 }
 0x3c2   : > { %6812 = vmatprep.mubr.f32.mxu1 %v15528_v43 }
 0x3c3   : > { %9911 = vmatmul.mubr.msk.f32.gmra.mrb[18].mxu0 %vm5609_vm13, %v14308_v48 }
 0x3c4   : > { %6913 = vmatprep.mubr.f32.mxu0 %v15528_v43 }
 0x3c5   : > { %9906 = vmatmul.mubr.msk.f32.gmra.mrb[8].mxu1 %vm5609_vm13, %v14351_v10 }
 0x3c6   : > { %6818 = vmatprep.mubr.f32.mxu1 %v15528_v43 }
 0x3c7   : > { %9912 = vmatmul.mubr.msk.f32.gmra.mrb[20].mxu0 %vm5609_vm13, %v14321_v0 }
 0x3c8   : > { %6919 = vmatprep.mubr.f32.mxu0 %v15528_v43 }
 0x3c9   : > { %9907 = vmatmul.mubr.msk.f32.gmra.mrb[10].mxu1 %vm5609_vm13, %v6584_v29 }
 0x3ca   : > { %6824 = vmatprep.mubr.f32.mxu1 %v15528_v43 }
 0x3cb   : > { %9913 = vmatmul.mubr.msk.f32.gmra.mrb[22].mxu0 %vm5609_vm13, %v14334_v25 }
 0x3cc   : > { %6925 = vmatprep.mubr.f32.mxu0 %v15528_v43 }
 0x3cd   : > { %9908 = vmatmul.mubr.msk.f32.gmra.mrb[12].mxu1 %vm5609_vm13, %v6585_v2 }
 0x3ce   : > { %6830 = vmatprep.mubr.f32.mxu1 %v15528_v43 }
 0x3cf   : > { %9914 = vmatmul.mubr.msk.f32.gmra.mrb[24].mxu0 %vm5609_vm13, %v14351_v10 }
 0x3d0   : > { %6931 = vmatprep.mubr.f32.mxu0 %v15528_v43 }
 0x3d1   : > { %9909 = vmatmul.mubr.msk.f32.gmra.mrb[14].mxu1 %vm5609_vm13, %v6586_v52 }
 0x3d2   : > { %7014 = vmatprep.mubr.f32.mxu1 %v15528_v43 }
 0x3d3   : > { %9915 = vmatmul.mubr.msk.f32.gmra.mrb[26].mxu0 %vm5609_vm13, %v6584_v29 }
 0x3d4   : > { %6937 = vmatprep.mubr.f32.mxu0 %v15528_v43 }
 0x3d5   : > { %9918 = vmatmul.mubr.msk.f32.vlgmr.msra.gmra.mrb[16].mxu1 %vm5609_vm13, %v14295_v13 }
 0x3d6   : > { %7020 = vmatprep.mubr.f32.mxu1 %v15528_v43 }
 0x3d7   : > { %9916 = vmatmul.mubr.msk.f32.gmra.mrb[28].mxu0 %vm5609_vm13, %v6585_v2 }
 0x3d8   : > { %6943 = vmatprep.mubr.f32.mxu0 %v15528_v43 }
 0x3d9   : > { %9919 = vmatmul.mubr.msk.f32.gmra.mrb[18].mxu1 %vm5609_vm13, %v14308_v48  ;;  %v14468_v48 = vpop.permute.xlu1 %7157 }
 0x3da   : > { %7026 = vmatprep.mubr.f32.mxu1 %v15528_v43 }
 0x3db   : > { %9917 = vmatmul.mubr.msk.f32.gmra.mrb[30].mxu0 %vm5609_vm13, %v6586_v52 }
 0x3dc   : > { %7448 = vmatprep.mubr.f32.mxu0 %v15528_v43 }
 0x3dd   : > { %9920 = vmatmul.mubr.msk.f32.gmra.mrb[20].mxu1 %vm5609_vm13, %v14321_v0  ;;  %v14477_v31 = vpop.permute.xlu1 %7167 }
 0x3de   : > { %7032 = vmatprep.mubr.f32.mxu1 %v15528_v43 }
 0x3e1   : > { %9921 = vmatmul.mubr.msk.f32.gmra.mrb[22].mxu1 %vm5609_vm13, %v14334_v25 }
 0x3e2   : > { %7038 = vmatprep.mubr.f32.mxu1 %v15528_v43 }
 0x3e5   : > { %9922 = vmatmul.mubr.msk.f32.gmra.mrb[24].mxu1 %vm5609_vm13, %v14351_v10 }
 0x3e6   : > { %7044 = vmatprep.mubr.f32.mxu1 %v15528_v43 }
 0x3e9   : > { %9923 = vmatmul.mubr.msk.f32.gmra.mrb[26].mxu1 %vm5609_vm13, %v6584_v29 }
 0x3ea   : > { %7050 = vmatprep.mubr.f32.mxu1 %v15528_v43 }
 0x3ed   : > { %9924 = vmatmul.mubr.msk.f32.gmra.mrb[28].mxu1 %vm5609_vm13, %v6585_v2 }
 0x3ee   : > { %7056 = vmatprep.mubr.f32.mxu1 %v15528_v43 }
 0x3f1   : > { %9925 = vmatmul.mubr.msk.f32.gmra.mrb[30].mxu1 %vm5609_vm13, %v6586_v52  ;;  %vm7359_vm13 = vcmask 523264  }
 0x3f2   : > { %7561 = vmatprep.mubr.f32.mxu1 %v15528_v43 }
 0x472   : > { %v6677_v50 = vpop.f32.mrb[0].mxu0 }
 0x473   : > { %v6679_v5 = vpop.f32.mrb[1].mxu0  ;;  %v7175_v20 = vadd.f32 %v14452_v62, %v6677_v50 }
 0x474   : > { %v7176_v35 = vadd.f32 %v14452_v62, %v6679_v5 }
 0x475   : > { %v7239_v59 = vmax.f32 %v7175_v20, 0.0 }
 0x476   : > { %v6683_v37 = vpop.f32.mrb[2].mxu0  ;;  %v7240_v6 = vmax.f32 %v7176_v35, 0.0 }
 0x477   : > { %v7183_v42 = vadd.f32 %v14455_v23, %v6683_v37  ;;  %v6685_v16 = vpop.f32.mrb[3].mxu0 }
 0x478   : > { %v7184_v51 = vadd.f32 %v14455_v23, %v6685_v16 }
 0x479   : > { %v7247_v9 = vmax.f32 %v7183_v42, 0.0 }
 0x47a   : > { %v7248_v56 = vmax.f32 %v7184_v51, 0.0  ;;  %v6689_v17 = vpop.f32.mrb[4].mxu0 }
 0x47b   : > { %v10106_v12 = vpack.c.bf16 %v7247_v9, %v7239_v59  ;;  %v6691_v14 = vpop.f32.mrb[5].mxu0  ;;  %v7191_v44 = vadd.f32 %v14460_v58, %v6689_v17 }
 0x47c   : > { %v10104_v47 = vpack.c.bf16 %v7248_v56, %v7240_v6  ;;  %v7192_v11 = vadd.f32 %v14460_v58, %v6691_v14 }
 0x47d   : > { %v7255_v22 = vmax.f32 %v7191_v44, 0.0 }
 0x47e   : > { %v6695_v30 = vpop.f32.mrb[6].mxu0  ;;  %10105 = vmatprep.subr.bf16.mxu0 %v10104_v47  ;;  %v7256_v1 = vmax.f32 %v7192_v11, 0.0 }
 0x47f   : > { %v7199_v26 = vadd.f32 %v14463_v49, %v6695_v30  ;;  %v6697_v27 = vpop.f32.mrb[7].mxu0  ;;  %10107 = vmatpush1.bf16.msra.mxu0 %v10106_v12 }
 0x480   : > { %v7200_v7 = vadd.f32 %v14463_v49, %v6697_v27 }
 0x481   : > { %v7263_v61 = vmax.f32 %v7199_v26, 0.0 }
 0x482   : > { %v7264_v13 = vmax.f32 %v7200_v7, 0.0  ;;  %v6701_v46 = vpop.f32.mrb[8].mxu0 }
 0x483   : > { %v10110_v41 = vpack.c.bf16 %v7263_v61, %v7255_v22  ;;  %v6703_v28 = vpop.f32.mrb[9].mxu0  ;;  %v7207_v54 = vadd.f32 %v14468_v48, %v6701_v46 }
 0x484   : > { %v10108_v0 = vpack.c.bf16 %v7264_v13, %v7256_v1  ;;  %v7208_v18 = vadd.f32 %v14468_v48, %v6703_v28 }
 0x485   : > { %v7271_v15 = vmax.f32 %v7207_v54, 0.0 }
 0x486   : > { %v6707_v38 = vpop.f32.mrb[10].mxu0  ;;  %10109 = vmatprep.subr.bf16.mxu0 %v10108_v0  ;;  %v7272_v10 = vmax.f32 %v7208_v18, 0.0 }
 0x487   : > { %v7215_v25 = vadd.f32 %v14471_v40, %v6707_v38  ;;  %v6709_v55 = vpop.f32.mrb[11].mxu0  ;;  %10111 = vmatpush1.bf16.msra.mxu0 %v10110_v41  ;;  %v14498_v38 = vld [vmem:[%s15304_s6] sm:$0xff] }
 0x488   : > { %v6790_v34 = vpop.f32.mrb[0].mxu1  ;;  %v7216_v32 = vadd.f32 %v14471_v40, %v6709_v55 }
 0x489   : > { %v6792_v8 = vpop.f32.mrb[1].mxu1  ;;  %v7279_v45 = vmax.f32 %v7215_v25, 0.0  ;;  %v7177_v3 = vadd.f32 %v14452_v62, %v6790_v34 }
 0x48a   : > { %v7280_v21 = vmax.f32 %v7216_v32, 0.0  ;;  %v6713_v60 = vpop.f32.mrb[12].mxu0  ;;  %v7178_v36 = vadd.f32 %v14452_v62, %v6792_v8 }
 0x48b   : > { %v10114_v4 = vpack.c.bf16 %v7279_v45, %v7271_v15  ;;  %v6715_v24 = vpop.f32.mrb[13].mxu0  ;;  %v7223_v53 = vadd.f32 %v14477_v31, %v6713_v60  ;;  %v7241_v50 = vmax.f32 %v7177_v3, 0.0 }
 0x48c   : > { %v6796_v33 = vpop.f32.mrb[2].mxu1  ;;  %v10112_v29 = vpack.c.bf16 %v7280_v21, %v7272_v10  ;;  %v7224_v2 = vadd.f32 %v14477_v31, %v6715_v24  ;;  %v7242_v37 = vmax.f32 %v7178_v36, 0.0 }
 0x48d   : > { %v7185_v57 = vadd.f32 %v14455_v23, %v6796_v33  ;;  %v6798_v63 = vpop.f32.mrb[3].mxu1  ;;  %v7287_v6 = vmax.f32 %v7223_v53, 0.0 }
 0x48e   : > { %v7186_v39 = vadd.f32 %v14455_v23, %v6798_v63  ;;  %v6719_v52 = vpop.f32.mrb[14].mxu0  ;;  %10113 = vmatprep.subr.bf16.mxu0 %v10112_v29  ;;  %v7288_v12 = vmax.f32 %v7224_v2, 0.0  ;;  %v14508_v29 = vld [vmem:[%s15304_s6 + $0x8] sm:$0xff] }
 0x48f   : > { %v7249_v5 = vmax.f32 %v7185_v57, 0.0  ;;  %v7231_v20 = vadd.f32 %v14482_v19, %v6719_v52  ;;  %v6721_v35 = vpop.f32.mrb[15].mxu0  ;;  %10115 = vmatpush1.bf16.msra.mxu0 %v10114_v4 }
 0x490   : > { %v7250_v42 = vmax.f32 %v7186_v39, 0.0  ;;  %v6802_v16 = vpop.f32.mrb[4].mxu1  ;;  %v7232_v51 = vadd.f32 %v14482_v19, %v6721_v35 }
 0x491   : > { %v10122_v59 = vpack.c.bf16 %v7249_v5, %v7241_v50  ;;  %v6804_v9 = vpop.f32.mrb[5].mxu1  ;;  %v7295_v56 = vmax.f32 %v7231_v20, 0.0  ;;  %v7193_v44 = vadd.f32 %v14460_v58, %v6802_v16 }
 0x492   : > { %v10120_v17 = vpack.c.bf16 %v7250_v42, %v7242_v37  ;;  %v7296_v14 = vmax.f32 %v7232_v51, 0.0  ;;  %v6903_v47 = vpop.f32.mrb[16].mxu0  ;;  %v7194_v26 = vadd.f32 %v14460_v58, %v6804_v9  ;;  %v14522_v51 = vld [vmem:[%s15304_s6 + $0x10] sm:$0xff] }
 0x493   : > { %v10118_v11 = vpack.c.bf16 %v7295_v56, %v7287_v6  ;;  %v6905_v30 = vpop.f32.mrb[17].mxu0  ;;  %v7179_v1 = vadd.f32 %v14452_v62, %v6903_v47  ;;  %v7257_v28 = vmax.f32 %v7193_v44, 0.0 }
 0x494   : > { %v6808_v27 = vpop.f32.mrb[6].mxu1  ;;  %10121 = vmatprep.subr.bf16.mxu1 %v10120_v17  ;;  %v10116_v7 = vpack.c.bf16 %v7296_v14, %v7288_v12  ;;  %v7180_v46 = vadd.f32 %v14452_v62, %v6905_v30  ;;  %v7258_v25 = vmax.f32 %v7194_v26, 0.0 }
 0x495   : > { %v7201_v22 = vadd.f32 %v14463_v49, %v6808_v27  ;;  %v6810_v61 = vpop.f32.mrb[7].mxu1  ;;  %10123 = vmatpush1.bf16.msra.mxu1 %v10122_v59  ;;  %v7243_v45 = vmax.f32 %v7179_v1, 0.0 }
 0x496   : > { %v7202_v13 = vadd.f32 %v14463_v49, %v6810_v61  ;;  %v6909_v41 = vpop.f32.mrb[18].mxu0  ;;  %10117 = vmatprep.subr.bf16.mxu0 %v10116_v7  ;;  %v7244_v60 = vmax.f32 %v7180_v46, 0.0  ;;  %v14532_v61 = vld [vmem:[%s15304_s6 + $0x18] sm:$0xff] }
 0x497   : > { %v7265_v0 = vmax.f32 %v7201_v22, 0.0  ;;  %v7187_v54 = vadd.f32 %v14455_v23, %v6909_v41  ;;  %v6911_v18 = vpop.f32.mrb[19].mxu0  ;;  %10119 = vmatpush1.bf16.msra.mxu0 %v10118_v11 }
 0x498   : > { %v7266_v55 = vmax.f32 %v7202_v13, 0.0  ;;  %v6814_v34 = vpop.f32.mrb[8].mxu1  ;;  %v7188_v32 = vadd.f32 %v14455_v23, %v6911_v18 }
 0x499   : > { %v10126_v8 = vpack.c.bf16 %v7265_v0, %v7257_v28  ;;  %v6816_v15 = vpop.f32.mrb[9].mxu1  ;;  %v7251_v10 = vmax.f32 %v7187_v54, 0.0  ;;  %v7209_v24 = vadd.f32 %v14468_v48, %v6814_v34 }
 0x49a   : > { %v10124_v21 = vpack.c.bf16 %v7266_v55, %v7258_v25  ;;  %v7252_v3 = vmax.f32 %v7188_v32, 0.0  ;;  %v6915_v4 = vpop.f32.mrb[20].mxu0  ;;  %9926 = vmatmul.mubr.msk.f32.vlgmr.msra.gmra.mrb[32].mxu0 %vm7359_vm13, %v14498_v38  ;;  %v7210_v57 = vadd.f32 %v14468_v48, %v6816_v15  ;;  %v14546_v15 = vld [vmem:[%s15304_s6 + $0x20] sm:$0xff] }
 0x49b   : > { %v10138_v36 = vpack.c.bf16 %v7251_v10, %v7243_v45  ;;  %v6917_v33 = vpop.f32.mrb[21].mxu0  ;;  %7454 = vmatprep.mubr.f32.mxu0 %v15528_v43  ;;  %v7195_v52 = vadd.f32 %v14460_v58, %v6915_v4  ;;  %v7273_v35 = vmax.f32 %v7209_v24, 0.0 }
 0x49c   : > { %v6820_v63 = vpop.f32.mrb[10].mxu1  ;;  %10125 = vmatprep.subr.bf16.mxu1 %v10124_v21  ;;  %v10136_v53 = vpack.c.bf16 %v7252_v3, %v7244_v60  ;;  %v7196_v5 = vadd.f32 %v14460_v58, %v6917_v33  ;;  %v7274_v59 = vmax.f32 %v7210_v57, 0.0 }
 0x49d   : > { %v7217_v39 = vadd.f32 %v14471_v40, %v6820_v63  ;;  %v6822_v2 = vpop.f32.mrb[11].mxu1  ;;  %10127 = vmatpush1.bf16.msra.mxu1 %v10126_v8  ;;  %v7259_v14 = vmax.f32 %v7195_v52, 0.0 }
 0x49e   : > { %v7218_v50 = vadd.f32 %v14471_v40, %v6822_v2  ;;  %v6921_v20 = vpop.f32.mrb[22].mxu0  ;;  %9927 = vmatmul.mubr.msk.f32.gmra.mrb[34].mxu0 %vm7359_vm13, %v14508_v29  ;;  %10137 = vmatprep.subr.bf16.mxu0 %v10136_v53  ;;  %v7260_v11 = vmax.f32 %v7196_v5, 0.0 }
 0x49f   : > { %v7281_v37 = vmax.f32 %v7217_v39, 0.0  ;;  %v7203_v42 = vadd.f32 %v14463_v49, %v6921_v20  ;;  %v6923_v16 = vpop.f32.mrb[23].mxu0  ;;  %10139 = vmatpush1.bf16.msra.mxu0 %v10138_v36  ;;  %7460 = vmatprep.mubr.f32.mxu0 %v15528_v43 }
 0x4a0   : > { %v7282_v9 = vmax.f32 %v7218_v50, 0.0  ;;  %v6826_v6 = vpop.f32.mrb[12].mxu1  ;;  %v7204_v56 = vadd.f32 %v14463_v49, %v6923_v16  ;;  %v14556_v50 = vld [vmem:[%s15304_s6 + $0x28] sm:$0xff] }
 0x4a1   : > { %v10130_v17 = vpack.c.bf16 %v7281_v37, %v7273_v35  ;;  %v6828_v12 = vpop.f32.mrb[13].mxu1  ;;  %v7267_v47 = vmax.f32 %v7203_v42, 0.0  ;;  %v7225_v27 = vadd.f32 %v14477_v31, %v6826_v6 }
 0x4a2   : > { %v10128_v44 = vpack.c.bf16 %v7282_v9, %v7274_v59  ;;  %v7268_v30 = vmax.f32 %v7204_v56, 0.0  ;;  %v6927_v26 = vpop.f32.mrb[24].mxu0  ;;  %9928 = vmatmul.mubr.msk.f32.gmra.mrb[36].mxu0 %vm7359_vm13, %v14522_v51  ;;  %v7226_v1 = vadd.f32 %v14477_v31, %v6828_v12 }
 0x4a3   : > { %v10142_v7 = vpack.c.bf16 %v7267_v47, %v7259_v14  ;;  %v6929_v22 = vpop.f32.mrb[25].mxu0  ;;  %7466 = vmatprep.mubr.f32.mxu0 %v15528_v43  ;;  %v7211_v0 = vadd.f32 %v14468_v48, %v6927_v26  ;;  %v7289_v55 = vmax.f32 %v7225_v27, 0.0  ;;  %v14570_v14 = vld [vmem:[%s15304_s6 + $0x30] sm:$0xff] }
 0x4a4   : > { %v6832_v13 = vpop.f32.mrb[14].mxu1  ;;  %10129 = vmatprep.subr.bf16.mxu1 %v10128_v44  ;;  %v10140_v46 = vpack.c.bf16 %v7268_v30, %v7260_v11  ;;  %v7212_v18 = vadd.f32 %v14468_v48, %v6929_v22  ;;  %v7290_v45 = vmax.f32 %v7226_v1, 0.0 }
 0x4a5   : > { %v7233_v41 = vadd.f32 %v14482_v19, %v6832_v13  ;;  %v6834_v28 = vpop.f32.mrb[15].mxu1  ;;  %10131 = vmatpush1.bf16.msra.mxu1 %v10130_v17  ;;  %v7275_v24 = vmax.f32 %v7211_v0, 0.0 }
 0x4a6   : > { %v7234_v54 = vadd.f32 %v14482_v19, %v6834_v28  ;;  %v6933_v25 = vpop.f32.mrb[26].mxu0  ;;  %9929 = vmatmul.mubr.msk.f32.gmra.mrb[38].mxu0 %vm7359_vm13, %v14532_v61  ;;  %10141 = vmatprep.subr.bf16.mxu0 %v10140_v46  ;;  %v7276_v57 = vmax.f32 %v7212_v18, 0.0  ;;  %v14583_v28 = vld [vmem:[%s15304_s6 + $0x38] sm:$0xff] }
 0x4a7   : > { %v7297_v34 = vmax.f32 %v7233_v41, 0.0  ;;  %v7219_v32 = vadd.f32 %v14471_v40, %v6933_v25  ;;  %v6935_v8 = vpop.f32.mrb[27].mxu0  ;;  %10143 = vmatpush1.bf16.msra.mxu0 %v10142_v7  ;;  %7472 = vmatprep.mubr.f32.mxu0 %v15528_v43 }
 0x4a8   : > { %v7298_v10 = vmax.f32 %v7234_v54, 0.0  ;;  %v7016_v21 = vpop.f32.mrb[16].mxu1  ;;  %v7220_v60 = vadd.f32 %v14471_v40, %v6935_v8 }
 0x4a9   : > { %v10134_v3 = vpack.c.bf16 %v7297_v34, %v7289_v55  ;;  %v7018_v4 = vpop.f32.mrb[17].mxu1  ;;  %v7283_v36 = vmax.f32 %v7219_v32, 0.0  ;;  %v7181_v39 = vadd.f32 %v14452_v62, %v7016_v21 }
 0x4aa   : > { %v10132_v33 = vpack.c.bf16 %v7298_v10, %v7290_v45  ;;  %v7284_v63 = vmax.f32 %v7220_v60, 0.0  ;;  %v6939_v53 = vpop.f32.mrb[28].mxu0  ;;  %9930 = vmatmul.mubr.msk.f32.gmra.mrb[40].mxu0 %vm7359_vm13, %v14546_v15  ;;  %v7182_v5 = vadd.f32 %v14452_v62, %v7018_v4 }
 0x4ab   : > { %v10146_v2 = vpack.c.bf16 %v7283_v36, %v7275_v24  ;;  %v6941_v52 = vpop.f32.mrb[29].mxu0  ;;  %7478 = vmatprep.mubr.f32.mxu0 %v15528_v43  ;;  %v7227_v16 = vadd.f32 %v14477_v31, %v6939_v53  ;;  %v7245_v56 = vmax.f32 %v7181_v39, 0.0 }
 0x4ac   : > { %v7022_v20 = vpop.f32.mrb[18].mxu1  ;;  %10133 = vmatprep.subr.bf16.mxu1 %v10132_v33  ;;  %v10144_v35 = vpack.c.bf16 %v7284_v63, %v7276_v57  ;;  %v7228_v9 = vadd.f32 %v14477_v31, %v6941_v52 }
 0x4ad   : > { %v7189_v37 = vadd.f32 %v14455_v23, %v7022_v20  ;;  %v7024_v42 = vpop.f32.mrb[19].mxu1  ;;  %10135 = vmatpush1.bf16.msra.mxu1 %v10134_v3  ;;  %v7291_v27 = vmax.f32 %v7227_v16, 0.0 }
 0x4ae   : > { %v7190_v59 = vadd.f32 %v14455_v23, %v7024_v42  ;;  %v6945_v6 = vpop.f32.mrb[30].mxu0  ;;  %9931 = vmatmul.mubr.msk.f32.gmra.mrb[42].mxu0 %vm7359_vm13, %v14556_v50  ;;  %10145 = vmatprep.subr.bf16.mxu0 %v10144_v35  ;;  %v7246_v23 = vmax.f32 %v7182_v5, 0.0  ;;  %v7292_v1 = vmax.f32 %v7228_v9, 0.0 }
 0x4af   : > { %v7253_v62 = vmax.f32 %v7189_v37, 0.0  ;;  %v7235_v17 = vadd.f32 %v14482_v19, %v6945_v6  ;;  %v6947_v12 = vpop.f32.mrb[31].mxu0  ;;  %10147 = vmatpush1.bf16.msra.mxu0 %v10146_v2  ;;  %7484 = vmatprep.mubr.f32.mxu0 %v15528_v43 }
 0x4b0   : > { %v7254_v47 = vmax.f32 %v7190_v59, 0.0  ;;  %v7028_v44 = vpop.f32.mrb[20].mxu1  ;;  %9934 = vmatmul.mubr.msk.f32.vlgmr.msra.gmra.mrb[32].mxu1 %vm7359_vm13, %v14498_v38  ;;  %v7236_v11 = vadd.f32 %v14482_v19, %v6947_v12 }
 0x4b1   : > { %v10154_v30 = vpack.c.bf16 %v7253_v62, %v7245_v56  ;;  %v7030_v26 = vpop.f32.mrb[21].mxu1  ;;  %7567 = vmatprep.mubr.f32.mxu1 %v15528_v43  ;;  %v7299_v7 = vmax.f32 %v7235_v17, 0.0  ;;  %v7197_v46 = vadd.f32 %v14460_v58, %v7028_v44 }
 0x4b2   : > { %v10152_v22 = vpack.c.bf16 %v7254_v47, %v7246_v23  ;;  %v7300_v13 = vmax.f32 %v7236_v11, 0.0  ;;  %9932 = vmatmul.mubr.msk.f32.gmra.mrb[44].mxu0 %vm7359_vm13, %v14570_v14  ;;  %v7198_v0 = vadd.f32 %v14460_v58, %v7030_v26 }
 0x4b3   : > { %v10150_v41 = vpack.c.bf16 %v7299_v7, %v7291_v27  ;;  %7490 = vmatprep.mubr.f32.mxu0 %v15528_v43  ;;  %v7261_v32 = vmax.f32 %v7197_v46, 0.0 }
 0x4b4   : > { %v7034_v54 = vpop.f32.mrb[22].mxu1  ;;  %9935 = vmatmul.mubr.msk.f32.gmra.mrb[34].mxu1 %vm7359_vm13, %v14508_v29  ;;  %10153 = vmatprep.subr.bf16.mxu1 %v10152_v22  ;;  %v10148_v18 = vpack.c.bf16 %v7300_v13, %v7292_v1  ;;  %v7262_v8 = vmax.f32 %v7198_v0, 0.0 }
 0x4b5   : > { %v7205_v25 = vadd.f32 %v14463_v49, %v7034_v54  ;;  %v7036_v55 = vpop.f32.mrb[23].mxu1  ;;  %10155 = vmatpush1.bf16.msra.mxu1 %v10154_v30  ;;  %7573 = vmatprep.mubr.f32.mxu1 %v15528_v43 }
 0x4b6   : > { %v7206_v34 = vadd.f32 %v14463_v49, %v7036_v55  ;;  %9933 = vmatmul.mubr.msk.f32.gmra.mrb[46].mxu0 %vm7359_vm13, %v14583_v28  ;;  %10149 = vmatprep.subr.bf16.mxu0 %v10148_v18 }
 0x4b7   : > { %v7269_v58 = vmax.f32 %v7205_v25, 0.0  ;;  %10151 = vmatpush1.bf16.msra.mxu0 %v10150_v41  ;;  %7674 = vmatprep.mubr.f32.mxu0 %v15528_v43 }
 0x4b8   : > { %v7270_v45 = vmax.f32 %v7206_v34, 0.0  ;;  %v7040_v10 = vpop.f32.mrb[24].mxu1  ;;  %9936 = vmatmul.mubr.msk.f32.gmra.mrb[36].mxu1 %vm7359_vm13, %v14522_v51 }
 0x4b9   : > { %v10158_v21 = vpack.c.bf16 %v7269_v58, %v7261_v32  ;;  %v7042_v60 = vpop.f32.mrb[25].mxu1  ;;  %7579 = vmatprep.mubr.f32.mxu1 %v15528_v43  ;;  %v7213_v3 = vadd.f32 %v14468_v48, %v7040_v10 }
 0x4ba   : > { %v10156_v49 = vpack.c.bf16 %v7270_v45, %v7262_v8  ;;  %9942 = vmatmul.mubr.msk.f32.vlgmr.msra.gmra.mrb[48].mxu0 %vm7359_vm13, %v14498_v38  ;;  %v7214_v4 = vadd.f32 %v14468_v48, %v7042_v60 }
 0x4bb   : > { %7680 = vmatprep.mubr.f32.mxu0 %v15528_v43  ;;  %v7277_v63 = vmax.f32 %v7213_v3, 0.0 }
 0x4bc   : > { %v7046_v24 = vpop.f32.mrb[26].mxu1  ;;  %9937 = vmatmul.mubr.msk.f32.gmra.mrb[38].mxu1 %vm7359_vm13, %v14532_v61  ;;  %10157 = vmatprep.subr.bf16.mxu1 %v10156_v49  ;;  %v7278_v48 = vmax.f32 %v7214_v4, 0.0 }
 0x4bd   : > { %v7221_v36 = vadd.f32 %v14471_v40, %v7046_v24  ;;  %v7048_v33 = vpop.f32.mrb[27].mxu1  ;;  %10159 = vmatpush1.bf16.msra.mxu1 %v10158_v21  ;;  %7585 = vmatprep.mubr.f32.mxu1 %v15528_v43 }
 0x4be   : > { %v7222_v57 = vadd.f32 %v14471_v40, %v7048_v33  ;;  %9943 = vmatmul.mubr.msk.f32.gmra.mrb[50].mxu0 %vm7359_vm13, %v14508_v29 }
 0x4bf   : > { %v7285_v53 = vmax.f32 %v7221_v36, 0.0  ;;  %7686 = vmatprep.mubr.f32.mxu0 %v15528_v43 }
 0x4c0   : > { %v7286_v39 = vmax.f32 %v7222_v57, 0.0  ;;  %v7052_v2 = vpop.f32.mrb[28].mxu1  ;;  %9938 = vmatmul.mubr.msk.f32.gmra.mrb[40].mxu1 %vm7359_vm13, %v14546_v15 }
 0x4c1   : > { %v10162_v52 = vpack.c.bf16 %v7285_v53, %v7277_v63  ;;  %v7054_v5 = vpop.f32.mrb[29].mxu1  ;;  %7591 = vmatprep.mubr.f32.mxu1 %v15528_v43  ;;  %v7229_v40 = vadd.f32 %v14477_v31, %v7052_v2 }
 0x4c2   : > { %v10160_v20 = vpack.c.bf16 %v7286_v39, %v7278_v48  ;;  %9944 = vmatmul.mubr.msk.f32.gmra.mrb[52].mxu0 %vm7359_vm13, %v14522_v51  ;;  %v7230_v35 = vadd.f32 %v14477_v31, %v7054_v5 }
 0x4c3   : > { %7692 = vmatprep.mubr.f32.mxu0 %v15528_v43  ;;  %v7293_v9 = vmax.f32 %v7229_v40, 0.0 }
 0x4c4   : > { %v7058_v37 = vpop.f32.mrb[30].mxu1  ;;  %9939 = vmatmul.mubr.msk.f32.gmra.mrb[42].mxu1 %vm7359_vm13, %v14556_v50  ;;  %10161 = vmatprep.subr.bf16.mxu1 %v10160_v20  ;;  %v7294_v31 = vmax.f32 %v7230_v35, 0.0 }
 0x4c5   : > { %v7237_v42 = vadd.f32 %v14482_v19, %v7058_v37  ;;  %v7060_v16 = vpop.f32.mrb[31].mxu1  ;;  %10163 = vmatpush1.bf16.msra.mxu1 %v10162_v52  ;;  %7597 = vmatprep.mubr.f32.mxu1 %v15528_v43 }
 0x4c6   : > { %v7238_v59 = vadd.f32 %v14482_v19, %v7060_v16  ;;  %9945 = vmatmul.mubr.msk.f32.gmra.mrb[54].mxu0 %vm7359_vm13, %v14532_v61 }
 0x4c7   : > { %v7301_v6 = vmax.f32 %v7237_v42, 0.0  ;;  %7698 = vmatprep.mubr.f32.mxu0 %v15528_v43 }
 0x4c8   : > { %v7302_v56 = vmax.f32 %v7238_v59, 0.0  ;;  %9940 = vmatmul.mubr.msk.f32.gmra.mrb[44].mxu1 %vm7359_vm13, %v14570_v14 }
 0x4c9   : > { %v10166_v62 = vpack.c.bf16 %v7301_v6, %v7293_v9  ;;  %7603 = vmatprep.mubr.f32.mxu1 %v15528_v43 }
 0x4ca   : > { %v10164_v17 = vpack.c.bf16 %v7302_v56, %v7294_v31  ;;  %9946 = vmatmul.mubr.msk.f32.gmra.mrb[56].mxu0 %vm7359_vm13, %v14546_v15 }
 0x4cb   : > { %7704 = vmatprep.mubr.f32.mxu0 %v15528_v43 }
 0x4cc   : > { %9941 = vmatmul.mubr.msk.f32.gmra.mrb[46].mxu1 %vm7359_vm13, %v14583_v28  ;;  %10165 = vmatprep.subr.bf16.mxu1 %v10164_v17 }
 0x4cd   : > { %10167 = vmatpush1.bf16.msra.mxu1 %v10166_v62  ;;  %7787 = vmatprep.mubr.f32.mxu1 %v15528_v43 }
 0x4ce   : > { %9947 = vmatmul.mubr.msk.f32.gmra.mrb[58].mxu0 %vm7359_vm13, %v14556_v50 }
 0x4cf   : > { %7710 = vmatprep.mubr.f32.mxu0 %v15528_v43 }
 0x4d0   : > { %9950 = vmatmul.mubr.msk.f32.vlgmr.msra.gmra.mrb[48].mxu1 %vm7359_vm13, %v14498_v38 }
 0x4d1   : > { %7793 = vmatprep.mubr.f32.mxu1 %v15528_v43 }
 0x4d2   : > { %9948 = vmatmul.mubr.msk.f32.gmra.mrb[60].mxu0 %vm7359_vm13, %v14570_v14 }
 0x4d3   : > { %7716 = vmatprep.mubr.f32.mxu0 %v15528_v43 }
 0x4d4   : > { %9951 = vmatmul.mubr.msk.f32.gmra.mrb[50].mxu1 %vm7359_vm13, %v14508_v29  ;;  %v14668_v29 = vpop.permute.xlu1 %7321 }
 0x4d5   : > { %7799 = vmatprep.mubr.f32.mxu1 %v15528_v43 }
 0x4d6   : > { %9949 = vmatmul.mubr.msk.f32.gmra.mrb[62].mxu0 %vm7359_vm13, %v14583_v28 }
 0x4d7   : > { %8046 = vmatprep.mubr.f32.mxu0 %v15528_v43 }
 0x4d8   : > { %9952 = vmatmul.mubr.msk.f32.gmra.mrb[52].mxu1 %vm7359_vm13, %v14522_v51  ;;  %v14676_v22 = vpop.permute.xlu1 %7331 }
 0x4d9   : > { %7805 = vmatprep.mubr.f32.mxu1 %v15528_v43 }
 0x4dc   : > { %9953 = vmatmul.mubr.msk.f32.gmra.mrb[54].mxu1 %vm7359_vm13, %v14532_v61  ;;  %v14671_v61 = vpop.permute.xlu0 %7326  ;;  %v14684_v10 = vpop.permute.xlu1 %7341 }
 0x4dd   : > { %7811 = vmatprep.mubr.f32.mxu1 %v15528_v43 }
 0x4e0   : > { %9954 = vmatmul.mubr.msk.f32.gmra.mrb[56].mxu1 %vm7359_vm13, %v14546_v15  ;;  %v14679_v46 = vpop.permute.xlu0 %7336  ;;  %v14693_v35 = vpop.permute.xlu1 %7351 }
 0x4e1   : > { %7817 = vmatprep.mubr.f32.mxu1 %v15528_v43 }
 0x4e4   : > { %9955 = vmatmul.mubr.msk.f32.gmra.mrb[58].mxu1 %vm7359_vm13, %v14556_v50  ;;  %v14687_v49 = vpop.permute.xlu0 %7346 }
 0x4e5   : > { %7823 = vmatprep.mubr.f32.mxu1 %v15528_v43 }
 0x4e8   : > { %9956 = vmatmul.mubr.msk.f32.gmra.mrb[60].mxu1 %vm7359_vm13, %v14570_v14  ;;  %v14698_v31 = vpop.permute.xlu0 %7356 }
 0x4e9   : > { %7829 = vmatprep.mubr.f32.mxu1 %v15528_v43 }
 0x4ec   : > { %9957 = vmatmul.mubr.msk.f32.gmra.mrb[62].mxu1 %vm7359_vm13, %v14583_v28 }
 0x4ed   : > { %8159 = vmatprep.mubr.f32.mxu1 %v15528_v43 }
 0x56d   : > { %v7450_v19 = vpop.f32.mrb[32].mxu0 }
 0x56e   : > { %v7452_v38 = vpop.f32.mrb[33].mxu0  ;;  %v7451_v51 = vadd.f32 %v7450_v19, %v14668_v29 }
 0x56f   : > { %v7453_v15 = vadd.f32 %v7452_v38, %v14668_v29 }
 0x570   : > { %v7836_v47 = vmax.f32 %v7451_v51, 0.0 }
 0x571   : > { %v7456_v50 = vpop.f32.mrb[34].mxu0  ;;  %v7837_v11 = vmax.f32 %v7453_v15, 0.0 }
 0x572   : > { %v7457_v12 = vadd.f32 %v7456_v50, %v14671_v61  ;;  %v7458_v14 = vpop.f32.mrb[35].mxu0 }
 0x573   : > { %v7459_v23 = vadd.f32 %v7458_v14, %v14671_v61 }
 0x574   : > { %v7844_v44 = vmax.f32 %v7457_v12, 0.0 }
 0x575   : > { %v7845_v30 = vmax.f32 %v7459_v23, 0.0  ;;  %v7462_v26 = vpop.f32.mrb[36].mxu0 }
 0x576   : > { %v10170_v27 = vpack.c.bf16 %v7844_v44, %v7836_v47  ;;  %v7464_v7 = vpop.f32.mrb[37].mxu0  ;;  %v7463_v13 = vadd.f32 %v7462_v26, %v14676_v22 }
 0x577   : > { %v10168_v1 = vpack.c.bf16 %v7845_v30, %v7837_v11  ;;  %v7465_v41 = vadd.f32 %v7464_v7, %v14676_v22 }
 0x578   : > { %v7852_v25 = vmax.f32 %v7463_v13, 0.0 }
 0x579   : > { %v7468_v28 = vpop.f32.mrb[38].mxu0  ;;  %10169 = vmatprep.subr.bf16.mxu0 %v10168_v1  ;;  %v7853_v34 = vmax.f32 %v7465_v41, 0.0 }
 0x57a   : > { %v7469_v0 = vadd.f32 %v7468_v28, %v14679_v46  ;;  %v7470_v54 = vpop.f32.mrb[39].mxu0  ;;  %10171 = vmatpush1.bf16.msra.mxu0 %v10170_v27 }
 0x57b   : > { %v7471_v18 = vadd.f32 %v7470_v54, %v14679_v46 }
 0x57c   : > { %v7860_v55 = vmax.f32 %v7469_v0, 0.0 }
 0x57d   : > { %v7861_v32 = vmax.f32 %v7471_v18, 0.0  ;;  %v7474_v58 = vpop.f32.mrb[40].mxu0 }
 0x57e   : > { %v10174_v8 = vpack.c.bf16 %v7860_v55, %v7852_v25  ;;  %v7476_v45 = vpop.f32.mrb[41].mxu0  ;;  %v7475_v60 = vadd.f32 %v7474_v58, %v14684_v10 }
 0x57f   : > { %v10172_v21 = vpack.c.bf16 %v7861_v32, %v7853_v34  ;;  %v7477_v3 = vadd.f32 %v7476_v45, %v14684_v10 }
 0x580   : > { %v7868_v53 = vmax.f32 %v7475_v60, 0.0 }
 0x581   : > { %v7480_v4 = vpop.f32.mrb[42].mxu0  ;;  %10173 = vmatprep.subr.bf16.mxu0 %v10172_v21  ;;  %v7869_v39 = vmax.f32 %v7477_v3, 0.0 }
 0x582   : > { %v7481_v24 = vadd.f32 %v7480_v4, %v14687_v49  ;;  %v7482_v36 = vpop.f32.mrb[43].mxu0  ;;  %10175 = vmatpush1.bf16.msra.mxu0 %v10174_v8  ;;  %v14714_v4 = vld [vmem:[%s15304_s6 + $0x40] sm:$0xff] }
 0x583   : > { %v7563_v33 = vpop.f32.mrb[32].mxu1  ;;  %v7483_v57 = vadd.f32 %v7482_v36, %v14687_v49 }
 0x584   : > { %v7565_v63 = vpop.f32.mrb[33].mxu1  ;;  %v7876_v48 = vmax.f32 %v7481_v24, 0.0  ;;  %v7564_v5 = vadd.f32 %v7563_v33, %v14668_v29 }
 0x585   : > { %v7877_v2 = vmax.f32 %v7483_v57, 0.0  ;;  %v7486_v52 = vpop.f32.mrb[44].mxu0  ;;  %v7566_v37 = vadd.f32 %v7565_v63, %v14668_v29 }
 0x586   : > { %v10178_v20 = vpack.c.bf16 %v7876_v48, %v7868_v53  ;;  %v7488_v40 = vpop.f32.mrb[45].mxu0  ;;  %v7487_v6 = vadd.f32 %v7486_v52, %v14693_v35  ;;  %v7838_v19 = vmax.f32 %v7564_v5, 0.0 }
 0x587   : > { %v7569_v42 = vpop.f32.mrb[34].mxu1  ;;  %v10176_v16 = vpack.c.bf16 %v7877_v2, %v7869_v39  ;;  %v7489_v62 = vadd.f32 %v7488_v40, %v14693_v35  ;;  %v7839_v50 = vmax.f32 %v7566_v37, 0.0 }
 0x588   : > { %v7570_v59 = vadd.f32 %v7569_v42, %v14671_v61  ;;  %v7571_v9 = vpop.f32.mrb[35].mxu1  ;;  %v7884_v11 = vmax.f32 %v7487_v6, 0.0 }
 0x589   : > { %v7572_v56 = vadd.f32 %v7571_v9, %v14671_v61  ;;  %v7492_v17 = vpop.f32.mrb[46].mxu0  ;;  %10177 = vmatprep.subr.bf16.mxu0 %v10176_v16  ;;  %v7885_v27 = vmax.f32 %v7489_v62, 0.0  ;;  %v14724_v16 = vld [vmem:[%s15304_s6 + $0x48] sm:$0xff] }
 0x58a   : > { %v7846_v38 = vmax.f32 %v7570_v59, 0.0  ;;  %v7493_v51 = vadd.f32 %v7492_v17, %v14698_v31  ;;  %v7494_v15 = vpop.f32.mrb[47].mxu0  ;;  %10179 = vmatpush1.bf16.msra.mxu0 %v10178_v20 }
 0x58b   : > { %v7847_v12 = vmax.f32 %v7572_v56, 0.0  ;;  %v7575_v14 = vpop.f32.mrb[36].mxu1  ;;  %v7495_v23 = vadd.f32 %v7494_v15, %v14698_v31 }
 0x58c   : > { %v10186_v47 = vpack.c.bf16 %v7846_v38, %v7838_v19  ;;  %v7577_v44 = vpop.f32.mrb[37].mxu1  ;;  %v7892_v30 = vmax.f32 %v7493_v51, 0.0  ;;  %v7576_v13 = vadd.f32 %v7575_v14, %v14676_v22 }
 0x58d   : > { %v10184_v26 = vpack.c.bf16 %v7847_v12, %v7839_v50  ;;  %v7893_v7 = vmax.f32 %v7495_v23, 0.0  ;;  %v7676_v1 = vpop.f32.mrb[48].mxu0  ;;  %v7578_v0 = vadd.f32 %v7577_v44, %v14676_v22  ;;  %v14738_v23 = vld [vmem:[%s15304_s6 + $0x50] sm:$0xff] }
 0x58e   : > { %v10182_v41 = vpack.c.bf16 %v7892_v30, %v7884_v11  ;;  %v7678_v28 = vpop.f32.mrb[49].mxu0  ;;  %v7677_v34 = vadd.f32 %v7676_v1, %v14668_v29  ;;  %v7854_v45 = vmax.f32 %v7576_v13, 0.0 }
 0x58f   : > { %v7581_v54 = vpop.f32.mrb[38].mxu1  ;;  %10185 = vmatprep.subr.bf16.mxu1 %v10184_v26  ;;  %v10180_v18 = vpack.c.bf16 %v7893_v7, %v7885_v27  ;;  %v7679_v58 = vadd.f32 %v7678_v28, %v14668_v29  ;;  %v7855_v24 = vmax.f32 %v7578_v0, 0.0 }
 0x590   : > { %v7582_v25 = vadd.f32 %v7581_v54, %v14679_v46  ;;  %v7583_v55 = vpop.f32.mrb[39].mxu1  ;;  %10187 = vmatpush1.bf16.msra.mxu1 %v10186_v47  ;;  %v7840_v48 = vmax.f32 %v7677_v34, 0.0 }
 0x591   : > { %v7584_v32 = vadd.f32 %v7583_v55, %v14679_v46  ;;  %v7682_v8 = vpop.f32.mrb[50].mxu0  ;;  %10181 = vmatprep.subr.bf16.mxu0 %v10180_v18  ;;  %v7841_v52 = vmax.f32 %v7679_v58, 0.0  ;;  %v14748_v55 = vld [vmem:[%s15304_s6 + $0x58] sm:$0xff] }
 0x592   : > { %v7862_v21 = vmax.f32 %v7582_v25, 0.0  ;;  %v7683_v60 = vadd.f32 %v7682_v8, %v14671_v61  ;;  %v7684_v3 = vpop.f32.mrb[51].mxu0  ;;  %10183 = vmatpush1.bf16.msra.mxu0 %v10182_v41 }
 0x593   : > { %v7863_v36 = vmax.f32 %v7584_v32, 0.0  ;;  %v7587_v33 = vpop.f32.mrb[40].mxu1  ;;  %v7685_v57 = vadd.f32 %v7684_v3, %v14671_v61 }
 0x594   : > { %v10190_v63 = vpack.c.bf16 %v7862_v21, %v7854_v45  ;;  %v7589_v53 = vpop.f32.mrb[41].mxu1  ;;  %v7848_v39 = vmax.f32 %v7683_v60, 0.0  ;;  %v7588_v40 = vadd.f32 %v7587_v33, %v14684_v10 }
 0x595   : > { %v10188_v2 = vpack.c.bf16 %v7863_v36, %v7855_v24  ;;  %v7849_v5 = vmax.f32 %v7685_v57, 0.0  ;;  %v7688_v20 = vpop.f32.mrb[52].mxu0  ;;  %9974 = vmatmul.mubr.msk.f32.vlgmr.msra.gmra.mrb[64].mxu0 %vm7359_vm13, %v14714_v4  ;;  %v7590_v59 = vadd.f32 %v7589_v53, %v14684_v10  ;;  %v14762_v53 = vld [vmem:[%s15304_s6 + $0x60] sm:$0xff] }
 0x596   : > { %v10202_v37 = vpack.c.bf16 %v7848_v39, %v7840_v48  ;;  %v7690_v42 = vpop.f32.mrb[53].mxu0  ;;  %8052 = vmatprep.mubr.f32.mxu0 %v15528_v43  ;;  %v7689_v17 = vadd.f32 %v7688_v20, %v14676_v22  ;;  %v7870_v15 = vmax.f32 %v7588_v40, 0.0 }
 0x597   : > { %v7593_v9 = vpop.f32.mrb[42].mxu1  ;;  %10189 = vmatprep.subr.bf16.mxu1 %v10188_v2  ;;  %v10200_v6 = vpack.c.bf16 %v7849_v5, %v7841_v52  ;;  %v7691_v38 = vadd.f32 %v7690_v42, %v14676_v22  ;;  %v7871_v47 = vmax.f32 %v7590_v59, 0.0 }
 0x598   : > { %v7594_v56 = vadd.f32 %v7593_v9, %v14687_v49  ;;  %v7595_v62 = vpop.f32.mrb[43].mxu1  ;;  %10191 = vmatpush1.bf16.msra.mxu1 %v10190_v63  ;;  %v7856_v7 = vmax.f32 %v7689_v17, 0.0 }
 0x599   : > { %v7596_v19 = vadd.f32 %v7595_v62, %v14687_v49  ;;  %v7694_v51 = vpop.f32.mrb[54].mxu0  ;;  %9975 = vmatmul.mubr.msk.f32.gmra.mrb[66].mxu0 %vm7359_vm13, %v14724_v16  ;;  %10201 = vmatprep.subr.bf16.mxu0 %v10200_v6  ;;  %v7857_v41 = vmax.f32 %v7691_v38, 0.0 }
 0x59a   : > { %v7878_v50 = vmax.f32 %v7594_v56, 0.0  ;;  %v7695_v12 = vadd.f32 %v7694_v51, %v14679_v46  ;;  %v7696_v14 = vpop.f32.mrb[55].mxu0  ;;  %10203 = vmatpush1.bf16.msra.mxu0 %v10202_v37  ;;  %8058 = vmatprep.mubr.f32.mxu0 %v15528_v43 }
 0x59b   : > { %v7879_v44 = vmax.f32 %v7596_v19, 0.0  ;;  %v7599_v11 = vpop.f32.mrb[44].mxu1  ;;  %v7697_v30 = vadd.f32 %v7696_v14, %v14679_v46  ;;  %v14772_v19 = vld [vmem:[%s15304_s6 + $0x68] sm:$0xff] }
 0x59c   : > { %v10194_v26 = vpack.c.bf16 %v7878_v50, %v7870_v15  ;;  %v7601_v27 = vpop.f32.mrb[45].mxu1  ;;  %v7864_v1 = vmax.f32 %v7695_v12, 0.0  ;;  %v7600_v54 = vadd.f32 %v7599_v11, %v14693_v35 }
 0x59d   : > { %v10192_v13 = vpack.c.bf16 %v7879_v44, %v7871_v47  ;;  %v7865_v28 = vmax.f32 %v7697_v30, 0.0  ;;  %v7700_v0 = vpop.f32.mrb[56].mxu0  ;;  %9976 = vmatmul.mubr.msk.f32.gmra.mrb[68].mxu0 %vm7359_vm13, %v14738_v23  ;;  %v7602_v34 = vadd.f32 %v7601_v27, %v14693_v35 }
 0x59e   : > { %v10206_v18 = vpack.c.bf16 %v7864_v1, %v7856_v7  ;;  %v7702_v25 = vpop.f32.mrb[57].mxu0  ;;  %8064 = vmatprep.mubr.f32.mxu0 %v15528_v43  ;;  %v7701_v21 = vadd.f32 %v7700_v0, %v14684_v10  ;;  %v7886_v36 = vmax.f32 %v7600_v54, 0.0  ;;  %v14786_v7 = vld [vmem:[%s15304_s6 + $0x70] sm:$0xff] }
 0x59f   : > { %v7605_v32 = vpop.f32.mrb[46].mxu1  ;;  %10193 = vmatprep.subr.bf16.mxu1 %v10192_v13  ;;  %v10204_v58 = vpack.c.bf16 %v7865_v28, %v7857_v41  ;;  %v7703_v3 = vadd.f32 %v7702_v25, %v14684_v10  ;;  %v7887_v48 = vmax.f32 %v7602_v34, 0.0 }
 0x5a0   : > { %v7606_v8 = vadd.f32 %v7605_v32, %v14698_v31  ;;  %v7607_v45 = vpop.f32.mrb[47].mxu1  ;;  %10195 = vmatpush1.bf16.msra.mxu1 %v10194_v26  ;;  %v7872_v40 = vmax.f32 %v7701_v21, 0.0 }
 0x5a1   : > { %v7608_v60 = vadd.f32 %v7607_v45, %v14698_v31  ;;  %v7706_v24 = vpop.f32.mrb[58].mxu0  ;;  %9977 = vmatmul.mubr.msk.f32.gmra.mrb[70].mxu0 %vm7359_vm13, %v14748_v55  ;;  %10205 = vmatprep.subr.bf16.mxu0 %v10204_v58  ;;  %v7873_v59 = vmax.f32 %v7703_v3, 0.0  ;;  %v14799_v45 = vld [vmem:[%s15304_s6 + $0x78] sm:$0xff] }
 0x5a2   : > { %v7894_v33 = vmax.f32 %v7606_v8, 0.0  ;;  %v7707_v57 = vadd.f32 %v7706_v24, %v14687_v49  ;;  %v7708_v63 = vpop.f32.mrb[59].mxu0  ;;  %10207 = vmatpush1.bf16.msra.mxu0 %v10206_v18  ;;  %8070 = vmatprep.mubr.f32.mxu0 %v15528_v43 }
 0x5a3   : > { %v7895_v39 = vmax.f32 %v7608_v60, 0.0  ;;  %v7789_v2 = vpop.f32.mrb[48].mxu1  ;;  %v7709_v52 = vadd.f32 %v7708_v63, %v14687_v49 }
 0x5a4   : > { %v10198_v5 = vpack.c.bf16 %v7894_v33, %v7886_v36  ;;  %v7791_v20 = vpop.f32.mrb[49].mxu1  ;;  %v7880_v37 = vmax.f32 %v7707_v57, 0.0  ;;  %v7790_v56 = vadd.f32 %v7789_v2, %v14668_v29 }
 0x5a5   : > { %v10196_v42 = vpack.c.bf16 %v7895_v39, %v7887_v48  ;;  %v7881_v9 = vmax.f32 %v7709_v52, 0.0  ;;  %v7712_v6 = vpop.f32.mrb[60].mxu0  ;;  %9978 = vmatmul.mubr.msk.f32.gmra.mrb[72].mxu0 %vm7359_vm13, %v14762_v53  ;;  %v7792_v38 = vadd.f32 %v7791_v20, %v14668_v29 }
 0x5a6   : > { %v10210_v62 = vpack.c.bf16 %v7880_v37, %v7872_v40  ;;  %v7714_v17 = vpop.f32.mrb[61].mxu0  ;;  %8076 = vmatprep.mubr.f32.mxu0 %v15528_v43  ;;  %v7713_v14 = vadd.f32 %v7712_v6, %v14693_v35  ;;  %v7842_v30 = vmax.f32 %v7790_v56, 0.0 }
 0x5a7   : > { %v7795_v51 = vpop.f32.mrb[50].mxu1  ;;  %10197 = vmatprep.subr.bf16.mxu1 %v10196_v42  ;;  %v10208_v15 = vpack.c.bf16 %v7881_v9, %v7873_v59  ;;  %v7715_v44 = vadd.f32 %v7714_v17, %v14693_v35 }
 0x5a8   : > { %v7796_v50 = vadd.f32 %v7795_v51, %v14671_v61  ;;  %v7797_v12 = vpop.f32.mrb[51].mxu1  ;;  %10199 = vmatpush1.bf16.msra.mxu1 %v10198_v5  ;;  %v7888_v54 = vmax.f32 %v7713_v14, 0.0 }
 0x5a9   : > { %v7798_v47 = vadd.f32 %v7797_v12, %v14671_v61  ;;  %v7718_v11 = vpop.f32.mrb[62].mxu0  ;;  %9979 = vmatmul.mubr.msk.f32.gmra.mrb[74].mxu0 %vm7359_vm13, %v14772_v19  ;;  %10209 = vmatprep.subr.bf16.mxu0 %v10208_v15  ;;  %v7843_v61 = vmax.f32 %v7792_v38, 0.0  ;;  %v7889_v34 = vmax.f32 %v7715_v44, 0.0 }
 0x5aa   : > { %v7850_v29 = vmax.f32 %v7796_v50, 0.0  ;;  %v7719_v26 = vadd.f32 %v7718_v11, %v14698_v31  ;;  %v7720_v27 = vpop.f32.mrb[63].mxu0  ;;  %10211 = vmatpush1.bf16.msra.mxu0 %v10210_v62  ;;  %8082 = vmatprep.mubr.f32.mxu0 %v15528_v43 }
 0x5ab   : > { %v7851_v1 = vmax.f32 %v7798_v47, 0.0  ;;  %v7801_v13 = vpop.f32.mrb[52].mxu1  ;;  %9982 = vmatmul.mubr.msk.f32.vlgmr.msra.gmra.mrb[64].mxu1 %vm7359_vm13, %v14714_v4  ;;  %v7721_v41 = vadd.f32 %v7720_v27, %v14698_v31 }
 0x5ac   : > { %v10218_v28 = vpack.c.bf16 %v7850_v29, %v7842_v30  ;;  %v7803_v0 = vpop.f32.mrb[53].mxu1  ;;  %8165 = vmatprep.mubr.f32.mxu1 %v15528_v43  ;;  %v7896_v18 = vmax.f32 %v7719_v26, 0.0  ;;  %v7802_v58 = vadd.f32 %v7801_v13, %v14676_v22 }
 0x5ad   : > { %v10216_v25 = vpack.c.bf16 %v7851_v1, %v7843_v61  ;;  %v7897_v32 = vmax.f32 %v7721_v41, 0.0  ;;  %9980 = vmatmul.mubr.msk.f32.gmra.mrb[76].mxu0 %vm7359_vm13, %v14786_v7  ;;  %v7804_v21 = vadd.f32 %v7803_v0, %v14676_v22 }
 0x5ae   : > { %v10214_v8 = vpack.c.bf16 %v7896_v18, %v7888_v54  ;;  %8088 = vmatprep.mubr.f32.mxu0 %v15528_v43  ;;  %v7858_v57 = vmax.f32 %v7802_v58, 0.0 }
 0x5af   : > { %v7807_v60 = vpop.f32.mrb[54].mxu1  ;;  %9983 = vmatmul.mubr.msk.f32.gmra.mrb[66].mxu1 %vm7359_vm13, %v14724_v16  ;;  %10217 = vmatprep.subr.bf16.mxu1 %v10216_v25  ;;  %v10212_v3 = vpack.c.bf16 %v7897_v32, %v7889_v34  ;;  %v7859_v63 = vmax.f32 %v7804_v21, 0.0 }
 0x5b0   : > { %v7808_v24 = vadd.f32 %v7807_v60, %v14679_v46  ;;  %v7809_v36 = vpop.f32.mrb[55].mxu1  ;;  %10219 = vmatpush1.bf16.msra.mxu1 %v10218_v28  ;;  %8171 = vmatprep.mubr.f32.mxu1 %v15528_v43 }
 0x5b1   : > { %v7810_v33 = vadd.f32 %v7809_v36, %v14679_v46  ;;  %9981 = vmatmul.mubr.msk.f32.gmra.mrb[78].mxu0 %vm7359_vm13, %v14799_v45  ;;  %10213 = vmatprep.subr.bf16.mxu0 %v10212_v3 }
 0x5b2   : > { %v7866_v22 = vmax.f32 %v7808_v24, 0.0  ;;  %10215 = vmatpush1.bf16.msra.mxu0 %v10214_v8  ;;  %8272 = vmatprep.mubr.f32.mxu0 %v15528_v43 }
 0x5b3   : > { %v7867_v48 = vmax.f32 %v7810_v33, 0.0  ;;  %v7813_v39 = vpop.f32.mrb[56].mxu1  ;;  %9984 = vmatmul.mubr.msk.f32.gmra.mrb[68].mxu1 %vm7359_vm13, %v14738_v23 }
 0x5b4   : > { %v10222_v2 = vpack.c.bf16 %v7866_v22, %v7858_v57  ;;  %v7815_v52 = vpop.f32.mrb[57].mxu1  ;;  %8177 = vmatprep.mubr.f32.mxu1 %v15528_v43  ;;  %v7814_v5 = vadd.f32 %v7813_v39, %v14684_v10 }
 0x5b5   : > { %v10220_v46 = vpack.c.bf16 %v7867_v48, %v7859_v63  ;;  %9990 = vmatmul.mubr.msk.f32.vlgmr.msra.gmra.mrb[80].mxu0 %vm7359_vm13, %v14714_v4  ;;  %v7816_v20 = vadd.f32 %v7815_v52, %v14684_v10 }
 0x5b6   : > { %8278 = vmatprep.mubr.f32.mxu0 %v15528_v43  ;;  %v7874_v9 = vmax.f32 %v7814_v5, 0.0 }
 0x5b7   : > { %v7819_v40 = vpop.f32.mrb[58].mxu1  ;;  %9985 = vmatmul.mubr.msk.f32.gmra.mrb[70].mxu1 %vm7359_vm13, %v14748_v55  ;;  %10221 = vmatprep.subr.bf16.mxu1 %v10220_v46  ;;  %v7875_v10 = vmax.f32 %v7816_v20, 0.0 }
 0x5b8   : > { %v7820_v37 = vadd.f32 %v7819_v40, %v14687_v49  ;;  %v7821_v42 = vpop.f32.mrb[59].mxu1  ;;  %10223 = vmatpush1.bf16.msra.mxu1 %v10222_v2  ;;  %8183 = vmatprep.mubr.f32.mxu1 %v15528_v43 }
 0x5b9   : > { %v7822_v59 = vadd.f32 %v7821_v42, %v14687_v49  ;;  %9991 = vmatmul.mubr.msk.f32.gmra.mrb[82].mxu0 %vm7359_vm13, %v14724_v16 }
 0x5ba   : > { %v7882_v6 = vmax.f32 %v7820_v37, 0.0  ;;  %8284 = vmatprep.mubr.f32.mxu0 %v15528_v43 }
 0x5bb   : > { %v7883_v56 = vmax.f32 %v7822_v59, 0.0  ;;  %v7825_v62 = vpop.f32.mrb[60].mxu1  ;;  %9986 = vmatmul.mubr.msk.f32.gmra.mrb[72].mxu1 %vm7359_vm13, %v14762_v53 }
 0x5bc   : > { %v10226_v17 = vpack.c.bf16 %v7882_v6, %v7874_v9  ;;  %v7827_v38 = vpop.f32.mrb[61].mxu1  ;;  %8189 = vmatprep.mubr.f32.mxu1 %v15528_v43  ;;  %v7826_v49 = vadd.f32 %v7825_v62, %v14693_v35 }
 0x5bd   : > { %v10224_v51 = vpack.c.bf16 %v7883_v56, %v7875_v10  ;;  %9992 = vmatmul.mubr.msk.f32.gmra.mrb[84].mxu0 %vm7359_vm13, %v14738_v23  ;;  %v7828_v15 = vadd.f32 %v7827_v38, %v14693_v35 }
 0x5be   : > { %8290 = vmatprep.mubr.f32.mxu0 %v15528_v43  ;;  %v7890_v44 = vmax.f32 %v7826_v49, 0.0 }
 0x5bf   : > { %v7831_v50 = vpop.f32.mrb[62].mxu1  ;;  %9987 = vmatmul.mubr.msk.f32.gmra.mrb[74].mxu1 %vm7359_vm13, %v14772_v19  ;;  %10225 = vmatprep.subr.bf16.mxu1 %v10224_v51  ;;  %v7891_v35 = vmax.f32 %v7828_v15, 0.0 }
 0x5c0   : > { %v7832_v12 = vadd.f32 %v7831_v50, %v14698_v31  ;;  %v7833_v14 = vpop.f32.mrb[63].mxu1  ;;  %10227 = vmatpush1.bf16.msra.mxu1 %v10226_v17  ;;  %8195 = vmatprep.mubr.f32.mxu1 %v15528_v43 }
 0x5c1   : > { %v7834_v47 = vadd.f32 %v7833_v14, %v14698_v31  ;;  %9993 = vmatmul.mubr.msk.f32.gmra.mrb[86].mxu0 %vm7359_vm13, %v14748_v55 }
 0x5c2   : > { %v7898_v11 = vmax.f32 %v7832_v12, 0.0  ;;  %8296 = vmatprep.mubr.f32.mxu0 %v15528_v43 }
 0x5c3   : > { %v7899_v30 = vmax.f32 %v7834_v47, 0.0  ;;  %9988 = vmatmul.mubr.msk.f32.gmra.mrb[76].mxu1 %vm7359_vm13, %v14786_v7 }
 0x5c4   : > { %v10230_v29 = vpack.c.bf16 %v7898_v11, %v7890_v44  ;;  %8201 = vmatprep.mubr.f32.mxu1 %v15528_v43 }
 0x5c5   : > { %v10228_v26 = vpack.c.bf16 %v7899_v30, %v7891_v35  ;;  %9994 = vmatmul.mubr.msk.f32.gmra.mrb[88].mxu0 %vm7359_vm13, %v14762_v53 }
 0x5c6   : > { %8302 = vmatprep.mubr.f32.mxu0 %v15528_v43 }
 0x5c7   : > { %9989 = vmatmul.mubr.msk.f32.gmra.mrb[78].mxu1 %vm7359_vm13, %v14799_v45  ;;  %10229 = vmatprep.subr.bf16.mxu1 %v10228_v26 }
 0x5c8   : > { %10231 = vmatpush1.bf16.msra.mxu1 %v10230_v29  ;;  %8385 = vmatprep.mubr.f32.mxu1 %v15528_v43 }
 0x5c9   : > { %9995 = vmatmul.mubr.msk.f32.gmra.mrb[90].mxu0 %vm7359_vm13, %v14772_v19 }
 0x5ca   : > { %8308 = vmatprep.mubr.f32.mxu0 %v15528_v43 }
 0x5cb   : > { %9998 = vmatmul.mubr.msk.f32.vlgmr.msra.gmra.mrb[80].mxu1 %vm7359_vm13, %v14714_v4 }
 0x5cc   : > { %8391 = vmatprep.mubr.f32.mxu1 %v15528_v43 }
 0x5cd   : > { %9996 = vmatmul.mubr.msk.f32.gmra.mrb[92].mxu0 %vm7359_vm13, %v14786_v7 }
 0x5ce   : > { %8314 = vmatprep.mubr.f32.mxu0 %v15528_v43 }
 0x5cf   : > { %9999 = vmatmul.mubr.msk.f32.gmra.mrb[82].mxu1 %vm7359_vm13, %v14724_v16  ;;  %v14884_v16 = vpop.permute.xlu1 %7920 }
 0x5d0   : > { %8397 = vmatprep.mubr.f32.mxu1 %v15528_v43 }
 0x5d1   : > { %9997 = vmatmul.mubr.msk.f32.gmra.mrb[94].mxu0 %vm7359_vm13, %v14799_v45 }
 0x5d2   : > { %8644 = vmatprep.mubr.f32.mxu0 %v15528_v43 }
 0x5d3   : > { %10000 = vmatmul.mubr.msk.f32.gmra.mrb[84].mxu1 %vm7359_vm13, %v14738_v23  ;;  %v14892_v25 = vpop.permute.xlu1 %7930 }
 0x5d4   : > { %8403 = vmatprep.mubr.f32.mxu1 %v15528_v43 }
 0x5d7   : > { %10001 = vmatmul.mubr.msk.f32.gmra.mrb[86].mxu1 %vm7359_vm13, %v14748_v55  ;;  %v14887_v55 = vpop.permute.xlu0 %7925  ;;  %v14900_v39 = vpop.permute.xlu1 %7940 }
 0x5d8   : > { %8409 = vmatprep.mubr.f32.mxu1 %v15528_v43 }
 0x5db   : > { %10002 = vmatmul.mubr.msk.f32.gmra.mrb[88].mxu1 %vm7359_vm13, %v14762_v53  ;;  %v14895_v58 = vpop.permute.xlu0 %7935  ;;  %v14909_v15 = vpop.permute.xlu1 %7950 }
 0x5dc   : > { %8415 = vmatprep.mubr.f32.mxu1 %v15528_v43 }
 0x5df   : > { %10003 = vmatmul.mubr.msk.f32.gmra.mrb[90].mxu1 %vm7359_vm13, %v14772_v19  ;;  %v14903_v46 = vpop.permute.xlu0 %7945 }
 0x5e0   : > { %8421 = vmatprep.mubr.f32.mxu1 %v15528_v43 }
 0x5e3   : > { %10004 = vmatmul.mubr.msk.f32.gmra.mrb[92].mxu1 %vm7359_vm13, %v14786_v7  ;;  %v14914_v35 = vpop.permute.xlu0 %7955 }
 0x5e4   : > { %8427 = vmatprep.mubr.f32.mxu1 %v15528_v43 }
 0x5e7   : > { %10005 = vmatmul.mubr.msk.f32.gmra.mrb[94].mxu1 %vm7359_vm13, %v14799_v45 }
 0x5e8   : > { %8757 = vmatprep.mubr.f32.mxu1 %v15528_v43 }
 0x668   : > { %v8048_v31 = vpop.f32.mrb[64].mxu0 }
 0x669   : > { %v8050_v4 = vpop.f32.mrb[65].mxu0  ;;  %v8049_v23 = vadd.f32 %v8048_v31, %v14884_v16 }
 0x66a   : > { %v8051_v53 = vadd.f32 %v8050_v4, %v14884_v16 }
 0x66b   : > { %v8434_v1 = vmax.f32 %v8049_v23, 0.0 }
 0x66c   : > { %v8054_v19 = vpop.f32.mrb[66].mxu0  ;;  %v8435_v41 = vmax.f32 %v8051_v53, 0.0 }
 0x66d   : > { %v8055_v27 = vadd.f32 %v8054_v19, %v14887_v55  ;;  %v8056_v7 = vpop.f32.mrb[67].mxu0 }
 0x66e   : > { %v8057_v61 = vadd.f32 %v8056_v7, %v14887_v55 }
 0x66f   : > { %v8442_v13 = vmax.f32 %v8055_v27, 0.0 }
 0x670   : > { %v8443_v28 = vmax.f32 %v8057_v61, 0.0  ;;  %v8060_v0 = vpop.f32.mrb[68].mxu0 }
 0x671   : > { %v10234_v54 = vpack.c.bf16 %v8442_v13, %v8434_v1  ;;  %v8062_v18 = vpop.f32.mrb[69].mxu0  ;;  %v8061_v32 = vadd.f32 %v8060_v0, %v14892_v25 }
 0x672   : > { %v10232_v34 = vpack.c.bf16 %v8443_v28, %v8435_v41  ;;  %v8063_v8 = vadd.f32 %v8062_v18, %v14892_v25 }
 0x673   : > { %v8450_v24 = vmax.f32 %v8061_v32, 0.0 }
 0x674   : > { %v8066_v45 = vpop.f32.mrb[70].mxu0  ;;  %10233 = vmatprep.subr.bf16.mxu0 %v10232_v34  ;;  %v8451_v33 = vmax.f32 %v8063_v8, 0.0 }
 0x675   : > { %v8067_v21 = vadd.f32 %v8066_v45, %v14895_v58  ;;  %v8068_v60 = vpop.f32.mrb[71].mxu0  ;;  %10235 = vmatpush1.bf16.msra.mxu0 %v10234_v54 }
 0x676   : > { %v8069_v3 = vadd.f32 %v8068_v60, %v14895_v58 }
 0x677   : > { %v8458_v36 = vmax.f32 %v8067_v21, 0.0 }
 0x678   : > { %v8459_v57 = vmax.f32 %v8069_v3, 0.0  ;;  %v8072_v22 = vpop.f32.mrb[72].mxu0 }
 0x679   : > { %v10238_v63 = vpack.c.bf16 %v8458_v36, %v8450_v24  ;;  %v8074_v48 = vpop.f32.mrb[73].mxu0  ;;  %v8073_v52 = vadd.f32 %v8072_v22, %v14900_v39 }
 0x67a   : > { %v10236_v2 = vpack.c.bf16 %v8459_v57, %v8451_v33  ;;  %v8075_v5 = vadd.f32 %v8074_v48, %v14900_v39 }
 0x67b   : > { %v8466_v6 = vmax.f32 %v8073_v52, 0.0 }
 0x67c   : > { %v8078_v20 = vpop.f32.mrb[74].mxu0  ;;  %10237 = vmatprep.subr.bf16.mxu0 %v10236_v2  ;;  %v8467_v56 = vmax.f32 %v8075_v5, 0.0 }
 0x67d   : > { %v8079_v40 = vadd.f32 %v8078_v20, %v14903_v46  ;;  %v8080_v37 = vpop.f32.mrb[75].mxu0  ;;  %10239 = vmatpush1.bf16.msra.mxu0 %v10238_v63  ;;  %v14930_v20 = vld [vmem:[%s15304_s6 + $0x80] sm:$0xff] }
 0x67e   : > { %v8161_v42 = vpop.f32.mrb[64].mxu1  ;;  %v8081_v59 = vadd.f32 %v8080_v37, %v14903_v46 }
 0x67f   : > { %v8163_v9 = vpop.f32.mrb[65].mxu1  ;;  %v8474_v10 = vmax.f32 %v8079_v40, 0.0  ;;  %v8162_v38 = vadd.f32 %v8161_v42, %v14884_v16 }
 0x680   : > { %v8475_v62 = vmax.f32 %v8081_v59, 0.0  ;;  %v8084_v17 = vpop.f32.mrb[76].mxu0  ;;  %v8164_v50 = vadd.f32 %v8163_v9, %v14884_v16 }
 0x681   : > { %v10242_v51 = vpack.c.bf16 %v8474_v10, %v8466_v6  ;;  %v8086_v49 = vpop.f32.mrb[77].mxu0  ;;  %v8085_v11 = vadd.f32 %v8084_v17, %v14909_v15  ;;  %v8436_v31 = vmax.f32 %v8162_v38, 0.0 }
 0x682   : > { %v8167_v12 = vpop.f32.mrb[66].mxu1  ;;  %v10240_v14 = vpack.c.bf16 %v8475_v62, %v8467_v56  ;;  %v8087_v29 = vadd.f32 %v8086_v49, %v14909_v15  ;;  %v8437_v19 = vmax.f32 %v8164_v50, 0.0 }
 0x683   : > { %v8168_v47 = vadd.f32 %v8167_v12, %v14887_v55  ;;  %v8169_v44 = vpop.f32.mrb[67].mxu1  ;;  %v8482_v41 = vmax.f32 %v8085_v11, 0.0 }
 0x684   : > { %v8170_v30 = vadd.f32 %v8169_v44, %v14887_v55  ;;  %v8090_v26 = vpop.f32.mrb[78].mxu0  ;;  %10241 = vmatprep.subr.bf16.mxu0 %v10240_v14  ;;  %v8483_v54 = vmax.f32 %v8087_v29, 0.0  ;;  %v14940_v14 = vld [vmem:[%s15304_s6 + $0x88] sm:$0xff] }
 0x685   : > { %v8444_v4 = vmax.f32 %v8168_v47, 0.0  ;;  %v8091_v23 = vadd.f32 %v8090_v26, %v14914_v35  ;;  %v8092_v53 = vpop.f32.mrb[79].mxu0  ;;  %10243 = vmatpush1.bf16.msra.mxu0 %v10242_v51 }
 0x686   : > { %v8445_v27 = vmax.f32 %v8170_v30, 0.0  ;;  %v8173_v7 = vpop.f32.mrb[68].mxu1  ;;  %v8093_v61 = vadd.f32 %v8092_v53, %v14914_v35 }
 0x687   : > { %v10250_v1 = vpack.c.bf16 %v8444_v4, %v8436_v31  ;;  %v8175_v13 = vpop.f32.mrb[69].mxu1  ;;  %v8490_v28 = vmax.f32 %v8091_v23, 0.0  ;;  %v8174_v32 = vadd.f32 %v8173_v7, %v14892_v25 }
 0x688   : > { %v10248_v0 = vpack.c.bf16 %v8445_v27, %v8437_v19  ;;  %v8491_v18 = vmax.f32 %v8093_v61, 0.0  ;;  %v8274_v34 = vpop.f32.mrb[80].mxu0  ;;  %v8176_v21 = vadd.f32 %v8175_v13, %v14892_v25  ;;  %v14954_v61 = vld [vmem:[%s15304_s6 + $0x90] sm:$0xff] }
 0x689   : > { %v10246_v8 = vpack.c.bf16 %v8490_v28, %v8482_v41  ;;  %v8276_v45 = vpop.f32.mrb[81].mxu0  ;;  %v8275_v33 = vadd.f32 %v8274_v34, %v14884_v16  ;;  %v8452_v48 = vmax.f32 %v8174_v32, 0.0 }
 0x68a   : > { %v8179_v60 = vpop.f32.mrb[70].mxu1  ;;  %10249 = vmatprep.subr.bf16.mxu1 %v10248_v0  ;;  %v10244_v3 = vpack.c.bf16 %v8491_v18, %v8483_v54  ;;  %v8277_v22 = vadd.f32 %v8276_v45, %v14884_v16  ;;  %v8453_v40 = vmax.f32 %v8176_v21, 0.0 }
 0x68b   : > { %v8180_v24 = vadd.f32 %v8179_v60, %v14895_v58  ;;  %v8181_v36 = vpop.f32.mrb[71].mxu1  ;;  %10251 = vmatpush1.bf16.msra.mxu1 %v10250_v1  ;;  %v8438_v10 = vmax.f32 %v8275_v33, 0.0 }
 0x68c   : > { %v8182_v57 = vadd.f32 %v8181_v36, %v14895_v58  ;;  %v8280_v63 = vpop.f32.mrb[82].mxu0  ;;  %10245 = vmatprep.subr.bf16.mxu0 %v10244_v3  ;;  %v8439_v17 = vmax.f32 %v8277_v22, 0.0  ;;  %v14964_v36 = vld [vmem:[%s15304_s6 + $0x98] sm:$0xff] }
 0x68d   : > { %v8460_v2 = vmax.f32 %v8180_v24, 0.0  ;;  %v8281_v52 = vadd.f32 %v8280_v63, %v14887_v55  ;;  %v8282_v5 = vpop.f32.mrb[83].mxu0  ;;  %10247 = vmatpush1.bf16.msra.mxu0 %v10246_v8 }
 0x68e   : > { %v8461_v37 = vmax.f32 %v8182_v57, 0.0  ;;  %v8185_v42 = vpop.f32.mrb[72].mxu1  ;;  %v8283_v59 = vadd.f32 %v8282_v5, %v14887_v55 }
 0x68f   : > { %v10254_v9 = vpack.c.bf16 %v8460_v2, %v8452_v48  ;;  %v8187_v6 = vpop.f32.mrb[73].mxu1  ;;  %v8446_v56 = vmax.f32 %v8281_v52, 0.0  ;;  %v8186_v49 = vadd.f32 %v8185_v42, %v14900_v39 }
 0x690   : > { %v10252_v62 = vpack.c.bf16 %v8461_v37, %v8453_v40  ;;  %v8447_v38 = vmax.f32 %v8283_v59, 0.0  ;;  %v8286_v51 = vpop.f32.mrb[84].mxu0  ;;  %10022 = vmatmul.mubr.msk.f32.vlgmr.msra.gmra.mrb[96].mxu0 %vm7359_vm13, %v14930_v20  ;;  %v8188_v47 = vadd.f32 %v8187_v6, %v14900_v39  ;;  %v14978_v6 = vld [vmem:[%s15304_s6 + $0xa0] sm:$0xff] }
 0x691   : > { %v10266_v50 = vpack.c.bf16 %v8446_v56, %v8438_v10  ;;  %v8288_v12 = vpop.f32.mrb[85].mxu0  ;;  %8650 = vmatprep.mubr.f32.mxu0 %v15528_v43  ;;  %v8287_v26 = vadd.f32 %v8286_v51, %v14892_v25  ;;  %v8468_v53 = vmax.f32 %v8186_v49, 0.0 }
 0x692   : > { %v8191_v44 = vpop.f32.mrb[74].mxu1  ;;  %10253 = vmatprep.subr.bf16.mxu1 %v10252_v62  ;;  %v10264_v11 = vpack.c.bf16 %v8447_v38, %v8439_v17  ;;  %v8289_v4 = vadd.f32 %v8288_v12, %v14892_v25  ;;  %v8469_v1 = vmax.f32 %v8188_v47, 0.0 }
 0x693   : > { %v8192_v30 = vadd.f32 %v8191_v44, %v14903_v46  ;;  %v8193_v29 = vpop.f32.mrb[75].mxu1  ;;  %10255 = vmatpush1.bf16.msra.mxu1 %v10254_v9  ;;  %v8454_v18 = vmax.f32 %v8287_v26, 0.0 }
 0x694   : > { %v8194_v31 = vadd.f32 %v8193_v29, %v14903_v46  ;;  %v8292_v23 = vpop.f32.mrb[86].mxu0  ;;  %10023 = vmatmul.mubr.msk.f32.gmra.mrb[98].mxu0 %vm7359_vm13, %v14940_v14  ;;  %10265 = vmatprep.subr.bf16.mxu0 %v10264_v11  ;;  %v8455_v8 = vmax.f32 %v8289_v4, 0.0 }
 0x695   : > { %v8476_v19 = vmax.f32 %v8192_v30, 0.0  ;;  %v8293_v27 = vadd.f32 %v8292_v23, %v14895_v58  ;;  %v8294_v7 = vpop.f32.mrb[87].mxu0  ;;  %10267 = vmatpush1.bf16.msra.mxu0 %v10266_v50  ;;  %8656 = vmatprep.mubr.f32.mxu0 %v15528_v43 }
 0x696   : > { %v8477_v13 = vmax.f32 %v8194_v31, 0.0  ;;  %v8197_v41 = vpop.f32.mrb[76].mxu1  ;;  %v8295_v28 = vadd.f32 %v8294_v7, %v14895_v58  ;;  %v14988_v31 = vld [vmem:[%s15304_s6 + $0xa8] sm:$0xff] }
 0x697   : > { %v10258_v0 = vpack.c.bf16 %v8476_v19, %v8468_v53  ;;  %v8199_v54 = vpop.f32.mrb[77].mxu1  ;;  %v8462_v34 = vmax.f32 %v8293_v27, 0.0  ;;  %v8198_v60 = vadd.f32 %v8197_v41, %v14909_v15 }
 0x698   : > { %v10256_v32 = vpack.c.bf16 %v8477_v13, %v8469_v1  ;;  %v8463_v45 = vmax.f32 %v8295_v28, 0.0  ;;  %v8298_v21 = vpop.f32.mrb[88].mxu0  ;;  %10024 = vmatmul.mubr.msk.f32.gmra.mrb[100].mxu0 %vm7359_vm13, %v14954_v61  ;;  %v8200_v33 = vadd.f32 %v8199_v54, %v14909_v15 }
 0x699   : > { %v10270_v3 = vpack.c.bf16 %v8462_v34, %v8454_v18  ;;  %v8300_v24 = vpop.f32.mrb[89].mxu0  ;;  %8662 = vmatprep.mubr.f32.mxu0 %v15528_v43  ;;  %v8299_v2 = vadd.f32 %v8298_v21, %v14900_v39  ;;  %v8484_v37 = vmax.f32 %v8198_v60, 0.0  ;;  %v15002_v18 = vld [vmem:[%s15304_s6 + $0xb0] sm:$0xff] }
 0x69a   : > { %v8203_v57 = vpop.f32.mrb[78].mxu1  ;;  %10257 = vmatprep.subr.bf16.mxu1 %v10256_v32  ;;  %v10268_v22 = vpack.c.bf16 %v8463_v45, %v8455_v8  ;;  %v8301_v5 = vadd.f32 %v8300_v24, %v14900_v39  ;;  %v8485_v10 = vmax.f32 %v8200_v33, 0.0 }
 0x69b   : > { %v8204_v63 = vadd.f32 %v8203_v57, %v14914_v35  ;;  %v8205_v48 = vpop.f32.mrb[79].mxu1  ;;  %10259 = vmatpush1.bf16.msra.mxu1 %v10258_v0  ;;  %v8470_v49 = vmax.f32 %v8299_v2, 0.0 }
 0x69c   : > { %v8206_v52 = vadd.f32 %v8205_v48, %v14914_v35  ;;  %v8304_v40 = vpop.f32.mrb[90].mxu0  ;;  %10025 = vmatmul.mubr.msk.f32.gmra.mrb[102].mxu0 %vm7359_vm13, %v14964_v36  ;;  %10269 = vmatprep.subr.bf16.mxu0 %v10268_v22  ;;  %v8471_v47 = vmax.f32 %v8301_v5, 0.0  ;;  %v15015_v48 = vld [vmem:[%s15304_s6 + $0xb8] sm:$0xff] }
 0x69d   : > { %v8492_v42 = vmax.f32 %v8204_v63, 0.0  ;;  %v8305_v59 = vadd.f32 %v8304_v40, %v14903_v46  ;;  %v8306_v9 = vpop.f32.mrb[91].mxu0  ;;  %10271 = vmatpush1.bf16.msra.mxu0 %v10270_v3  ;;  %8668 = vmatprep.mubr.f32.mxu0 %v15528_v43 }
 0x69e   : > { %v8493_v56 = vmax.f32 %v8206_v52, 0.0  ;;  %v8387_v62 = vpop.f32.mrb[80].mxu1  ;;  %v8307_v17 = vadd.f32 %v8306_v9, %v14903_v46 }
 0x69f   : > { %v10262_v38 = vpack.c.bf16 %v8492_v42, %v8484_v37  ;;  %v8389_v51 = vpop.f32.mrb[81].mxu1  ;;  %v8478_v50 = vmax.f32 %v8305_v59, 0.0  ;;  %v8388_v30 = vadd.f32 %v8387_v62, %v14884_v16 }
 0x6a0   : > { %v10260_v12 = vpack.c.bf16 %v8493_v56, %v8485_v10  ;;  %v8479_v44 = vmax.f32 %v8307_v17, 0.0  ;;  %v8310_v11 = vpop.f32.mrb[92].mxu0  ;;  %10026 = vmatmul.mubr.msk.f32.gmra.mrb[104].mxu0 %vm7359_vm13, %v14978_v6  ;;  %v8390_v4 = vadd.f32 %v8389_v51, %v14884_v16 }
 0x6a1   : > { %v10274_v29 = vpack.c.bf16 %v8478_v50, %v8470_v49  ;;  %v8312_v26 = vpop.f32.mrb[93].mxu0  ;;  %8674 = vmatprep.mubr.f32.mxu0 %v15528_v43  ;;  %v8311_v7 = vadd.f32 %v8310_v11, %v14909_v15  ;;  %v8440_v28 = vmax.f32 %v8388_v30, 0.0 }
 0x6a2   : > { %v8393_v23 = vpop.f32.mrb[82].mxu1  ;;  %10261 = vmatprep.subr.bf16.mxu1 %v10260_v12  ;;  %v10272_v53 = vpack.c.bf16 %v8479_v44, %v8471_v47  ;;  %v8313_v13 = vadd.f32 %v8312_v26, %v14909_v15 }
 0x6a3   : > { %v8394_v19 = vadd.f32 %v8393_v23, %v14887_v55  ;;  %v8395_v27 = vpop.f32.mrb[83].mxu1  ;;  %10263 = vmatpush1.bf16.msra.mxu1 %v10262_v38  ;;  %v8486_v60 = vmax.f32 %v8311_v7, 0.0 }
 0x6a4   : > { %v8396_v1 = vadd.f32 %v8395_v27, %v14887_v55  ;;  %v8316_v41 = vpop.f32.mrb[94].mxu0  ;;  %10027 = vmatmul.mubr.msk.f32.gmra.mrb[106].mxu0 %vm7359_vm13, %v14988_v31  ;;  %10273 = vmatprep.subr.bf16.mxu0 %v10272_v53  ;;  %v8441_v55 = vmax.f32 %v8390_v4, 0.0  ;;  %v8487_v33 = vmax.f32 %v8313_v13, 0.0 }
 0x6a5   : > { %v8448_v16 = vmax.f32 %v8394_v19, 0.0  ;;  %v8317_v0 = vadd.f32 %v8316_v41, %v14914_v35  ;;  %v8318_v54 = vpop.f32.mrb[95].mxu0  ;;  %10275 = vmatpush1.bf16.msra.mxu0 %v10274_v29  ;;  %8680 = vmatprep.mubr.f32.mxu0 %v15528_v43 }
 0x6a6   : > { %v8449_v34 = vmax.f32 %v8396_v1, 0.0  ;;  %v8399_v32 = vpop.f32.mrb[84].mxu1  ;;  %10030 = vmatmul.mubr.msk.f32.vlgmr.msra.gmra.mrb[96].mxu1 %vm7359_vm13, %v14930_v20  ;;  %v8319_v8 = vadd.f32 %v8318_v54, %v14914_v35 }
 0x6a7   : > { %v10282_v45 = vpack.c.bf16 %v8448_v16, %v8440_v28  ;;  %v8401_v21 = vpop.f32.mrb[85].mxu1  ;;  %8763 = vmatprep.mubr.f32.mxu1 %v15528_v43  ;;  %v8494_v3 = vmax.f32 %v8317_v0, 0.0  ;;  %v8400_v22 = vadd.f32 %v8399_v32, %v14892_v25 }
 0x6a8   : > { %v10280_v24 = vpack.c.bf16 %v8449_v34, %v8441_v55  ;;  %v8495_v57 = vmax.f32 %v8319_v8, 0.0  ;;  %10028 = vmatmul.mubr.msk.f32.gmra.mrb[108].mxu0 %vm7359_vm13, %v15002_v18  ;;  %v8402_v2 = vadd.f32 %v8401_v21, %v14892_v25 }
 0x6a9   : > { %v10278_v63 = vpack.c.bf16 %v8494_v3, %v8486_v60  ;;  %8686 = vmatprep.mubr.f32.mxu0 %v15528_v43  ;;  %v8456_v59 = vmax.f32 %v8400_v22, 0.0 }
 0x6aa   : > { %v8405_v52 = vpop.f32.mrb[86].mxu1  ;;  %10031 = vmatmul.mubr.msk.f32.gmra.mrb[98].mxu1 %vm7359_vm13, %v14940_v14  ;;  %10281 = vmatprep.subr.bf16.mxu1 %v10280_v24  ;;  %v10276_v5 = vpack.c.bf16 %v8495_v57, %v8487_v33  ;;  %v8457_v9 = vmax.f32 %v8402_v2, 0.0 }
 0x6ab   : > { %v8406_v40 = vadd.f32 %v8405_v52, %v14895_v58  ;;  %v8407_v37 = vpop.f32.mrb[87].mxu1  ;;  %10283 = vmatpush1.bf16.msra.mxu1 %v10282_v45  ;;  %8769 = vmatprep.mubr.f32.mxu1 %v15528_v43 }
 0x6ac   : > { %v8408_v42 = vadd.f32 %v8407_v37, %v14895_v58  ;;  %10029 = vmatmul.mubr.msk.f32.gmra.mrb[110].mxu0 %vm7359_vm13, %v15015_v48  ;;  %10277 = vmatprep.subr.bf16.mxu0 %v10276_v5 }
 0x6ad   : > { %v8464_v25 = vmax.f32 %v8406_v40, 0.0  ;;  %10279 = vmatpush1.bf16.msra.mxu0 %v10278_v63  ;;  %8870 = vmatprep.mubr.f32.mxu0 %v15528_v43 }
 0x6ae   : > { %v8465_v10 = vmax.f32 %v8408_v42, 0.0  ;;  %v8411_v56 = vpop.f32.mrb[88].mxu1  ;;  %10032 = vmatmul.mubr.msk.f32.gmra.mrb[100].mxu1 %vm7359_vm13, %v14954_v61 }
 0x6af   : > { %v10286_v62 = vpack.c.bf16 %v8464_v25, %v8456_v59  ;;  %v8413_v17 = vpop.f32.mrb[89].mxu1  ;;  %8775 = vmatprep.mubr.f32.mxu1 %v15528_v43  ;;  %v8412_v38 = vadd.f32 %v8411_v56, %v14900_v39 }
 0x6b0   : > { %v10284_v58 = vpack.c.bf16 %v8465_v10, %v8457_v9  ;;  %10038 = vmatmul.mubr.msk.f32.vlgmr.msra.gmra.mrb[112].mxu0 %vm7359_vm13, %v14930_v20  ;;  %v8414_v51 = vadd.f32 %v8413_v17, %v14900_v39 }
 0x6b1   : > { %8876 = vmatprep.mubr.f32.mxu0 %v15528_v43  ;;  %v8472_v44 = vmax.f32 %v8412_v38, 0.0 }
 0x6b2   : > { %v8417_v49 = vpop.f32.mrb[90].mxu1  ;;  %10033 = vmatmul.mubr.msk.f32.gmra.mrb[102].mxu1 %vm7359_vm13, %v14964_v36  ;;  %10285 = vmatprep.subr.bf16.mxu1 %v10284_v58  ;;  %v8473_v39 = vmax.f32 %v8414_v51, 0.0 }
 0x6b3   : > { %v8418_v50 = vadd.f32 %v8417_v49, %v14903_v46  ;;  %v8419_v12 = vpop.f32.mrb[91].mxu1  ;;  %10287 = vmatpush1.bf16.msra.mxu1 %v10286_v62  ;;  %8781 = vmatprep.mubr.f32.mxu1 %v15528_v43 }
 0x6b4   : > { %v8420_v47 = vadd.f32 %v8419_v12, %v14903_v46  ;;  %10039 = vmatmul.mubr.msk.f32.gmra.mrb[114].mxu0 %vm7359_vm13, %v14940_v14 }
 0x6b5   : > { %v8480_v11 = vmax.f32 %v8418_v50, 0.0  ;;  %8882 = vmatprep.mubr.f32.mxu0 %v15528_v43 }
 0x6b6   : > { %v8481_v30 = vmax.f32 %v8420_v47, 0.0  ;;  %v8423_v29 = vpop.f32.mrb[92].mxu1  ;;  %10034 = vmatmul.mubr.msk.f32.gmra.mrb[104].mxu1 %vm7359_vm13, %v14978_v6 }
 0x6b7   : > { %v10290_v26 = vpack.c.bf16 %v8480_v11, %v8472_v44  ;;  %v8425_v4 = vpop.f32.mrb[93].mxu1  ;;  %8787 = vmatprep.mubr.f32.mxu1 %v15528_v43  ;;  %v8424_v46 = vadd.f32 %v8423_v29, %v14909_v15 }
 0x6b8   : > { %v10288_v23 = vpack.c.bf16 %v8481_v30, %v8473_v39  ;;  %10040 = vmatmul.mubr.msk.f32.gmra.mrb[116].mxu0 %vm7359_vm13, %v14954_v61  ;;  %v8426_v53 = vadd.f32 %v8425_v4, %v14909_v15 }
 0x6b9   : > { %8888 = vmatprep.mubr.f32.mxu0 %v15528_v43  ;;  %v8488_v13 = vmax.f32 %v8424_v46, 0.0 }
 0x6ba   : > { %v8429_v19 = vpop.f32.mrb[94].mxu1  ;;  %10035 = vmatmul.mubr.msk.f32.gmra.mrb[106].mxu1 %vm7359_vm13, %v14988_v31  ;;  %10289 = vmatprep.subr.bf16.mxu1 %v10288_v23  ;;  %v8489_v15 = vmax.f32 %v8426_v53, 0.0 }
 0x6bb   : > { %v8430_v27 = vadd.f32 %v8429_v19, %v14914_v35  ;;  %v8431_v7 = vpop.f32.mrb[95].mxu1  ;;  %10291 = vmatpush1.bf16.msra.mxu1 %v10290_v26  ;;  %8793 = vmatprep.mubr.f32.mxu1 %v15528_v43 }
 0x6bc   : > { %v8432_v1 = vadd.f32 %v8431_v7, %v14914_v35  ;;  %10041 = vmatmul.mubr.msk.f32.gmra.mrb[118].mxu0 %vm7359_vm13, %v14964_v36 }
 0x6bd   : > { %v8496_v41 = vmax.f32 %v8430_v27, 0.0  ;;  %8894 = vmatprep.mubr.f32.mxu0 %v15528_v43 }
 0x6be   : > { %v8497_v28 = vmax.f32 %v8432_v1, 0.0  ;;  %10036 = vmatmul.mubr.msk.f32.gmra.mrb[108].mxu1 %vm7359_vm13, %v15002_v18 }
 0x6bf   : > { %v10294_v16 = vpack.c.bf16 %v8496_v41, %v8488_v13  ;;  %8799 = vmatprep.mubr.f32.mxu1 %v15528_v43 }
 0x6c0   : > { %v10292_v0 = vpack.c.bf16 %v8497_v28, %v8489_v15  ;;  %10042 = vmatmul.mubr.msk.f32.gmra.mrb[120].mxu0 %vm7359_vm13, %v14978_v6 }
 0x6c1   : > { %8900 = vmatprep.mubr.f32.mxu0 %v15528_v43 }
 0x6c2   : > { %10037 = vmatmul.mubr.msk.f32.gmra.mrb[110].mxu1 %vm7359_vm13, %v15015_v48  ;;  %10293 = vmatprep.subr.bf16.mxu1 %v10292_v0 }
 0x6c3   : > { %10295 = vmatpush1.bf16.msra.mxu1 %v10294_v16  ;;  %8983 = vmatprep.mubr.f32.mxu1 %v15528_v43 }
 0x6c4   : > { %10043 = vmatmul.mubr.msk.f32.gmra.mrb[122].mxu0 %vm7359_vm13, %v14988_v31 }
 0x6c5   : > { %8906 = vmatprep.mubr.f32.mxu0 %v15528_v43 }
 0x6c6   : > { %10046 = vmatmul.mubr.msk.f32.vlgmr.msra.gmra.mrb[112].mxu1 %vm7359_vm13, %v14930_v20 }
 0x6c7   : > { %8989 = vmatprep.mubr.f32.mxu1 %v15528_v43 }
 0x6c8   : > { %10044 = vmatmul.mubr.msk.f32.gmra.mrb[124].mxu0 %vm7359_vm13, %v15002_v18 }
 0x6c9   : > { %8912 = vmatprep.mubr.f32.mxu0 %v15528_v43 }
 0x6ca   : > { %10047 = vmatmul.mubr.msk.f32.gmra.mrb[114].mxu1 %vm7359_vm13, %v14940_v14  ;;  %v15100_v14 = vpop.permute.xlu1 %8518 }
 0x6cb   : > { %8995 = vmatprep.mubr.f32.mxu1 %v15528_v43 }
 0x6cc   : > { %10045 = vmatmul.mubr.msk.f32.gmra.mrb[126].mxu0 %vm7359_vm13, %v15015_v48 }
 0x6cd   : > { %9170 = vmatprep.mubr.f32.mxu0 %v15528_v43 }
 0x6ce   : > { %10048 = vmatmul.mubr.msk.f32.gmra.mrb[116].mxu1 %vm7359_vm13, %v14954_v61  ;;  %v15108_v24 = vpop.permute.xlu1 %8528 }
 0x6cf   : > { %9001 = vmatprep.mubr.f32.mxu1 %v15528_v43 }
 0x6d2   : > { %10049 = vmatmul.mubr.msk.f32.gmra.mrb[118].mxu1 %vm7359_vm13, %v14964_v36  ;;  %v15103_v36 = vpop.permute.xlu0 %8523  ;;  %v15116_v56 = vpop.permute.xlu1 %8538 }
 0x6d3   : > { %9007 = vmatprep.mubr.f32.mxu1 %v15528_v43 }
 0x6d6   : > { %10050 = vmatmul.mubr.msk.f32.gmra.mrb[120].mxu1 %vm7359_vm13, %v14978_v6  ;;  %v15111_v22 = vpop.permute.xlu0 %8533  ;;  %v15125_v53 = vpop.permute.xlu1 %8548 }
 0x6d7   : > { %9013 = vmatprep.mubr.f32.mxu1 %v15528_v43 }
 0x6da   : > { %10051 = vmatmul.mubr.msk.f32.gmra.mrb[122].mxu1 %vm7359_vm13, %v14988_v31  ;;  %v15119_v58 = vpop.permute.xlu0 %8543 }
 0x6db   : > { %9019 = vmatprep.mubr.f32.mxu1 %v15528_v43 }
 0x6de   : > { %10052 = vmatmul.mubr.msk.f32.gmra.mrb[124].mxu1 %vm7359_vm13, %v15002_v18  ;;  %v15130_v15 = vpop.permute.xlu0 %8553 }
 0x6df   : > { %9025 = vmatprep.mubr.f32.mxu1 %v15528_v43 }
 0x6e2   : > { %10053 = vmatmul.mubr.msk.f32.gmra.mrb[126].mxu1 %vm7359_vm13, %v15015_v48 }
 0x6e3   : > { %9241 = vmatprep.mubr.f32.mxu1 %v15528_v43 }
 0x763   : > { %v8646_v35 = vpop.f32.mrb[96].mxu0 }
 0x764   : > { %v8648_v20 = vpop.f32.mrb[97].mxu0  ;;  %v8647_v61 = vadd.f32 %v8646_v35, %v15100_v14 }
 0x765   : > { %v8649_v6 = vadd.f32 %v8648_v20, %v15100_v14 }
 0x766   : > { %v9032_v34 = vmax.f32 %v8647_v61, 0.0 }
 0x767   : > { %v8652_v31 = vpop.f32.mrb[98].mxu0  ;;  %v9033_v8 = vmax.f32 %v8649_v6, 0.0 }
 0x768   : > { %v8653_v54 = vadd.f32 %v8652_v31, %v15103_v36  ;;  %v8654_v18 = vpop.f32.mrb[99].mxu0 }
 0x769   : > { %v8655_v55 = vadd.f32 %v8654_v18, %v15103_v36 }
 0x76a   : > { %v9040_v32 = vmax.f32 %v8653_v54, 0.0 }
 0x76b   : > { %v9041_v45 = vmax.f32 %v8655_v55, 0.0  ;;  %v8658_v21 = vpop.f32.mrb[100].mxu0 }
 0x76c   : > { %v10298_v60 = vpack.c.bf16 %v9040_v32, %v9032_v34  ;;  %v8660_v3 = vpop.f32.mrb[101].mxu0  ;;  %v8659_v57 = vadd.f32 %v8658_v21, %v15108_v24 }
 0x76d   : > { %v10296_v33 = vpack.c.bf16 %v9041_v45, %v9033_v8  ;;  %v8661_v63 = vadd.f32 %v8660_v3, %v15108_v24 }
 0x76e   : > { %v9048_v40 = vmax.f32 %v8659_v57, 0.0 }
 0x76f   : > { %v8664_v48 = vpop.f32.mrb[102].mxu0  ;;  %10297 = vmatprep.subr.bf16.mxu0 %v10296_v33  ;;  %v9049_v42 = vmax.f32 %v8661_v63, 0.0 }
 0x770   : > { %v8665_v2 = vadd.f32 %v8664_v48, %v15111_v22  ;;  %v8666_v52 = vpop.f32.mrb[103].mxu0  ;;  %10299 = vmatpush1.bf16.msra.mxu0 %v10298_v60 }
 0x771   : > { %v8667_v5 = vadd.f32 %v8666_v52, %v15111_v22 }
 0x772   : > { %v9056_v37 = vmax.f32 %v8665_v2, 0.0 }
 0x773   : > { %v9057_v59 = vmax.f32 %v8667_v5, 0.0  ;;  %v8670_v25 = vpop.f32.mrb[104].mxu0 }
 0x774   : > { %v10302_v9 = vpack.c.bf16 %v9056_v37, %v9048_v40  ;;  %v8672_v10 = vpop.f32.mrb[105].mxu0  ;;  %v8671_v17 = vadd.f32 %v8670_v25, %v15116_v56 }
 0x775   : > { %v10300_v62 = vpack.c.bf16 %v9057_v59, %v9049_v42  ;;  %v8673_v38 = vadd.f32 %v8672_v10, %v15116_v56 }
 0x776   : > { %v9064_v11 = vmax.f32 %v8671_v17, 0.0 }
 0x777   : > { %v8676_v51 = vpop.f32.mrb[106].mxu0  ;;  %10301 = vmatprep.subr.bf16.mxu0 %v10300_v62  ;;  %v9065_v30 = vmax.f32 %v8673_v38, 0.0 }
 0x778   : > { %v8677_v49 = vadd.f32 %v8676_v51, %v15119_v58  ;;  %v8678_v50 = vpop.f32.mrb[107].mxu0  ;;  %10303 = vmatpush1.bf16.msra.mxu0 %v10302_v9  ;;  %v15146_v51 = vld [vmem:[%s15306_s8] sm:$0xf] }
 0x779   : > { %v8759_v12 = vpop.f32.mrb[96].mxu1  ;;  %v8679_v47 = vadd.f32 %v8678_v50, %v15119_v58 }
 0x77a   : > { %v8761_v44 = vpop.f32.mrb[97].mxu1  ;;  %v9072_v39 = vmax.f32 %v8677_v49, 0.0  ;;  %v8760_v4 = vadd.f32 %v8759_v12, %v15100_v14 }
 0x77b   : > { %v9073_v29 = vmax.f32 %v8679_v47, 0.0  ;;  %v8682_v26 = vpop.f32.mrb[108].mxu0  ;;  %v8762_v19 = vadd.f32 %v8761_v44, %v15100_v14 }
 0x77c   : > { %v10306_v23 = vpack.c.bf16 %v9072_v39, %v9064_v11  ;;  %v8684_v46 = vpop.f32.mrb[109].mxu0  ;;  %v8683_v41 = vadd.f32 %v8682_v26, %v15125_v53  ;;  %v9034_v35 = vmax.f32 %v8760_v4, 0.0 }
 0x77d   : > { %v8765_v27 = vpop.f32.mrb[98].mxu1  ;;  %v10304_v7 = vpack.c.bf16 %v9073_v29, %v9065_v30  ;;  %v8685_v16 = vadd.f32 %v8684_v46, %v15125_v53  ;;  %v9035_v31 = vmax.f32 %v8762_v19, 0.0 }
 0x77e   : > { %v8766_v1 = vadd.f32 %v8765_v27, %v15103_v36  ;;  %v8767_v13 = vpop.f32.mrb[99].mxu1  ;;  %v9080_v8 = vmax.f32 %v8683_v41, 0.0 }
 0x77f   : > { %v8768_v28 = vadd.f32 %v8767_v13, %v15103_v36  ;;  %v8688_v0 = vpop.f32.mrb[110].mxu0  ;;  %10305 = vmatprep.subr.bf16.mxu0 %v10304_v7  ;;  %v9081_v60 = vmax.f32 %v8685_v16, 0.0 }
 0x780   : > { %v9042_v20 = vmax.f32 %v8766_v1, 0.0  ;;  %v8689_v61 = vadd.f32 %v8688_v0, %v15130_v15  ;;  %v8690_v6 = vpop.f32.mrb[111].mxu0  ;;  %10307 = vmatpush1.bf16.msra.mxu0 %v10306_v23 }
 0x781   : > { %v9043_v54 = vmax.f32 %v8768_v28, 0.0  ;;  %v8771_v18 = vpop.f32.mrb[100].mxu1  ;;  %v8691_v55 = vadd.f32 %v8690_v6, %v15130_v15 }
 0x782   : > { %v10314_v34 = vpack.c.bf16 %v9042_v20, %v9034_v35  ;;  %v8773_v32 = vpop.f32.mrb[101].mxu1  ;;  %v9088_v45 = vmax.f32 %v8689_v61, 0.0  ;;  %v8772_v57 = vadd.f32 %v8771_v18, %v15108_v24 }
 0x783   : > { %v10312_v21 = vpack.c.bf16 %v9043_v54, %v9035_v31  ;;  %v9089_v3 = vmax.f32 %v8691_v55, 0.0  ;;  %v8872_v33 = vpop.f32.mrb[112].mxu0  ;;  %v8774_v2 = vadd.f32 %v8773_v32, %v15108_v24 }
 0x784   : > { %v10310_v63 = vpack.c.bf16 %v9088_v45, %v9080_v8  ;;  %v8874_v48 = vpop.f32.mrb[113].mxu0  ;;  %v8873_v42 = vadd.f32 %v8872_v33, %v15100_v14  ;;  %v9050_v10 = vmax.f32 %v8772_v57, 0.0 }
 0x785   : > { %v8777_v52 = vpop.f32.mrb[102].mxu1  ;;  %10313 = vmatprep.subr.bf16.mxu1 %v10312_v21  ;;  %v10308_v5 = vpack.c.bf16 %v9089_v3, %v9081_v60  ;;  %v8875_v25 = vadd.f32 %v8874_v48, %v15100_v14  ;;  %v9051_v49 = vmax.f32 %v8774_v2, 0.0 }
 0x786   : > { %v8778_v40 = vadd.f32 %v8777_v52, %v15111_v22  ;;  %v8779_v37 = vpop.f32.mrb[103].mxu1  ;;  %10315 = vmatpush1.bf16.msra.mxu1 %v10314_v34  ;;  %v9036_v39 = vmax.f32 %v8873_v42, 0.0 }
 0x787   : > { %v8780_v59 = vadd.f32 %v8779_v37, %v15111_v22  ;;  %v8878_v9 = vpop.f32.mrb[114].mxu0  ;;  %10309 = vmatprep.subr.bf16.mxu0 %v10308_v5  ;;  %v9037_v26 = vmax.f32 %v8875_v25, 0.0 }
 0x788   : > { %v9058_v62 = vmax.f32 %v8778_v40, 0.0  ;;  %v8879_v17 = vadd.f32 %v8878_v9, %v15103_v36  ;;  %v8880_v38 = vpop.f32.mrb[115].mxu0  ;;  %10311 = vmatpush1.bf16.msra.mxu0 %v10310_v63 }
 0x789   : > { %v9059_v50 = vmax.f32 %v8780_v59, 0.0  ;;  %v8783_v12 = vpop.f32.mrb[104].mxu1  ;;  %v8881_v47 = vadd.f32 %v8880_v38, %v15103_v36 }
 0x78a   : > { %v10318_v44 = vpack.c.bf16 %v9058_v62, %v9050_v10  ;;  %v8785_v11 = vpop.f32.mrb[105].mxu1  ;;  %v9044_v30 = vmax.f32 %v8879_v17, 0.0  ;;  %v8784_v46 = vadd.f32 %v8783_v12, %v15116_v56 }
 0x78b   : > { %v10316_v29 = vpack.c.bf16 %v9059_v50, %v9051_v49  ;;  %v9045_v4 = vmax.f32 %v8881_v47, 0.0  ;;  %v8884_v23 = vpop.f32.mrb[116].mxu0  ;;  %10054 = vmatmul.mubr.msk.f32.vlgmr.msra.gmra.mrb[128].mxu0 %vm7359_vm13, %v15146_v51  ;;  %v8786_v7 = vadd.f32 %v8785_v11, %v15116_v56 }
 0x78c   : > { %v10330_v19 = vpack.c.bf16 %v9044_v30, %v9036_v39  ;;  %v8886_v27 = vpop.f32.mrb[117].mxu0  ;;  %9312 = vmatprep.mubr.f32.mxu0 %v15528_v43  ;;  %v8885_v16 = vadd.f32 %v8884_v23, %v15108_v24  ;;  %v9066_v61 = vmax.f32 %v8784_v46, 0.0 }
 0x78d   : > { %v8789_v1 = vpop.f32.mrb[106].mxu1  ;;  %10317 = vmatprep.subr.bf16.mxu1 %v10316_v29  ;;  %v10328_v13 = vpack.c.bf16 %v9045_v4, %v9037_v26  ;;  %v8887_v35 = vadd.f32 %v8886_v27, %v15108_v24  ;;  %v9067_v18 = vmax.f32 %v8786_v7, 0.0 }
 0x78e   : > { %v8790_v41 = vadd.f32 %v8789_v1, %v15119_v58  ;;  %v8791_v28 = vpop.f32.mrb[107].mxu1  ;;  %10319 = vmatpush1.bf16.msra.mxu1 %v10318_v44  ;;  %v9052_v21 = vmax.f32 %v8885_v16, 0.0 }
 0x78f   : > { %v8792_v0 = vadd.f32 %v8791_v28, %v15119_v58  ;;  %v8890_v20 = vpop.f32.mrb[118].mxu0  ;;  %10329 = vmatprep.subr.bf16.mxu0 %v10328_v13  ;;  %v9053_v33 = vmax.f32 %v8887_v35, 0.0 }
 0x790   : > { %v9074_v6 = vmax.f32 %v8790_v41, 0.0  ;;  %v8891_v31 = vadd.f32 %v8890_v20, %v15111_v22  ;;  %v8892_v54 = vpop.f32.mrb[119].mxu0  ;;  %10331 = vmatpush1.bf16.msra.mxu0 %v10330_v19 }
 0x791   : > { %v9075_v55 = vmax.f32 %v8792_v0, 0.0  ;;  %v8795_v34 = vpop.f32.mrb[108].mxu1  ;;  %v8893_v32 = vadd.f32 %v8892_v54, %v15111_v22 }
 0x792   : > { %v10322_v8 = vpack.c.bf16 %v9074_v6, %v9066_v61  ;;  %v8797_v45 = vpop.f32.mrb[109].mxu1  ;;  %v9060_v60 = vmax.f32 %v8891_v31, 0.0  ;;  %v8796_v48 = vadd.f32 %v8795_v34, %v15125_v53 }
 0x793   : > { %v10320_v3 = vpack.c.bf16 %v9075_v55, %v9067_v18  ;;  %v9061_v57 = vmax.f32 %v8893_v32, 0.0  ;;  %v8896_v63 = vpop.f32.mrb[120].mxu0  ;;  %v8798_v5 = vadd.f32 %v8797_v45, %v15125_v53 }
 0x794   : > { %v10334_v2 = vpack.c.bf16 %v9060_v60, %v9052_v21  ;;  %v8898_v52 = vpop.f32.mrb[121].mxu0  ;;  %v8897_v25 = vadd.f32 %v8896_v63, %v15116_v56  ;;  %v9082_v17 = vmax.f32 %v8796_v48, 0.0 }
 0x795   : > { %v8801_v40 = vpop.f32.mrb[110].mxu1  ;;  %10321 = vmatprep.subr.bf16.mxu1 %v10320_v3  ;;  %v10332_v37 = vpack.c.bf16 %v9061_v57, %v9053_v33  ;;  %v8899_v10 = vadd.f32 %v8898_v52, %v15116_v56  ;;  %v9083_v12 = vmax.f32 %v8798_v5, 0.0 }
 0x796   : > { %v8802_v42 = vadd.f32 %v8801_v40, %v15130_v15  ;;  %v8803_v59 = vpop.f32.mrb[111].mxu1  ;;  %10323 = vmatpush1.bf16.msra.mxu1 %v10322_v8  ;;  %v9068_v29 = vmax.f32 %v8897_v25, 0.0 }
 0x797   : > { %v8804_v9 = vadd.f32 %v8803_v59, %v15130_v15  ;;  %v8902_v62 = vpop.f32.mrb[122].mxu0  ;;  %10333 = vmatprep.subr.bf16.mxu0 %v10332_v37  ;;  %v9069_v23 = vmax.f32 %v8899_v10, 0.0 }
 0x798   : > { %v9090_v38 = vmax.f32 %v8802_v42, 0.0  ;;  %v8903_v49 = vadd.f32 %v8902_v62, %v15119_v58  ;;  %v8904_v50 = vpop.f32.mrb[123].mxu0  ;;  %10335 = vmatpush1.bf16.msra.mxu0 %v10334_v2 }
 0x799   : > { %v9091_v47 = vmax.f32 %v8804_v9, 0.0  ;;  %v8985_v44 = vpop.f32.mrb[112].mxu1  ;;  %v8905_v11 = vadd.f32 %v8904_v50, %v15119_v58 }
 0x79a   : > { %v10326_v39 = vpack.c.bf16 %v9090_v38, %v9082_v17  ;;  %v8987_v30 = vpop.f32.mrb[113].mxu1  ;;  %v9076_v26 = vmax.f32 %v8903_v49, 0.0  ;;  %v8986_v27 = vadd.f32 %v8985_v44, %v15100_v14 }
 0x79b   : > { %v10324_v4 = vpack.c.bf16 %v9091_v47, %v9083_v12  ;;  %v9077_v46 = vmax.f32 %v8905_v11, 0.0  ;;  %v8908_v19 = vpop.f32.mrb[124].mxu0  ;;  %v8988_v13 = vadd.f32 %v8987_v30, %v15100_v14 }
 0x79c   : > { %v10338_v7 = vpack.c.bf16 %v9076_v26, %v9068_v29  ;;  %v8910_v1 = vpop.f32.mrb[125].mxu0  ;;  %v8909_v35 = vadd.f32 %v8908_v19, %v15125_v53  ;;  %v9038_v31 = vmax.f32 %v8986_v27, 0.0 }
 0x79d   : > { %v8991_v41 = vpop.f32.mrb[114].mxu1  ;;  %10325 = vmatprep.subr.bf16.mxu1 %v10324_v4  ;;  %v10336_v28 = vpack.c.bf16 %v9077_v46, %v9069_v23  ;;  %v8911_v61 = vadd.f32 %v8910_v1, %v15125_v53  ;;  %v9039_v55 = vmax.f32 %v8988_v13, 0.0 }
 0x79e   : > { %v8992_v16 = vadd.f32 %v8991_v41, %v15103_v36  ;;  %v8993_v0 = vpop.f32.mrb[115].mxu1  ;;  %10327 = vmatpush1.bf16.msra.mxu1 %v10326_v39  ;;  %v9084_v21 = vmax.f32 %v8909_v35, 0.0 }
 0x79f   : > { %v8994_v20 = vadd.f32 %v8993_v0, %v15103_v36  ;;  %v8914_v6 = vpop.f32.mrb[126].mxu0  ;;  %10337 = vmatprep.subr.bf16.mxu0 %v10336_v28  ;;  %v9085_v33 = vmax.f32 %v8911_v61, 0.0 }
 0x7a0   : > { %v9046_v54 = vmax.f32 %v8992_v16, 0.0  ;;  %v8915_v18 = vadd.f32 %v8914_v6, %v15130_v15  ;;  %v8916_v14 = vpop.f32.mrb[127].mxu0  ;;  %10339 = vmatpush1.bf16.msra.mxu0 %v10338_v7 }
 0x7a1   : > { %v9047_v34 = vmax.f32 %v8994_v20, 0.0  ;;  %v8997_v32 = vpop.f32.mrb[116].mxu1  ;;  %10055 = vmatmul.mubr.msk.f32.vlgmr.msra.gmra.mrb[128].mxu1 %vm7359_vm13, %v15146_v51  ;;  %v8917_v8 = vadd.f32 %v8916_v14, %v15130_v15  ;;  %v10879_v14 = vmov 1966171168  }
 0x7a2   : > { %v10346_v45 = vpack.c.bf16 %v9046_v54, %v9038_v31  ;;  %v8999_v36 = vpop.f32.mrb[117].mxu1  ;;  %v9092_v60 = vmax.f32 %v8915_v18, 0.0  ;;  %9383 = vmatprep.mubr.f32.mxu1 %v15528_v43  ;;  %v8998_v63 = vadd.f32 %v8997_v32, %v15108_v24 }
 0x7a3   : > { %v10344_v3 = vpack.c.bf16 %v9047_v34, %v9039_v55  ;;  %v9093_v57 = vmax.f32 %v8917_v8, 0.0  ;;  %v9000_v2 = vadd.f32 %v8999_v36, %v15108_v24  ;;  %v9403_v55 = vunpack.c.l.s4 %v10879_v14 }
 0x7a4   : > { %v10342_v48 = vpack.c.bf16 %v9092_v60, %v9084_v21  ;;  %v9054_v59 = vmax.f32 %v8998_v63, 0.0  ;;  %v9405_v34 = vlaneseq  ;;  %v10771_v21 = vld [vmem:[%s11102_s16] sm:$0x77] }
 0x7a5   : > { %v9003_v52 = vpop.f32.mrb[118].mxu1  ;;  %10345 = vmatprep.subr.bf16.mxu1 %v10344_v3  ;;  %v10340_v5 = vpack.c.bf16 %v9093_v57, %v9085_v33  ;;  %v9055_v25 = vmax.f32 %v9000_v2, 0.0  ;;  %v9404_v8 = vunpack.c.0.s8 %v9403_v55 }
 0x7a6   : > { %v9004_v40 = vadd.f32 %v9003_v52, %v15111_v22  ;;  %v9005_v37 = vpop.f32.mrb[119].mxu1  ;;  %10347 = vmatpush1.bf16.msra.mxu1 %v10346_v45  ;;  %v9406_v45 = vshrl.u32 %v9405_v34, 7 }
 0x7a7   : > { %v9006_v42 = vadd.f32 %v9005_v37, %v15111_v22  ;;  %10341 = vmatprep.subr.bf16.mxu0 %v10340_v5 }
 0x7a8   : > { %v9062_v43 = vmax.f32 %v9004_v40, 0.0  ;;  %10343 = vmatpush1.bf16.msra.mxu0 %v10342_v48  ;;  %v9407_v33 = vsub.s32 %v9404_v8, %v9406_v45 }
 0x7a9   : > { %v9063_v9 = vmax.f32 %v9006_v42, 0.0  ;;  %v9009_v10 = vpop.f32.mrb[120].mxu1 }
 0x7aa   : > { %v10350_v62 = vpack.c.bf16 %v9062_v43, %v9054_v59  ;;  %v9011_v17 = vpop.f32.mrb[121].mxu1  ;;  %v9010_v24 = vadd.f32 %v9009_v10, %v15116_v56 }
 0x7ab   : > { %v10348_v38 = vpack.c.bf16 %v9063_v9, %v9055_v25  ;;  %10056 = vmatmul.mubr.msk.f32.vlgmr.msra.gmra.mrb[130].mxu0 %vm7359_vm13, %v15146_v51  ;;  %v9012_v49 = vadd.f32 %v9011_v17, %v15116_v56 }
 0x7ac   : > { %v9070_v44 = vmax.f32 %v9010_v24, 0.0 }
 0x7ad   : > { %v9015_v50 = vpop.f32.mrb[122].mxu1  ;;  %10349 = vmatprep.subr.bf16.mxu1 %v10348_v38  ;;  %v9071_v39 = vmax.f32 %v9012_v49, 0.0  ;;  %v10772_v49 = vld [vmem:[%s11102_s16 + $0x8] sm:$0x77] }
 0x7ae   : > { %v9016_v22 = vadd.f32 %v9015_v50, %v15119_v58  ;;  %v9017_v12 = vpop.f32.mrb[123].mxu1  ;;  %10351 = vmatpush1.bf16.msra.mxu1 %v10350_v62 }
 0x7af   : > { %v9018_v47 = vadd.f32 %v9017_v12, %v15119_v58 }
 0x7b0   : > { %v9078_v11 = vmax.f32 %v9016_v22, 0.0 }
 0x7b1   : > { %v9079_v30 = vmax.f32 %v9018_v47, 0.0  ;;  %v9021_v29 = vpop.f32.mrb[124].mxu1 }
 0x7b2   : > { %v10354_v26 = vpack.c.bf16 %v9078_v11, %v9070_v44  ;;  %v9023_v4 = vpop.f32.mrb[125].mxu1  ;;  %v9022_v46 = vadd.f32 %v9021_v29, %v15125_v53 }
 0x7b3   : > { %v10352_v23 = vpack.c.bf16 %v9079_v30, %v9071_v39  ;;  %v9024_v56 = vadd.f32 %v9023_v4, %v15125_v53  ;;  %v15195_v53 = vpop.permute.xlu1 %9100  ;;  %v10773_v30 = vld [vmem:[%s11102_s16 + $0x10] sm:$0x77] }
 0x7b4   : > { %v9086_v1 = vmax.f32 %v9022_v46, 0.0 }
 0x7b5   : > { %v9027_v19 = vpop.f32.mrb[126].mxu1  ;;  %10353 = vmatprep.subr.bf16.mxu1 %v10352_v23  ;;  %v9087_v41 = vmax.f32 %v9024_v56, 0.0 }
 0x7b6   : > { %v9028_v27 = vadd.f32 %v9027_v19, %v15130_v15  ;;  %v9029_v7 = vpop.f32.mrb[127].mxu1  ;;  %10355 = vmatpush1.bf16.msra.mxu1 %v10354_v26 }
 0x7b7   : > { %v9030_v58 = vadd.f32 %v9029_v7, %v15130_v15 }
 0x7b8   : > { %v9094_v13 = vmax.f32 %v9028_v27, 0.0 }
 0x7b9   : > { %v9095_v28 = vmax.f32 %v9030_v58, 0.0 }
 0x7ba   : > { %v10358_v16 = vpack.c.bf16 %v9094_v13, %v9086_v1 }
 0x7bb   : > { %v10356_v0 = vpack.c.bf16 %v9095_v28, %v9087_v41 }
 0x7bd   : > { %10357 = vmatprep.subr.bf16.mxu1 %v10356_v0 }
 0x7be   : > { %10359 = vmatpush1.bf16.msra.mxu1 %v10358_v16 }
 0x7c1   : > { %10057 = vmatmul.mubr.msk.f32.vlgmr.msra.gmra.mrb[130].mxu1 %vm7359_vm13, %v15146_v51 }
 0x85e   : > { %v9172_v35 = vpop.f32.mrb[128].mxu0 }
 0x85f   : > { %v9173_v20 = vadd.f32 %v9172_v35, %v15195_v53  ;;  %v9174_v61 = vpop.f32.mrb[129].mxu0 }
 0x860   : > { %v9175_v15 = vadd.f32 %v9174_v61, %v15195_v53 }
 0x861   : > { %10743 = vtanh.f32 %v9173_v20 }
 0x862   : > { %v9398_v6 = vcombine.low %v9173_v20, %v9175_v15  ;;  %10745 = vtanh.f32 %v9175_v15 }
 0x864   : > { %v9408_v2 = vrot.slane %v9398_v6, %v9407_v33 }
 0x86b   : > { %v10744_v31 = vpop.eup %10743 }
 0x86c   : > { %v10746_v54 = vpop.eup %10745  ;;  %v9457_v18 = vmul.f32 0.083333336, %v10744_v31 }
 0x86d   : > { %v9458_v51 = vmul.f32 0.083333336, %v10746_v54 }
 0x86f   : > { %v9473_v32 = vcombine.low %v9457_v18, %v9458_v51 }
 0x871   : > { %v10058_v36 = vrot.slane %v9473_v32, 9 }
 0x873   : > { %v9489_v60 = vadd.f32 %v10771_v21, %v10058_v36 }
 0x874   : > { %v9243_v3 = vpop.f32.mrb[128].mxu1 }
 0x875   : > { %v9244_v57 = vadd.f32 %v9243_v3, %v15195_v53  ;;  %v9245_v63 = vpop.f32.mrb[129].mxu1  ;;  %9493 = vst [vmem:[%s15205_s12] sm:$0x77] %v9489_v60 }
 0x876   : > { %v9246_v48 = vadd.f32 %v9245_v63, %v15195_v53 }
 0x877   : > { %10747 = vtanh.f32 %v9244_v57 }
 0x878   : > { %v9399_v52 = vcombine.low %v9244_v57, %v9246_v48  ;;  %10749 = vtanh.f32 %v9246_v48 }
 0x87a   : > { %v9415_v5 = vrot.slane %v9399_v52, %v9407_v33 }
 0x87c   : > { %v9430_v40 = vcombine.low %v9408_v2, %v9415_v5 }
 0x87e   : > { %v9314_v37 = vpop.f32.mrb[130].mxu0  ;;  %v9438_v58 = vrot.slane %v9430_v40, %v9407_v33 }
 0x87f   : > { %v9315_v42 = vadd.f32 %v9314_v37, %v15195_v53  ;;  %v9316_v59 = vpop.f32.mrb[131].mxu0 }
 0x880   : > { %v9317_v43 = vadd.f32 %v9316_v59, %v15195_v53 }
 0x881   : > { %v10748_v25 = vpop.eup %10747  ;;  %10751 = vtanh.f32 %v9315_v42 }
 0x882   : > { %v10750_v9 = vpop.eup %10749  ;;  %v9459_v10 = vmul.f32 0.083333336, %v10748_v25  ;;  %v9400_v62 = vcombine.low %v9315_v42, %v9317_v43  ;;  %10753 = vtanh.f32 %v9317_v43 }
 0x883   : > { %v9460_v17 = vmul.f32 0.083333336, %v10750_v9 }
 0x884   : > { %v9422_v56 = vrot.slane %v9400_v62, %v9407_v33 }
 0x885   : > { %v9474_v38 = vcombine.low %v9459_v10, %v9460_v17 }
 0x887   : > { %v10059_v24 = vrot.slane %v9474_v38, 9 }
 0x889   : > { %v9490_v50 = vadd.f32 %v10772_v49, %v10059_v24 }
 0x88b   : > { %v10752_v22 = vpop.eup %10751  ;;  %9494 = vst [vmem:[%s15205_s12 + $0x8] sm:$0x77] %v9490_v50 }
 0x88c   : > { %v10754_v12 = vpop.eup %10753  ;;  %v9461_v47 = vmul.f32 0.083333336, %v10752_v22 }
 0x88d   : > { %v9462_v44 = vmul.f32 0.083333336, %v10754_v12 }
 0x88f   : > { %v9475_v11 = vcombine.low %v9461_v47, %v9462_v44 }
 0x891   : > { %v10060_v39 = vrot.slane %v9475_v11, 9 }
 0x893   : > { %v9491_v29 = vadd.f32 %v10773_v30, %v10060_v39 }
 0x894   : > { %v9385_v26 = vpop.f32.mrb[130].mxu1 }
 0x895   : > { %v9386_v4 = vadd.f32 %v9385_v26, %v15195_v53  ;;  %v9387_v23 = vpop.f32.mrb[131].mxu1  ;;  %9495 = vst [vmem:[%s15205_s12 + $0x10] sm:$0x77] %v9491_v29 }
 0x896   : > { %v9388_v46 = vadd.f32 %v9387_v23, %v15195_v53 }
 0x897   : > { %10755 = vtanh.f32 %v9386_v4 }
 0x898   : > { %v9401_v19 = vcombine.low %v9386_v4, %v9388_v46  ;;  %10757 = vtanh.f32 %v9388_v46 }
 0x89a   : > { %v9429_v27 = vrot.slane %v9401_v19, %v9407_v33 }
 0x89c   : > { %v9431_v7 = vcombine.low %v9422_v56, %v9429_v27 }
 0x89e   : > { %v9445_v1 = vrot.slane %v9431_v7, %v9407_v33 }
 0x8a0   : > { %v9446_v13 = vcombine.low %v9438_v58, %v9445_v1 }
 0x8a1   : > { %v10756_v41 = vpop.eup %10755 }
 0x8a2   : > { %v10758_v28 = vpop.eup %10757  ;;  %v9463_v16 = vmul.f32 0.083333336, %v10756_v41  ;;  %9448 = vst [vmem:[%s391_s15] sm:$0xff] %v9446_v13 }
 0x8a3   : > { %v9464_v0 = vmul.f32 0.083333336, %v10758_v28 }
 0x8a4   : > { %10788 = shalt.err (!%p10785_p3)
}
 0x8a5   : > { %s10789_s15 = scalar_lea.hbm %s15222_s30, 128  ;;  %s10793_s1 = scalar_lea.hbm %s15309_s11, 256 }
 0x8a6   : > { %p10790_p4 = scmp.ne.s32.totalorder %s15222_s30, %s10789_s15  ;;  %p10794_p9 = scmp.lt.u32.totalorder %s15222_s30, %s15309_s11 }
 0x8a7   : > { %p10795_p10 = scmp.lt.u32.totalorder %s10793_s1, %s10789_s15  ;;  %p10797_p12 = scmp.lt.u32.totalorder %s10789_s15, %s15222_s30 }
 0x8a8   : > { %p10791_p7 = pnand %p10790_p4, %p10980_p5 }
 0x8a9   : > { %p10796_p11 = por %p10795_p10, %p10794_p9 }
 0x8aa   : > { %p10792_p8 = pneg %p10791_p7 }
 0x8ab   : > { %p10798_p13 = por %p10797_p12, %p10796_p11 }
 0x8ad   : > { %p10799_p0 = pnand %p10798_p13, %p10792_p8 }
 0x8af   : > { %10802 = shalt.err (!%p10799_p0)
}
 0x8b0   : > { %10585 = dma.vmem_to_hbm [thread:$0]  (%p10980_p5), %s15224_s22, 128, %s15222_s30, %s9503_s13   ;;  %v9476_v53 = vcombine.low %v9463_v16, %v9464_v0  ;;  %v10774_v20 = vld [vmem:[%s11102_s16 + $0x18] sm:$0x77] }
 0x8b1   : > { %s10070_s0 = sshll.u32 %s10963_s21, 9  ;;  %s9517_s2 = sshll.u32 %s15205_s12, 4  ;;  %s15256_s2 = int_to_ptr.vmem [resolvable:$true] %s9517_s2 }
 0x8b2   : > { %v10061_v35 = vrot.slane %v9476_v53, 9  ;;  %s15254_s15 = scalar_lea.hbm %s15308_s10, %s10070_s0  ;;  %s9498_s25 = scalar_lea.sflag [#allocation3], %s15200_s29 }
 0x8b3   : > { %s10803_s1 = scalar_lea.vmem %s15256_s2, 512  ;;  %s10881_s21 = smov [#allocation2]  }
 0x8b4   : > { %v9492_v61 = vadd.f32 %v10774_v20, %v10061_v35  ;;  %p10804_p1 = scmp.ne.s32.totalorder %s15256_s2, %s10803_s1  ;;  %s10807_s16 = sshll.u32 %s10881_s21, 4  ;;  %s10808_s16 = int_to_ptr.vmem [resolvable:$false] %s10807_s16 }
 0x8b5   : > { %s10809_s22 = scalar_lea.vmem %s10808_s16, 1024  ;;  %p10810_p4 = scmp.lt.s32.totalorder %s15256_s2, %s10808_s16 }
 0x8b6   : > { %9496 = vst [vmem:[%s15205_s12 + $0x18] sm:$0x77] %v9492_v61  ;;  %p10805_p2 = pnand %p10804_p1, %p10980_p5  ;;  %p10811_p7 = scmp.lt.s32.totalorder %s10809_s22, %s10803_s1 }
 0x8b8   : > { %p10806_p3 = pneg %p10805_p2  ;;  %p10812_p8 = por %p10811_p7, %p10810_p4 }
 0x8ba   : > { %p10813_p9 = pnand %p10812_p8, %p10806_p3 }
 0x8bc   : > { %10816 = shalt.err (!%p10813_p9)
}
 0x8bd   : > { %s10817_s29 = scalar_lea.hbm %s15254_s15, 512  ;;  %s10821_s13 = scalar_lea.hbm %s15308_s10, 1024 }
 0x8be   : > { %p10818_p10 = scmp.ne.s32.totalorder %s15254_s15, %s10817_s29  ;;  %p10822_p13 = scmp.lt.u32.totalorder %s15254_s15, %s15308_s10 }
 0x8bf   : > { %p10823_p0 = scmp.lt.u32.totalorder %s10821_s13, %s10817_s29  ;;  %p10825_p2 = scmp.lt.u32.totalorder %s10817_s29, %s15254_s15 }
 0x8c0   : > { %p10819_p11 = pnand %p10818_p10, %p10980_p5 }
 0x8c1   : > { %p10824_p1 = por %p10823_p0, %p10822_p13 }
 0x8c2   : > { %p10820_p12 = pneg %p10819_p11 }
 0x8c3   : > { %p10826_p3 = por %p10825_p2, %p10824_p1 }
 0x8c5   : > { %p10827_p4 = pnand %p10826_p3, %p10820_p12 }
 0x8c7   : > { %10830 = shalt.err (!%p10827_p4)
}
 0x8c8   : > { %10584 = dma.vmem_to_hbm [thread:$0]  (%p10980_p5), %s15256_s2, 512, %s15254_s15, %s9498_s25  }
 0x8c9 PF: > { %p10595_p7 = scmp.ge.s32.totalorder %s10869_s20, 2  ;;  %s9543_s3 = sand.u32 1, %s10857_s17  }
 0x8ca   : > { %s9544_s14 = scalar_lea.sflag [#allocation3], %s9543_s3 }
 0x8cb   : > { %p10589_p8 = pnand %p10595_p7, %p10984_p6 }
 0x8cd   : > { %10848 = dma.done.wait (!%p10589_p8), %s9544_s14, 512  }
 0x8ce   : > { %10850 = vsyncadd (!%p10589_p8), %s9544_s14, 4294966784  ;;  %s9553_s1 = scalar_lea.sflag [#allocation5], %s9543_s3 }
 0x8cf   : > { %10852 = dma.done.wait (!%p10589_p8), %s9553_s1, 128  }
 0x8d0   : > { %10854 = vsyncadd (!%p10589_p8), %s9553_s1, 4294967168  ;;  %p25_p5 = scmp.ge.s32.totalorder %s10967_s23, 4   ;;  %s15698_s17 = smov %s10861_s18 }
 0x8d1   : > { %s15699_s18 = smov %s10865_s19  ;;  %s15700_s19 = smov %s10978_s26 }
 0x8d2   : > { %s15701_s20 = smov %s10967_s23  ;;  %27 = sbr.rel (!%p25_p5) target bundleno = 10 (0xa), region = 116 }
 0x8d9   :  { %9558 = vsyncpa [#allocation3], 1 }
 0x8da   :  { %9560 = vsyncpa [#allocation3 + $0x1], 1 }
 0x8db   :  { %9561 = vsyncpa [#allocation5], 1 }
 0x8dc   :  { %9563 = vsyncpa [#allocation5 + $0x1], 1 }

</bundles_post_ra>
